<compile_context>
chip_gen: v6e
topology: v6e:2x2x1
jax: 0.10.0
libtpu: 0.0.40
codegen_flags: <defaults>
</compile_context>

<pallas_src>
import functools
import math

import numpy as np
import jax
import jax.numpy as jnp
from jax.experimental import pallas as pl
from jax.experimental.pallas import tpu as pltpu  # noqa: F401  (kept for clarity)

# ----------------------------- configuration --------------------------------
BATCH = 2
LOOK_BACK = 24
HORIZON = 8
D_MODEL = 16
UNITS = 32
THETAS_DIM = 4            # also n_heads of the MultiHeadAttention
N_HEADS = THETAS_DIM
LAYER_SIZE = 32
PRE_LAYER = 1
RES_LAYER = 1
TRE_LAYER = 1
LAYER_NUM = 2

LEAKY_SLOPE = 0.01        # nn.LeakyReLU default
LN_EPS = 1e-5             # nn.LayerNorm default
CONV_OUT_LEN = LOOK_BACK - 15   # length after conv1..3 (+pools) = 9
BL = BATCH * LOOK_BACK          # 48 merged attention rows
LD = LOOK_BACK * D_MODEL        # 384 flattened features

_PARAM_ORDER = (
    # TrendModule
    "t_fc1_w", "t_fc1_b", "t_fc2_w", "t_fc2_b", "t_fc3_w", "t_fc3_b",
    "t_fc4_w", "t_fc4_b", "t_hid_w", "t_hid_b", "t_T",
    # PredictModule
    "p_pe", "p_selb", "p_diag", "p_amask", "p_qkv_w", "p_qkv_b",
    "p_fc_w", "p_fc_b", "p_ln_g", "p_ln_b",
    "p_tile", "p_fmask", "p_selrow",
    "p_l1_w", "p_l1_b", "p_l2_w", "p_l2_b",
    # ResidualModule
    "r_c1_w", "r_c1_b", "r_c2_w", "r_c2_b", "r_c3_w", "r_c3_b",
    "r_l1_w", "r_l1_b", "r_l2_w", "r_l2_b",
)


# ----------------------------- fused kernel ----------------------------------
def _ip2sdcd_kernel(
    x_ref,
    # trend
    t_fc1w, t_fc1b, t_fc2w, t_fc2b, t_fc3w, t_fc3b, t_fc4w, t_fc4b,
    t_hidw, t_hidb, t_T,
    # predict
    p_pe, p_selb, p_diag, p_amask, p_qkvw, p_qkvb,
    p_fcw, p_fcb, p_lng, p_lnb,
    p_tile, p_fmask, p_selrow,
    p_l1w, p_l1b, p_l2w, p_l2b,
    # residual
    r_c1w, r_c1b, r_c2w, r_c2b, r_c3w, r_c3b,
    r_l1w, r_l1b, r_l2w, r_l2b,
    # output (fore | trend | predict | residual, lane-concatenated)
    out_ref,
    *, batch,
):
    f32 = jnp.float32

    def mm(a, b):    # a @ b
        return jax.lax.dot_general(a, b, (((1,), (0,)), ((), ())),
                                   preferred_element_type=f32)

    def mm_t(a, b):  # a @ b.T
        return jax.lax.dot_general(a, b, (((1,), (1,)), ((), ())),
                                   preferred_element_type=f32)

    def relu(v):
        return jnp.maximum(v, 0.0)

    def leaky(v):
        return jnp.where(v >= 0.0, v, LEAKY_SLOPE * v)

    res_x = x_ref[...]                                   # [B, L]
    t_fore = jnp.zeros((batch, HORIZON), f32)
    p_fore = jnp.zeros((batch, HORIZON), f32)
    r_fore = jnp.zeros((batch, HORIZON), f32)

    pe = p_pe[...]          # [B*L, D]   (pe tiled over batch at init)
    selb = p_selb[...]      # [B*L, B]   one-hot batch selector
    diag = p_diag[...]      # [B*L, L]   per-row position one-hot
    amask = p_amask[...]    # [B*L, B*L] block-diagonal 0 / -1e30 softmax mask
    tile_m = p_tile[...]    # [D, L*D]   lane-tiling matrix (TILE[d, l*D+d] = 1)
    fmask = p_fmask[...]    # [B*L, L*D] flatten selection mask
    selrow = p_selrow[...]  # [B, B*L]   per-batch row-sum selector
    scale = 1.0 / math.sqrt(D_MODEL)

    for _layer in range(LAYER_NUM):
        # ------------------------- TrendModule ----------------------------
        for _ in range(TRE_LAYER):
            out = relu(mm(res_x, t_fc1w[...]) + t_fc1b[...])
            out = relu(mm(out, t_fc2w[...]) + t_fc2b[...])
            out = relu(mm(out, t_fc3w[...]) + t_fc3b[...])
            out = relu(mm(out, t_fc4w[...]) + t_fc4b[...])
            th = relu(mm(out, t_hidw[...]) + t_hidb[...])       # [B, 4*p]
            # 4-way theta head sum folded into the (4x row-tiled) basis matmul.
            multi = mm(th, t_T[...])                            # [B, L+H]
            res_x = res_x - multi[:, :LOOK_BACK]
            t_fore = t_fore + multi[:, LOOK_BACK:]

        # ------------------------ PredictModule ---------------------------
        # Both batch rows merged into one [B*L, D] attention problem with a
        # block-diagonal softmax mask (cross-batch attention weights == 0).
        for _ in range(PRE_LAYER):
            # x_col[b*L+l] = res_x[b, l]  via selection matmul + masked lane-sum
            g = mm(selb, res_x)                                 # [B*L, L]
            x_col = jnp.sum(g * diag, axis=-1, keepdims=True)   # [B*L, 1]
            q_in = pe + x_col                                   # [B*L, D]

            qkv = mm(q_in, p_qkvw[...]) + p_qkvb[...]           # [B*L, 3*H*D]
            heads = []
            for h in range(N_HEADS):
                q_h = qkv[:, h * D_MODEL:(h + 1) * D_MODEL]
                k_h = qkv[:, (N_HEADS + h) * D_MODEL:(N_HEADS + h + 1) * D_MODEL]
                v_h = qkv[:, (2 * N_HEADS + h) * D_MODEL:
                          (2 * N_HEADS + h + 1) * D_MODEL]
                s = mm_t(q_h, k_h) * scale + amask              # [B*L, B*L]
                s = s - jnp.max(s, axis=-1, keepdims=True)
                pr = jnp.exp(s)
                pr = pr / jnp.sum(pr, axis=-1, keepdims=True)   # exact softmax
                heads.append(mm(pr, v_h))                       # [B*L, D]
            # single output projection with the full fc weight (K = H*D = 64)
            attn = mm(jnp.concatenate(heads, axis=1), p_fcw[...]) + p_fcb[...]

            # residual add + LayerNorm(d_model)
            z = q_in + attn
            mu = jnp.mean(z, axis=-1, keepdims=True)
            zc = z - mu
            var = jnp.mean(zc * zc, axis=-1, keepdims=True)
            z = zc * jax.lax.rsqrt(var + LN_EPS) * p_lng[...] + p_lnb[...]

            # [B*L, D] -> [B, L*D] flatten, fully in-register:
            #   tile z along lanes (one matmul with a static 0/1 TILE matrix),
            #   mask off wrong positions, sum each batch block (selection matmul).
            zf = mm(selrow, mm(z, tile_m) * fmask)              # [B, L*D]

            out = leaky(mm(zf, p_l1w[...]) + p_l1b[...])        # [B, 512]
            # TODO(synk): nn.Dropout (train-mode) skipped -> eval-mode identity
            out = mm(out, p_l2w[...]) + p_l2b[...]              # [B, L+H]
            res_x = res_x - out[:, :LOOK_BACK]
            p_fore = p_fore + out[:, LOOK_BACK:]

        # ------------------------ ResidualModule --------------------------
        # Convs as static Toeplitz matmuls (both rows at once);
        # MaxPool1d(2, stride=1) as shifted-slice maximum; boundary garbage
        # lanes are multiplied by zero rows of the next Toeplitz matrix.
        for _ in range(RES_LAYER):
            h1 = relu(mm(res_x, r_c1w[...]) + r_c1b[...])       # [B, 4*18]
            h1 = jnp.maximum(h1[:, :-1], h1[:, 1:])             # [B, 71]
            h2 = relu(mm(h1, r_c2w[...]) + r_c2b[...])          # [B, 8*13]
            h2 = jnp.maximum(h2[:, :-1], h2[:, 1:])             # [B, 103]
            h3 = relu(mm(h2, r_c3w[...]) + r_c3b[...])          # [B, 10]
            h3 = jnp.maximum(h3[:, :-1], h3[:, 1:])             # [B, 9]
            out = leaky(mm(h3, r_l1w[...]) + r_l1b[...])        # [B, 32]
            out = mm(out, r_l2w[...]) + r_l2b[...]              # [B, L+H]
            res_x = res_x - out[:, :LOOK_BACK]
            r_fore = r_fore + out[:, LOOK_BACK:]

    fore = t_fore + p_fore + r_fore
    out_ref[...] = jnp.concatenate([fore, t_fore, p_fore, r_fore], axis=1)


# ----------------------------- wrapper ---------------------------------------
def ip2sdcd_forward(params, x):
    B, L = x.shape
    assert B == BATCH and L == LOOK_BACK
    args = (x,) + tuple(params[name] for name in _PARAM_ORDER)
    out = pl.pallas_call(
        functools.partial(_ip2sdcd_kernel, batch=B),
        out_shape=jax.ShapeDtypeStruct((B, 4 * HORIZON), jnp.float32),
    )(*args)
    fore = out[:, 0 * HORIZON:1 * HORIZON]
    t_fore = out[:, 1 * HORIZON:2 * HORIZON]
    p_fore = out[:, 2 * HORIZON:3 * HORIZON]
    r_fore = out[:, 3 * HORIZON:4 * HORIZON]
    return fore, t_fore, p_fore, r_fore


# ----------------------------- parameter init --------------------------------
def init_params(key):
    """Builds kernel-ready (pre-transposed / Toeplitz-packed / masked) params."""
    keys = iter(jax.random.split(key, 64))

    def lin(out_f, in_f):
        k1, k2 = next(keys), next(keys)
        bound = 1.0 / math.sqrt(in_f)
        w = jax.random.uniform(k1, (out_f, in_f), jnp.float32, -bound, bound)
        b = jax.random.uniform(k2, (out_f,), jnp.float32, -bound, bound)
        return w, b

    def conv(out_c, in_c, k):
        k1, k2 = next(keys), next(keys)
        bound = 1.0 / math.sqrt(in_c * k)
        w = jax.random.uniform(k1, (out_c, in_c, k), jnp.float32, -bound, bound)
        b = jax.random.uniform(k2, (out_c,), jnp.float32, -bound, bound)
        return w, b

    p = {}

    # ----- TrendModule -----
    w, b = lin(UNITS, LOOK_BACK)
    p["t_fc1_w"], p["t_fc1_b"] = w.T, b[None, :]
    for i in (2, 3, 4):
        w, b = lin(UNITS, UNITS)
        p[f"t_fc{i}_w"], p[f"t_fc{i}_b"] = w.T, b[None, :]
    hw, hb = [], []
    for _ in range(THETAS_DIM):                       # 4 x Linear(units, thetas_dim)
        w, b = lin(THETAS_DIM, UNITS)
        hw.append(w.T)                                # [UNITS, THETAS_DIM]
        hb.append(b)
    p["t_hid_w"] = jnp.concatenate(hw, axis=1)        # [UNITS, 4*THETAS_DIM]
    p["t_hid_b"] = jnp.concatenate(hb)[None, :]       # [1, 16]
    t = np.linspace(-LOOK_BACK, HORIZON, LOOK_BACK + HORIZON).astype(np.float32)
    T = np.stack([t ** i for i in range(THETAS_DIM)], axis=0)      # [p, L+H]
    p["t_T"] = jnp.asarray(np.tile(T, (THETAS_DIM, 1)))            # [4p, L+H] (head-sum folded)

    # ----- PredictModule -----
    max_len = 64
    position = np.arange(max_len, dtype=np.float32)[:, None]
    div_term = np.exp(np.arange(0, D_MODEL, 2, dtype=np.float32)
                      * (-math.log(10000.0) / D_MODEL))
    pe = np.zeros((max_len, D_MODEL), np.float32)
    pe[:, 0::2] = np.sin(position * div_term)
    pe[:, 1::2] = np.cos(position * div_term)
    p["p_pe"] = jnp.asarray(np.tile(pe[:LOOK_BACK], (BATCH, 1)))   # [B*L, D]

    rows = np.arange(BL)
    b_idx, l_idx = rows // LOOK_BACK, rows % LOOK_BACK
    p["p_selb"] = jnp.asarray(
        (b_idx[:, None] == np.arange(BATCH)[None, :]).astype(np.float32))   # [B*L, B]
    p["p_selrow"] = jnp.asarray(
        (np.arange(BATCH)[:, None] == b_idx[None, :]).astype(np.float32))   # [B, B*L]
    p["p_diag"] = jnp.asarray(
        (l_idx[:, None] == np.arange(LOOK_BACK)[None, :]).astype(np.float32))  # [B*L, L]
    p["p_amask"] = jnp.asarray(
        np.where(b_idx[:, None] == b_idx[None, :], 0.0, -1e30).astype(np.float32))  # [B*L, B*L]
    cols = np.arange(LD)
    p["p_tile"] = jnp.asarray(
        (np.arange(D_MODEL)[:, None] == (cols[None, :] % D_MODEL)).astype(np.float32))  # [D, L*D]
    p["p_fmask"] = jnp.asarray(
        (l_idx[:, None] == (cols[None, :] // D_MODEL)).astype(np.float32))   # [B*L, L*D]

    qw, qb = lin(N_HEADS * D_MODEL, D_MODEL)
    kw, kb = lin(N_HEADS * D_MODEL, D_MODEL)
    vw, vb = lin(N_HEADS * D_MODEL, D_MODEL)
    p["p_qkv_w"] = jnp.concatenate([qw, kw, vw], axis=0).T          # [D, 3*H*D]
    p["p_qkv_b"] = jnp.concatenate([qb, kb, vb])[None, :]           # [1, 3*H*D]
    w, b = lin(D_MODEL, N_HEADS * D_MODEL)
    p["p_fc_w"], p["p_fc_b"] = w.T, b[None, :]                      # [H*D, D]
    p["p_ln_g"] = jnp.ones((1, D_MODEL), jnp.float32)
    p["p_ln_b"] = jnp.zeros((1, D_MODEL), jnp.float32)
    w, b = lin(512, D_MODEL * LOOK_BACK)
    p["p_l1_w"], p["p_l1_b"] = w.T, b[None, :]                      # [L*D, 512]
    w, b = lin(LOOK_BACK + HORIZON, 512)
    p["p_l2_w"], p["p_l2_b"] = w.T, b[None, :]                      # [512, L+H]

    # ----- ResidualModule -----  (Toeplitz-packed conv weights)
    L1 = LOOK_BACK - 7 + 1          # 18 (conv1 out length)
    L2 = (L1 - 1) - 5 + 1           # 13 (conv2 out length, after pool 17)
    L3 = (L2 - 1) - 3 + 1           # 10 (conv3 out length, after pool 12)

    w, b = conv(4, 1, 7)
    w, b = np.asarray(w), np.asarray(b)
    W1 = np.zeros((LOOK_BACK, 4 * L1), np.float32)
    for c in range(4):
        for j in range(L1):
            for k in range(7):
                W1[j + k, c * L1 + j] = w[c, 0, k]
    p["r_c1_w"] = jnp.asarray(W1)                                   # [24, 72]
    p["r_c1_b"] = jnp.asarray(np.repeat(b, L1)[None, :])            # [1, 72]

    w, b = conv(8, 4, 5)
    w, b = np.asarray(w), np.asarray(b)
    W2 = np.zeros((4 * L1 - 1, 8 * L2), np.float32)    # input layout stride L1, 71 rows
    for c2 in range(8):
        for c1 in range(4):
            for j in range(L2):
                for k in range(5):
                    W2[c1 * L1 + j + k, c2 * L2 + j] = w[c2, c1, k]
    p["r_c2_w"] = jnp.asarray(W2)                                   # [71, 104]
    p["r_c2_b"] = jnp.asarray(np.repeat(b, L2)[None, :])            # [1, 104]

    w, b = conv(1, 8, 3)
    w, b = np.asarray(w), np.asarray(b)
    W3 = np.zeros((8 * L2 - 1, L3), np.float32)        # input layout stride L2, 103 rows
    for c1 in range(8):
        for j in range(L3):
            for k in range(3):
                W3[c1 * L2 + j + k, j] = w[0, c1, k]
    p["r_c3_w"] = jnp.asarray(W3)                                   # [103, 10]
    p["r_c3_b"] = jnp.asarray(np.full((1, L3), float(b[0]), np.float32))

    w, b = lin(LAYER_SIZE, CONV_OUT_LEN)
    p["r_l1_w"], p["r_l1_b"] = w.T, b[None, :]                      # [9, 32]
    w, b = lin(LOOK_BACK + HORIZON, LAYER_SIZE)
    p["r_l2_w"], p["r_l2_b"] = w.T, b[None, :]                      # [32, L+H]

    return p


# --------------------------------- main ---------------------------------------
if __name__ == "__main__":
    key = jax.random.PRNGKey(0)
    pkey, xkey = jax.random.split(key)
    params = init_params(pkey)
    x = jax.random.normal(xkey, (BATCH, LOOK_BACK), jnp.float32)

    fwd = jax.jit(ip2sdcd_forward)
    outs = fwd(params, x)
    outs = jax.block_until_ready(outs)

    assert all(o.shape == (BATCH, HORIZON) for o in outs)
    assert all(bool(jnp.all(jnp.isfinite(o))) for o in outs)
    print("KERNEL_OK")
</pallas_src>

<mosaic_0001>
module attributes {stable_mosaic.version = 11 : i64} {
  func.func @_ip2sdcd_kernel(%arg0: memref<2x24xf32, #tpu.memory_space<vmem>>, %arg1: memref<24x32xf32, #tpu.memory_space<vmem>>, %arg2: memref<1x32xf32, #tpu.memory_space<vmem>>, %arg3: memref<32x32xf32, #tpu.memory_space<vmem>>, %arg4: memref<1x32xf32, #tpu.memory_space<vmem>>, %arg5: memref<32x32xf32, #tpu.memory_space<vmem>>, %arg6: memref<1x32xf32, #tpu.memory_space<vmem>>, %arg7: memref<32x32xf32, #tpu.memory_space<vmem>>, %arg8: memref<1x32xf32, #tpu.memory_space<vmem>>, %arg9: memref<32x16xf32, #tpu.memory_space<vmem>>, %arg10: memref<1x16xf32, #tpu.memory_space<vmem>>, %arg11: memref<16x32xf32, #tpu.memory_space<vmem>>, %arg12: memref<48x16xf32, #tpu.memory_space<vmem>>, %arg13: memref<48x2xf32, #tpu.memory_space<vmem>>, %arg14: memref<48x24xf32, #tpu.memory_space<vmem>>, %arg15: memref<48x48xf32, #tpu.memory_space<vmem>>, %arg16: memref<16x192xf32, #tpu.memory_space<vmem>>, %arg17: memref<1x192xf32, #tpu.memory_space<vmem>>, %arg18: memref<64x16xf32, #tpu.memory_space<vmem>>, %arg19: memref<1x16xf32, #tpu.memory_space<vmem>>, %arg20: memref<1x16xf32, #tpu.memory_space<vmem>>, %arg21: memref<1x16xf32, #tpu.memory_space<vmem>>, %arg22: memref<16x384xf32, #tpu.memory_space<vmem>>, %arg23: memref<48x384xf32, #tpu.memory_space<vmem>>, %arg24: memref<2x48xf32, #tpu.memory_space<vmem>>, %arg25: memref<384x512xf32, #tpu.memory_space<vmem>>, %arg26: memref<1x512xf32, #tpu.memory_space<vmem>>, %arg27: memref<512x32xf32, #tpu.memory_space<vmem>>, %arg28: memref<1x32xf32, #tpu.memory_space<vmem>>, %arg29: memref<24x72xf32, #tpu.memory_space<vmem>>, %arg30: memref<1x72xf32, #tpu.memory_space<vmem>>, %arg31: memref<71x104xf32, #tpu.memory_space<vmem>>, %arg32: memref<1x104xf32, #tpu.memory_space<vmem>>, %arg33: memref<103x10xf32, #tpu.memory_space<vmem>>, %arg34: memref<1x10xf32, #tpu.memory_space<vmem>>, %arg35: memref<9x32xf32, #tpu.memory_space<vmem>>, %arg36: memref<1x32xf32, #tpu.memory_space<vmem>>, %arg37: memref<32x32xf32, #tpu.memory_space<vmem>>, %arg38: memref<1x32xf32, #tpu.memory_space<vmem>>, %arg39: memref<2x32xf32, #tpu.memory_space<vmem>>) attributes {dimension_semantics = [], scalar_prefetch = 0 : i64, scratch_operands = 0 : i64, tpu.core_type = #tpu.core_type<tc>} {
    %c0 = arith.constant 0 : index
    %c0_0 = arith.constant 0 : index
    %0 = vector.load %arg0[%c0, %c0_0] : memref<2x24xf32, #tpu.memory_space<vmem>>, vector<2x24xf32>
    %cst = arith.constant 0.000000e+00 : f32
    %1 = vector.broadcast %cst : f32 to vector<2x8xf32>
    %cst_1 = arith.constant 0.000000e+00 : f32
    %2 = vector.broadcast %cst_1 : f32 to vector<2x8xf32>
    %cst_2 = arith.constant 0.000000e+00 : f32
    %3 = vector.broadcast %cst_2 : f32 to vector<2x8xf32>
    %c0_3 = arith.constant 0 : index
    %c0_4 = arith.constant 0 : index
    %4 = vector.load %arg12[%c0_3, %c0_4] : memref<48x16xf32, #tpu.memory_space<vmem>>, vector<48x16xf32>
    %c0_5 = arith.constant 0 : index
    %c0_6 = arith.constant 0 : index
    %5 = vector.load %arg13[%c0_5, %c0_6] : memref<48x2xf32, #tpu.memory_space<vmem>>, vector<48x2xf32>
    %c0_7 = arith.constant 0 : index
    %c0_8 = arith.constant 0 : index
    %6 = vector.load %arg14[%c0_7, %c0_8] : memref<48x24xf32, #tpu.memory_space<vmem>>, vector<48x24xf32>
    %c0_9 = arith.constant 0 : index
    %c0_10 = arith.constant 0 : index
    %7 = vector.load %arg15[%c0_9, %c0_10] : memref<48x48xf32, #tpu.memory_space<vmem>>, vector<48x48xf32>
    %c0_11 = arith.constant 0 : index
    %c0_12 = arith.constant 0 : index
    %8 = vector.load %arg22[%c0_11, %c0_12] : memref<16x384xf32, #tpu.memory_space<vmem>>, vector<16x384xf32>
    %c0_13 = arith.constant 0 : index
    %c0_14 = arith.constant 0 : index
    %9 = vector.load %arg23[%c0_13, %c0_14] : memref<48x384xf32, #tpu.memory_space<vmem>>, vector<48x384xf32>
    %c0_15 = arith.constant 0 : index
    %c0_16 = arith.constant 0 : index
    %10 = vector.load %arg24[%c0_15, %c0_16] : memref<2x48xf32, #tpu.memory_space<vmem>>, vector<2x48xf32>
    %c0_17 = arith.constant 0 : index
    %c0_18 = arith.constant 0 : index
    %11 = vector.load %arg1[%c0_17, %c0_18] : memref<24x32xf32, #tpu.memory_space<vmem>>, vector<24x32xf32>
    %cst_19 = arith.constant dense<0.000000e+00> : vector<2x32xf32>
    %12 = tpu.matmul %0, %11, %cst_19 {dimension_numbers = #tpu.dot_dimension_numbers<[1], [0], [0], [1], [0, 0, 1, 1], [], []>} : vector<2x24xf32>, vector<24x32xf32>, vector<2x32xf32> -> vector<2x32xf32>
    %c0_20 = arith.constant 0 : index
    %c0_21 = arith.constant 0 : index
    %13 = vector.load %arg2[%c0_20, %c0_21] : memref<1x32xf32, #tpu.memory_space<vmem>>, vector<1x32xf32>
    %14 = vector.broadcast %13 : vector<1x32xf32> to vector<2x32xf32>
    %15 = arith.addf %12, %14 : vector<2x32xf32>
    %cst_22 = arith.constant 0.000000e+00 : f32
    %16 = vector.broadcast %cst_22 : f32 to vector<2x32xf32>
    %17 = arith.maximumf %15, %16 : vector<2x32xf32>
    %c0_23 = arith.constant 0 : index
    %c0_24 = arith.constant 0 : index
    %18 = vector.load %arg3[%c0_23, %c0_24] : memref<32x32xf32, #tpu.memory_space<vmem>>, vector<32x32xf32>
    %cst_25 = arith.constant dense<0.000000e+00> : vector<2x32xf32>
    %19 = tpu.matmul %17, %18, %cst_25 {dimension_numbers = #tpu.dot_dimension_numbers<[1], [0], [0], [1], [0, 0, 1, 1], [], []>} : vector<2x32xf32>, vector<32x32xf32>, vector<2x32xf32> -> vector<2x32xf32>
    %c0_26 = arith.constant 0 : index
    %c0_27 = arith.constant 0 : index
    %20 = vector.load %arg4[%c0_26, %c0_27] : memref<1x32xf32, #tpu.memory_space<vmem>>, vector<1x32xf32>
    %21 = vector.broadcast %20 : vector<1x32xf32> to vector<2x32xf32>
    %22 = arith.addf %19, %21 : vector<2x32xf32>
    %cst_28 = arith.constant 0.000000e+00 : f32
    %23 = vector.broadcast %cst_28 : f32 to vector<2x32xf32>
    %24 = arith.maximumf %22, %23 : vector<2x32xf32>
    %c0_29 = arith.constant 0 : index
    %c0_30 = arith.constant 0 : index
    %25 = vector.load %arg5[%c0_29, %c0_30] : memref<32x32xf32, #tpu.memory_space<vmem>>, vector<32x32xf32>
    %cst_31 = arith.constant dense<0.000000e+00> : vector<2x32xf32>
    %26 = tpu.matmul %24, %25, %cst_31 {dimension_numbers = #tpu.dot_dimension_numbers<[1], [0], [0], [1], [0, 0, 1, 1], [], []>} : vector<2x32xf32>, vector<32x32xf32>, vector<2x32xf32> -> vector<2x32xf32>
    %c0_32 = arith.constant 0 : index
    %c0_33 = arith.constant 0 : index
    %27 = vector.load %arg6[%c0_32, %c0_33] : memref<1x32xf32, #tpu.memory_space<vmem>>, vector<1x32xf32>
    %28 = vector.broadcast %27 : vector<1x32xf32> to vector<2x32xf32>
    %29 = arith.addf %26, %28 : vector<2x32xf32>
    %cst_34 = arith.constant 0.000000e+00 : f32
    %30 = vector.broadcast %cst_34 : f32 to vector<2x32xf32>
    %31 = arith.maximumf %29, %30 : vector<2x32xf32>
    %c0_35 = arith.constant 0 : index
    %c0_36 = arith.constant 0 : index
    %32 = vector.load %arg7[%c0_35, %c0_36] : memref<32x32xf32, #tpu.memory_space<vmem>>, vector<32x32xf32>
    %cst_37 = arith.constant dense<0.000000e+00> : vector<2x32xf32>
    %33 = tpu.matmul %31, %32, %cst_37 {dimension_numbers = #tpu.dot_dimension_numbers<[1], [0], [0], [1], [0, 0, 1, 1], [], []>} : vector<2x32xf32>, vector<32x32xf32>, vector<2x32xf32> -> vector<2x32xf32>
    %c0_38 = arith.constant 0 : index
    %c0_39 = arith.constant 0 : index
    %34 = vector.load %arg8[%c0_38, %c0_39] : memref<1x32xf32, #tpu.memory_space<vmem>>, vector<1x32xf32>
    %35 = vector.broadcast %34 : vector<1x32xf32> to vector<2x32xf32>
    %36 = arith.addf %33, %35 : vector<2x32xf32>
    %cst_40 = arith.constant 0.000000e+00 : f32
    %37 = vector.broadcast %cst_40 : f32 to vector<2x32xf32>
    %38 = arith.maximumf %36, %37 : vector<2x32xf32>
    %c0_41 = arith.constant 0 : index
    %c0_42 = arith.constant 0 : index
    %39 = vector.load %arg9[%c0_41, %c0_42] : memref<32x16xf32, #tpu.memory_space<vmem>>, vector<32x16xf32>
    %cst_43 = arith.constant dense<0.000000e+00> : vector<2x16xf32>
    %40 = tpu.matmul %38, %39, %cst_43 {dimension_numbers = #tpu.dot_dimension_numbers<[1], [0], [0], [1], [0, 0, 1, 1], [], []>} : vector<2x32xf32>, vector<32x16xf32>, vector<2x16xf32> -> vector<2x16xf32>
    %c0_44 = arith.constant 0 : index
    %c0_45 = arith.constant 0 : index
    %41 = vector.load %arg10[%c0_44, %c0_45] : memref<1x16xf32, #tpu.memory_space<vmem>>, vector<1x16xf32>
    %42 = vector.broadcast %41 : vector<1x16xf32> to vector<2x16xf32>
    %43 = arith.addf %40, %42 : vector<2x16xf32>
    %cst_46 = arith.constant 0.000000e+00 : f32
    %44 = vector.broadcast %cst_46 : f32 to vector<2x16xf32>
    %45 = arith.maximumf %43, %44 : vector<2x16xf32>
    %c0_47 = arith.constant 0 : index
    %c0_48 = arith.constant 0 : index
    %46 = vector.load %arg11[%c0_47, %c0_48] : memref<16x32xf32, #tpu.memory_space<vmem>>, vector<16x32xf32>
    %cst_49 = arith.constant dense<0.000000e+00> : vector<2x32xf32>
    %47 = tpu.matmul %45, %46, %cst_49 {dimension_numbers = #tpu.dot_dimension_numbers<[1], [0], [0], [1], [0, 0, 1, 1], [], []>} : vector<2x16xf32>, vector<16x32xf32>, vector<2x32xf32> -> vector<2x32xf32>
    %48 = vector.extract_strided_slice %47 {offsets = [0, 0], sizes = [2, 24], strides = [1, 1]} : vector<2x32xf32> to vector<2x24xf32>
    %49 = arith.subf %0, %48 : vector<2x24xf32>
    %50 = vector.extract_strided_slice %47 {offsets = [0, 24], sizes = [2, 8], strides = [1, 1]} : vector<2x32xf32> to vector<2x8xf32>
    %51 = arith.addf %1, %50 : vector<2x8xf32>
    %cst_50 = arith.constant dense<0.000000e+00> : vector<48x24xf32>
    %52 = tpu.matmul %5, %49, %cst_50 {dimension_numbers = #tpu.dot_dimension_numbers<[1], [0], [0], [1], [0, 0, 1, 1], [], []>} : vector<48x2xf32>, vector<2x24xf32>, vector<48x24xf32> -> vector<48x24xf32>
    %53 = arith.mulf %52, %6 : vector<48x24xf32>
    %cst_51 = arith.constant dense<0.000000e+00> : vector<48xf32>
    %54 = vector.multi_reduction <add>, %53, %cst_51 [1] : vector<48x24xf32> to vector<48xf32>
    %55 = vector.shape_cast %54 : vector<48xf32> to vector<48x1xf32>
    %56 = vector.broadcast %55 : vector<48x1xf32> to vector<48x16xf32>
    %57 = arith.addf %4, %56 : vector<48x16xf32>
    %c0_52 = arith.constant 0 : index
    %c0_53 = arith.constant 0 : index
    %58 = vector.load %arg16[%c0_52, %c0_53] : memref<16x192xf32, #tpu.memory_space<vmem>>, vector<16x192xf32>
    %cst_54 = arith.constant dense<0.000000e+00> : vector<48x192xf32>
    %59 = tpu.matmul %57, %58, %cst_54 {dimension_numbers = #tpu.dot_dimension_numbers<[1], [0], [0], [1], [0, 0, 1, 1], [], []>} : vector<48x16xf32>, vector<16x192xf32>, vector<48x192xf32> -> vector<48x192xf32>
    %c0_55 = arith.constant 0 : index
    %c0_56 = arith.constant 0 : index
    %60 = vector.load %arg17[%c0_55, %c0_56] : memref<1x192xf32, #tpu.memory_space<vmem>>, vector<1x192xf32>
    %61 = vector.broadcast %60 : vector<1x192xf32> to vector<48x192xf32>
    %62 = arith.addf %59, %61 : vector<48x192xf32>
    %63 = vector.extract_strided_slice %62 {offsets = [0, 0], sizes = [48, 16], strides = [1, 1]} : vector<48x192xf32> to vector<48x16xf32>
    %64 = vector.extract_strided_slice %62 {offsets = [0, 64], sizes = [48, 16], strides = [1, 1]} : vector<48x192xf32> to vector<48x16xf32>
    %65 = vector.extract_strided_slice %62 {offsets = [0, 128], sizes = [48, 16], strides = [1, 1]} : vector<48x192xf32> to vector<48x16xf32>
    %cst_57 = arith.constant dense<0.000000e+00> : vector<48x48xf32>
    %66 = tpu.matmul %63, %64, %cst_57 {dimension_numbers = #tpu.dot_dimension_numbers<[1], [1], [0], [0], [0, 0, 1, 0], [], []>} : vector<48x16xf32>, vector<48x16xf32>, vector<48x48xf32> -> vector<48x48xf32>
    %cst_58 = arith.constant 2.500000e-01 : f32
    %67 = vector.broadcast %cst_58 : f32 to vector<48x48xf32>
    %68 = arith.mulf %66, %67 : vector<48x48xf32>
    %69 = arith.addf %68, %7 : vector<48x48xf32>
    %cst_59 = arith.constant dense<0xFF800000> : vector<48xf32>
    %70 = vector.multi_reduction <maximumf>, %69, %cst_59 [1] : vector<48x48xf32> to vector<48xf32>
    %71 = vector.shape_cast %70 : vector<48xf32> to vector<48x1xf32>
    %72 = vector.broadcast %71 : vector<48x1xf32> to vector<48x48xf32>
    %73 = arith.subf %69, %72 : vector<48x48xf32>
    %74 = math.exp %73 : vector<48x48xf32>
    %cst_60 = arith.constant dense<0.000000e+00> : vector<48xf32>
    %75 = vector.multi_reduction <add>, %74, %cst_60 [1] : vector<48x48xf32> to vector<48xf32>
    %76 = vector.shape_cast %75 : vector<48xf32> to vector<48x1xf32>
    %77 = vector.broadcast %76 : vector<48x1xf32> to vector<48x48xf32>
    %78 = arith.divf %74, %77 : vector<48x48xf32>
    %cst_61 = arith.constant dense<0.000000e+00> : vector<48x16xf32>
    %79 = tpu.matmul %78, %65, %cst_61 {dimension_numbers = #tpu.dot_dimension_numbers<[1], [0], [0], [1], [0, 0, 1, 1], [], []>} : vector<48x48xf32>, vector<48x16xf32>, vector<48x16xf32> -> vector<48x16xf32>
    %80 = vector.extract_strided_slice %62 {offsets = [0, 16], sizes = [48, 16], strides = [1, 1]} : vector<48x192xf32> to vector<48x16xf32>
    %81 = vector.extract_strided_slice %62 {offsets = [0, 80], sizes = [48, 16], strides = [1, 1]} : vector<48x192xf32> to vector<48x16xf32>
    %82 = vector.extract_strided_slice %62 {offsets = [0, 144], sizes = [48, 16], strides = [1, 1]} : vector<48x192xf32> to vector<48x16xf32>
    %cst_62 = arith.constant dense<0.000000e+00> : vector<48x48xf32>
    %83 = tpu.matmul %80, %81, %cst_62 {dimension_numbers = #tpu.dot_dimension_numbers<[1], [1], [0], [0], [0, 0, 1, 0], [], []>} : vector<48x16xf32>, vector<48x16xf32>, vector<48x48xf32> -> vector<48x48xf32>
    %cst_63 = arith.constant 2.500000e-01 : f32
    %84 = vector.broadcast %cst_63 : f32 to vector<48x48xf32>
    %85 = arith.mulf %83, %84 : vector<48x48xf32>
    %86 = arith.addf %85, %7 : vector<48x48xf32>
    %cst_64 = arith.constant dense<0xFF800000> : vector<48xf32>
    %87 = vector.multi_reduction <maximumf>, %86, %cst_64 [1] : vector<48x48xf32> to vector<48xf32>
    %88 = vector.shape_cast %87 : vector<48xf32> to vector<48x1xf32>
    %89 = vector.broadcast %88 : vector<48x1xf32> to vector<48x48xf32>
    %90 = arith.subf %86, %89 : vector<48x48xf32>
    %91 = math.exp %90 : vector<48x48xf32>
    %cst_65 = arith.constant dense<0.000000e+00> : vector<48xf32>
    %92 = vector.multi_reduction <add>, %91, %cst_65 [1] : vector<48x48xf32> to vector<48xf32>
    %93 = vector.shape_cast %92 : vector<48xf32> to vector<48x1xf32>
    %94 = vector.broadcast %93 : vector<48x1xf32> to vector<48x48xf32>
    %95 = arith.divf %91, %94 : vector<48x48xf32>
    %cst_66 = arith.constant dense<0.000000e+00> : vector<48x16xf32>
    %96 = tpu.matmul %95, %82, %cst_66 {dimension_numbers = #tpu.dot_dimension_numbers<[1], [0], [0], [1], [0, 0, 1, 1], [], []>} : vector<48x48xf32>, vector<48x16xf32>, vector<48x16xf32> -> vector<48x16xf32>
    %97 = vector.extract_strided_slice %62 {offsets = [0, 32], sizes = [48, 16], strides = [1, 1]} : vector<48x192xf32> to vector<48x16xf32>
    %98 = vector.extract_strided_slice %62 {offsets = [0, 96], sizes = [48, 16], strides = [1, 1]} : vector<48x192xf32> to vector<48x16xf32>
    %99 = vector.extract_strided_slice %62 {offsets = [0, 160], sizes = [48, 16], strides = [1, 1]} : vector<48x192xf32> to vector<48x16xf32>
    %cst_67 = arith.constant dense<0.000000e+00> : vector<48x48xf32>
    %100 = tpu.matmul %97, %98, %cst_67 {dimension_numbers = #tpu.dot_dimension_numbers<[1], [1], [0], [0], [0, 0, 1, 0], [], []>} : vector<48x16xf32>, vector<48x16xf32>, vector<48x48xf32> -> vector<48x48xf32>
    %cst_68 = arith.constant 2.500000e-01 : f32
    %101 = vector.broadcast %cst_68 : f32 to vector<48x48xf32>
    %102 = arith.mulf %100, %101 : vector<48x48xf32>
    %103 = arith.addf %102, %7 : vector<48x48xf32>
    %cst_69 = arith.constant dense<0xFF800000> : vector<48xf32>
    %104 = vector.multi_reduction <maximumf>, %103, %cst_69 [1] : vector<48x48xf32> to vector<48xf32>
    %105 = vector.shape_cast %104 : vector<48xf32> to vector<48x1xf32>
    %106 = vector.broadcast %105 : vector<48x1xf32> to vector<48x48xf32>
    %107 = arith.subf %103, %106 : vector<48x48xf32>
    %108 = math.exp %107 : vector<48x48xf32>
    %cst_70 = arith.constant dense<0.000000e+00> : vector<48xf32>
    %109 = vector.multi_reduction <add>, %108, %cst_70 [1] : vector<48x48xf32> to vector<48xf32>
    %110 = vector.shape_cast %109 : vector<48xf32> to vector<48x1xf32>
    %111 = vector.broadcast %110 : vector<48x1xf32> to vector<48x48xf32>
    %112 = arith.divf %108, %111 : vector<48x48xf32>
    %cst_71 = arith.constant dense<0.000000e+00> : vector<48x16xf32>
    %113 = tpu.matmul %112, %99, %cst_71 {dimension_numbers = #tpu.dot_dimension_numbers<[1], [0], [0], [1], [0, 0, 1, 1], [], []>} : vector<48x48xf32>, vector<48x16xf32>, vector<48x16xf32> -> vector<48x16xf32>
    %114 = vector.extract_strided_slice %62 {offsets = [0, 48], sizes = [48, 16], strides = [1, 1]} : vector<48x192xf32> to vector<48x16xf32>
    %115 = vector.extract_strided_slice %62 {offsets = [0, 112], sizes = [48, 16], strides = [1, 1]} : vector<48x192xf32> to vector<48x16xf32>
    %116 = vector.extract_strided_slice %62 {offsets = [0, 176], sizes = [48, 16], strides = [1, 1]} : vector<48x192xf32> to vector<48x16xf32>
    %cst_72 = arith.constant dense<0.000000e+00> : vector<48x48xf32>
    %117 = tpu.matmul %114, %115, %cst_72 {dimension_numbers = #tpu.dot_dimension_numbers<[1], [1], [0], [0], [0, 0, 1, 0], [], []>} : vector<48x16xf32>, vector<48x16xf32>, vector<48x48xf32> -> vector<48x48xf32>
    %cst_73 = arith.constant 2.500000e-01 : f32
    %118 = vector.broadcast %cst_73 : f32 to vector<48x48xf32>
    %119 = arith.mulf %117, %118 : vector<48x48xf32>
    %120 = arith.addf %119, %7 : vector<48x48xf32>
    %cst_74 = arith.constant dense<0xFF800000> : vector<48xf32>
    %121 = vector.multi_reduction <maximumf>, %120, %cst_74 [1] : vector<48x48xf32> to vector<48xf32>
    %122 = vector.shape_cast %121 : vector<48xf32> to vector<48x1xf32>
    %123 = vector.broadcast %122 : vector<48x1xf32> to vector<48x48xf32>
    %124 = arith.subf %120, %123 : vector<48x48xf32>
    %125 = math.exp %124 : vector<48x48xf32>
    %cst_75 = arith.constant dense<0.000000e+00> : vector<48xf32>
    %126 = vector.multi_reduction <add>, %125, %cst_75 [1] : vector<48x48xf32> to vector<48xf32>
    %127 = vector.shape_cast %126 : vector<48xf32> to vector<48x1xf32>
    %128 = vector.broadcast %127 : vector<48x1xf32> to vector<48x48xf32>
    %129 = arith.divf %125, %128 : vector<48x48xf32>
    %cst_76 = arith.constant dense<0.000000e+00> : vector<48x16xf32>
    %130 = tpu.matmul %129, %116, %cst_76 {dimension_numbers = #tpu.dot_dimension_numbers<[1], [0], [0], [1], [0, 0, 1, 1], [], []>} : vector<48x48xf32>, vector<48x16xf32>, vector<48x16xf32> -> vector<48x16xf32>
    %131 = tpu.concatenate %79, %96, %113, %130 in 1 : vector<48x16xf32>, vector<48x16xf32>, vector<48x16xf32>, vector<48x16xf32> -> vector<48x64xf32>
    %c0_77 = arith.constant 0 : index
    %c0_78 = arith.constant 0 : index
    %132 = vector.load %arg18[%c0_77, %c0_78] : memref<64x16xf32, #tpu.memory_space<vmem>>, vector<64x16xf32>
    %cst_79 = arith.constant dense<0.000000e+00> : vector<48x16xf32>
    %133 = tpu.matmul %131, %132, %cst_79 {dimension_numbers = #tpu.dot_dimension_numbers<[1], [0], [0], [1], [0, 0, 1, 1], [], []>} : vector<48x64xf32>, vector<64x16xf32>, vector<48x16xf32> -> vector<48x16xf32>
    %c0_80 = arith.constant 0 : index
    %c0_81 = arith.constant 0 : index
    %134 = vector.load %arg19[%c0_80, %c0_81] : memref<1x16xf32, #tpu.memory_space<vmem>>, vector<1x16xf32>
    %135 = vector.broadcast %134 : vector<1x16xf32> to vector<48x16xf32>
    %136 = arith.addf %133, %135 : vector<48x16xf32>
    %137 = arith.addf %57, %136 : vector<48x16xf32>
    %cst_82 = arith.constant dense<0.000000e+00> : vector<48xf32>
    %138 = vector.multi_reduction <add>, %137, %cst_82 [1] : vector<48x16xf32> to vector<48xf32>
    %139 = vector.shape_cast %138 : vector<48xf32> to vector<48x1xf32>
    %cst_83 = arith.constant 1.600000e+01 : f32
    %140 = vector.broadcast %cst_83 : f32 to vector<48x1xf32>
    %141 = arith.divf %139, %140 : vector<48x1xf32>
    %142 = vector.broadcast %141 : vector<48x1xf32> to vector<48x16xf32>
    %143 = arith.subf %137, %142 : vector<48x16xf32>
    %144 = arith.mulf %143, %143 : vector<48x16xf32>
    %cst_84 = arith.constant dense<0.000000e+00> : vector<48xf32>
    %145 = vector.multi_reduction <add>, %144, %cst_84 [1] : vector<48x16xf32> to vector<48xf32>
    %146 = vector.shape_cast %145 : vector<48xf32> to vector<48x1xf32>
    %cst_85 = arith.constant 1.600000e+01 : f32
    %147 = vector.broadcast %cst_85 : f32 to vector<48x1xf32>
    %148 = arith.divf %146, %147 : vector<48x1xf32>
    %cst_86 = arith.constant 9.99999974E-6 : f32
    %149 = vector.broadcast %cst_86 : f32 to vector<48x1xf32>
    %150 = arith.addf %148, %149 : vector<48x1xf32>
    %151 = math.rsqrt %150 : vector<48x1xf32>
    %152 = vector.broadcast %151 : vector<48x1xf32> to vector<48x16xf32>
    %153 = arith.mulf %143, %152 : vector<48x16xf32>
    %c0_87 = arith.constant 0 : index
    %c0_88 = arith.constant 0 : index
    %154 = vector.load %arg20[%c0_87, %c0_88] : memref<1x16xf32, #tpu.memory_space<vmem>>, vector<1x16xf32>
    %155 = vector.broadcast %154 : vector<1x16xf32> to vector<48x16xf32>
    %156 = arith.mulf %153, %155 : vector<48x16xf32>
    %c0_89 = arith.constant 0 : index
    %c0_90 = arith.constant 0 : index
    %157 = vector.load %arg21[%c0_89, %c0_90] : memref<1x16xf32, #tpu.memory_space<vmem>>, vector<1x16xf32>
    %158 = vector.broadcast %157 : vector<1x16xf32> to vector<48x16xf32>
    %159 = arith.addf %156, %158 : vector<48x16xf32>
    %cst_91 = arith.constant dense<0.000000e+00> : vector<48x384xf32>
    %160 = tpu.matmul %159, %8, %cst_91 {dimension_numbers = #tpu.dot_dimension_numbers<[1], [0], [0], [1], [0, 0, 1, 1], [], []>} : vector<48x16xf32>, vector<16x384xf32>, vector<48x384xf32> -> vector<48x384xf32>
    %161 = arith.mulf %160, %9 : vector<48x384xf32>
    %cst_92 = arith.constant dense<0.000000e+00> : vector<2x384xf32>
    %162 = tpu.matmul %10, %161, %cst_92 {dimension_numbers = #tpu.dot_dimension_numbers<[1], [0], [0], [1], [0, 0, 1, 1], [], []>} : vector<2x48xf32>, vector<48x384xf32>, vector<2x384xf32> -> vector<2x384xf32>
    %c0_93 = arith.constant 0 : index
    %c0_94 = arith.constant 0 : index
    %163 = vector.load %arg25[%c0_93, %c0_94] : memref<384x512xf32, #tpu.memory_space<vmem>>, vector<384x512xf32>
    %cst_95 = arith.constant dense<0.000000e+00> : vector<2x512xf32>
    %164 = tpu.matmul %162, %163, %cst_95 {dimension_numbers = #tpu.dot_dimension_numbers<[1], [0], [0], [1], [0, 0, 1, 1], [], []>} : vector<2x384xf32>, vector<384x512xf32>, vector<2x512xf32> -> vector<2x512xf32>
    %c0_96 = arith.constant 0 : index
    %c0_97 = arith.constant 0 : index
    %165 = vector.load %arg26[%c0_96, %c0_97] : memref<1x512xf32, #tpu.memory_space<vmem>>, vector<1x512xf32>
    %166 = vector.broadcast %165 : vector<1x512xf32> to vector<2x512xf32>
    %167 = arith.addf %164, %166 : vector<2x512xf32>
    %cst_98 = arith.constant 0.000000e+00 : f32
    %168 = vector.broadcast %cst_98 : f32 to vector<2x512xf32>
    %169 = arith.cmpf oge, %167, %168 : vector<2x512xf32>
    %cst_99 = arith.constant 0.00999999977 : f32
    %170 = vector.broadcast %cst_99 : f32 to vector<2x512xf32>
    %171 = arith.mulf %170, %167 : vector<2x512xf32>
    %172 = arith.select %169, %167, %171 : vector<2x512xi1>, vector<2x512xf32>
    %c0_100 = arith.constant 0 : index
    %c0_101 = arith.constant 0 : index
    %173 = vector.load %arg27[%c0_100, %c0_101] : memref<512x32xf32, #tpu.memory_space<vmem>>, vector<512x32xf32>
    %cst_102 = arith.constant dense<0.000000e+00> : vector<2x32xf32>
    %174 = tpu.matmul %172, %173, %cst_102 {dimension_numbers = #tpu.dot_dimension_numbers<[1], [0], [0], [1], [0, 0, 1, 1], [], []>} : vector<2x512xf32>, vector<512x32xf32>, vector<2x32xf32> -> vector<2x32xf32>
    %c0_103 = arith.constant 0 : index
    %c0_104 = arith.constant 0 : index
    %175 = vector.load %arg28[%c0_103, %c0_104] : memref<1x32xf32, #tpu.memory_space<vmem>>, vector<1x32xf32>
    %176 = vector.broadcast %175 : vector<1x32xf32> to vector<2x32xf32>
    %177 = arith.addf %174, %176 : vector<2x32xf32>
    %178 = vector.extract_strided_slice %177 {offsets = [0, 0], sizes = [2, 24], strides = [1, 1]} : vector<2x32xf32> to vector<2x24xf32>
    %179 = arith.subf %49, %178 : vector<2x24xf32>
    %180 = vector.extract_strided_slice %177 {offsets = [0, 24], sizes = [2, 8], strides = [1, 1]} : vector<2x32xf32> to vector<2x8xf32>
    %181 = arith.addf %2, %180 : vector<2x8xf32>
    %c0_105 = arith.constant 0 : index
    %c0_106 = arith.constant 0 : index
    %182 = vector.load %arg29[%c0_105, %c0_106] : memref<24x72xf32, #tpu.memory_space<vmem>>, vector<24x72xf32>
    %cst_107 = arith.constant dense<0.000000e+00> : vector<2x72xf32>
    %183 = tpu.matmul %179, %182, %cst_107 {dimension_numbers = #tpu.dot_dimension_numbers<[1], [0], [0], [1], [0, 0, 1, 1], [], []>} : vector<2x24xf32>, vector<24x72xf32>, vector<2x72xf32> -> vector<2x72xf32>
    %c0_108 = arith.constant 0 : index
    %c0_109 = arith.constant 0 : index
    %184 = vector.load %arg30[%c0_108, %c0_109] : memref<1x72xf32, #tpu.memory_space<vmem>>, vector<1x72xf32>
    %185 = vector.broadcast %184 : vector<1x72xf32> to vector<2x72xf32>
    %186 = arith.addf %183, %185 : vector<2x72xf32>
    %cst_110 = arith.constant 0.000000e+00 : f32
    %187 = vector.broadcast %cst_110 : f32 to vector<2x72xf32>
    %188 = arith.maximumf %186, %187 : vector<2x72xf32>
    %189 = vector.extract_strided_slice %188 {offsets = [0, 0], sizes = [2, 71], strides = [1, 1]} : vector<2x72xf32> to vector<2x71xf32>
    %190 = vector.extract_strided_slice %188 {offsets = [0, 1], sizes = [2, 71], strides = [1, 1]} : vector<2x72xf32> to vector<2x71xf32>
    %191 = arith.maximumf %189, %190 : vector<2x71xf32>
    %c0_111 = arith.constant 0 : index
    %c0_112 = arith.constant 0 : index
    %192 = vector.load %arg31[%c0_111, %c0_112] : memref<71x104xf32, #tpu.memory_space<vmem>>, vector<71x104xf32>
    %cst_113 = arith.constant dense<0.000000e+00> : vector<2x104xf32>
    %193 = tpu.matmul %191, %192, %cst_113 {dimension_numbers = #tpu.dot_dimension_numbers<[1], [0], [0], [1], [0, 0, 1, 1], [], []>} : vector<2x71xf32>, vector<71x104xf32>, vector<2x104xf32> -> vector<2x104xf32>
    %c0_114 = arith.constant 0 : index
    %c0_115 = arith.constant 0 : index
    %194 = vector.load %arg32[%c0_114, %c0_115] : memref<1x104xf32, #tpu.memory_space<vmem>>, vector<1x104xf32>
    %195 = vector.broadcast %194 : vector<1x104xf32> to vector<2x104xf32>
    %196 = arith.addf %193, %195 : vector<2x104xf32>
    %cst_116 = arith.constant 0.000000e+00 : f32
    %197 = vector.broadcast %cst_116 : f32 to vector<2x104xf32>
    %198 = arith.maximumf %196, %197 : vector<2x104xf32>
    %199 = vector.extract_strided_slice %198 {offsets = [0, 0], sizes = [2, 103], strides = [1, 1]} : vector<2x104xf32> to vector<2x103xf32>
    %200 = vector.extract_strided_slice %198 {offsets = [0, 1], sizes = [2, 103], strides = [1, 1]} : vector<2x104xf32> to vector<2x103xf32>
    %201 = arith.maximumf %199, %200 : vector<2x103xf32>
    %c0_117 = arith.constant 0 : index
    %c0_118 = arith.constant 0 : index
    %202 = vector.load %arg33[%c0_117, %c0_118] : memref<103x10xf32, #tpu.memory_space<vmem>>, vector<103x10xf32>
    %cst_119 = arith.constant dense<0.000000e+00> : vector<2x10xf32>
    %203 = tpu.matmul %201, %202, %cst_119 {dimension_numbers = #tpu.dot_dimension_numbers<[1], [0], [0], [1], [0, 0, 1, 1], [], []>} : vector<2x103xf32>, vector<103x10xf32>, vector<2x10xf32> -> vector<2x10xf32>
    %c0_120 = arith.constant 0 : index
    %c0_121 = arith.constant 0 : index
    %204 = vector.load %arg34[%c0_120, %c0_121] : memref<1x10xf32, #tpu.memory_space<vmem>>, vector<1x10xf32>
    %205 = vector.broadcast %204 : vector<1x10xf32> to vector<2x10xf32>
    %206 = arith.addf %203, %205 : vector<2x10xf32>
    %cst_122 = arith.constant 0.000000e+00 : f32
    %207 = vector.broadcast %cst_122 : f32 to vector<2x10xf32>
    %208 = arith.maximumf %206, %207 : vector<2x10xf32>
    %209 = vector.extract_strided_slice %208 {offsets = [0, 0], sizes = [2, 9], strides = [1, 1]} : vector<2x10xf32> to vector<2x9xf32>
    %210 = vector.extract_strided_slice %208 {offsets = [0, 1], sizes = [2, 9], strides = [1, 1]} : vector<2x10xf32> to vector<2x9xf32>
    %211 = arith.maximumf %209, %210 : vector<2x9xf32>
    %c0_123 = arith.constant 0 : index
    %c0_124 = arith.constant 0 : index
    %212 = vector.load %arg35[%c0_123, %c0_124] : memref<9x32xf32, #tpu.memory_space<vmem>>, vector<9x32xf32>
    %cst_125 = arith.constant dense<0.000000e+00> : vector<2x32xf32>
    %213 = tpu.matmul %211, %212, %cst_125 {dimension_numbers = #tpu.dot_dimension_numbers<[1], [0], [0], [1], [0, 0, 1, 1], [], []>} : vector<2x9xf32>, vector<9x32xf32>, vector<2x32xf32> -> vector<2x32xf32>
    %c0_126 = arith.constant 0 : index
    %c0_127 = arith.constant 0 : index
    %214 = vector.load %arg36[%c0_126, %c0_127] : memref<1x32xf32, #tpu.memory_space<vmem>>, vector<1x32xf32>
    %215 = vector.broadcast %214 : vector<1x32xf32> to vector<2x32xf32>
    %216 = arith.addf %213, %215 : vector<2x32xf32>
    %cst_128 = arith.constant 0.000000e+00 : f32
    %217 = vector.broadcast %cst_128 : f32 to vector<2x32xf32>
    %218 = arith.cmpf oge, %216, %217 : vector<2x32xf32>
    %cst_129 = arith.constant 0.00999999977 : f32
    %219 = vector.broadcast %cst_129 : f32 to vector<2x32xf32>
    %220 = arith.mulf %219, %216 : vector<2x32xf32>
    %221 = arith.select %218, %216, %220 : vector<2x32xi1>, vector<2x32xf32>
    %c0_130 = arith.constant 0 : index
    %c0_131 = arith.constant 0 : index
    %222 = vector.load %arg37[%c0_130, %c0_131] : memref<32x32xf32, #tpu.memory_space<vmem>>, vector<32x32xf32>
    %cst_132 = arith.constant dense<0.000000e+00> : vector<2x32xf32>
    %223 = tpu.matmul %221, %222, %cst_132 {dimension_numbers = #tpu.dot_dimension_numbers<[1], [0], [0], [1], [0, 0, 1, 1], [], []>} : vector<2x32xf32>, vector<32x32xf32>, vector<2x32xf32> -> vector<2x32xf32>
    %c0_133 = arith.constant 0 : index
    %c0_134 = arith.constant 0 : index
    %224 = vector.load %arg38[%c0_133, %c0_134] : memref<1x32xf32, #tpu.memory_space<vmem>>, vector<1x32xf32>
    %225 = vector.broadcast %224 : vector<1x32xf32> to vector<2x32xf32>
    %226 = arith.addf %223, %225 : vector<2x32xf32>
    %227 = vector.extract_strided_slice %226 {offsets = [0, 0], sizes = [2, 24], strides = [1, 1]} : vector<2x32xf32> to vector<2x24xf32>
    %228 = arith.subf %179, %227 : vector<2x24xf32>
    %229 = vector.extract_strided_slice %226 {offsets = [0, 24], sizes = [2, 8], strides = [1, 1]} : vector<2x32xf32> to vector<2x8xf32>
    %230 = arith.addf %3, %229 : vector<2x8xf32>
    %c0_135 = arith.constant 0 : index
    %c0_136 = arith.constant 0 : index
    %231 = vector.load %arg1[%c0_135, %c0_136] : memref<24x32xf32, #tpu.memory_space<vmem>>, vector<24x32xf32>
    %cst_137 = arith.constant dense<0.000000e+00> : vector<2x32xf32>
    %232 = tpu.matmul %228, %231, %cst_137 {dimension_numbers = #tpu.dot_dimension_numbers<[1], [0], [0], [1], [0, 0, 1, 1], [], []>} : vector<2x24xf32>, vector<24x32xf32>, vector<2x32xf32> -> vector<2x32xf32>
    %c0_138 = arith.constant 0 : index
    %c0_139 = arith.constant 0 : index
    %233 = vector.load %arg2[%c0_138, %c0_139] : memref<1x32xf32, #tpu.memory_space<vmem>>, vector<1x32xf32>
    %234 = vector.broadcast %233 : vector<1x32xf32> to vector<2x32xf32>
    %235 = arith.addf %232, %234 : vector<2x32xf32>
    %cst_140 = arith.constant 0.000000e+00 : f32
    %236 = vector.broadcast %cst_140 : f32 to vector<2x32xf32>
    %237 = arith.maximumf %235, %236 : vector<2x32xf32>
    %c0_141 = arith.constant 0 : index
    %c0_142 = arith.constant 0 : index
    %238 = vector.load %arg3[%c0_141, %c0_142] : memref<32x32xf32, #tpu.memory_space<vmem>>, vector<32x32xf32>
    %cst_143 = arith.constant dense<0.000000e+00> : vector<2x32xf32>
    %239 = tpu.matmul %237, %238, %cst_143 {dimension_numbers = #tpu.dot_dimension_numbers<[1], [0], [0], [1], [0, 0, 1, 1], [], []>} : vector<2x32xf32>, vector<32x32xf32>, vector<2x32xf32> -> vector<2x32xf32>
    %c0_144 = arith.constant 0 : index
    %c0_145 = arith.constant 0 : index
    %240 = vector.load %arg4[%c0_144, %c0_145] : memref<1x32xf32, #tpu.memory_space<vmem>>, vector<1x32xf32>
    %241 = vector.broadcast %240 : vector<1x32xf32> to vector<2x32xf32>
    %242 = arith.addf %239, %241 : vector<2x32xf32>
    %cst_146 = arith.constant 0.000000e+00 : f32
    %243 = vector.broadcast %cst_146 : f32 to vector<2x32xf32>
    %244 = arith.maximumf %242, %243 : vector<2x32xf32>
    %c0_147 = arith.constant 0 : index
    %c0_148 = arith.constant 0 : index
    %245 = vector.load %arg5[%c0_147, %c0_148] : memref<32x32xf32, #tpu.memory_space<vmem>>, vector<32x32xf32>
    %cst_149 = arith.constant dense<0.000000e+00> : vector<2x32xf32>
    %246 = tpu.matmul %244, %245, %cst_149 {dimension_numbers = #tpu.dot_dimension_numbers<[1], [0], [0], [1], [0, 0, 1, 1], [], []>} : vector<2x32xf32>, vector<32x32xf32>, vector<2x32xf32> -> vector<2x32xf32>
    %c0_150 = arith.constant 0 : index
    %c0_151 = arith.constant 0 : index
    %247 = vector.load %arg6[%c0_150, %c0_151] : memref<1x32xf32, #tpu.memory_space<vmem>>, vector<1x32xf32>
    %248 = vector.broadcast %247 : vector<1x32xf32> to vector<2x32xf32>
    %249 = arith.addf %246, %248 : vector<2x32xf32>
    %cst_152 = arith.constant 0.000000e+00 : f32
    %250 = vector.broadcast %cst_152 : f32 to vector<2x32xf32>
    %251 = arith.maximumf %249, %250 : vector<2x32xf32>
    %c0_153 = arith.constant 0 : index
    %c0_154 = arith.constant 0 : index
    %252 = vector.load %arg7[%c0_153, %c0_154] : memref<32x32xf32, #tpu.memory_space<vmem>>, vector<32x32xf32>
    %cst_155 = arith.constant dense<0.000000e+00> : vector<2x32xf32>
    %253 = tpu.matmul %251, %252, %cst_155 {dimension_numbers = #tpu.dot_dimension_numbers<[1], [0], [0], [1], [0, 0, 1, 1], [], []>} : vector<2x32xf32>, vector<32x32xf32>, vector<2x32xf32> -> vector<2x32xf32>
    %c0_156 = arith.constant 0 : index
    %c0_157 = arith.constant 0 : index
    %254 = vector.load %arg8[%c0_156, %c0_157] : memref<1x32xf32, #tpu.memory_space<vmem>>, vector<1x32xf32>
    %255 = vector.broadcast %254 : vector<1x32xf32> to vector<2x32xf32>
    %256 = arith.addf %253, %255 : vector<2x32xf32>
    %cst_158 = arith.constant 0.000000e+00 : f32
    %257 = vector.broadcast %cst_158 : f32 to vector<2x32xf32>
    %258 = arith.maximumf %256, %257 : vector<2x32xf32>
    %c0_159 = arith.constant 0 : index
    %c0_160 = arith.constant 0 : index
    %259 = vector.load %arg9[%c0_159, %c0_160] : memref<32x16xf32, #tpu.memory_space<vmem>>, vector<32x16xf32>
    %cst_161 = arith.constant dense<0.000000e+00> : vector<2x16xf32>
    %260 = tpu.matmul %258, %259, %cst_161 {dimension_numbers = #tpu.dot_dimension_numbers<[1], [0], [0], [1], [0, 0, 1, 1], [], []>} : vector<2x32xf32>, vector<32x16xf32>, vector<2x16xf32> -> vector<2x16xf32>
    %c0_162 = arith.constant 0 : index
    %c0_163 = arith.constant 0 : index
    %261 = vector.load %arg10[%c0_162, %c0_163] : memref<1x16xf32, #tpu.memory_space<vmem>>, vector<1x16xf32>
    %262 = vector.broadcast %261 : vector<1x16xf32> to vector<2x16xf32>
    %263 = arith.addf %260, %262 : vector<2x16xf32>
    %cst_164 = arith.constant 0.000000e+00 : f32
    %264 = vector.broadcast %cst_164 : f32 to vector<2x16xf32>
    %265 = arith.maximumf %263, %264 : vector<2x16xf32>
    %c0_165 = arith.constant 0 : index
    %c0_166 = arith.constant 0 : index
    %266 = vector.load %arg11[%c0_165, %c0_166] : memref<16x32xf32, #tpu.memory_space<vmem>>, vector<16x32xf32>
    %cst_167 = arith.constant dense<0.000000e+00> : vector<2x32xf32>
    %267 = tpu.matmul %265, %266, %cst_167 {dimension_numbers = #tpu.dot_dimension_numbers<[1], [0], [0], [1], [0, 0, 1, 1], [], []>} : vector<2x16xf32>, vector<16x32xf32>, vector<2x32xf32> -> vector<2x32xf32>
    %268 = vector.extract_strided_slice %267 {offsets = [0, 0], sizes = [2, 24], strides = [1, 1]} : vector<2x32xf32> to vector<2x24xf32>
    %269 = arith.subf %228, %268 : vector<2x24xf32>
    %270 = vector.extract_strided_slice %267 {offsets = [0, 24], sizes = [2, 8], strides = [1, 1]} : vector<2x32xf32> to vector<2x8xf32>
    %271 = arith.addf %51, %270 : vector<2x8xf32>
    %cst_168 = arith.constant dense<0.000000e+00> : vector<48x24xf32>
    %272 = tpu.matmul %5, %269, %cst_168 {dimension_numbers = #tpu.dot_dimension_numbers<[1], [0], [0], [1], [0, 0, 1, 1], [], []>} : vector<48x2xf32>, vector<2x24xf32>, vector<48x24xf32> -> vector<48x24xf32>
    %273 = arith.mulf %272, %6 : vector<48x24xf32>
    %cst_169 = arith.constant dense<0.000000e+00> : vector<48xf32>
    %274 = vector.multi_reduction <add>, %273, %cst_169 [1] : vector<48x24xf32> to vector<48xf32>
    %275 = vector.shape_cast %274 : vector<48xf32> to vector<48x1xf32>
    %276 = vector.broadcast %275 : vector<48x1xf32> to vector<48x16xf32>
    %277 = arith.addf %4, %276 : vector<48x16xf32>
    %c0_170 = arith.constant 0 : index
    %c0_171 = arith.constant 0 : index
    %278 = vector.load %arg16[%c0_170, %c0_171] : memref<16x192xf32, #tpu.memory_space<vmem>>, vector<16x192xf32>
    %cst_172 = arith.constant dense<0.000000e+00> : vector<48x192xf32>
    %279 = tpu.matmul %277, %278, %cst_172 {dimension_numbers = #tpu.dot_dimension_numbers<[1], [0], [0], [1], [0, 0, 1, 1], [], []>} : vector<48x16xf32>, vector<16x192xf32>, vector<48x192xf32> -> vector<48x192xf32>
    %c0_173 = arith.constant 0 : index
    %c0_174 = arith.constant 0 : index
    %280 = vector.load %arg17[%c0_173, %c0_174] : memref<1x192xf32, #tpu.memory_space<vmem>>, vector<1x192xf32>
    %281 = vector.broadcast %280 : vector<1x192xf32> to vector<48x192xf32>
    %282 = arith.addf %279, %281 : vector<48x192xf32>
    %283 = vector.extract_strided_slice %282 {offsets = [0, 0], sizes = [48, 16], strides = [1, 1]} : vector<48x192xf32> to vector<48x16xf32>
    %284 = vector.extract_strided_slice %282 {offsets = [0, 64], sizes = [48, 16], strides = [1, 1]} : vector<48x192xf32> to vector<48x16xf32>
    %285 = vector.extract_strided_slice %282 {offsets = [0, 128], sizes = [48, 16], strides = [1, 1]} : vector<48x192xf32> to vector<48x16xf32>
    %cst_175 = arith.constant dense<0.000000e+00> : vector<48x48xf32>
    %286 = tpu.matmul %283, %284, %cst_175 {dimension_numbers = #tpu.dot_dimension_numbers<[1], [1], [0], [0], [0, 0, 1, 0], [], []>} : vector<48x16xf32>, vector<48x16xf32>, vector<48x48xf32> -> vector<48x48xf32>
    %cst_176 = arith.constant 2.500000e-01 : f32
    %287 = vector.broadcast %cst_176 : f32 to vector<48x48xf32>
    %288 = arith.mulf %286, %287 : vector<48x48xf32>
    %289 = arith.addf %288, %7 : vector<48x48xf32>
    %cst_177 = arith.constant dense<0xFF800000> : vector<48xf32>
    %290 = vector.multi_reduction <maximumf>, %289, %cst_177 [1] : vector<48x48xf32> to vector<48xf32>
    %291 = vector.shape_cast %290 : vector<48xf32> to vector<48x1xf32>
    %292 = vector.broadcast %291 : vector<48x1xf32> to vector<48x48xf32>
    %293 = arith.subf %289, %292 : vector<48x48xf32>
    %294 = math.exp %293 : vector<48x48xf32>
    %cst_178 = arith.constant dense<0.000000e+00> : vector<48xf32>
    %295 = vector.multi_reduction <add>, %294, %cst_178 [1] : vector<48x48xf32> to vector<48xf32>
    %296 = vector.shape_cast %295 : vector<48xf32> to vector<48x1xf32>
    %297 = vector.broadcast %296 : vector<48x1xf32> to vector<48x48xf32>
    %298 = arith.divf %294, %297 : vector<48x48xf32>
    %cst_179 = arith.constant dense<0.000000e+00> : vector<48x16xf32>
    %299 = tpu.matmul %298, %285, %cst_179 {dimension_numbers = #tpu.dot_dimension_numbers<[1], [0], [0], [1], [0, 0, 1, 1], [], []>} : vector<48x48xf32>, vector<48x16xf32>, vector<48x16xf32> -> vector<48x16xf32>
    %300 = vector.extract_strided_slice %282 {offsets = [0, 16], sizes = [48, 16], strides = [1, 1]} : vector<48x192xf32> to vector<48x16xf32>
    %301 = vector.extract_strided_slice %282 {offsets = [0, 80], sizes = [48, 16], strides = [1, 1]} : vector<48x192xf32> to vector<48x16xf32>
    %302 = vector.extract_strided_slice %282 {offsets = [0, 144], sizes = [48, 16], strides = [1, 1]} : vector<48x192xf32> to vector<48x16xf32>
    %cst_180 = arith.constant dense<0.000000e+00> : vector<48x48xf32>
    %303 = tpu.matmul %300, %301, %cst_180 {dimension_numbers = #tpu.dot_dimension_numbers<[1], [1], [0], [0], [0, 0, 1, 0], [], []>} : vector<48x16xf32>, vector<48x16xf32>, vector<48x48xf32> -> vector<48x48xf32>
    %cst_181 = arith.constant 2.500000e-01 : f32
    %304 = vector.broadcast %cst_181 : f32 to vector<48x48xf32>
    %305 = arith.mulf %303, %304 : vector<48x48xf32>
    %306 = arith.addf %305, %7 : vector<48x48xf32>
    %cst_182 = arith.constant dense<0xFF800000> : vector<48xf32>
    %307 = vector.multi_reduction <maximumf>, %306, %cst_182 [1] : vector<48x48xf32> to vector<48xf32>
    %308 = vector.shape_cast %307 : vector<48xf32> to vector<48x1xf32>
    %309 = vector.broadcast %308 : vector<48x1xf32> to vector<48x48xf32>
    %310 = arith.subf %306, %309 : vector<48x48xf32>
    %311 = math.exp %310 : vector<48x48xf32>
    %cst_183 = arith.constant dense<0.000000e+00> : vector<48xf32>
    %312 = vector.multi_reduction <add>, %311, %cst_183 [1] : vector<48x48xf32> to vector<48xf32>
    %313 = vector.shape_cast %312 : vector<48xf32> to vector<48x1xf32>
    %314 = vector.broadcast %313 : vector<48x1xf32> to vector<48x48xf32>
    %315 = arith.divf %311, %314 : vector<48x48xf32>
    %cst_184 = arith.constant dense<0.000000e+00> : vector<48x16xf32>
    %316 = tpu.matmul %315, %302, %cst_184 {dimension_numbers = #tpu.dot_dimension_numbers<[1], [0], [0], [1], [0, 0, 1, 1], [], []>} : vector<48x48xf32>, vector<48x16xf32>, vector<48x16xf32> -> vector<48x16xf32>
    %317 = vector.extract_strided_slice %282 {offsets = [0, 32], sizes = [48, 16], strides = [1, 1]} : vector<48x192xf32> to vector<48x16xf32>
    %318 = vector.extract_strided_slice %282 {offsets = [0, 96], sizes = [48, 16], strides = [1, 1]} : vector<48x192xf32> to vector<48x16xf32>
    %319 = vector.extract_strided_slice %282 {offsets = [0, 160], sizes = [48, 16], strides = [1, 1]} : vector<48x192xf32> to vector<48x16xf32>
    %cst_185 = arith.constant dense<0.000000e+00> : vector<48x48xf32>
    %320 = tpu.matmul %317, %318, %cst_185 {dimension_numbers = #tpu.dot_dimension_numbers<[1], [1], [0], [0], [0, 0, 1, 0], [], []>} : vector<48x16xf32>, vector<48x16xf32>, vector<48x48xf32> -> vector<48x48xf32>
    %cst_186 = arith.constant 2.500000e-01 : f32
    %321 = vector.broadcast %cst_186 : f32 to vector<48x48xf32>
    %322 = arith.mulf %320, %321 : vector<48x48xf32>
    %323 = arith.addf %322, %7 : vector<48x48xf32>
    %cst_187 = arith.constant dense<0xFF800000> : vector<48xf32>
    %324 = vector.multi_reduction <maximumf>, %323, %cst_187 [1] : vector<48x48xf32> to vector<48xf32>
    %325 = vector.shape_cast %324 : vector<48xf32> to vector<48x1xf32>
    %326 = vector.broadcast %325 : vector<48x1xf32> to vector<48x48xf32>
    %327 = arith.subf %323, %326 : vector<48x48xf32>
    %328 = math.exp %327 : vector<48x48xf32>
    %cst_188 = arith.constant dense<0.000000e+00> : vector<48xf32>
    %329 = vector.multi_reduction <add>, %328, %cst_188 [1] : vector<48x48xf32> to vector<48xf32>
    %330 = vector.shape_cast %329 : vector<48xf32> to vector<48x1xf32>
    %331 = vector.broadcast %330 : vector<48x1xf32> to vector<48x48xf32>
    %332 = arith.divf %328, %331 : vector<48x48xf32>
    %cst_189 = arith.constant dense<0.000000e+00> : vector<48x16xf32>
    %333 = tpu.matmul %332, %319, %cst_189 {dimension_numbers = #tpu.dot_dimension_numbers<[1], [0], [0], [1], [0, 0, 1, 1], [], []>} : vector<48x48xf32>, vector<48x16xf32>, vector<48x16xf32> -> vector<48x16xf32>
    %334 = vector.extract_strided_slice %282 {offsets = [0, 48], sizes = [48, 16], strides = [1, 1]} : vector<48x192xf32> to vector<48x16xf32>
    %335 = vector.extract_strided_slice %282 {offsets = [0, 112], sizes = [48, 16], strides = [1, 1]} : vector<48x192xf32> to vector<48x16xf32>
    %336 = vector.extract_strided_slice %282 {offsets = [0, 176], sizes = [48, 16], strides = [1, 1]} : vector<48x192xf32> to vector<48x16xf32>
    %cst_190 = arith.constant dense<0.000000e+00> : vector<48x48xf32>
    %337 = tpu.matmul %334, %335, %cst_190 {dimension_numbers = #tpu.dot_dimension_numbers<[1], [1], [0], [0], [0, 0, 1, 0], [], []>} : vector<48x16xf32>, vector<48x16xf32>, vector<48x48xf32> -> vector<48x48xf32>
    %cst_191 = arith.constant 2.500000e-01 : f32
    %338 = vector.broadcast %cst_191 : f32 to vector<48x48xf32>
    %339 = arith.mulf %337, %338 : vector<48x48xf32>
    %340 = arith.addf %339, %7 : vector<48x48xf32>
    %cst_192 = arith.constant dense<0xFF800000> : vector<48xf32>
    %341 = vector.multi_reduction <maximumf>, %340, %cst_192 [1] : vector<48x48xf32> to vector<48xf32>
    %342 = vector.shape_cast %341 : vector<48xf32> to vector<48x1xf32>
    %343 = vector.broadcast %342 : vector<48x1xf32> to vector<48x48xf32>
    %344 = arith.subf %340, %343 : vector<48x48xf32>
    %345 = math.exp %344 : vector<48x48xf32>
    %cst_193 = arith.constant dense<0.000000e+00> : vector<48xf32>
    %346 = vector.multi_reduction <add>, %345, %cst_193 [1] : vector<48x48xf32> to vector<48xf32>
    %347 = vector.shape_cast %346 : vector<48xf32> to vector<48x1xf32>
    %348 = vector.broadcast %347 : vector<48x1xf32> to vector<48x48xf32>
    %349 = arith.divf %345, %348 : vector<48x48xf32>
    %cst_194 = arith.constant dense<0.000000e+00> : vector<48x16xf32>
    %350 = tpu.matmul %349, %336, %cst_194 {dimension_numbers = #tpu.dot_dimension_numbers<[1], [0], [0], [1], [0, 0, 1, 1], [], []>} : vector<48x48xf32>, vector<48x16xf32>, vector<48x16xf32> -> vector<48x16xf32>
    %351 = tpu.concatenate %299, %316, %333, %350 in 1 : vector<48x16xf32>, vector<48x16xf32>, vector<48x16xf32>, vector<48x16xf32> -> vector<48x64xf32>
    %c0_195 = arith.constant 0 : index
    %c0_196 = arith.constant 0 : index
    %352 = vector.load %arg18[%c0_195, %c0_196] : memref<64x16xf32, #tpu.memory_space<vmem>>, vector<64x16xf32>
    %cst_197 = arith.constant dense<0.000000e+00> : vector<48x16xf32>
    %353 = tpu.matmul %351, %352, %cst_197 {dimension_numbers = #tpu.dot_dimension_numbers<[1], [0], [0], [1], [0, 0, 1, 1], [], []>} : vector<48x64xf32>, vector<64x16xf32>, vector<48x16xf32> -> vector<48x16xf32>
    %c0_198 = arith.constant 0 : index
    %c0_199 = arith.constant 0 : index
    %354 = vector.load %arg19[%c0_198, %c0_199] : memref<1x16xf32, #tpu.memory_space<vmem>>, vector<1x16xf32>
    %355 = vector.broadcast %354 : vector<1x16xf32> to vector<48x16xf32>
    %356 = arith.addf %353, %355 : vector<48x16xf32>
    %357 = arith.addf %277, %356 : vector<48x16xf32>
    %cst_200 = arith.constant dense<0.000000e+00> : vector<48xf32>
    %358 = vector.multi_reduction <add>, %357, %cst_200 [1] : vector<48x16xf32> to vector<48xf32>
    %359 = vector.shape_cast %358 : vector<48xf32> to vector<48x1xf32>
    %cst_201 = arith.constant 1.600000e+01 : f32
    %360 = vector.broadcast %cst_201 : f32 to vector<48x1xf32>
    %361 = arith.divf %359, %360 : vector<48x1xf32>
    %362 = vector.broadcast %361 : vector<48x1xf32> to vector<48x16xf32>
    %363 = arith.subf %357, %362 : vector<48x16xf32>
    %364 = arith.mulf %363, %363 : vector<48x16xf32>
    %cst_202 = arith.constant dense<0.000000e+00> : vector<48xf32>
    %365 = vector.multi_reduction <add>, %364, %cst_202 [1] : vector<48x16xf32> to vector<48xf32>
    %366 = vector.shape_cast %365 : vector<48xf32> to vector<48x1xf32>
    %cst_203 = arith.constant 1.600000e+01 : f32
    %367 = vector.broadcast %cst_203 : f32 to vector<48x1xf32>
    %368 = arith.divf %366, %367 : vector<48x1xf32>
    %cst_204 = arith.constant 9.99999974E-6 : f32
    %369 = vector.broadcast %cst_204 : f32 to vector<48x1xf32>
    %370 = arith.addf %368, %369 : vector<48x1xf32>
    %371 = math.rsqrt %370 : vector<48x1xf32>
    %372 = vector.broadcast %371 : vector<48x1xf32> to vector<48x16xf32>
    %373 = arith.mulf %363, %372 : vector<48x16xf32>
    %c0_205 = arith.constant 0 : index
    %c0_206 = arith.constant 0 : index
    %374 = vector.load %arg20[%c0_205, %c0_206] : memref<1x16xf32, #tpu.memory_space<vmem>>, vector<1x16xf32>
    %375 = vector.broadcast %374 : vector<1x16xf32> to vector<48x16xf32>
    %376 = arith.mulf %373, %375 : vector<48x16xf32>
    %c0_207 = arith.constant 0 : index
    %c0_208 = arith.constant 0 : index
    %377 = vector.load %arg21[%c0_207, %c0_208] : memref<1x16xf32, #tpu.memory_space<vmem>>, vector<1x16xf32>
    %378 = vector.broadcast %377 : vector<1x16xf32> to vector<48x16xf32>
    %379 = arith.addf %376, %378 : vector<48x16xf32>
    %cst_209 = arith.constant dense<0.000000e+00> : vector<48x384xf32>
    %380 = tpu.matmul %379, %8, %cst_209 {dimension_numbers = #tpu.dot_dimension_numbers<[1], [0], [0], [1], [0, 0, 1, 1], [], []>} : vector<48x16xf32>, vector<16x384xf32>, vector<48x384xf32> -> vector<48x384xf32>
    %381 = arith.mulf %380, %9 : vector<48x384xf32>
    %cst_210 = arith.constant dense<0.000000e+00> : vector<2x384xf32>
    %382 = tpu.matmul %10, %381, %cst_210 {dimension_numbers = #tpu.dot_dimension_numbers<[1], [0], [0], [1], [0, 0, 1, 1], [], []>} : vector<2x48xf32>, vector<48x384xf32>, vector<2x384xf32> -> vector<2x384xf32>
    %c0_211 = arith.constant 0 : index
    %c0_212 = arith.constant 0 : index
    %383 = vector.load %arg25[%c0_211, %c0_212] : memref<384x512xf32, #tpu.memory_space<vmem>>, vector<384x512xf32>
    %cst_213 = arith.constant dense<0.000000e+00> : vector<2x512xf32>
    %384 = tpu.matmul %382, %383, %cst_213 {dimension_numbers = #tpu.dot_dimension_numbers<[1], [0], [0], [1], [0, 0, 1, 1], [], []>} : vector<2x384xf32>, vector<384x512xf32>, vector<2x512xf32> -> vector<2x512xf32>
    %c0_214 = arith.constant 0 : index
    %c0_215 = arith.constant 0 : index
    %385 = vector.load %arg26[%c0_214, %c0_215] : memref<1x512xf32, #tpu.memory_space<vmem>>, vector<1x512xf32>
    %386 = vector.broadcast %385 : vector<1x512xf32> to vector<2x512xf32>
    %387 = arith.addf %384, %386 : vector<2x512xf32>
    %cst_216 = arith.constant 0.000000e+00 : f32
    %388 = vector.broadcast %cst_216 : f32 to vector<2x512xf32>
    %389 = arith.cmpf oge, %387, %388 : vector<2x512xf32>
    %cst_217 = arith.constant 0.00999999977 : f32
    %390 = vector.broadcast %cst_217 : f32 to vector<2x512xf32>
    %391 = arith.mulf %390, %387 : vector<2x512xf32>
    %392 = arith.select %389, %387, %391 : vector<2x512xi1>, vector<2x512xf32>
    %c0_218 = arith.constant 0 : index
    %c0_219 = arith.constant 0 : index
    %393 = vector.load %arg27[%c0_218, %c0_219] : memref<512x32xf32, #tpu.memory_space<vmem>>, vector<512x32xf32>
    %cst_220 = arith.constant dense<0.000000e+00> : vector<2x32xf32>
    %394 = tpu.matmul %392, %393, %cst_220 {dimension_numbers = #tpu.dot_dimension_numbers<[1], [0], [0], [1], [0, 0, 1, 1], [], []>} : vector<2x512xf32>, vector<512x32xf32>, vector<2x32xf32> -> vector<2x32xf32>
    %c0_221 = arith.constant 0 : index
    %c0_222 = arith.constant 0 : index
    %395 = vector.load %arg28[%c0_221, %c0_222] : memref<1x32xf32, #tpu.memory_space<vmem>>, vector<1x32xf32>
    %396 = vector.broadcast %395 : vector<1x32xf32> to vector<2x32xf32>
    %397 = arith.addf %394, %396 : vector<2x32xf32>
    %398 = vector.extract_strided_slice %397 {offsets = [0, 0], sizes = [2, 24], strides = [1, 1]} : vector<2x32xf32> to vector<2x24xf32>
    %399 = arith.subf %269, %398 : vector<2x24xf32>
    %400 = vector.extract_strided_slice %397 {offsets = [0, 24], sizes = [2, 8], strides = [1, 1]} : vector<2x32xf32> to vector<2x8xf32>
    %401 = arith.addf %181, %400 : vector<2x8xf32>
    %c0_223 = arith.constant 0 : index
    %c0_224 = arith.constant 0 : index
    %402 = vector.load %arg29[%c0_223, %c0_224] : memref<24x72xf32, #tpu.memory_space<vmem>>, vector<24x72xf32>
    %cst_225 = arith.constant dense<0.000000e+00> : vector<2x72xf32>
    %403 = tpu.matmul %399, %402, %cst_225 {dimension_numbers = #tpu.dot_dimension_numbers<[1], [0], [0], [1], [0, 0, 1, 1], [], []>} : vector<2x24xf32>, vector<24x72xf32>, vector<2x72xf32> -> vector<2x72xf32>
    %c0_226 = arith.constant 0 : index
    %c0_227 = arith.constant 0 : index
    %404 = vector.load %arg30[%c0_226, %c0_227] : memref<1x72xf32, #tpu.memory_space<vmem>>, vector<1x72xf32>
    %405 = vector.broadcast %404 : vector<1x72xf32> to vector<2x72xf32>
    %406 = arith.addf %403, %405 : vector<2x72xf32>
    %cst_228 = arith.constant 0.000000e+00 : f32
    %407 = vector.broadcast %cst_228 : f32 to vector<2x72xf32>
    %408 = arith.maximumf %406, %407 : vector<2x72xf32>
    %409 = vector.extract_strided_slice %408 {offsets = [0, 0], sizes = [2, 71], strides = [1, 1]} : vector<2x72xf32> to vector<2x71xf32>
    %410 = vector.extract_strided_slice %408 {offsets = [0, 1], sizes = [2, 71], strides = [1, 1]} : vector<2x72xf32> to vector<2x71xf32>
    %411 = arith.maximumf %409, %410 : vector<2x71xf32>
    %c0_229 = arith.constant 0 : index
    %c0_230 = arith.constant 0 : index
    %412 = vector.load %arg31[%c0_229, %c0_230] : memref<71x104xf32, #tpu.memory_space<vmem>>, vector<71x104xf32>
    %cst_231 = arith.constant dense<0.000000e+00> : vector<2x104xf32>
    %413 = tpu.matmul %411, %412, %cst_231 {dimension_numbers = #tpu.dot_dimension_numbers<[1], [0], [0], [1], [0, 0, 1, 1], [], []>} : vector<2x71xf32>, vector<71x104xf32>, vector<2x104xf32> -> vector<2x104xf32>
    %c0_232 = arith.constant 0 : index
    %c0_233 = arith.constant 0 : index
    %414 = vector.load %arg32[%c0_232, %c0_233] : memref<1x104xf32, #tpu.memory_space<vmem>>, vector<1x104xf32>
    %415 = vector.broadcast %414 : vector<1x104xf32> to vector<2x104xf32>
    %416 = arith.addf %413, %415 : vector<2x104xf32>
    %cst_234 = arith.constant 0.000000e+00 : f32
    %417 = vector.broadcast %cst_234 : f32 to vector<2x104xf32>
    %418 = arith.maximumf %416, %417 : vector<2x104xf32>
    %419 = vector.extract_strided_slice %418 {offsets = [0, 0], sizes = [2, 103], strides = [1, 1]} : vector<2x104xf32> to vector<2x103xf32>
    %420 = vector.extract_strided_slice %418 {offsets = [0, 1], sizes = [2, 103], strides = [1, 1]} : vector<2x104xf32> to vector<2x103xf32>
    %421 = arith.maximumf %419, %420 : vector<2x103xf32>
    %c0_235 = arith.constant 0 : index
    %c0_236 = arith.constant 0 : index
    %422 = vector.load %arg33[%c0_235, %c0_236] : memref<103x10xf32, #tpu.memory_space<vmem>>, vector<103x10xf32>
    %cst_237 = arith.constant dense<0.000000e+00> : vector<2x10xf32>
    %423 = tpu.matmul %421, %422, %cst_237 {dimension_numbers = #tpu.dot_dimension_numbers<[1], [0], [0], [1], [0, 0, 1, 1], [], []>} : vector<2x103xf32>, vector<103x10xf32>, vector<2x10xf32> -> vector<2x10xf32>
    %c0_238 = arith.constant 0 : index
    %c0_239 = arith.constant 0 : index
    %424 = vector.load %arg34[%c0_238, %c0_239] : memref<1x10xf32, #tpu.memory_space<vmem>>, vector<1x10xf32>
    %425 = vector.broadcast %424 : vector<1x10xf32> to vector<2x10xf32>
    %426 = arith.addf %423, %425 : vector<2x10xf32>
    %cst_240 = arith.constant 0.000000e+00 : f32
    %427 = vector.broadcast %cst_240 : f32 to vector<2x10xf32>
    %428 = arith.maximumf %426, %427 : vector<2x10xf32>
    %429 = vector.extract_strided_slice %428 {offsets = [0, 0], sizes = [2, 9], strides = [1, 1]} : vector<2x10xf32> to vector<2x9xf32>
    %430 = vector.extract_strided_slice %428 {offsets = [0, 1], sizes = [2, 9], strides = [1, 1]} : vector<2x10xf32> to vector<2x9xf32>
    %431 = arith.maximumf %429, %430 : vector<2x9xf32>
    %c0_241 = arith.constant 0 : index
    %c0_242 = arith.constant 0 : index
    %432 = vector.load %arg35[%c0_241, %c0_242] : memref<9x32xf32, #tpu.memory_space<vmem>>, vector<9x32xf32>
    %cst_243 = arith.constant dense<0.000000e+00> : vector<2x32xf32>
    %433 = tpu.matmul %431, %432, %cst_243 {dimension_numbers = #tpu.dot_dimension_numbers<[1], [0], [0], [1], [0, 0, 1, 1], [], []>} : vector<2x9xf32>, vector<9x32xf32>, vector<2x32xf32> -> vector<2x32xf32>
    %c0_244 = arith.constant 0 : index
    %c0_245 = arith.constant 0 : index
    %434 = vector.load %arg36[%c0_244, %c0_245] : memref<1x32xf32, #tpu.memory_space<vmem>>, vector<1x32xf32>
    %435 = vector.broadcast %434 : vector<1x32xf32> to vector<2x32xf32>
    %436 = arith.addf %433, %435 : vector<2x32xf32>
    %cst_246 = arith.constant 0.000000e+00 : f32
    %437 = vector.broadcast %cst_246 : f32 to vector<2x32xf32>
    %438 = arith.cmpf oge, %436, %437 : vector<2x32xf32>
    %cst_247 = arith.constant 0.00999999977 : f32
    %439 = vector.broadcast %cst_247 : f32 to vector<2x32xf32>
    %440 = arith.mulf %439, %436 : vector<2x32xf32>
    %441 = arith.select %438, %436, %440 : vector<2x32xi1>, vector<2x32xf32>
    %c0_248 = arith.constant 0 : index
    %c0_249 = arith.constant 0 : index
    %442 = vector.load %arg37[%c0_248, %c0_249] : memref<32x32xf32, #tpu.memory_space<vmem>>, vector<32x32xf32>
    %cst_250 = arith.constant dense<0.000000e+00> : vector<2x32xf32>
    %443 = tpu.matmul %441, %442, %cst_250 {dimension_numbers = #tpu.dot_dimension_numbers<[1], [0], [0], [1], [0, 0, 1, 1], [], []>} : vector<2x32xf32>, vector<32x32xf32>, vector<2x32xf32> -> vector<2x32xf32>
    %c0_251 = arith.constant 0 : index
    %c0_252 = arith.constant 0 : index
    %444 = vector.load %arg38[%c0_251, %c0_252] : memref<1x32xf32, #tpu.memory_space<vmem>>, vector<1x32xf32>
    %445 = vector.broadcast %444 : vector<1x32xf32> to vector<2x32xf32>
    %446 = arith.addf %443, %445 : vector<2x32xf32>
    %447 = vector.extract_strided_slice %446 {offsets = [0, 24], sizes = [2, 8], strides = [1, 1]} : vector<2x32xf32> to vector<2x8xf32>
    %448 = arith.addf %230, %447 : vector<2x8xf32>
    %449 = arith.addf %271, %401 : vector<2x8xf32>
    %450 = arith.addf %449, %448 : vector<2x8xf32>
    %451 = tpu.concatenate %450, %271, %401, %448 in 1 : vector<2x8xf32>, vector<2x8xf32>, vector<2x8xf32>, vector<2x8xf32> -> vector<2x32xf32>
    %c0_253 = arith.constant 0 : index
    %c0_254 = arith.constant 0 : index
    %452 = vector.load %arg39[%c0_253, %c0_254] : memref<2x32xf32, #tpu.memory_space<vmem>>, vector<2x32xf32>
    tpu.vector_store %arg39[%c0_253, %c0_254], %451 {strides = array<i32>} : memref<2x32xf32, #tpu.memory_space<vmem>>, vector<2x32xf32>,
    return
  }
}

</mosaic_0001>

<bundles_post_ra>
// kernel: ip2sdcd_forward.1
= control target key start
LH: loop header
LB: loop body
LE: loop exit
PB: predicated region body
PF: predicated region fallthrough
CT: control target
= control target key end

     0   :  { %s10138_s6 = smov 1   ;;  %s10139_s10 = smov 2   ;;  %s12484_s0 = inlined_call_operand.smem [shape: u32[40], index: -1, kind: input, shape index: {}] }
   0x1   :  { %s10199_s5 = sld [smem:[%s12484_s0]]   ;;  %s10140_s14 = smov 3  }
   0x2   :  { %s10204_s9 = sld [smem:[%s12484_s0 + %s10138_s6]]   ;;  %s10141_s18 = smov 4  }
   0x3   :  { %s10209_s13 = sld [smem:[%s12484_s0 + %s10139_s10]]   ;;  %s10142_s22 = smov 5  }
   0x4   :  { %s10214_s17 = sld [smem:[%s12484_s0 + %s10140_s14]]   ;;  %s10143_s26 = smov 6  }
   0x5   :  { %s10219_s21 = sld [smem:[%s12484_s0 + %s10141_s18]]   ;;  %s10144_s30 = smov 7  }
   0x6   :  { %s10224_s25 = sld [smem:[%s12484_s0 + %s10142_s22]]   ;;  %s10145_s4 = smov 8  }
   0x7   :  { %s10229_s29 = sld [smem:[%s12484_s0 + %s10143_s26]]   ;;  %s10146_s10 = smov 9  }
   0x8   :  { %s10234_s3 = sld [smem:[%s12484_s0 + %s10144_s30]]   ;;  %s10147_s15 = smov 10  }
   0x9   :  { %s10239_s8 = sld [smem:[%s12484_s0 + %s10145_s4]]   ;;  %s10148_s20 = smov 11  }
   0xa   :  { %s10244_s14 = sld [smem:[%s12484_s0 + %s10146_s10]]   ;;  %s10149_s26 = smov 12  }
   0xb   :  { %s10249_s19 = sld [smem:[%s12484_s0 + %s10147_s15]]   ;;  %s10150_s1 = smov 13  }
   0xc   :  { %s10254_s24 = sld [smem:[%s12484_s0 + %s10148_s20]]   ;;  %s10151_s7 = smov 14  }
   0xd   :  { %s10259_s30 = sld [smem:[%s12484_s0 + %s10149_s26]]   ;;  %s10152_s15 = smov 15  }
   0xe   :  { %s10264_s6 = sld [smem:[%s12484_s0 + %s10150_s1]]   ;;  %s10153_s22 = smov 16  }
   0xf   :  { %s10269_s12 = sld [smem:[%s12484_s0 + %s10151_s7]]   ;;  %s10154_s28 = smov 17  }
  0x10   :  { %s10274_s20 = sld [smem:[%s12484_s0 + %s10152_s15]]   ;;  %s10155_s7 = smov 18  }
  0x11   :  { %s10279_s27 = sld [smem:[%s12484_s0 + %s10153_s22]]   ;;  %s10156_s15 = smov 19  }
  0x12   :  { %s10284_s4 = sld [smem:[%s12484_s0 + %s10154_s28]]   ;;  %s10157_s22 = smov 20  }
  0x13   :  { %12532 = sst [smem:[#allocation5_spill]] %s10259_s30  ;;  %s10158_s28 = smov 21  }
  0x14   :  { %s10289_s30 = sld [smem:[%s12484_s0 + %s10155_s7]]   ;;  %s10159_s7 = smov 22  }
  0x15   :  { %12533 = sst [smem:[#allocation6_spill]] %s10269_s12 }
  0x16   :  { %12534 = sst [smem:[#allocation7_spill]] %s10274_s20 }
  0x17   :  { %12535 = sst [smem:[#allocation8_spill]] %s10279_s27 }
  0x18   :  { %12536 = sst [smem:[#allocation9_spill]] %s10284_s4 }
  0x19   :  { %s10294_s20 = sld [smem:[%s12484_s0 + %s10156_s15]]   ;;  %s10160_s15 = smov 23  }
  0x1a   :  { %12537 = sst [smem:[#allocation10_spill]] %s10289_s30 }
  0x1b   :  { %s10299_s12 = sld [smem:[%s12484_s0 + %s10157_s22]]   ;;  %s10161_s22 = smov 24  }
  0x1c   :  { %s10304_s4 = sld [smem:[%s12484_s0 + %s10158_s28]]   ;;  %s10162_s28 = smov 25  }
  0x1d   :  { %s10309_s30 = sld [smem:[%s12484_s0 + %s10159_s7]]   ;;  %s10163_s7 = smov 26  }
  0x1f   :  { %12538 = sst [smem:[#allocation11_spill]] %s10294_s20 }
  0x20   :  { %s10314_s20 = sld [smem:[%s12484_s0 + %s10160_s15]]   ;;  %s10164_s15 = smov 27  }
  0x21   :  { %12539 = sst [smem:[#allocation12_spill]] %s10299_s12 }
  0x22   :  { %12540 = sst [smem:[#allocation13_spill]] %s10304_s4 }
  0x23   :  { %12541 = sst [smem:[#allocation14_spill]] %s10309_s30 }
  0x24   :  { %s10319_s12 = sld [smem:[%s12484_s0 + %s10161_s22]]   ;;  %s10165_s22 = smov 28  }
  0x25   :  { %s10324_s4 = sld [smem:[%s12484_s0 + %s10162_s28]]   ;;  %s10166_s28 = smov 29  }
  0x26   :  { %12542 = sst [smem:[#allocation15_spill]] %s10314_s20 }
  0x27   :  { %s10329_s30 = sld [smem:[%s12484_s0 + %s10163_s7]]   ;;  %s10167_s7 = smov 30  }
  0x28   :  { %s10334_s20 = sld [smem:[%s12484_s0 + %s10164_s15]]   ;;  %s10168_s15 = smov 31  }
  0x29   :  { %s10344_s27 = sld [smem:[%s12484_s0 + %s10166_s28]]   ;;  %s10170_s28 = smov 33  }
  0x2a   :  { %12543 = sst [smem:[#allocation16_spill]] %s10319_s12 }
  0x2b   :  { %s10339_s12 = sld [smem:[%s12484_s0 + %s10165_s22]]   ;;  %s10169_s22 = smov 32  }
  0x2d   :  { %12544 = sst [smem:[#allocation17_spill]] %s10329_s30 }
  0x2e   :  { %12545 = sst [smem:[#allocation18_spill]] %s10334_s20 }
  0x2f   :  { %12547 = sst [smem:[#allocation20_spill]] %s10344_s27 }
  0x30   :  { %s10349_s30 = sld [smem:[%s12484_s0 + %s10167_s7]]   ;;  %s10171_s7 = smov 34  }
  0x31   :  { %12546 = sst [smem:[#allocation19_spill]] %s10339_s12 }
  0x32   :  { %s10354_s20 = sld [smem:[%s12484_s0 + %s10168_s15]]   ;;  %s10172_s15 = smov 35  }
  0x33   :  { %s10359_s12 = sld [smem:[%s12484_s0 + %s10169_s22]]   ;;  %s10173_s22 = smov 36  }
  0x34   :  { %s10364_s27 = sld [smem:[%s12484_s0 + %s10170_s28]]   ;;  %s10174_s28 = smov 37  }
  0x36   :  { %12548 = sst [smem:[#allocation21_spill]] %s10349_s30 }
  0x37   :  { %s10369_s30 = sld [smem:[%s12484_s0 + %s10171_s7]]   ;;  %s10175_s7 = smov 38  }
  0x38   :  { %12549 = sst [smem:[#allocation22_spill]] %s10354_s20 }
  0x39   :  { %12550 = sst [smem:[#allocation23_spill]] %s10359_s12 }
  0x3a   :  { %12551 = sst [smem:[#allocation24_spill]] %s10364_s27 }
  0x3b   :  { %s10374_s20 = sld [smem:[%s12484_s0 + %s10172_s15]]   ;;  %s10176_s15 = smov 39  }
  0x3c   :  { %s10379_s12 = sld [smem:[%s12484_s0 + %s10173_s22]]  }
  0x3d   :  { %12552 = sst [smem:[#allocation25_spill]] %s10369_s30 }
  0x3e   :  { %s10384_s27 = sld [smem:[%s12484_s0 + %s10174_s28]]  }
  0x3f   :  { %s10389_s30 = sld [smem:[%s12484_s0 + %s10175_s7]]  }
  0x41   :  { %12553 = sst [smem:[#allocation26_spill]] %s10374_s20 }
  0x42   :  { %s10394_s20 = sld [smem:[%s12484_s0 + %s10176_s15]]  }
  0x48   :  { %12554 = sst [smem:[#allocation27_spill]] %s10394_s20 }
  0x49   :  { %84 = vsyncpa [#allocation3], 0  ;;  %s10177_s22 = smov [#allocation2]  }
  0x4a   :  { %s140_s23 = sshll.u32 %s10177_s22, 4  ;;  %s141_s23 = int_to_ptr.vmem [resolvable:$true] %s140_s23 }
  0x4b   :  { %s10124_s26 = scalar_lea.vmem %s141_s23, 24576  ;;  %p10129_p1 = scmp.lt.s32.totalorder %s141_s23, %s141_s23 }
  0x4c   :  { %p10125_p0 = scmp.ne.s32.totalorder %s141_s23, %s10124_s26  ;;  %p10130_p2 = scmp.lt.s32.totalorder %s10124_s26, %s10124_s26 }
  0x4e   :  { %p10131_p3 = por %p10130_p2, %p10129_p1 }
  0x50   :  { %p10132_p4 = pnand %p10131_p3, %p10125_p0 }
  0x52   :  { %10135 = shalt.err (!%p10132_p4)
}
  0x53   :  { %s10178_s28 = smov 512   ;;  %s12515_s1 = smov 32  }
  0x54   :  { %146 = dma.hbm_to_vmem [thread:$0]  %s10324_s4, 24576, %s141_s23, [#allocation3], %s10178_s28, %s10178_s28, %s12515_s1  }
  0x55   :  { %10136 = dma.done.wait [#allocation3], 24576  }
  0x56   :  { %10137 = vsyncadd [#allocation3], 4294942720  ;;  %v12507_v0 = vmov 0.0   ;;  %vm10181_vm0 = vmmov 0   ;;  %v228_v1 = vld [vmem:[%s10204_s9 + $0x10] sm:$0xff]  ;;  %v227_v2 = vld [vmem:[%s10204_s9 + $0x8] sm:$0xff] }
  0x57   :  { %8726 = vmatprep.subr.mxu0 %v12507_v0  ;;  %8732 = vmatprep.mubr.msk.f32.mxu0 %vm10181_vm0, %v12507_v0  ;;  %v314_v3 = vld [vmem:[%s10214_s17 + $0x18] sm:$0xff]  ;;  %v226_v4 = vld [vmem:[%s10204_s9] sm:$0xff]  ;;  %vm236_vm1 = vcmask 195584   ;;  %v313_v6 = vld [vmem:[%s10214_s17 + $0x10] sm:$0xff]  ;;  %vm322_vm2 = vcmask 261120   ;;  %vm654_vm3 = vcmask 130048  }
  0x58   :  { %8735 = vmatprep.subr.mxu1 %v12507_v0  ;;  %8743 = vmatprep.mubr.msk.f32.mxu1 %vm10181_vm0, %v12507_v0  ;;  %v10410_v5 = vld [vmem:[%s10199_s5] sm:$0x3]  ;;  %v312_v7 = vld [vmem:[%s10214_s17 + $0x8] sm:$0xff]  ;;  %v400_v9 = vld [vmem:[%s10224_s25 + $0x18] sm:$0xff]  ;;  %vm730_vm4 = vcmask 15360   ;;  %s12556_s0 = sld [smem:[#allocation8_spill]] }
  0x59   :  { %8727 = vmatpush3.msra.mxu0 %v228_v1  ;;  %8736 = vmatpush3.msra.mxu1 %v314_v3  ;;  %v311_v8 = vld [vmem:[%s10214_s17] sm:$0xff]  ;;  %v399_v15 = vld [vmem:[%s10224_s25 + $0x10] sm:$0xff]  ;;  %v398_v16 = vld [vmem:[%s10224_s25 + $0x8] sm:$0xff]  ;;  %vm749_vm5 = vcmask 1041408   ;;  %s12557_s5 = sld [smem:[#allocation6_spill]]  ;;  %s12521_s7 = smov 64  }
  0x5a   :  { %8728 = vmatprep.subr.mxu0 %v12507_v0  ;;  %8737 = vmatprep.subr.mxu1 %v12507_v0  ;;  %v7944_v10 = vld [vmem:[%s10209_s13] ss:$0 sm:$0xff]  ;;  %v485_v18 = vld [vmem:[%s10234_s3 + $0x18] sm:$0xff]  ;;  %v484_v24 = vld [vmem:[%s10234_s3 + $0x10] sm:$0xff]  ;;  %s12558_s4 = sld [smem:[#allocation5_spill]]  ;;  %s12519_s10 = smov 48  }
  0x5b   :  { %8729 = vmatpush3.msra.mxu0 %v227_v2  ;;  %8738 = vmatpush3.msra.mxu1 %v313_v6  ;;  %v397_v17 = vld [vmem:[%s10224_s25] sm:$0xff]  ;;  %v483_v25 = vld [vmem:[%s10234_s3 + $0x8] sm:$0xff]  ;;  %v570_v27 = vld [vmem:[%s10244_s14 + $0x18] sm:$0xff]  ;;  %s12559_s2 = sld [smem:[#allocation9_spill]]  ;;  %s12517_s11 = smov 112   ;;  %vm1162_vm6 = vcmask 392192  }
  0x5c   :  { %8730 = vmatprep.subr.mxu0 %v12507_v0  ;;  %8739 = vmatprep.subr.mxu1 %v12507_v0  ;;  %v7946_v19 = vld [vmem:[%s10219_s21] ss:$0 sm:$0xff]  ;;  %v569_v33 = vld [vmem:[%s10244_s14 + $0x10] sm:$0xff]  ;;  %v568_v34 = vld [vmem:[%s10244_s14 + $0x8] sm:$0xff]  ;;  %s12560_s15 = sld [smem:[#allocation7_spill]]  ;;  %s12513_s16 = smov 96  }
  0x5d   :  { %8731 = vmatpush3.msra.mxu0 %v226_v4  ;;  %8740 = vmatpush3.msra.mxu1 %v312_v7  ;;  %v482_v26 = vld [vmem:[%s10234_s3] sm:$0xff]  ;;  %v653_v41 = vld [vmem:[%s10254_s24 + $0x8] sm:$0xff]  ;;  %v185_v53 = vld [vmem:[%s10264_s6 + $0x10] sm:$0xff]  ;;  %s12511_s18 = smov 16   ;;  %s12509_s22 = smov 80   ;;  %vm2509_vm7 = vcmask 523264  }
  0x5e   :  { %8733 = vmatmul.mubr.msk.f32.vlgmr.msra.gmra.mxu0 %vm236_vm1, %v10410_v5  ;;  %8746 = vmatprep.subr.mxu0 %v12507_v0  ;;  %v7948_v28 = vld [vmem:[%s10229_s29] ss:$0 sm:$0xff]  ;;  %v184_v52 = vld [vmem:[%s10264_s6 + $0x8] sm:$0xff]  ;;  %v186_v54 = vld [vmem:[%s10264_s6 + $0x18] sm:$0xff]  ;;  %s12562_s23 = sld [smem:[#allocation10_spill]]  ;;  %vm3942_vm12 = vcmask 1046528  }
  0x5f   :  { %8754 = vmatprep.mubr.msk.f32.mxu0 %vm10181_vm0, %v12507_v0  ;;  %8741 = vmatprep.subr.mxu1 %v12507_v0  ;;  %v567_v35 = vld [vmem:[%s10244_s14] sm:$0xff]  ;;  %v188_v56 = vld [vmem:[%s10264_s6 + $0x28] sm:$0xff]  ;;  %v881_v57 = vld [vmem:[%s12556_s0 + $0x18] sm:$0xff]  ;;  %s12563_s26 = sld [smem:[#allocation11_spill]]  ;;  %vm3938_vm13 = vcmask 580608   ;;  %vm4042_vm14 = vcmask 842752  }
  0x60   :  { %8742 = vmatpush3.msra.mxu1 %v311_v8  ;;  %8747 = vmatpush3.msra.mxu0 %v400_v9  ;;  %v7950_v36 = vld [vmem:[%s10239_s8] ss:$0 sm:$0xff]  ;;  %v880_v58 = vld [vmem:[%s12556_s0 + $0x10] sm:$0xff]  ;;  %v190_v61 = vld [vmem:[%s12557_s5 + $0x8] sm:$0xff]  ;;  %s12564_s28 = sld [smem:[#allocation14_spill]]  ;;  %vm4138_vm15 = vcmask 1040384  }
  0x61   :  { %8757 = vmatprep.subr.mxu1 %v12507_v0  ;;  %8748 = vmatprep.subr.mxu0 %v12507_v0  ;;  %v652_v42 = vld [vmem:[%s10254_s24] sm:$0xff]  ;;  %v191_v2 = vld [vmem:[%s12557_s5 + $0x10] sm:$0xff]  ;;  %v194_v8 = vld [vmem:[%s12557_s5 + $0x28] sm:$0xff]  ;;  %s12577_s20 = sld [smem:[#allocation21_spill]] }
  0x62   :  { %8749 = vmatpush3.msra.mxu0 %v399_v15  ;;  %v7952_v43 = vld [vmem:[%s10249_s19] ss:$0 sm:$0xff] }
  0x63   :  { %8750 = vmatprep.subr.mxu0 %v12507_v0  ;;  %v183_v48 = vld [vmem:[%s10264_s6] sm:$0xff] }
  0x64   :  { %8751 = vmatpush3.msra.mxu0 %v398_v16  ;;  %v187_v55 = vld [vmem:[%s10264_s6 + $0x20] sm:$0xff] }
  0x65   :  { %8752 = vmatprep.subr.mxu0 %v12507_v0  ;;  %v189_v60 = vld [vmem:[%s12557_s5] sm:$0xff] }
  0x66   :  { %8753 = vmatpush3.msra.mxu0 %v397_v17 }
  0x67   :  { %8768 = vmatprep.subr.mxu0 %v12507_v0 }
 0x11e   :  { %v306_v11 = vpop.f32.mrf.mxu0 }
 0x11f   :  { %v307_v12 = vadd.f32 %v7944_v10, %v306_v11  ;;  %v193_v10 = vld [vmem:[%s12557_s5 + $0x20] sm:$0xff] }
 0x120   :  { %v8734_v13 = vpop.f32.mrf.mxu0 }
 0x121   :  { %v310_v14 = vmax.f32 %v307_v12, 0.0 }
 0x123   :  { %8744 = vmatmul.mubr.msk.f32.vlgmr.msra.gmra.mxu1 %vm322_vm2, %v310_v14 }
 0x124   :  { %8765 = vmatprep.mubr.msk.f32.mxu1 %vm10181_vm0, %v12507_v0  ;;  %8758 = vmatpush3.msra.mxu1 %v485_v18 }
 0x125   :  { %8759 = vmatprep.subr.mxu1 %v12507_v0 }
 0x126   :  { %8760 = vmatpush3.msra.mxu1 %v484_v24 }
 0x127   :  { %8761 = vmatprep.subr.mxu1 %v12507_v0 }
 0x128   :  { %8762 = vmatpush3.msra.mxu1 %v483_v25  ;;  %v178_v25 = vld [vmem:[%s12558_s4 + $0x8] sm:$0xff] }
 0x129   :  { %8763 = vmatprep.subr.mxu1 %v12507_v0 }
 0x12a   :  { %8764 = vmatpush3.msra.mxu1 %v482_v26 }
 0x12b   :  { %8779 = vmatprep.subr.mxu1 %v12507_v0 }
 0x1e3   :  { %v392_v20 = vpop.f32.mrf.mxu1 }
 0x1e4   :  { %v393_v21 = vadd.f32 %v7946_v19, %v392_v20  ;;  %v879_v20 = vld [vmem:[%s12556_s0 + $0x8] sm:$0xff] }
 0x1e5   :  { %v8745_v22 = vpop.f32.mrf.mxu1 }
 0x1e6   :  { %v396_v23 = vmax.f32 %v393_v21, 0.0  ;;  %v878_v21 = vld [vmem:[%s12556_s0] sm:$0xff] }
 0x1e7   :  { %v177_v22 = vld [vmem:[%s12558_s4] sm:$0xff] }
 0x1e8   :  { %8755 = vmatmul.mubr.msk.f32.vlgmr.msra.gmra.mxu0 %vm322_vm2, %v396_v23 }
 0x1e9   :  { %8776 = vmatprep.mubr.msk.f32.mxu0 %vm10181_vm0, %v12507_v0  ;;  %8769 = vmatpush3.msra.mxu0 %v570_v27 }
 0x1ea   :  { %8770 = vmatprep.subr.mxu0 %v12507_v0 }
 0x1eb   :  { %8771 = vmatpush3.msra.mxu0 %v569_v33 }
 0x1ec   :  { %8772 = vmatprep.subr.mxu0 %v12507_v0 }
 0x1ed   :  { %8773 = vmatpush3.msra.mxu0 %v568_v34  ;;  %v181_v34 = vld [vmem:[%s12558_s4 + $0x20] sm:$0xff] }
 0x1ee   :  { %8774 = vmatprep.subr.mxu0 %v12507_v0 }
 0x1ef   :  { %8775 = vmatpush3.msra.mxu0 %v567_v35 }
 0x1f0   :  { %940 = vmatprep.subr.mxu0 %v881_v57 }
 0x2a8   :  { %v477_v29 = vpop.f32.mrf.mxu0 }
 0x2a9   :  { %v478_v30 = vadd.f32 %v7948_v28, %v477_v29  ;;  %v179_v29 = vld [vmem:[%s12558_s4 + $0x10] sm:$0xff] }
 0x2aa   :  { %v8756_v31 = vpop.f32.mrf.mxu0 }
 0x2ab   :  { %v481_v32 = vmax.f32 %v478_v30, 0.0  ;;  %v180_v31 = vld [vmem:[%s12558_s4 + $0x18] sm:$0xff] }
 0x2ad   :  { %8766 = vmatmul.mubr.msk.f32.vlgmr.msra.gmra.mxu1 %vm322_vm2, %v481_v32 }
 0x2ae   :  { %8783 = vmatprep.mubr.msk.f32.mxu1 %vm10181_vm0, %v12507_v0  ;;  %8780 = vmatpush3.msra.mxu1 %v653_v41 }
 0x2af   :  { %8781 = vmatprep.subr.mxu1 %v12507_v0 }
 0x2b0   :  { %8782 = vmatpush3.msra.mxu1 %v652_v42 }
 0x36d   :  { %v562_v37 = vpop.f32.mrf.mxu1 }
 0x36e   :  { %v563_v38 = vadd.f32 %v7950_v36, %v562_v37  ;;  %v182_v37 = vld [vmem:[%s12558_s4 + $0x28] sm:$0xff] }
 0x36f   :  { %v8767_v39 = vpop.f32.mrf.mxu1 }
 0x370   :  { %v566_v40 = vmax.f32 %v563_v38, 0.0 }
 0x372   :  { %8777 = vmatmul.mubr.msk.f32.vlgmr.msra.gmra.mxu0 %vm322_vm2, %v566_v40  ;;  %v884_v40 = vlaneseq }
 0x373   :  { %976 = vmatprep.mubr.f32.mxu0 %v12507_v0  ;;  %941 = vmatpush1.msra.mxu0 %v880_v58 }
 0x374   :  { %942 = vmatprep.subr.mxu0 %v879_v20  ;;  %v10541_v41 = vshrl.u32 %v884_v40, 7 }
 0x375   :  { %943 = vmatpush1.msra.mxu0 %v878_v21 }
 0x376   :  { %v12506_v42 = vsub.s32 0, %v10541_v41  ;;  %v12505_v57 = vsub.s32 1, %v10541_v41 }
 0x432   :  { %v647_v44 = vpop.f32.mrf.mxu0 }
 0x433   :  { %v648_v45 = vadd.f32 %v7952_v43, %v647_v44  ;;  %v882_v43 = vld [vmem:[%s12559_s2] sm:$0x3]  ;;  %s12565_s2 = sld [smem:[#allocation12_spill]] }
 0x434   :  { %v8778_v46 = vpop.f32.mrf.mxu0  ;;  %v10547_v44 = vrot.slane %v882_v43, %v12506_v42 }
 0x435   :  { %v651_v47 = vmax.f32 %v648_v45, 0.0 }
 0x437   :  { %8784 = vmatmul.mubr.msk.f32.vlgmr.msra.gmra.mxu1 %vm654_vm3, %v651_v47 }
 0x438   :  { %8788 = vmatprep.mubr.msk.f32.mxu1 %vm730_vm4, %v183_v48 }
 0x4f7   :  { %v10470_v49 = vpop.f32.mrf.mxu1 }
 0x4f8   :  { %12555 = vst [vmem:[#allocation28_spill] sm:$0xff] %v10470_v49  ;;  %v10474_v50 = vsub.f32 %v10410_v5, %v10470_v49  ;;  %v192_v5 = vld [vmem:[%s12557_s5 + $0x18] sm:$0xff] }
 0x4f9   :  { %v8785_v51 = vpop.f32.mrf.mxu1 }
 0x4fa   :  { %8786 = vmatprep.subr.msk.mxu1 %vm749_vm5, %v10474_v50 }
 0x4fb   :  { %8787 = vmatpush3.msk.msra.mxu1 %vm749_vm5, %v10474_v50 }
 0x4fc   :  { %8789 = vmatmul.mubr.msk.f32.vlgmr.msra.gmra.mxu1 %vm730_vm4, %v184_v52 }
 0x4fd   :  { %8791 = vmatprep.mubr.msk.f32.mxu1 %vm730_vm4, %v185_v53 }
 0x500   :  { %8792 = vmatmul.mubr.msk.f32.gmra.mxu1 %vm730_vm4, %v186_v54 }
 0x501   :  { %8794 = vmatprep.mubr.msk.f32.mxu1 %vm730_vm4, %v187_v55 }
 0x504   :  { %8795 = vmatmul.mubr.msk.f32.gmra.mxu1 %vm730_vm4, %v188_v56 }
 0x5bc   :  { %v8790_v59 = vpop.f32.mrf.mxu1 }
 0x5bd   :  { %v849_v3 = vmul.f32 %v8790_v59, %v190_v61  ;;  %v10562_v61 = vrot.slane %v882_v43, %v12505_v57  ;;  %v10707_v43 = vld [vmem:[%s12560_s15] sm:$0xff] }
 0x5be   :  { %v819_v62 = vpop.f32.mrf.mxu1 }
 0x5bf   :  { %v848_v63 = vmul.f32 %v819_v62, %v189_v60  ;;  %v857_v12 = vsel %vm236_vm1, %v849_v3, 0.0 }
 0x5c0   :  { %v8793_v1 = vpop.f32.mrf.mxu1 }
 0x5c1   :  { %v854_v4 = vsel %vm236_vm1, %v848_v63, 0.0  ;;  %v851_v11 = vmul.f32 %v8793_v1, %v192_v5 }
 0x5c2   :  { %855 = vadd.xlane.f32.xlu0 %v854_v4  ;;  %v829_v6 = vpop.f32.mrf.mxu1 }
 0x5c3   :  { %v850_v7 = vmul.f32 %v829_v6, %v191_v2  ;;  %v863_v17 = vsel %vm236_vm1, %v851_v11, 0.0 }
 0x5c4   :  { %v8796_v9 = vpop.f32.mrf.mxu1 }
 0x5c5   :  { %v860_v13 = vsel %vm236_vm1, %v850_v7, 0.0  ;;  %v853_v15 = vmul.f32 %v8796_v9, %v194_v8 }
 0x5c6   :  { %858 = vadd.xlane.f32.xlu0 %v857_v12  ;;  %861 = vadd.xlane.f32.xlu1 %v860_v13  ;;  %v839_v14 = vpop.f32.mrf.mxu1 }
 0x5c7   :  { %v852_v16 = vmul.f32 %v839_v14, %v193_v10  ;;  %v869_v19 = vsel %vm236_vm1, %v853_v15, 0.0 }
 0x5c9   :  { %v866_v18 = vsel %vm236_vm1, %v852_v16, 0.0 }
 0x5ca   :  { %864 = vadd.xlane.f32.xlu1 %v863_v17  ;;  %867 = vadd.xlane.f32.xlu0 %v866_v18 }
 0x5ce   :  { %870 = vadd.xlane.f32.xlu1 %v869_v19 }
 0x64b   :  { %v856_v23 = vpop.xlane.xlu0 %855 }
 0x64c   :  { %v10507_v24 = vadd.f32 %v856_v23, %v177_v22 }
 0x64e   :  { %7962 = vmatmul.mubr.msk.f32.vlgmr.msra.gmra.mxu0 %vm654_vm3, %v10507_v24 }
 0x64f   :  { %v859_v26 = vpop.xlane.xlu0 %858  ;;  %v862_v27 = vpop.xlane.xlu1 %861  ;;  %982 = vmatprep.mubr.f32.mxu0 %v12507_v0 }
 0x650   :  { %v10513_v28 = vadd.f32 %v859_v26, %v178_v25  ;;  %v10519_v30 = vadd.f32 %v862_v27, %v179_v29 }
 0x652   :  { %7963 = vmatmul.mubr.msk.f32.gmra.mxu0 %vm654_vm3, %v10513_v28 }
 0x653   :  { %988 = vmatprep.mubr.f32.mxu0 %v12507_v0  ;;  %v865_v32 = vpop.xlane.xlu1 %864  ;;  %v868_v35 = vpop.xlane.xlu0 %867 }
 0x654   :  { %v10525_v33 = vadd.f32 %v865_v32, %v180_v31  ;;  %v10531_v36 = vadd.f32 %v868_v35, %v181_v34 }
 0x656   :  { %7964 = vmatmul.mubr.msk.f32.gmra.mxu0 %vm654_vm3, %v10519_v30 }
 0x657   :  { %994 = vmatprep.mubr.f32.mxu0 %v12507_v0  ;;  %v871_v38 = vpop.xlane.xlu1 %870 }
 0x658   :  { %v10537_v39 = vadd.f32 %v871_v38, %v182_v37  ;;  %v10704_v37 = vld [vmem:[%s12560_s15 + $0x8] sm:$0xff] }
 0x65a   :  { %7965 = vmatmul.mubr.msk.f32.gmra.mxu0 %vm654_vm3, %v10525_v33 }
 0x65b   :  { %1000 = vmatprep.mubr.f32.mxu0 %v12507_v0 }
 0x65e   :  { %7966 = vmatmul.mubr.msk.f32.gmra.mxu0 %vm654_vm3, %v10531_v36 }
 0x65f   :  { %1006 = vmatprep.mubr.f32.mxu0 %v12507_v0 }
 0x662   :  { %7967 = vmatmul.mubr.msk.f32.gmra.mxu0 %vm654_vm3, %v10537_v39 }
 0x70e   :  { %v978_v45 = vpop.f32.mrf.mxu0 }
 0x70f   :  { %v10550_v46 = vadd.f32 %v978_v45, %v10547_v44 }
 0x710   :  { %v980_v47 = vpop.f32.mrf.mxu0 }
 0x711   :  { %8809 = vmatprep.mubr.msk.f32.mxu1 %vm654_vm3, %v10550_v46  ;;  %v10612_v9 = vadd.f32 %v980_v47, %v10562_v61 }
 0x712   :  { %v984_v48 = vpop.f32.mrf.mxu0 }
 0x713   :  { %v10585_v5 = vadd.f32 %v984_v48, %v10547_v44 }
 0x714   :  { %v986_v51 = vpop.f32.mrf.mxu0 }
 0x715   :  { %v10603_v8 = vadd.f32 %v986_v51, %v10562_v61  ;;  %v10713_v51 = vld [vmem:[%s12560_s15 + $0x18] sm:$0xff] }
 0x716   :  { %v990_v52 = vpop.f32.mrf.mxu0 }
 0x717   :  { %v10578_v3 = vadd.f32 %v990_v52, %v10547_v44 }
 0x718   :  { %v992_v53 = vpop.f32.mrf.mxu0 }
 0x719   :  { %v10598_v7 = vadd.f32 %v992_v53, %v10562_v61 }
 0x71a   :  { %v996_v54 = vpop.f32.mrf.mxu0 }
 0x71b   :  { %v10565_v62 = vadd.f32 %v996_v54, %v10547_v44 }
 0x71c   :  { %v998_v55 = vpop.f32.mrf.mxu0 }
 0x71d   :  { %v10589_v6 = vadd.f32 %v998_v55, %v10562_v61 }
 0x71e   :  { %v1002_v56 = vpop.f32.mrf.mxu0 }
 0x71f   :  { %v10556_v58 = vadd.f32 %v1002_v56, %v10547_v44 }
 0x720   :  { %v1004_v59 = vpop.f32.mrf.mxu0 }
 0x721   :  { %1027 = vrot.lane.b32.xlu1 %v10556_v58, %s12521_s7  ;;  %v10581_v4 = vadd.f32 %v1004_v59, %v10562_v61 }
 0x722   :  { %v1008_v60 = vpop.f32.mrf.mxu0 }
 0x723   :  { %v10568_v63 = vadd.f32 %v1008_v60, %v10547_v44 }
 0x724   :  { %v1010_v1 = vpop.f32.mrf.mxu0 }
 0x725   :  { %v10571_v2 = vadd.f32 %v1010_v1, %v10562_v61  ;;  %1029 = vrot.lane.b32.xlu0 %v10568_v63, %s12521_s7  ;;  %1025 = vrot.lane.b32.xlu1 %v10565_v62, %s12521_s7 }
 0x727   :  { %8818 = vmatprep.subr.mxu0 %v10571_v2 }
 0x728   :  { %8819 = vmatpush3.msra.mxu0 %v10571_v2 }
 0x729   :  { %8820 = vmatprep.subr.mxu0 %v10581_v4  ;;  %1023 = vrot.lane.b32.xlu1 %v10578_v3, %s12521_s7 }
 0x72a   :  { %1021 = vrot.lane.b32.xlu0 %v10585_v5, %s12521_s7  ;;  %8821 = vmatpush3.msra.mxu0 %v10581_v4 }
 0x72b   :  { %8822 = vmatprep.subr.mxu0 %v10589_v6 }
 0x72c   :  { %8823 = vmatpush3.msra.mxu0 %v10589_v6 }
 0x72d   :  { %8824 = vmatprep.subr.mxu0 %v10598_v7  ;;  %1019 = vrot.lane.b32.xlu1 %v10550_v46, %s12521_s7  ;;  %s12575_s7 = sld [smem:[#allocation22_spill]] }
 0x72e   :  { %1364 = vrot.lane.b32.xlu0 %v10568_v63, %s12519_s10  ;;  %8825 = vmatpush3.msra.mxu0 %v10598_v7 }
 0x72f   :  { %8826 = vmatprep.subr.mxu0 %v10603_v8 }
 0x730   :  { %8827 = vmatpush3.msra.mxu0 %v10603_v8 }
 0x731   :  { %8828 = vmatprep.subr.mxu0 %v10612_v9  ;;  %1362 = vrot.lane.b32.xlu1 %v10556_v58, %s12519_s10 }
 0x732   :  { %1360 = vrot.lane.b32.xlu0 %v10565_v62, %s12519_s10  ;;  %8829 = vmatpush3.msra.mxu0 %v10612_v9 }
 0x735   :  { %1358 = vrot.lane.b32.xlu1 %v10578_v3, %s12519_s10 }
 0x736   :  { %1356 = vrot.lane.b32.xlu0 %v10585_v5, %s12519_s10 }
 0x739   :  { %1354 = vrot.lane.b32.xlu1 %v10550_v46, %s12519_s10 }
 0x73a   :  { %1342 = vrot.lane.b32.xlu0 %v10550_v46, %s12517_s11 }
 0x73d   :  { %1344 = vrot.lane.b32.xlu1 %v10585_v5, %s12517_s11 }
 0x73e   :  { %1346 = vrot.lane.b32.xlu0 %v10578_v3, %s12517_s11 }
 0x741   :  { %1348 = vrot.lane.b32.xlu1 %v10565_v62, %s12517_s11 }
 0x742   :  { %1350 = vrot.lane.b32.xlu0 %v10556_v58, %s12517_s11 }
 0x745   :  { %1352 = vrot.lane.b32.xlu1 %v10568_v63, %s12517_s11 }
 0x746   :  { %1575 = vrot.lane.b32.xlu0 %v10589_v6, %s12517_s11 }
 0x749   :  { %1577 = vrot.lane.b32.xlu1 %v10581_v4, %s12517_s11 }
 0x74a   :  { %1722 = vrot.lane.b32.xlu0 %v10568_v63, %s12515_s1 }
 0x74d   :  { %1573 = vrot.lane.b32.xlu1 %v10598_v7, %s12517_s11 }
 0x74e   :  { %1579 = vrot.lane.b32.xlu0 %v10571_v2, %s12517_s11 }
 0x751   :  { %1571 = vrot.lane.b32.xlu1 %v10603_v8, %s12517_s11 }
 0x755   :  { %1569 = vrot.lane.b32.xlu1 %v10612_v9, %s12517_s11  ;;  %s12570_s11 = sld [smem:[#allocation17_spill]] }
 0x759   :  { %1720 = vrot.lane.b32.xlu1 %v10556_v58, %s12515_s1 }
 0x793   :  { %v1028_v10 = vpop.permute.xlu1 %1027 }
 0x797   :  { %v1030_v11 = vpop.permute.xlu0 %1029  ;;  %v1026_v12 = vpop.permute.xlu1 %1025 }
 0x798   :  { %8797 = vmatprep.subr.msk.mxu1 %vm654_vm3, %v1030_v11 }
 0x799   :  { %8798 = vmatpush3.xpose.msk.msra.mxu1 %vm654_vm3, %v1030_v11  ;;  %v10729_v11 = vld [vmem:[%s12560_s15 + $0x10] sm:$0xff] }
 0x79a   :  { %8799 = vmatprep.subr.msk.mxu1 %vm654_vm3, %v1028_v10 }
 0x79b   :  { %v1024_v15 = vpop.permute.xlu1 %1023 }
 0x79c   :  { %v1022_v13 = vpop.permute.xlu0 %1021 }
 0x79d   :  { %8800 = vmatpush3.xpose.msk.msra.mxu1 %vm654_vm3, %v1028_v10  ;;  %v10726_v10 = vld [vmem:[%s12560_s15 + $0x28] sm:$0xff] }
 0x79e   :  { %8801 = vmatprep.subr.msk.mxu1 %vm654_vm3, %v1026_v12 }
 0x79f   :  { %v1020_v18 = vpop.permute.xlu1 %1019 }
 0x7a0   :  { %v1365_v14 = vpop.permute.xlu0 %1364 }
 0x7a1   :  { %8802 = vmatpush3.xpose.msk.msra.mxu1 %vm654_vm3, %v1026_v12 }
 0x7a2   :  { %8803 = vmatprep.subr.msk.mxu1 %vm654_vm3, %v1024_v15 }
 0x7a3   :  { %v1363_v21 = vpop.permute.xlu1 %1362 }
 0x7a4   :  { %v1361_v16 = vpop.permute.xlu0 %1360 }
 0x7a5   :  { %8804 = vmatpush3.xpose.msk.msra.mxu1 %vm654_vm3, %v1024_v15 }
 0x7a6   :  { %8805 = vmatprep.subr.msk.mxu1 %vm654_vm3, %v1022_v13 }
 0x7a7   :  { %v1359_v23 = vpop.permute.xlu1 %1358 }
 0x7a8   :  { %v1357_v17 = vpop.permute.xlu0 %1356 }
 0x7a9   :  { %8806 = vmatpush3.xpose.msk.msra.mxu1 %vm654_vm3, %v1022_v13 }
 0x7aa   :  { %8807 = vmatprep.subr.msk.mxu1 %vm654_vm3, %v1020_v18 }
 0x7ab   :  { %v1355_v27 = vpop.permute.xlu1 %1354 }
 0x7ac   :  { %v1343_v19 = vpop.permute.xlu0 %1342 }
 0x7ad   :  { %8808 = vmatpush3.xpose.msk.msra.mxu1 %vm654_vm3, %v1020_v18  ;;  %v10740_v18 = vld [vmem:[%s12560_s15 + $0x20] sm:$0xff] }
 0x7ae   :  { %8839 = vmatprep.subr.msk.mxu1 %vm654_vm3, %v1365_v14 }
 0x7af   :  { %v1345_v31 = vpop.permute.xlu1 %1344 }
 0x7b0   :  { %v1347_v20 = vpop.permute.xlu0 %1346  ;;  %8810 = vmatmul.mubr.msk.f32.vlgmr.msra.gmra.mxu1 %vm654_vm3, %v10585_v5 }
 0x7b1   :  { %8812 = vmatprep.mubr.msk.f32.mxu1 %vm654_vm3, %v10578_v3  ;;  %8840 = vmatpush3.xpose.msk.msra.mxu1 %vm654_vm3, %v1365_v14 }
 0x7b2   :  { %8841 = vmatprep.subr.msk.mxu1 %vm654_vm3, %v1363_v21 }
 0x7b3   :  { %v1349_v32 = vpop.permute.xlu1 %1348 }
 0x7b4   :  { %v1351_v22 = vpop.permute.xlu0 %1350  ;;  %8813 = vmatmul.mubr.msk.f32.gmra.mxu1 %vm654_vm3, %v10565_v62 }
 0x7b5   :  { %8815 = vmatprep.mubr.msk.f32.mxu1 %vm654_vm3, %v10556_v58  ;;  %8842 = vmatpush3.xpose.msk.msra.mxu1 %vm654_vm3, %v1363_v21 }
 0x7b6   :  { %8843 = vmatprep.subr.msk.mxu1 %vm654_vm3, %v1361_v16 }
 0x7b7   :  { %v1353_v34 = vpop.permute.xlu1 %1352 }
 0x7b8   :  { %v10681_v25 = vpop.permute.xlu0 %1575  ;;  %8816 = vmatmul.mubr.msk.f32.gmra.mxu1 %vm654_vm3, %v10568_v63 }
 0x7b9   :  { %8844 = vmatpush3.xpose.msk.msra.mxu1 %vm654_vm3, %v1361_v16  ;;  %8851 = vmatprep.mubr.msk.f32.mxu1 %vm654_vm3, %v1343_v19 }
 0x7ba   :  { %8845 = vmatprep.subr.msk.mxu1 %vm654_vm3, %v1359_v23 }
 0x7bc   :  { %v10688_v26 = vpop.permute.xlu0 %1722 }
 0x7bd   :  { %8846 = vmatpush3.xpose.msk.msra.mxu1 %vm654_vm3, %v1359_v23 }
 0x7be   :  { %8847 = vmatprep.subr.msk.mxu1 %vm654_vm3, %v1357_v17 }
 0x7c0   :  { %v10692_v29 = vpop.permute.xlu0 %1579 }
 0x7c1   :  { %8860 = vmatprep.subr.mxu0 %v10692_v29  ;;  %8848 = vmatpush3.xpose.msk.msra.mxu1 %vm654_vm3, %v1357_v17 }
 0x7c2   :  { %8849 = vmatprep.subr.msk.mxu1 %vm654_vm3, %v1355_v27 }
 0x7c5   :  { %8850 = vmatpush3.xpose.msk.msra.mxu1 %vm654_vm3, %v1355_v27 }
 0x7c8   :  { %8852 = vmatmul.mubr.msk.f32.vlgmr.msra.gmra.mxu1 %vm654_vm3, %v1345_v31 }
 0x7c9   :  { %8854 = vmatprep.mubr.msk.f32.mxu1 %vm654_vm3, %v1347_v20 }
 0x7cc   :  { %8855 = vmatmul.mubr.msk.f32.gmra.mxu1 %vm654_vm3, %v1349_v32 }
 0x7cd   :  { %8857 = vmatprep.mubr.msk.f32.mxu1 %vm654_vm3, %v1351_v22 }
 0x7d0   :  { %8858 = vmatmul.mubr.msk.f32.gmra.mxu1 %vm654_vm3, %v1353_v34 }
 0x870   :  { %v8811_v35 = vpop.f32.mrf.mxu1 }
 0x871   :  { %v1151_v38 = vmul.f32 0.25, %v8811_v35 }
 0x872   :  { %v1121_v40 = vpop.f32.mrf.mxu1 }
 0x873   :  { %v1150_v45 = vmul.f32 0.25, %v1121_v40  ;;  %v10710_v47 = vadd.f32 %v1151_v38, %v10704_v37 }
 0x874   :  { %v8814_v48 = vpop.f32.mrf.mxu1 }
 0x875   :  { %v1153_v52 = vmul.f32 0.25, %v8814_v48  ;;  %v1166_v53 = vsel %vm1162_vm6, %v10710_v47, -inf  ;;  %v10718_v54 = vadd.f32 %v1150_v45, %v10707_v43 }
 0x876   :  { %1167 = vmax.xlane.f32.xlu1 %v1166_v53  ;;  %v1131_v55 = vpop.f32.mrf.mxu1 }
 0x877   :  { %v1152_v56 = vmul.f32 0.25, %v1131_v55  ;;  %v1163_v59 = vsel %vm1162_vm6, %v10718_v54, -inf  ;;  %v10723_v60 = vadd.f32 %v1153_v52, %v10713_v51 }
 0x878   :  { %1164 = vmax.xlane.f32.xlu0 %v1163_v59  ;;  %v8817_v1 = vpop.f32.mrf.mxu1 }
 0x879   :  { %v1155_v12 = vmul.f32 0.25, %v8817_v1  ;;  %v1172_v15 = vsel %vm1162_vm6, %v10723_v60, -inf  ;;  %v10737_v17 = vadd.f32 %v1152_v56, %v10729_v11 }
 0x87a   :  { %v1141_v13 = vpop.f32.mrf.mxu1 }
 0x87b   :  { %v1154_v14 = vmul.f32 0.25, %v1141_v13  ;;  %v10734_v16 = vadd.f32 %v1155_v12, %v10726_v10  ;;  %v1169_v20 = vsel %vm1162_vm6, %v10737_v17, -inf }
 0x87c   :  { %1173 = vmax.xlane.f32.xlu0 %v1172_v15 }
 0x87d   :  { %v1178_v19 = vsel %vm1162_vm6, %v10734_v16, -inf  ;;  %v10747_v21 = vadd.f32 %v1154_v14, %v10740_v18 }
 0x87e   :  { %1179 = vmax.xlane.f32.xlu1 %v1178_v19 }
 0x87f   :  { %v1175_v22 = vsel %vm1162_vm6, %v10747_v21, -inf }
 0x880   :  { %1170 = vmax.xlane.f32.xlu0 %v1169_v20 }
 0x884   :  { %1176 = vmax.xlane.f32.xlu0 %v1175_v22 }
 0x888   :  { %v8853_v23 = vpop.f32.mrf.mxu1 }
 0x889   :  { %v1486_v27 = vmul.f32 0.25, %v8853_v23 }
 0x88a   :  { %v1456_v31 = vpop.f32.mrf.mxu1 }
 0x88b   :  { %v1485_v32 = vmul.f32 0.25, %v1456_v31  ;;  %v10752_v34 = vadd.f32 %v1486_v27, %v10704_v37  ;;  %v10785_v27 = vpop.permute.xlu1 %1577 }
 0x88c   :  { %v8856_v35 = vpop.f32.mrf.mxu1 }
 0x88d   :  { %v1488_v38 = vmul.f32 0.25, %v8856_v35  ;;  %v1500_v40 = vsel %vm1162_vm6, %v10752_v34, -inf  ;;  %v10757_v45 = vadd.f32 %v1485_v32, %v10707_v43 }
 0x88e   :  { %1501 = vmax.xlane.f32.xlu1 %v1500_v40  ;;  %v1466_v48 = vpop.f32.mrf.mxu1 }
 0x88f   :  { %v1487_v52 = vmul.f32 0.25, %v1466_v48  ;;  %v1497_v53 = vsel %vm1162_vm6, %v10757_v45, -inf  ;;  %v10762_v55 = vadd.f32 %v1488_v38, %v10713_v51  ;;  %v10787_v31 = vpop.permute.xlu1 %1573 }
 0x890   :  { %v8859_v56 = vpop.f32.mrf.mxu1  ;;  %1498 = vmax.xlane.f32.xlu0 %v1497_v53 }
 0x891   :  { %v1490_v59 = vmul.f32 0.25, %v8859_v56  ;;  %v1506_v1 = vsel %vm1162_vm6, %v10762_v55, -inf  ;;  %v10767_v12 = vadd.f32 %v1487_v52, %v10729_v11 }
 0x892   :  { %1507 = vmax.xlane.f32.xlu1 %v1506_v1  ;;  %v1476_v13 = vpop.f32.mrf.mxu1 }
 0x893   :  { %v1489_v14 = vmul.f32 0.25, %v1476_v13  ;;  %v1503_v15 = vsel %vm1162_vm6, %v10767_v12, -inf  ;;  %v10772_v19 = vadd.f32 %v1490_v59, %v10726_v10  ;;  %v10789_v32 = vpop.permute.xlu1 %1571 }
 0x894   :  { %1504 = vmax.xlane.f32.xlu0 %v1503_v15 }
 0x895   :  { %v1512_v20 = vsel %vm1162_vm6, %v10772_v19, -inf  ;;  %v10777_v22 = vadd.f32 %v1489_v14, %v10740_v18 }
 0x896   :  { %1513 = vmax.xlane.f32.xlu1 %v1512_v20 }
 0x897   :  { %v1509_v23 = vsel %vm1162_vm6, %v10777_v22, -inf  ;;  %v10791_v35 = vpop.permute.xlu1 %1569 }
 0x898   :  { %1510 = vmax.xlane.f32.xlu0 %v1509_v23 }
 0x89b   :  { %v10793_v38 = vpop.permute.xlu1 %1720 }
 0x8a7   :  { %1716 = vrot.lane.b32.xlu1 %v10578_v3, %s12515_s1 }
 0x8ae   :  { %1718 = vrot.lane.b32.xlu0 %v10565_v62, %s12515_s1 }
 0x8ff   :  { %v1168_v40 = vpop.xlane.xlu1 %1167 }
 0x900   :  { %v1182_v48 = vsub.f32 %v10710_v47, %v1168_v40 }
 0x901   :  { %v1165_v52 = vpop.xlane.xlu0 %1164 }
 0x902   :  { %v1189_v53 = vmul.f32 1.442695, %v1182_v48  ;;  %v1181_v56 = vsub.f32 %v10718_v54, %v1165_v52 }
 0x904   :  { %9517 = vpow2.f32 %v1189_v53  ;;  %v1187_v59 = vmul.f32 1.442695, %v1181_v56 }
 0x905   :  { %v1174_v1 = vpop.xlane.xlu0 %1173 }
 0x906   :  { %9519 = vpow2.f32 %v1187_v59  ;;  %v1184_v13 = vsub.f32 %v10723_v60, %v1174_v1 }
 0x907   :  { %v1180_v14 = vpop.xlane.xlu1 %1179 }
 0x908   :  { %v1193_v15 = vmul.f32 1.442695, %v1184_v13  ;;  %v1186_v20 = vsub.f32 %v10734_v16, %v1180_v14 }
 0x909   :  { %v1171_v23 = vpop.xlane.xlu0 %1170 }
 0x90a   :  { %9521 = vpow2.f32 %v1193_v15  ;;  %v1197_v57 = vmul.f32 1.442695, %v1186_v20  ;;  %v1183_v42 = vsub.f32 %v10737_v17, %v1171_v23 }
 0x90c   :  { %9523 = vpow2.f32 %v1197_v57  ;;  %v1191_v47 = vmul.f32 1.442695, %v1183_v42 }
 0x90d   :  { %v1177_v40 = vpop.xlane.xlu0 %1176 }
 0x90e   :  { %9525 = vpow2.f32 %v1191_v47  ;;  %v1185_v54 = vsub.f32 %v10747_v21, %v1177_v40 }
 0x910   :  { %v1195_v48 = vmul.f32 1.442695, %v1185_v54 }
 0x911   :  { %v10801_v52 = vpop.eup %9517 }
 0x912   :  { %9527 = vpow2.f32 %v1195_v48  ;;  %v1202_v60 = vsel %vm1162_vm6, %v10801_v52, 0.0 }
 0x913   :  { %v10805_v53 = vpop.eup %9519  ;;  %1203 = vadd.xlane.f32.xlu1 %v1202_v60 }
 0x914   :  { %v1199_v16 = vsel %vm1162_vm6, %v10805_v53, 0.0 }
 0x915   :  { %1200 = vadd.xlane.f32.xlu0 %v1199_v16 }
 0x917   :  { %v10809_v57 = vpop.eup %9521  ;;  %v1502_v42 = vpop.xlane.xlu1 %1501 }
 0x918   :  { %v1516_v17 = vsub.f32 %v10752_v34, %v1502_v42  ;;  %v1208_v21 = vsel %vm1162_vm6, %v10809_v57, 0.0 }
 0x919   :  { %v10814_v56 = vpop.eup %9523  ;;  %1209 = vadd.xlane.f32.xlu1 %v1208_v21  ;;  %v1499_v59 = vpop.xlane.xlu0 %1498 }
 0x91a   :  { %v1523_v1 = vmul.f32 1.442695, %v1516_v17  ;;  %v1515_v13 = vsub.f32 %v10757_v45, %v1499_v59  ;;  %v1214_v20 = vsel %vm1162_vm6, %v10814_v56, 0.0 }
 0x91b   :  { %v10817_v14 = vpop.eup %9525  ;;  %v1508_v15 = vpop.xlane.xlu1 %1507 }
 0x91c   :  { %9529 = vpow2.f32 %v1523_v1  ;;  %v1521_v23 = vmul.f32 1.442695, %v1515_v13  ;;  %v1518_v34 = vsub.f32 %v10762_v55, %v1508_v15  ;;  %v1205_v47 = vsel %vm1162_vm6, %v10817_v14, 0.0 }
 0x91d   :  { %1215 = vadd.xlane.f32.xlu1 %v1214_v20  ;;  %1206 = vadd.xlane.f32.xlu0 %v1205_v47  ;;  %v1505_v40 = vpop.xlane.xlu0 %1504 }
 0x91e   :  { %9531 = vpow2.f32 %v1521_v23  ;;  %v1527_v54 = vmul.f32 1.442695, %v1518_v34  ;;  %v1517_v45 = vsub.f32 %v10767_v12, %v1505_v40 }
 0x91f   :  { %v10825_v48 = vpop.eup %9527  ;;  %v1514_v20 = vpop.xlane.xlu1 %1513 }
 0x920   :  { %9533 = vpow2.f32 %v1527_v54  ;;  %v1525_v60 = vmul.f32 1.442695, %v1517_v45  ;;  %v1211_v16 = vsel %vm1162_vm6, %v10825_v48, 0.0  ;;  %v1520_v34 = vsub.f32 %v10772_v19, %v1514_v20 }
 0x921   :  { %1212 = vadd.xlane.f32.xlu0 %v1211_v16  ;;  %v1511_v15 = vpop.xlane.xlu0 %1510 }
 0x922   :  { %9535 = vpow2.f32 %v1525_v60  ;;  %v1519_v23 = vsub.f32 %v10777_v22, %v1511_v15  ;;  %v1531_v40 = vmul.f32 1.442695, %v1520_v34 }
 0x923   :  { %v10887_v19 = vpop.permute.xlu1 %1716 }
 0x924   :  { %v1529_v47 = vmul.f32 1.442695, %v1519_v23 }
 0x925   :  { %v10889_v22 = vpop.permute.xlu0 %1718 }
 0x926   :  { %9537 = vpow2.f32 %v1529_v47 }
 0x927   :  { %9539 = vpow2.f32 %v1531_v40 }
 0x929   :  { %v10829_v55 = vpop.eup %9529 }
 0x92a   :  { %v1536_v42 = vsel %vm1162_vm6, %v10829_v55, 0.0 }
 0x92b   :  { %v10833_v17 = vpop.eup %9531  ;;  %1537 = vadd.xlane.f32.xlu1 %v1536_v42 }
 0x92c   :  { %v1533_v12 = vsel %vm1162_vm6, %v10833_v17, 0.0 }
 0x92d   :  { %v10837_v21 = vpop.eup %9533  ;;  %1534 = vadd.xlane.f32.xlu0 %v1533_v12 }
 0x92e   :  { %v1542_v59 = vsel %vm1162_vm6, %v10837_v21, 0.0 }
 0x92f   :  { %v10841_v1 = vpop.eup %9535  ;;  %1543 = vadd.xlane.f32.xlu1 %v1542_v59 }
 0x930   :  { %v1539_v13 = vsel %vm1162_vm6, %v10841_v1, 0.0 }
 0x931   :  { %1540 = vadd.xlane.f32.xlu0 %v1539_v13 }
 0x933   :  { %v10851_v54 = vpop.eup %9537 }
 0x934   :  { %v10853_v45 = vpop.eup %9539  ;;  %v1545_v60 = vsel %vm1162_vm6, %v10851_v54, 0.0 }
 0x935   :  { %v1548_v16 = vsel %vm1162_vm6, %v10853_v45, 0.0 }
 0x940   :  { %1712 = vrot.lane.b32.xlu1 %v10550_v46, %s12515_s1 }
 0x947   :  { %1714 = vrot.lane.b32.xlu0 %v10585_v5, %s12515_s1 }
 0x964   :  { %1546 = vadd.xlane.f32.xlu1 %v1545_v60 }
 0x966   :  { %1549 = vadd.xlane.f32.xlu0 %v1548_v16 }
 0x975   :  { %1702 = vrot.lane.b32.xlu1 %v10585_v5, %s12513_s16 }
 0x979   :  { %1706 = vrot.lane.b32.xlu1 %v10565_v62, %s12513_s16 }
 0x97c   :  { %1700 = vrot.lane.b32.xlu0 %v10550_v46, %s12513_s16 }
 0x97d   :  { %1710 = vrot.lane.b32.xlu1 %v10568_v63, %s12513_s16 }
 0x980   :  { %1704 = vrot.lane.b32.xlu0 %v10578_v3, %s12513_s16 }
 0x981   :  { %1929 = vrot.lane.b32.xlu1 %v10581_v4, %s12513_s16 }
 0x984   :  { %1708 = vrot.lane.b32.xlu0 %v10556_v58, %s12513_s16 }
 0x985   :  { %1925 = vrot.lane.b32.xlu1 %v10598_v7, %s12513_s16 }
 0x988   :  { %1931 = vrot.lane.b32.xlu0 %v10571_v2, %s12513_s16 }
 0x989   :  { %1923 = vrot.lane.b32.xlu1 %v10603_v8, %s12513_s16 }
 0x98c   :  { %1927 = vrot.lane.b32.xlu0 %v10589_v6, %s12513_s16 }
 0x98d   :  { %1921 = vrot.lane.b32.xlu1 %v10612_v9, %s12513_s16  ;;  %s12568_s16 = sld [smem:[#allocation16_spill]] }
 0x990   :  { %2074 = vrot.lane.b32.xlu0 %v10568_v63, %s12511_s18 }
 0x991   :  { %2072 = vrot.lane.b32.xlu1 %v10556_v58, %s12511_s18 }
 0x99c   :  { %v1204_v42 = vpop.xlane.xlu1 %1203 }
 0x99d   :  { %9541 = vrcp.f32 %v1204_v42 }
 0x99e   :  { %v1201_v12 = vpop.xlane.xlu0 %1200 }
 0x99f   :  { %9543 = vrcp.f32 %v1201_v12 }
 0x9a2   :  { %v1210_v59 = vpop.xlane.xlu1 %1209 }
 0x9a3   :  { %9545 = vrcp.f32 %v1210_v59 }
 0x9a6   :  { %v1207_v13 = vpop.xlane.xlu0 %1206  ;;  %v1216_v15 = vpop.xlane.xlu1 %1215 }
 0x9a7   :  { %9547 = vrcp.f32 %v1207_v13 }
 0x9a8   :  { %9549 = vrcp.f32 %v1216_v15 }
 0x9aa   :  { %v1213_v20 = vpop.xlane.xlu0 %1212  ;;  %v9542_v23 = vpop.eup %9541 }
 0x9ab   :  { %9551 = vrcp.f32 %v1213_v20  ;;  %v1220_v40 = vmul.f32 %v9542_v23, %v10801_v52 }
 0x9ac   :  { %v9544_v34 = vpop.eup %9543 }
 0x9ad   :  { %v1218_v47 = vmul.f32 %v9544_v34, %v10805_v53 }
 0x9af   :  { %8830 = vmatprep.mubr.msk.f32.mxu0 %vm1162_vm6, %v1218_v47 }
 0x9b0   :  { %8831 = vmatmul.mubr.msk.f32.vlgmr.msra.gmra.mxu0 %vm1162_vm6, %v1220_v40  ;;  %v9546_v60 = vpop.eup %9545 }
 0x9b1   :  { %8861 = vmatpush3.msra.mxu0 %v10692_v29  ;;  %v1224_v29 = vmul.f32 %v9546_v60, %v10809_v57 }
 0x9b2   :  { %8862 = vmatprep.subr.mxu0 %v10785_v27 }
 0x9b3   :  { %8863 = vmatpush3.msra.mxu0 %v10785_v27 }
 0x9b4   :  { %8864 = vmatprep.subr.mxu0 %v10681_v25  ;;  %v1538_v16 = vpop.xlane.xlu1 %1537  ;;  %v9548_v42 = vpop.eup %9547 }
 0x9b5   :  { %8865 = vmatpush3.msra.mxu0 %v10681_v25  ;;  %9553 = vrcp.f32 %v1538_v16  ;;  %v1222_v53 = vmul.f32 %v9548_v42, %v10817_v14  ;;  %v9550_v12 = vpop.eup %9549 }
 0x9b6   :  { %8866 = vmatprep.subr.mxu0 %v10787_v31  ;;  %v1535_v52 = vpop.xlane.xlu0 %1534 }
 0x9b7   :  { %8867 = vmatpush3.msra.mxu0 %v10787_v31  ;;  %9555 = vrcp.f32 %v1535_v52  ;;  %8833 = vmatprep.mubr.msk.f32.mxu0 %vm1162_vm6, %v1222_v53  ;;  %v1228_v31 = vmul.f32 %v9550_v12, %v10814_v56 }
 0x9b8   :  { %v9552_v27 = vpop.eup %9551  ;;  %8868 = vmatprep.subr.mxu0 %v10789_v32  ;;  %v1544_v59 = vpop.xlane.xlu1 %1543  ;;  %8834 = vmatmul.mubr.msk.f32.gmra.mxu0 %vm1162_vm6, %v1224_v29 }
 0x9b9   :  { %v1226_v25 = vmul.f32 %v9552_v27, %v10825_v48  ;;  %9557 = vrcp.f32 %v1544_v59  ;;  %8869 = vmatpush3.msra.mxu0 %v10789_v32 }
 0x9ba   :  { %v1541_v14 = vpop.xlane.xlu0 %1540  ;;  %8870 = vmatprep.subr.mxu0 %v10791_v35 }
 0x9bb   :  { %9559 = vrcp.f32 %v1541_v14  ;;  %8836 = vmatprep.mubr.msk.f32.mxu0 %vm1162_vm6, %v1226_v25  ;;  %8871 = vmatpush3.msra.mxu0 %v10791_v35 }
 0x9bc   :  { %8881 = vmatprep.subr.msk.mxu0 %vm654_vm3, %v10688_v26  ;;  %8837 = vmatmul.mubr.msk.f32.gmra.mxu0 %vm1162_vm6, %v1228_v31 }
 0x9c2   :  { %v9554_v57 = vpop.eup %9553 }
 0x9c3   :  { %v1554_v32 = vmul.f32 %v9554_v57, %v10829_v55  ;;  %v1713_v55 = vpop.permute.xlu1 %1712 }
 0x9c4   :  { %v9556_v48 = vpop.eup %9555 }
 0x9c5   :  { %v1552_v13 = vmul.f32 %v9556_v48, %v10833_v17 }
 0x9c6   :  { %v9558_v15 = vpop.eup %9557 }
 0x9c7   :  { %8872 = vmatprep.mubr.msk.f32.mxu0 %vm1162_vm6, %v1552_v13  ;;  %v1558_v56 = vmul.f32 %v9558_v15, %v10837_v21 }
 0x9c8   :  { %v9560_v20 = vpop.eup %9559  ;;  %8873 = vmatmul.mubr.msk.f32.vlgmr.msra.gmra.mxu0 %vm1162_vm6, %v1554_v32 }
 0x9c9   :  { %8882 = vmatpush3.xpose.msk.msra.mxu0 %vm654_vm3, %v10688_v26  ;;  %v1556_v35 = vmul.f32 %v9560_v20, %v10841_v1  ;;  %v1715_v26 = vpop.permute.xlu0 %1714 }
 0x9ca   :  { %8883 = vmatprep.subr.msk.mxu0 %vm654_vm3, %v10793_v38 }
 0x9cb   :  { %8875 = vmatprep.mubr.msk.f32.mxu0 %vm1162_vm6, %v1556_v35 }
 0x9cc   :  { %8876 = vmatmul.mubr.msk.f32.gmra.mxu0 %vm1162_vm6, %v1558_v56 }
 0x9cd   :  { %8884 = vmatpush3.xpose.msk.msra.mxu0 %vm654_vm3, %v10793_v38 }
 0x9ce   :  { %8885 = vmatprep.subr.msk.mxu0 %vm654_vm3, %v10889_v22 }
 0x9d1   :  { %8886 = vmatpush3.xpose.msk.msra.mxu0 %vm654_vm3, %v10889_v22 }
 0x9d2   :  { %8887 = vmatprep.subr.msk.mxu0 %vm654_vm3, %v10887_v19 }
 0x9d5   :  { %8888 = vmatpush3.xpose.msk.msra.mxu0 %vm654_vm3, %v10887_v19 }
 0x9d6   :  { %8889 = vmatprep.subr.msk.mxu0 %vm654_vm3, %v1715_v26 }
 0x9d9   :  { %8890 = vmatpush3.xpose.msk.msra.mxu0 %vm654_vm3, %v1715_v26 }
 0x9da   :  { %8891 = vmatprep.subr.msk.mxu0 %vm654_vm3, %v1713_v55 }
 0x9dd   :  { %8892 = vmatpush3.xpose.msk.msra.mxu0 %vm654_vm3, %v1713_v55 }
 0x9ed   :  { %v1547_v38 = vpop.xlane.xlu1 %1546 }
 0x9ee   :  { %9561 = vrcp.f32 %v1547_v38 }
 0x9ef   :  { %v1550_v17 = vpop.xlane.xlu0 %1549 }
 0x9f0   :  { %9563 = vrcp.f32 %v1550_v17 }
 0x9f1   :  { %v1703_v21 = vpop.permute.xlu1 %1702 }
 0x9f3   :  { %v1701_v1 = vpop.permute.xlu0 %1700 }
 0x9f5   :  { %v1707_v22 = vpop.permute.xlu1 %1706 }
 0x9f7   :  { %v1705_v23 = vpop.permute.xlu0 %1704 }
 0x9f9   :  { %v1711_v34 = vpop.permute.xlu1 %1710 }
 0x9fb   :  { %v9562_v47 = vpop.eup %9561  ;;  %v1709_v19 = vpop.permute.xlu0 %1708 }
 0x9fc   :  { %v1560_v40 = vmul.f32 %v9562_v47, %v10851_v54 }
 0x9fd   :  { %v9564_v60 = vpop.eup %9563  ;;  %v1930_v16 = vpop.permute.xlu1 %1929 }
 0x9fe   :  { %8878 = vmatprep.mubr.msk.f32.mxu0 %vm1162_vm6, %v1560_v40  ;;  %v1562_v42 = vmul.f32 %v9564_v60, %v10853_v45 }
 0x9ff   :  { %v1932_v52 = vpop.permute.xlu0 %1931 }
 0xa00   :  { %8879 = vmatmul.mubr.msk.f32.gmra.mxu0 %vm1162_vm6, %v1562_v42  ;;  %8902 = vmatprep.subr.mxu1 %v1932_v52 }
 0xa01   :  { %v1926_v53 = vpop.permute.xlu1 %1925  ;;  %8893 = vmatprep.mubr.msk.f32.mxu0 %vm654_vm3, %v1701_v1  ;;  %8903 = vmatpush3.msra.mxu1 %v1932_v52 }
 0xa02   :  { %8904 = vmatprep.subr.mxu1 %v1930_v16 }
 0xa03   :  { %8905 = vmatpush3.msra.mxu1 %v1930_v16  ;;  %v1928_v12 = vpop.permute.xlu0 %1927 }
 0xa04   :  { %8894 = vmatmul.mubr.msk.f32.vlgmr.msra.gmra.mxu0 %vm654_vm3, %v1703_v21  ;;  %8906 = vmatprep.subr.mxu1 %v1928_v12 }
 0xa05   :  { %v1924_v54 = vpop.permute.xlu1 %1923  ;;  %8896 = vmatprep.mubr.msk.f32.mxu0 %vm654_vm3, %v1705_v23  ;;  %8907 = vmatpush3.msra.mxu1 %v1928_v12 }
 0xa06   :  { %8908 = vmatprep.subr.mxu1 %v1926_v53 }
 0xa07   :  { %8909 = vmatpush3.msra.mxu1 %v1926_v53  ;;  %v10951_v29 = vpop.permute.xlu0 %2074 }
 0xa08   :  { %8897 = vmatmul.mubr.msk.f32.gmra.mxu0 %vm654_vm3, %v1707_v22  ;;  %8910 = vmatprep.subr.mxu1 %v1924_v54 }
 0xa09   :  { %v1922_v45 = vpop.permute.xlu1 %1921  ;;  %8899 = vmatprep.mubr.msk.f32.mxu0 %vm654_vm3, %v1709_v19  ;;  %8911 = vmatpush3.msra.mxu1 %v1924_v54 }
 0xa0a   :  { %8912 = vmatprep.subr.mxu1 %v1922_v45 }
 0xa0b   :  { %8913 = vmatpush3.msra.mxu1 %v1922_v45 }
 0xa0c   :  { %8900 = vmatmul.mubr.msk.f32.gmra.mxu0 %vm654_vm3, %v1711_v34  ;;  %8923 = vmatprep.subr.msk.mxu1 %vm654_vm3, %v10951_v29 }
 0xa70   :  { %v10956_v27 = vpop.f32.mrf.mxu0 }
 0xa72   :  { %v10958_v59 = vpop.f32.mrf.mxu0 }
 0xa78   :  { %v10960_v25 = vpop.f32.mrf.mxu0 }
 0xa7a   :  { %v10962_v14 = vpop.f32.mrf.mxu0 }
 0xa7c   :  { %v10964_v31 = vpop.f32.mrf.mxu0 }
 0xa7e   :  { %v10966_v57 = vpop.f32.mrf.mxu0 }
 0xa88   :  { %v10968_v48 = vpop.f32.mrf.mxu0 }
 0xa8a   :  { %v10970_v13 = vpop.f32.mrf.mxu0 }
 0xa8c   :  { %v10972_v32 = vpop.f32.mrf.mxu0 }
 0xa8e   :  { %v10974_v15 = vpop.f32.mrf.mxu0 }
 0xac0   :  { %v10976_v20 = vpop.f32.mrf.mxu0 }
 0xac2   :  { %v10978_v35 = vpop.f32.mrf.mxu0 }
 0xac4   :  { %v8895_v56 = vpop.f32.mrf.mxu0 }
 0xac5   :  { %v1844_v26 = vmul.f32 0.25, %v8895_v56 }
 0xac6   :  { %v1814_v55 = vpop.f32.mrf.mxu0 }
 0xac7   :  { %v1843_v38 = vmul.f32 0.25, %v1814_v55  ;;  %v1850_v17 = vadd.f32 %v1844_v26, %v10704_v37 }
 0xac8   :  { %v8898_v21 = vpop.f32.mrf.mxu0 }
 0xac9   :  { %v1846_v1 = vmul.f32 0.25, %v8898_v21  ;;  %v1858_v22 = vsel %vm1162_vm6, %v1850_v17, -inf  ;;  %v1849_v23 = vadd.f32 %v1843_v38, %v10707_v43  ;;  %v10996_v38 = vpop.permute.xlu1 %2072 }
 0xaca   :  { %1859 = vmax.xlane.f32.xlu1 %v1858_v22  ;;  %v1824_v34 = vpop.f32.mrf.mxu0 }
 0xacb   :  { %v1845_v47 = vmul.f32 0.25, %v1824_v34  ;;  %v1855_v19 = vsel %vm1162_vm6, %v1849_v23, -inf  ;;  %v1852_v40 = vadd.f32 %v1846_v1, %v10713_v51 }
 0xacc   :  { %1856 = vmax.xlane.f32.xlu0 %v1855_v19  ;;  %v8901_v60 = vpop.f32.mrf.mxu0 }
 0xacd   :  { %v1848_v16 = vmul.f32 0.25, %v8901_v60  ;;  %v1864_v53 = vsel %vm1162_vm6, %v1852_v40, -inf  ;;  %v1851_v54 = vadd.f32 %v1845_v47, %v10729_v11 }
 0xace   :  { %v1834_v42 = vpop.f32.mrf.mxu0 }
 0xacf   :  { %v1847_v52 = vmul.f32 0.25, %v1834_v42  ;;  %v1854_v12 = vadd.f32 %v1848_v16, %v10726_v10  ;;  %v1861_v56 = vsel %vm1162_vm6, %v1851_v54, -inf }
 0xad0   :  { %1865 = vmax.xlane.f32.xlu0 %v1864_v53 }
 0xad1   :  { %v1870_v45 = vsel %vm1162_vm6, %v1854_v12, -inf  ;;  %v1853_v26 = vadd.f32 %v1847_v52, %v10740_v18 }
 0xad2   :  { %1871 = vmax.xlane.f32.xlu1 %v1870_v45 }
 0xad3   :  { %v1867_v55 = vsel %vm1162_vm6, %v1853_v26, -inf }
 0xad4   :  { %1862 = vmax.xlane.f32.xlu0 %v1861_v56 }
 0xad8   :  { %1868 = vmax.xlane.f32.xlu0 %v1867_v55 }
 0xae3   :  { %2068 = vrot.lane.b32.xlu1 %v10578_v3, %s12511_s18 }
 0xaee   :  { %2070 = vrot.lane.b32.xlu0 %v10565_v62, %s12511_s18 }
 0xb53   :  { %v1860_v21 = vpop.xlane.xlu1 %1859 }
 0xb54   :  { %v1874_v1 = vsub.f32 %v1850_v17, %v1860_v21 }
 0xb55   :  { %v1857_v22 = vpop.xlane.xlu0 %1856 }
 0xb56   :  { %v1881_v34 = vmul.f32 1.442695, %v1874_v1  ;;  %v1873_v47 = vsub.f32 %v1849_v23, %v1857_v22 }
 0xb58   :  { %9565 = vpow2.f32 %v1881_v34  ;;  %v1879_v19 = vmul.f32 1.442695, %v1873_v47 }
 0xb59   :  { %v1866_v60 = vpop.xlane.xlu0 %1865 }
 0xb5a   :  { %9567 = vpow2.f32 %v1879_v19  ;;  %v1876_v16 = vsub.f32 %v1852_v40, %v1866_v60 }
 0xb5b   :  { %v1872_v34 = vpop.xlane.xlu1 %1871 }
 0xb5c   :  { %v1885_v42 = vmul.f32 1.442695, %v1876_v16  ;;  %v1878_v47 = vsub.f32 %v1854_v12, %v1872_v34 }
 0xb5d   :  { %v1863_v52 = vpop.xlane.xlu0 %1862 }
 0xb5e   :  { %9569 = vpow2.f32 %v1885_v42  ;;  %v1875_v53 = vsub.f32 %v1851_v54, %v1863_v52  ;;  %v1889_v60 = vmul.f32 1.442695, %v1878_v47 }
 0xb5f   :  { %v2069_v12 = vpop.permute.xlu1 %2068 }
 0xb60   :  { %v1883_v45 = vmul.f32 1.442695, %v1875_v53 }
 0xb61   :  { %v1869_v54 = vpop.xlane.xlu0 %1868 }
 0xb62   :  { %9571 = vpow2.f32 %v1883_v45  ;;  %v1877_v22 = vsub.f32 %v1853_v26, %v1869_v54 }
 0xb64   :  { %v1887_v19 = vmul.f32 1.442695, %v1877_v22 }
 0xb65   :  { %v9566_v56 = vpop.eup %9565  ;;  %v2071_v26 = vpop.permute.xlu0 %2070 }
 0xb66   :  { %v1894_v55 = vsel %vm1162_vm6, %v9566_v56, 0.0  ;;  %9573 = vpow2.f32 %v1887_v19 }
 0xb67   :  { %v9568_v0 = vpop.eup %9567  ;;  %1895 = vadd.xlane.f32.xlu1 %v1894_v55  ;;  %9575 = vpow2.f32 %v1889_v60 }
 0xb68   :  { %v1891_v17 = vsel %vm1162_vm6, %v9568_v0, 0.0 }
 0xb69   :  { %1892 = vadd.xlane.f32.xlu0 %v1891_v17 }
 0xb6b   :  { %v9570_v23 = vpop.eup %9569 }
 0xb6c   :  { %v1900_v21 = vsel %vm1162_vm6, %v9570_v23, 0.0 }
 0xb6d   :  { %1901 = vadd.xlane.f32.xlu1 %v1900_v21 }
 0xb6f   :  { %v9572_v1 = vpop.eup %9571 }
 0xb70   :  { %v1897_v40 = vsel %vm1162_vm6, %v9572_v1, 0.0 }
 0xb71   :  { %1898 = vadd.xlane.f32.xlu0 %v1897_v40 }
 0xb73   :  { %v9574_v16 = vpop.eup %9573 }
 0xb74   :  { %v1903_v42 = vsel %vm1162_vm6, %v9574_v16, 0.0  ;;  %v9576_v52 = vpop.eup %9575 }
 0xb75   :  { %v1906_v53 = vsel %vm1162_vm6, %v9576_v52, 0.0 }
 0xb7e   :  { %2064 = vrot.lane.b32.xlu1 %v10550_v46, %s12511_s18 }
 0xb87   :  { %2066 = vrot.lane.b32.xlu0 %v10585_v5, %s12511_s18 }
 0xba2   :  { %1904 = vadd.xlane.f32.xlu1 %v1903_v42 }
 0xba6   :  { %1907 = vadd.xlane.f32.xlu0 %v1906_v53 }
 0xbb3   :  { %2054 = vrot.lane.b32.xlu1 %v10585_v5, %s12509_s22 }
 0xbb7   :  { %2058 = vrot.lane.b32.xlu1 %v10565_v62, %s12509_s22 }
 0xbbb   :  { %2062 = vrot.lane.b32.xlu1 %v10568_v63, %s12509_s22 }
 0xbbc   :  { %2052 = vrot.lane.b32.xlu0 %v10550_v46, %s12509_s22 }
 0xbc0   :  { %2056 = vrot.lane.b32.xlu0 %v10578_v3, %s12509_s22 }
 0xbc4   :  { %2060 = vrot.lane.b32.xlu0 %v10556_v58, %s12509_s22 }
 0xbf0   :  { %v1896_v45 = vpop.xlane.xlu1 %1895 }
 0xbf1   :  { %9577 = vrcp.f32 %v1896_v45 }
 0xbf2   :  { %v1893_v5 = vpop.xlane.xlu0 %1892 }
 0xbf3   :  { %9579 = vrcp.f32 %v1893_v5 }
 0xbf6   :  { %v1902_v55 = vpop.xlane.xlu1 %1901 }
 0xbf7   :  { %9581 = vrcp.f32 %v1902_v55 }
 0xbfa   :  { %v1899_v62 = vpop.xlane.xlu0 %1898 }
 0xbfb   :  { %9583 = vrcp.f32 %v1899_v62 }
 0xbfe   :  { %v9578_v63 = vpop.eup %9577 }
 0xbff   :  { %v1912_v46 = vmul.f32 %v9578_v63, %v9566_v56  ;;  %v2065_v56 = vpop.permute.xlu1 %2064 }
 0xc00   :  { %v9580_v17 = vpop.eup %9579 }
 0xc01   :  { %v1910_v21 = vmul.f32 %v9580_v17, %v9568_v0 }
 0xc03   :  { %8914 = vmatprep.mubr.msk.f32.mxu1 %vm1162_vm6, %v1910_v21 }
 0xc04   :  { %8915 = vmatmul.mubr.msk.f32.vlgmr.msra.gmra.mxu1 %vm1162_vm6, %v1912_v46  ;;  %v9582_v58 = vpop.eup %9581 }
 0xc05   :  { %8924 = vmatpush3.xpose.msk.msra.mxu1 %vm654_vm3, %v10951_v29  ;;  %v1916_v0 = vmul.f32 %v9582_v58, %v9570_v23  ;;  %v2067_v29 = vpop.permute.xlu0 %2066 }
 0xc06   :  { %8925 = vmatprep.subr.msk.mxu1 %vm654_vm3, %v10996_v38 }
 0xc08   :  { %v9584_v3 = vpop.eup %9583 }
 0xc09   :  { %8926 = vmatpush3.xpose.msk.msra.mxu1 %vm654_vm3, %v10996_v38  ;;  %v1914_v40 = vmul.f32 %v9584_v3, %v9572_v1 }
 0xc0a   :  { %8927 = vmatprep.subr.msk.mxu1 %vm654_vm3, %v2071_v26 }
 0xc0b   :  { %8917 = vmatprep.mubr.msk.f32.mxu1 %vm1162_vm6, %v1914_v40 }
 0xc0c   :  { %8918 = vmatmul.mubr.msk.f32.gmra.mxu1 %vm1162_vm6, %v1916_v0 }
 0xc0d   :  { %8928 = vmatpush3.xpose.msk.msra.mxu1 %vm654_vm3, %v2071_v26 }
 0xc0e   :  { %8929 = vmatprep.subr.msk.mxu1 %vm654_vm3, %v2069_v12 }
 0xc11   :  { %8930 = vmatpush3.xpose.msk.msra.mxu1 %vm654_vm3, %v2069_v12 }
 0xc12   :  { %8931 = vmatprep.subr.msk.mxu1 %vm654_vm3, %v2067_v29 }
 0xc15   :  { %8932 = vmatpush3.xpose.msk.msra.mxu1 %vm654_vm3, %v2067_v29 }
 0xc16   :  { %8933 = vmatprep.subr.msk.mxu1 %vm654_vm3, %v2065_v56 }
 0xc19   :  { %8934 = vmatpush3.xpose.msk.msra.mxu1 %vm654_vm3, %v2065_v56 }
 0xc2b   :  { %v1905_v38 = vpop.xlane.xlu1 %1904 }
 0xc2c   :  { %9585 = vrcp.f32 %v1905_v38 }
 0xc2f   :  { %v1908_v23 = vpop.xlane.xlu0 %1907  ;;  %v2055_v19 = vpop.permute.xlu1 %2054 }
 0xc30   :  { %9587 = vrcp.f32 %v1908_v23 }
 0xc33   :  { %v2053_v22 = vpop.permute.xlu0 %2052  ;;  %v2059_v42 = vpop.permute.xlu1 %2058 }
 0xc37   :  { %v2057_v60 = vpop.permute.xlu0 %2056 }
 0xc39   :  { %v9586_v1 = vpop.eup %9585 }
 0xc3a   :  { %v1918_v54 = vmul.f32 %v9586_v1, %v9574_v16  ;;  %v2063_v16 = vpop.permute.xlu1 %2062 }
 0xc3b   :  { %v2061_v53 = vpop.permute.xlu0 %2060 }
 0xc3c   :  { %8920 = vmatprep.mubr.msk.f32.mxu1 %vm1162_vm6, %v1918_v54 }
 0xc3d   :  { %v9588_v34 = vpop.eup %9587 }
 0xc3e   :  { %v1920_v47 = vmul.f32 %v9588_v34, %v9576_v52  ;;  %v12561_v52 = vmov 0.0  }
 0xc40   :  { %8921 = vmatmul.mubr.msk.f32.gmra.mxu1 %vm1162_vm6, %v1920_v47 }
 0xc41   :  { %8935 = vmatprep.mubr.msk.f32.mxu1 %vm654_vm3, %v2053_v22 }
 0xc44   :  { %8936 = vmatmul.mubr.msk.f32.vlgmr.msra.gmra.mxu1 %vm654_vm3, %v2055_v19 }
 0xc45   :  { %8938 = vmatprep.mubr.msk.f32.mxu1 %vm654_vm3, %v2057_v60 }
 0xc48   :  { %8939 = vmatmul.mubr.msk.f32.gmra.mxu1 %vm654_vm3, %v2059_v42 }
 0xc49   :  { %8941 = vmatprep.mubr.msk.f32.mxu1 %vm654_vm3, %v2061_v53 }
 0xc4c   :  { %8942 = vmatmul.mubr.msk.f32.gmra.mxu1 %vm654_vm3, %v2063_v16 }
 0xc4d   :  { %2816 = vmatprep.mubr.f32.mxu1 %v12561_v52 }
 0xcc4   :  { %v11047_v12 = vpop.f32.mrf.mxu1 }
 0xcc6   :  { %v11049_v26 = vpop.f32.mrf.mxu1 }
 0xccc   :  { %v11051_v45 = vpop.f32.mrf.mxu1 }
 0xcce   :  { %v11053_v5 = vpop.f32.mrf.mxu1 }
 0xd00   :  { %v11055_v55 = vpop.f32.mrf.mxu1 }
 0xd02   :  { %v11057_v62 = vpop.f32.mrf.mxu1 }
 0xd04   :  { %v8937_v63 = vpop.f32.mrf.mxu1 }
 0xd05   :  { %v2196_v17 = vmul.f32 0.25, %v8937_v63 }
 0xd06   :  { %v2166_v21 = vpop.f32.mrf.mxu1 }
 0xd07   :  { %v2202_v46 = vadd.f32 %v2196_v17, %v10704_v37  ;;  %v2195_v58 = vmul.f32 0.25, %v2166_v21 }
 0xd08   :  { %v8940_v3 = vpop.f32.mrf.mxu1 }
 0xd09   :  { %v2198_v40 = vmul.f32 0.25, %v8940_v3  ;;  %v2210_v0 = vsel %vm1162_vm6, %v2202_v46, -inf  ;;  %v2201_v29 = vadd.f32 %v2195_v58, %v10707_v43 }
 0xd0a   :  { %2211 = vmax.xlane.f32.xlu1 %v2210_v0  ;;  %v2176_v56 = vpop.f32.mrf.mxu1 }
 0xd0b   :  { %v2197_v38 = vmul.f32 0.25, %v2176_v56  ;;  %v2207_v23 = vsel %vm1162_vm6, %v2201_v29, -inf  ;;  %v2204_v1 = vadd.f32 %v2198_v40, %v10713_v51 }
 0xd0c   :  { %2208 = vmax.xlane.f32.xlu0 %v2207_v23  ;;  %v8943_v54 = vpop.f32.mrf.mxu1 }
 0xd0d   :  { %v2200_v22 = vmul.f32 0.25, %v8943_v54  ;;  %v2203_v37 = vadd.f32 %v2197_v38, %v10729_v11  ;;  %v2216_v60 = vsel %vm1162_vm6, %v2204_v1, -inf }
 0xd0e   :  { %v2186_v34 = vpop.f32.mrf.mxu1 }
 0xd0f   :  { %v2206_v47 = vadd.f32 %v2200_v22, %v10726_v10  ;;  %v2199_v19 = vmul.f32 0.25, %v2186_v34  ;;  %v2213_v53 = vsel %vm1162_vm6, %v2203_v37, -inf }
 0xd10   :  { %2217 = vmax.xlane.f32.xlu0 %v2216_v60 }
 0xd11   :  { %v2222_v43 = vsel %vm1162_vm6, %v2206_v47, -inf  ;;  %v2205_v42 = vadd.f32 %v2199_v19, %v10740_v18 }
 0xd12   :  { %2223 = vmax.xlane.f32.xlu1 %v2222_v43 }
 0xd13   :  { %v2219_v51 = vsel %vm1162_vm6, %v2205_v42, -inf }
 0xd14   :  { %2214 = vmax.xlane.f32.xlu0 %v2213_v53 }
 0xd18   :  { %2220 = vmax.xlane.f32.xlu0 %v2219_v51 }
 0xd23   :  { %2281 = vrot.lane.b32.xlu1 %v10581_v4, %s12509_s22 }
 0xd27   :  { %2279 = vrot.lane.b32.xlu1 %v10589_v6, %s12509_s22 }
 0xd2b   :  { %2277 = vrot.lane.b32.xlu1 %v10598_v7, %s12509_s22 }
 0xd2e   :  { %2283 = vrot.lane.b32.xlu0 %v10571_v2, %s12509_s22 }
 0xd93   :  { %v2212_v10 = vpop.xlane.xlu1 %2211 }
 0xd94   :  { %v2226_v11 = vsub.f32 %v2202_v46, %v2212_v10 }
 0xd95   :  { %v2209_v18 = vpop.xlane.xlu0 %2208 }
 0xd96   :  { %v2233_v16 = vmul.f32 1.442695, %v2226_v11  ;;  %v2225_v63 = vsub.f32 %v2201_v29, %v2209_v18 }
 0xd98   :  { %9589 = vpow2.f32 %v2233_v16  ;;  %v2231_v17 = vmul.f32 1.442695, %v2225_v63 }
 0xd99   :  { %v2218_v21 = vpop.xlane.xlu0 %2217 }
 0xd9a   :  { %9591 = vpow2.f32 %v2231_v17  ;;  %v2228_v58 = vsub.f32 %v2204_v1, %v2218_v21 }
 0xd9b   :  { %v2224_v4 = vpop.xlane.xlu1 %2223 }
 0xd9c   :  { %v2237_v3 = vmul.f32 1.442695, %v2228_v58  ;;  %v2230_v40 = vsub.f32 %v2206_v47, %v2224_v4  ;;  %v2501_v4 = vld [vmem:[%s12562_s23 + $0x38] sm:$0xff] }
 0xd9d   :  { %v2215_v6 = vpop.xlane.xlu0 %2214 }
 0xd9e   :  { %9593 = vpow2.f32 %v2237_v3  ;;  %v2241_v0 = vmul.f32 1.442695, %v2230_v40  ;;  %v2227_v7 = vsub.f32 %v2203_v37, %v2215_v6  ;;  %v2500_v3 = vld [vmem:[%s12562_s23 + $0x30] sm:$0xff]  ;;  %v2499_v40 = vld [vmem:[%s12562_s23 + $0x28] sm:$0xff]  ;;  %v2498_v6 = vld [vmem:[%s12562_s23 + $0x20] sm:$0xff] }
 0xd9f   :  { %v2282_v56 = vpop.permute.xlu1 %2281 }
 0xda0   :  { %9595 = vpow2.f32 %v2241_v0  ;;  %v2235_v2 = vmul.f32 1.442695, %v2227_v7  ;;  %v2497_v0 = vld [vmem:[%s12562_s23 + $0x18] sm:$0xff]  ;;  %v2496_v7 = vld [vmem:[%s12562_s23 + $0x10] sm:$0xff] }
 0xda1   :  { %v2221_v38 = vpop.xlane.xlu0 %2220 }
 0xda2   :  { %9597 = vpow2.f32 %v2235_v2  ;;  %v2229_v46 = vsub.f32 %v2205_v42, %v2221_v38  ;;  %v2494_v2 = vld [vmem:[%s12562_s23] sm:$0xff] }
 0xda3   :  { %v2280_v54 = vpop.permute.xlu1 %2279 }
 0xda4   :  { %v2239_v23 = vmul.f32 1.442695, %v2229_v46 }
 0xda5   :  { %v11079_v29 = vpop.eup %9589  ;;  %v2284_v22 = vpop.permute.xlu0 %2283 }
 0xda6   :  { %9599 = vpow2.f32 %v2239_v23  ;;  %8944 = vmatprep.subr.mxu0 %v2284_v22  ;;  %v2246_v1 = vsel %vm1162_vm6, %v11079_v29, 0.0 }
 0xda7   :  { %v9592_v34 = vpop.eup %9591  ;;  %2247 = vadd.xlane.f32.xlu1 %v2246_v1  ;;  %8945 = vmatpush3.msra.mxu0 %v2284_v22  ;;  %v2278_v19 = vpop.permute.xlu1 %2277 }
 0xda8   :  { %8946 = vmatprep.subr.mxu0 %v2282_v56  ;;  %v2243_v37 = vsel %vm1162_vm6, %v9592_v34, 0.0 }
 0xda9   :  { %2244 = vadd.xlane.f32.xlu0 %v2243_v37  ;;  %8947 = vmatpush3.msra.mxu0 %v2282_v56  ;;  %v2495_v56 = vld [vmem:[%s12562_s23 + $0x8] sm:$0xff] }
 0xdaa   :  { %8948 = vmatprep.subr.mxu0 %v2280_v54 }
 0xdab   :  { %v9594_v47 = vpop.eup %9593  ;;  %8949 = vmatpush3.msra.mxu0 %v2280_v54 }
 0xdac   :  { %8950 = vmatprep.subr.mxu0 %v2278_v19  ;;  %v2252_v60 = vsel %vm1162_vm6, %v9594_v47, 0.0 }
 0xdad   :  { %v9596_v43 = vpop.eup %9595  ;;  %2253 = vadd.xlane.f32.xlu1 %v2252_v60  ;;  %8951 = vmatpush3.msra.mxu0 %v2278_v19 }
 0xdae   :  { %v2258_v53 = vsel %vm1162_vm6, %v9596_v43, 0.0 }
 0xdaf   :  { %v9598_v42 = vpop.eup %9597 }
 0xdb0   :  { %v2249_v51 = vsel %vm1162_vm6, %v9598_v42, 0.0 }
 0xdb1   :  { %2259 = vadd.xlane.f32.xlu1 %v2258_v53  ;;  %2250 = vadd.xlane.f32.xlu0 %v2249_v51 }
 0xdb3   :  { %v9600_v10 = vpop.eup %9599 }
 0xdb4   :  { %v2255_v11 = vsel %vm1162_vm6, %v9600_v10, 0.0 }
 0xdb5   :  { %2256 = vadd.xlane.f32.xlu0 %v2255_v11 }
 0xdc2   :  { %2273 = vrot.lane.b32.xlu1 %v10612_v9, %s12509_s22 }
 0xdc6   :  { %2412 = vrot.lane.b32.xlu1 %v10968_v48, %s12511_s18 }
 0xdca   :  { %2436 = vrot.lane.b32.xlu1 %v11047_v12, %s12515_s1 }
 0xdcb   :  { %2275 = vrot.lane.b32.xlu0 %v10603_v8, %s12509_s22  ;;  %s12566_s22 = sld [smem:[#allocation13_spill]] }
 0xdce   :  { %2416 = vrot.lane.b32.xlu1 %v10972_v32, %s12511_s18 }
 0xdcf   :  { %2410 = vrot.lane.b32.xlu0 %v10970_v13, %s12511_s18 }
 0xdd2   :  { %2440 = vrot.lane.b32.xlu1 %v11051_v45, %s12515_s1 }
 0xdd3   :  { %2434 = vrot.lane.b32.xlu0 %v11049_v26, %s12515_s1 }
 0xdd6   :  { %2420 = vrot.lane.b32.xlu1 %v10976_v20, %s12511_s18 }
 0xdd7   :  { %2414 = vrot.lane.b32.xlu0 %v10974_v15, %s12511_s18 }
 0xdda   :  { %2444 = vrot.lane.b32.xlu1 %v11055_v55, %s12515_s1 }
 0xddb   :  { %2438 = vrot.lane.b32.xlu0 %v11053_v5, %s12515_s1 }
 0xddf   :  { %2418 = vrot.lane.b32.xlu0 %v10978_v35, %s12511_s18  ;;  %s12567_s18 = sld [smem:[#allocation15_spill]] }
 0xde3   :  { %2442 = vrot.lane.b32.xlu0 %v11057_v62, %s12515_s1  ;;  %s12569_s1 = sld [smem:[#allocation18_spill]] }
 0xe30   :  { %v2248_v8 = vpop.xlane.xlu1 %2247 }
 0xe32   :  { %v2245_v9 = vpop.xlane.xlu0 %2244 }
 0xe33   :  { %9601 = vrcp.f32 %v2245_v9 }
 0xe34   :  { %9603 = vrcp.f32 %v2248_v8 }
 0xe36   :  { %v2254_v48 = vpop.xlane.xlu1 %2253 }
 0xe37   :  { %9605 = vrcp.f32 %v2254_v48 }
 0xe3a   :  { %v2251_v13 = vpop.xlane.xlu0 %2250  ;;  %v2260_v32 = vpop.xlane.xlu1 %2259 }
 0xe3b   :  { %9607 = vrcp.f32 %v2251_v13 }
 0xe3c   :  { %9609 = vrcp.f32 %v2260_v32 }
 0xe3e   :  { %v2257_v15 = vpop.xlane.xlu0 %2256  ;;  %v2274_v35 = vpop.permute.xlu1 %2273 }
 0xe3f   :  { %9611 = vrcp.f32 %v2257_v15 }
 0xe40   :  { %v9602_v20 = vpop.eup %9601 }
 0xe41   :  { %v2262_v12 = vmul.f32 %v9602_v20, %v9592_v34  ;;  %v9604_v26 = vpop.eup %9603 }
 0xe42   :  { %v2276_v45 = vpop.permute.xlu0 %2275  ;;  %v2264_v5 = vmul.f32 %v9604_v26, %v11079_v29  ;;  %v2413_v1 = vpop.permute.xlu1 %2412 }
 0xe43   :  { %8952 = vmatprep.subr.mxu0 %v2276_v45  ;;  %8956 = vmatprep.mubr.msk.f32.mxu0 %vm1162_vm6, %v2262_v12  ;;  %v2477_v48 = vsel %vm654_vm3, %v10956_v27, %v2413_v1 }
 0xe44   :  { %8953 = vmatpush3.msra.mxu0 %v2276_v45  ;;  %v9606_v55 = vpop.eup %9605 }
 0xe45   :  { %8954 = vmatprep.subr.mxu0 %v2274_v35  ;;  %v2268_v63 = vmul.f32 %v9606_v55, %v9594_v47 }
 0xe46   :  { %8955 = vmatpush3.msra.mxu0 %v2274_v35  ;;  %v2411_v34 = vpop.permute.xlu0 %2410  ;;  %v2437_v37 = vpop.permute.xlu1 %2436 }
 0xe47   :  { %8957 = vmatmul.mubr.msk.f32.vlgmr.msra.gmra.mxu0 %vm1162_vm6, %v2264_v5  ;;  %8965 = vmatprep.subr.mxu0 %v2501_v4  ;;  %v2476_v9 = vsel %vm654_vm3, %v10958_v59, %v2411_v34  ;;  %v2483_v15 = vsel %vm322_vm2, %v2477_v48, %v2437_v37 }
 0xe48   :  { %v9608_v62 = vpop.eup %9607  ;;  %8966 = vmatpush3.msra.mxu0 %v2501_v4 }
 0xe49   :  { %v2266_v18 = vmul.f32 %v9608_v62, %v9598_v42  ;;  %v9610_v16 = vpop.eup %9609  ;;  %8967 = vmatprep.subr.mxu0 %v2500_v3 }
 0xe4a   :  { %v2272_v58 = vmul.f32 %v9610_v16, %v9596_v43  ;;  %8968 = vmatpush3.msra.mxu0 %v2500_v3  ;;  %v2435_v47 = vpop.permute.xlu0 %2434  ;;  %v2417_v19 = vpop.permute.xlu1 %2416 }
 0xe4b   :  { %8959 = vmatprep.mubr.msk.f32.mxu0 %vm1162_vm6, %v2266_v18  ;;  %8969 = vmatprep.subr.mxu0 %v2499_v40  ;;  %v2482_v13 = vsel %vm322_vm2, %v2476_v9, %v2435_v47  ;;  %v2479_v27 = vsel %vm654_vm3, %v10960_v25, %v2417_v19 }
 0xe4c   :  { %v9612_v17 = vpop.eup %9611  ;;  %8960 = vmatmul.mubr.msk.f32.gmra.mxu0 %vm1162_vm6, %v2268_v63 }
 0xe4d   :  { %v2270_v21 = vmul.f32 %v9612_v17, %v9600_v10  ;;  %8970 = vmatpush3.msra.mxu0 %v2499_v40 }
 0xe4e   :  { %8971 = vmatprep.subr.mxu0 %v2498_v6  ;;  %v2415_v60 = vpop.permute.xlu0 %2414  ;;  %v2441_v43 = vpop.permute.xlu1 %2440 }
 0xe4f   :  { %8962 = vmatprep.mubr.msk.f32.mxu0 %vm1162_vm6, %v2270_v21  ;;  %8972 = vmatpush3.msra.mxu0 %v2498_v6  ;;  %v2478_v59 = vsel %vm654_vm3, %v10962_v14, %v2415_v60  ;;  %v2485_v5 = vsel %vm322_vm2, %v2479_v27, %v2441_v43 }
 0xe50   :  { %8963 = vmatmul.mubr.msk.f32.gmra.mxu0 %vm1162_vm6, %v2272_v58  ;;  %8973 = vmatprep.subr.mxu0 %v2497_v0 }
 0xe51   :  { %8974 = vmatpush3.msra.mxu0 %v2497_v0 }
 0xe52   :  { %8975 = vmatprep.subr.mxu0 %v2496_v7  ;;  %v2439_v42 = vpop.permute.xlu0 %2438  ;;  %v2421_v53 = vpop.permute.xlu1 %2420 }
 0xe53   :  { %8976 = vmatpush3.msra.mxu0 %v2496_v7  ;;  %v2484_v45 = vsel %vm322_vm2, %v2478_v59, %v2439_v42  ;;  %v2481_v25 = vsel %vm654_vm3, %v10964_v31, %v2421_v53 }
 0xe54   :  { %8977 = vmatprep.subr.mxu0 %v2495_v56 }
 0xe55   :  { %8978 = vmatpush3.msra.mxu0 %v2495_v56 }
 0xe56   :  { %8979 = vmatprep.subr.mxu0 %v2494_v2  ;;  %v2419_v51 = vpop.permute.xlu0 %2418  ;;  %v2445_v10 = vpop.permute.xlu1 %2444 }
 0xe57   :  { %8980 = vmatpush3.msra.mxu0 %v2494_v2  ;;  %v2480_v18 = vsel %vm654_vm3, %v10966_v57, %v2419_v51  ;;  %v2487_v17 = vsel %vm322_vm2, %v2481_v25, %v2445_v10  ;;  %v8040_v57 = vld [vmem:[%s12563_s26] ss:$0 sm:$0xff] }
 0xe5a   :  { %v2443_v11 = vpop.permute.xlu0 %2442 }
 0xe5b   :  { %v2486_v14 = vsel %vm322_vm2, %v2480_v18, %v2443_v11 }
 0xf07   :  { %v8958_v38 = vpop.f32.mrf.mxu0 }
 0xf08   :  { %2460 = vrot.lane.b32.xlu1 %v8958_v38, %s12519_s10 }
 0xf09   :  { %v2375_v46 = vpop.f32.mrf.mxu0 }
 0xf0a   :  { %2458 = vrot.lane.b32.xlu0 %v2375_v46, %s12519_s10 }
 0xf0c   :  { %v8961_v23 = vpop.f32.mrf.mxu0 }
 0xf0d   :  { %2464 = vrot.lane.b32.xlu1 %v8961_v23, %s12519_s10 }
 0xf0e   :  { %v2385_v29 = vpop.f32.mrf.mxu0 }
 0xf0f   :  { %2462 = vrot.lane.b32.xlu0 %v2385_v29, %s12519_s10 }
 0xf10   :  { %v8964_v54 = vpop.f32.mrf.mxu0 }
 0xf11   :  { %2468 = vrot.lane.b32.xlu1 %v8964_v54, %s12519_s10 }
 0xf12   :  { %v2395_v22 = vpop.f32.mrf.mxu0 }
 0xf13   :  { %2466 = vrot.lane.b32.xlu0 %v2395_v22, %s12519_s10  ;;  %s12574_s10 = sld [smem:[#allocation19_spill]] }
 0xf7a   :  { %v2461_v8 = vpop.permute.xlu1 %2460 }
 0xf7b   :  { %v2489_v12 = vsel %vm1162_vm6, %v2483_v15, %v2461_v8 }
 0xf7c   :  { %v2459_v32 = vpop.permute.xlu0 %2458 }
 0xf7d   :  { %v2488_v20 = vsel %vm1162_vm6, %v2482_v13, %v2459_v32 }
 0xf7e   :  { %8981 = vmatprep.mubr.msk.f32.mxu0 %vm2509_vm7, %v2488_v20 }
 0xf7f   :  { %8982 = vmatmul.mubr.msk.f32.vlgmr.msra.gmra.mxu0 %vm2509_vm7, %v2489_v12  ;;  %v2465_v26 = vpop.permute.xlu1 %2464 }
 0xf80   :  { %v2491_v62 = vsel %vm1162_vm6, %v2485_v5, %v2465_v26 }
 0xf81   :  { %v2463_v35 = vpop.permute.xlu0 %2462 }
 0xf82   :  { %v2490_v55 = vsel %vm1162_vm6, %v2484_v45, %v2463_v35 }
 0xf83   :  { %8984 = vmatprep.mubr.msk.f32.mxu0 %vm2509_vm7, %v2490_v55  ;;  %v2469_v16 = vpop.permute.xlu1 %2468 }
 0xf84   :  { %8985 = vmatmul.mubr.msk.f32.gmra.mxu0 %vm2509_vm7, %v2491_v62  ;;  %v2493_v58 = vsel %vm1162_vm6, %v2487_v17, %v2469_v16  ;;  %v205_v17 = vld [vmem:[%s12564_s28 + $0x20] sm:$0xff] }
 0xf85   :  { %v2467_v63 = vpop.permute.xlu0 %2466  ;;  %2780 = vmatprep.subr.mxu1 %v205_v17 }
 0xf86   :  { %v2492_v21 = vsel %vm1162_vm6, %v2486_v14, %v2467_v63 }
 0xf87   :  { %8987 = vmatprep.mubr.msk.f32.mxu0 %vm2509_vm7, %v2492_v21  ;;  %v204_v21 = vld [vmem:[%s12564_s28 + $0x18] sm:$0xff] }
 0xf88   :  { %8988 = vmatmul.mubr.msk.f32.gmra.mxu0 %vm2509_vm7, %v2493_v58  ;;  %v206_v58 = vld [vmem:[%s12564_s28 + $0x28] sm:$0xff]  ;;  %2781 = vmatpush1.msra.mxu1 %v204_v21 }
 0xf89   :  { %8990 = vmatprep.subr.mxu0 %v206_v58 }
 0xf8a   :  { %8991 = vmatpush3.msra.mxu0 %v206_v58  ;;  %v224_v58 = vld [vmem:[%s12567_s18 + $0x88] sm:$0xff] }
0x103f   :  { %v8983_v4 = vpop.f32.mrf.mxu0 }
0x1040   :  { %v2600_v3 = vadd.f32 %v8983_v4, %v8040_v57  ;;  %v201_v4 = vld [vmem:[%s12564_s28] sm:$0xff] }
0x1041   :  { %v2594_v40 = vpop.f32.mrf.mxu0 }
0x1042   :  { %v2624_v6 = vadd.f32 %v2600_v3, %v10513_v28  ;;  %v2595_v31 = vadd.f32 %v8040_v57, %v2594_v40  ;;  %v203_v3 = vld [vmem:[%s12564_s28 + $0x10] sm:$0xff] }
0x1043   :  { %8992 = vmatprep.subr.mxu0 %v203_v3 }
0x1044   :  { %v2623_v0 = vadd.f32 %v2595_v31, %v10507_v24  ;;  %v2632_v7 = vsel %vm654_vm3, %v2624_v6, 0.0  ;;  %v8986_v56 = vpop.f32.mrf.mxu0  ;;  %8993 = vmatpush3.msra.mxu0 %v203_v3  ;;  %v221_v3 = vld [vmem:[%s12567_s18 + $0x70] sm:$0xff] }
0x1045   :  { %2633 = vadd.xlane.f32.xlu1 %v2632_v7  ;;  %v2610_v2 = vadd.f32 %v8986_v56, %v8040_v57 }
0x1046   :  { %v2629_v38 = vsel %vm654_vm3, %v2623_v0, 0.0  ;;  %v2604_v46 = vpop.f32.mrf.mxu0 }
0x1047   :  { %2630 = vadd.xlane.f32.xlu0 %v2629_v38  ;;  %v2626_v23 = vadd.f32 %v2610_v2, %v10525_v33  ;;  %v2605_v29 = vadd.f32 %v8040_v57, %v2604_v46 }
0x1048   :  { %v8989_v54 = vpop.f32.mrf.mxu0 }
0x1049   :  { %v2625_v22 = vadd.f32 %v2605_v29, %v10519_v30  ;;  %v2620_v1 = vadd.f32 %v8989_v54, %v8040_v57  ;;  %v2638_v28 = vsel %vm654_vm3, %v2626_v23, 0.0 }
0x104a   :  { %v2614_v34 = vpop.f32.mrf.mxu0 }
0x104b   :  { %2639 = vadd.xlane.f32.xlu0 %v2638_v28  ;;  %v2628_v24 = vadd.f32 %v2620_v1, %v10537_v39  ;;  %v2615_v37 = vadd.f32 %v8040_v57, %v2614_v34  ;;  %v2635_v60 = vsel %vm654_vm3, %v2625_v22, 0.0  ;;  %v202_v57 = vld [vmem:[%s12564_s28 + $0x8] sm:$0xff] }
0x104c   :  { %2782 = vmatprep.subr.mxu1 %v202_v57 }
0x104d   :  { %v2627_v47 = vadd.f32 %v2615_v37, %v10531_v36  ;;  %v2644_v19 = vsel %vm654_vm3, %v2628_v24, 0.0  ;;  %2783 = vmatpush1.msra.mxu1 %v201_v4 }
0x104e   :  { %2645 = vadd.xlane.f32.xlu1 %v2644_v19  ;;  %9003 = vmatprep.subr.mxu1 %v12561_v52  ;;  %v8047_v19 = vld [vmem:[%s12565_s2] ss:$0 sm:$0xff] }
0x104f   :  { %2636 = vadd.xlane.f32.xlu0 %v2635_v60  ;;  %v2641_v33 = vsel %vm654_vm3, %v2627_v47, 0.0 }
0x1053   :  { %2642 = vadd.xlane.f32.xlu0 %v2641_v33 }
0x10ce   :  { %v2634_v30 = vpop.xlane.xlu1 %2633 }
0x10cf   :  { %v2649_v43 = vmul.f32 0.0625, %v2634_v30 }
0x10d0   :  { %v2631_v42 = vpop.xlane.xlu0 %2630 }
0x10d1   :  { %v11180_v53 = vsub.f32 %v2624_v6, %v2649_v43  ;;  %v2648_v51 = vmul.f32 0.0625, %v2631_v42 }
0x10d3   :  { %v11182_v10 = vsub.f32 %v2623_v0, %v2648_v51  ;;  %v2661_v36 = vmul.f32 %v11180_v53, %v11180_v53  ;;  %v8048_v51 = vld [vmem:[%s12566_s22] ss:$0 sm:$0xff] }
0x10d4   :  { %v2640_v39 = vpop.xlane.xlu0 %2639 }
0x10d5   :  { %v2651_v11 = vmul.f32 0.0625, %v2640_v39  ;;  %v2669_v8 = vsel %vm654_vm3, %v2661_v36, 0.0  ;;  %v2660_v9 = vmul.f32 %v11182_v10, %v11182_v10 }
0x10d6   :  { %2670 = vadd.xlane.f32.xlu1 %v2669_v8 }
0x10d7   :  { %v11189_v48 = vsub.f32 %v2626_v23, %v2651_v11  ;;  %v2666_v13 = vsel %vm654_vm3, %v2660_v9, 0.0  ;;  %v2646_v32 = vpop.xlane.xlu1 %2645 }
0x10d8   :  { %2667 = vadd.xlane.f32.xlu0 %v2666_v13  ;;  %v2637_v15 = vpop.xlane.xlu0 %2636  ;;  %v2653_v20 = vmul.f32 0.0625, %v2646_v32 }
0x10d9   :  { %v2650_v12 = vmul.f32 0.0625, %v2637_v15  ;;  %v2663_v26 = vmul.f32 %v11189_v48, %v11189_v48 }
0x10da   :  { %v11194_v59 = vsub.f32 %v2628_v24, %v2653_v20 }
0x10db   :  { %v11196_v27 = vsub.f32 %v2625_v22, %v2650_v12  ;;  %v2675_v45 = vsel %vm654_vm3, %v2663_v26, 0.0 }
0x10dc   :  { %2676 = vadd.xlane.f32.xlu1 %v2675_v45  ;;  %v2643_v35 = vpop.xlane.xlu0 %2642  ;;  %v2665_v55 = vmul.f32 %v11194_v59, %v11194_v59 }
0x10dd   :  { %v2652_v5 = vmul.f32 0.0625, %v2643_v35  ;;  %v2662_v62 = vmul.f32 %v11196_v27, %v11196_v27 }
0x10de   :  { %v2681_v16 = vsel %vm654_vm3, %v2665_v55, 0.0 }
0x10df   :  { %v11203_v18 = vsub.f32 %v2627_v47, %v2652_v5  ;;  %v2672_v25 = vsel %vm654_vm3, %v2662_v62, 0.0 }
0x10e0   :  { %2682 = vadd.xlane.f32.xlu1 %v2681_v16  ;;  %2673 = vadd.xlane.f32.xlu0 %v2672_v25 }
0x10e1   :  { %v2664_v14 = vmul.f32 %v11203_v18, %v11203_v18 }
0x10e3   :  { %v2678_v63 = vsel %vm654_vm3, %v2664_v14, 0.0 }
0x10e4   :  { %2679 = vadd.xlane.f32.xlu0 %v2678_v63 }
0x115f   :  { %v2671_v40 = vpop.xlane.xlu1 %2670 }
0x1160   :  { %v2685_v6 = vmul.f32 0.0625, %v2671_v40 }
0x1161   :  { %v2668_v31 = vpop.xlane.xlu0 %2667 }
0x1162   :  { %v2691_v0 = vadd.f32 1e-05, %v2685_v6  ;;  %v2684_v7 = vmul.f32 0.0625, %v2668_v31  ;;  %v218_v31 = vld [vmem:[%s12567_s18 + $0x58] sm:$0xff] }
0x1164   :  { %9613 = vrsqrt.f32 %v2691_v0  ;;  %v2690_v56 = vadd.f32 1e-05, %v2684_v7 }
0x1165   :  { %v2677_v2 = vpop.xlane.xlu1 %2676 }
0x1166   :  { %9615 = vrsqrt.f32 %v2690_v56  ;;  %v2687_v38 = vmul.f32 0.0625, %v2677_v2  ;;  %v215_v2 = vld [vmem:[%s12567_s18 + $0x40] sm:$0xff] }
0x1168   :  { %v2693_v46 = vadd.f32 1e-05, %v2687_v38 }
0x1169   :  { %v2683_v23 = vpop.xlane.xlu1 %2682  ;;  %v2674_v29 = vpop.xlane.xlu0 %2673 }
0x116a   :  { %9617 = vrsqrt.f32 %v2693_v46  ;;  %v2689_v54 = vmul.f32 0.0625, %v2683_v23  ;;  %v2686_v22 = vmul.f32 0.0625, %v2674_v29  ;;  %v212_v23 = vld [vmem:[%s12567_s18 + $0x28] sm:$0xff] }
0x116c   :  { %v2695_v1 = vadd.f32 1e-05, %v2689_v54  ;;  %v2692_v28 = vadd.f32 1e-05, %v2686_v22  ;;  %v223_v22 = vld [vmem:[%s12567_s18 + $0x80] sm:$0xff] }
0x116d   :  { %v2680_v34 = vpop.xlane.xlu0 %2679 }
0x116e   :  { %9619 = vrsqrt.f32 %v2695_v1  ;;  %v2688_v24 = vmul.f32 0.0625, %v2680_v34  ;;  %v209_v1 = vld [vmem:[%s12567_s18 + $0x10] sm:$0xff] }
0x116f   :  { %9621 = vrsqrt.f32 %v2692_v28  ;;  %v222_v28 = vld [vmem:[%s12567_s18 + $0x78] sm:$0xff] }
0x1170   :  { %v2694_v37 = vadd.f32 1e-05, %v2688_v24  ;;  %v220_v24 = vld [vmem:[%s12567_s18 + $0x68] sm:$0xff] }
0x1171   :  { %v9614_v47 = vpop.eup %9613 }
0x1172   :  { %v2703_v60 = vmul.f32 %v9614_v47, %v11180_v53  ;;  %9623 = vrsqrt.f32 %v2694_v37  ;;  %v219_v47 = vld [vmem:[%s12567_s18 + $0x60] sm:$0xff] }
0x1173   :  { %v9616_v33 = vpop.eup %9615 }
0x1174   :  { %v2702_v30 = vmul.f32 %v9616_v33, %v11182_v10  ;;  %v2716_v43 = vmul.f32 %v8047_v19, %v2703_v60  ;;  %v217_v33 = vld [vmem:[%s12567_s18 + $0x50] sm:$0xff] }
0x1176   :  { %v2715_v42 = vmul.f32 %v8047_v19, %v2702_v30  ;;  %v2729_v11 = vadd.f32 %v8048_v51, %v2716_v43  ;;  %v225_v43 = vld [vmem:[%s12568_s16] sm:$0x3] }
0x1177   :  { %v9618_v36 = vpop.eup %9617 }
0x1178   :  { %v2728_v39 = vadd.f32 %v8048_v51, %v2715_v42  ;;  %v2705_v8 = vmul.f32 %v9618_v36, %v11189_v48  ;;  %v216_v42 = vld [vmem:[%s12567_s18 + $0x48] sm:$0xff] }
0x1179   :  { %v3299_v36 = vld [vmem:[#allocation2 + $0x5e8] sm:$0xff] }
0x117a   :  { %8049 = vmatmul.mubr.msk.f32.vlgmr.msra.gmra.mxu1 %vm654_vm3, %v2728_v39  ;;  %8994 = vmatprep.mubr.msk.f32.mxu0 %vm654_vm3, %v2728_v39  ;;  %v2718_v13 = vmul.f32 %v8047_v19, %v2705_v8  ;;  %v214_v39 = vld [vmem:[%s12567_s18 + $0x38] sm:$0xff]  ;;  %v3298_v8 = vld [vmem:[#allocation2 + $0x5e0] sm:$0xff] }
0x117b   :  { %v9620_v9 = vpop.eup %9619  ;;  %8995 = vmatmul.mubr.msk.f32.vlgmr.msra.gmra.mxu0 %vm654_vm3, %v2729_v11  ;;  %2822 = vmatprep.mubr.f32.mxu1 %v12561_v52 }
0x117c   :  { %v9622_v53 = vpop.eup %9621  ;;  %v2707_v32 = vmul.f32 %v9620_v9, %v11194_v59  ;;  %v2731_v26 = vadd.f32 %v8048_v51, %v2718_v13  ;;  %v213_v9 = vld [vmem:[%s12567_s18 + $0x30] sm:$0xff]  ;;  %v211_v13 = vld [vmem:[%s12567_s18 + $0x20] sm:$0xff] }
0x117d   :  { %v2704_v10 = vmul.f32 %v9622_v53, %v11196_v27 }
0x117e   :  { %8050 = vmatmul.mubr.msk.f32.gmra.mxu1 %vm654_vm3, %v2729_v11  ;;  %v2720_v35 = vmul.f32 %v8047_v19, %v2707_v32 }
0x117f   :  { %v9624_v15 = vpop.eup %9623  ;;  %2828 = vmatprep.mubr.f32.mxu1 %v12561_v52  ;;  %v2717_v20 = vmul.f32 %v8047_v19, %v2704_v10  ;;  %v3295_v10 = vld [vmem:[#allocation2 + $0x5c8] sm:$0xff] }
0x1180   :  { %v2706_v12 = vmul.f32 %v9624_v15, %v11203_v18  ;;  %v2733_v59 = vadd.f32 %v8048_v51, %v2720_v35  ;;  %v3294_v15 = vld [vmem:[#allocation2 + $0x5c0] sm:$0xff] }
0x1181   :  { %v2730_v48 = vadd.f32 %v8048_v51, %v2717_v20  ;;  %v210_v20 = vld [vmem:[%s12567_s18 + $0x18] sm:$0xff]  ;;  %v3290_v35 = vld [vmem:[#allocation2 + $0x5a0] sm:$0xff] }
0x1182   :  { %v2719_v45 = vmul.f32 %v8047_v19, %v2706_v12 }
0x1183   :  { %8051 = vmatmul.mubr.msk.f32.gmra.mxu1 %vm654_vm3, %v2730_v48  ;;  %8997 = vmatprep.mubr.msk.f32.mxu0 %vm654_vm3, %v2730_v48  ;;  %v3291_v48 = vld [vmem:[#allocation2 + $0x5a8] sm:$0xff] }
0x1184   :  { %8998 = vmatmul.mubr.msk.f32.gmra.mxu0 %vm654_vm3, %v2731_v26  ;;  %2834 = vmatprep.mubr.f32.mxu1 %v12561_v52  ;;  %v2732_v27 = vadd.f32 %v8048_v51, %v2719_v45 }
0x1186   :  { %9000 = vmatprep.mubr.msk.f32.mxu0 %vm654_vm3, %v2732_v27 }
0x1187   :  { %8052 = vmatmul.mubr.msk.f32.gmra.mxu1 %vm654_vm3, %v2731_v26  ;;  %v208_v26 = vld [vmem:[%s12567_s18 + $0x8] sm:$0xff] }
0x1188   :  { %9001 = vmatmul.mubr.msk.f32.gmra.mxu0 %vm654_vm3, %v2733_v59  ;;  %2840 = vmatprep.mubr.f32.mxu1 %v12561_v52 }
0x1189   :  { %3033 = vmatprep.mubr.f32.mxu0 %v12561_v52 }
0x118b   :  { %8053 = vmatmul.mubr.msk.f32.gmra.mxu1 %vm654_vm3, %v2732_v27  ;;  %v207_v27 = vld [vmem:[%s12567_s18] sm:$0xff] }
0x118c   :  { %2846 = vmatprep.mubr.f32.mxu1 %v12561_v52 }
0x118f   :  { %8054 = vmatmul.mubr.msk.f32.gmra.mxu1 %vm654_vm3, %v2733_v59 }
0x1190   :  { %9015 = vmatprep.mubr.msk.f32.mxu1 %vm10181_vm0, %v12561_v52 }
0x123a   :  { %v11245_v5 = vpop.f32.mrf.mxu1 }
0x123b   :  { %v8996_v62 = vpop.f32.mrf.mxu0 }
0x123c   :  { %v11247_v55 = vpop.f32.mrf.mxu1  ;;  %v2953_v34 = vmul.f32 %v8996_v62, %v212_v23  ;;  %v3287_v62 = vld [vmem:[#allocation2 + $0x588] sm:$0xff]  ;;  %v3154_v23 = vld [vmem:[#allocation2 + $0x160] sm:$0xff] }
0x123d   :  { %v2919_v25 = vpop.f32.mrf.mxu0 }
0x123e   :  { %v11249_v18 = vpop.f32.mrf.mxu1  ;;  %v2950_v60 = vmul.f32 %v2919_v25, %v209_v1  ;;  %v3150_v1 = vld [vmem:[#allocation2 + $0x140] sm:$0xff] }
0x123f   :  { %v2951_v25 = vmul.f32 %v11249_v18, %v210_v20  ;;  %v3279_v18 = vld [vmem:[#allocation2 + $0x548] sm:$0xff] }
0x1240   :  { %v11251_v16 = vpop.f32.mrf.mxu1  ;;  %v3239_v20 = vld [vmem:[#allocation2 + $0x408] sm:$0xff] }
0x1241   :  { %v2952_v59 = vmul.f32 %v11251_v16, %v211_v13  ;;  %v3170_v16 = vld [vmem:[#allocation2 + $0x1e0] sm:$0xff] }
0x1242   :  { %v3130_v13 = vld [vmem:[#allocation2 + $0xa0] sm:$0xff] }
0x1243   :  { %v11253_v14 = vpop.f32.mrf.mxu1 }
0x1244   :  { %v8999_v63 = vpop.f32.mrf.mxu0  ;;  %v2954_v45 = vmul.f32 %v11253_v14, %v213_v9  ;;  %v2948_v14 = vmul.f32 %v11245_v5, %v207_v27  ;;  %v3275_v5 = vld [vmem:[#allocation2 + $0x528] sm:$0xff]  ;;  %v3246_v9 = vld [vmem:[#allocation2 + $0x440] sm:$0xff] }
0x1245   :  { %v2832_v17 = vpop.f32.mrf.mxu1  ;;  %v2959_v38 = vmul.f32 %v8999_v63, %v218_v31  ;;  %v3286_v63 = vld [vmem:[#allocation2 + $0x580] sm:$0xff] }
0x1246   :  { %v2929_v21 = vpop.f32.mrf.mxu0  ;;  %v2955_v12 = vmul.f32 %v2832_v17, %v214_v39  ;;  %v2949_v17 = vmul.f32 %v11247_v55, %v208_v26  ;;  %v3166_v55 = vld [vmem:[#allocation2 + $0x1c0] sm:$0xff]  ;;  %v3135_v39 = vld [vmem:[#allocation2 + $0xc8] sm:$0xff] }
0x1247   :  { %v2836_v57 = vpop.f32.mrf.mxu1  ;;  %v2956_v29 = vmul.f32 %v2929_v21, %v215_v2  ;;  %v3283_v21 = vld [vmem:[#allocation2 + $0x568] sm:$0xff]  ;;  %v3274_v31 = vld [vmem:[#allocation2 + $0x520] sm:$0xff] }
0x1248   :  { %v9002_v4 = vpop.f32.mrf.mxu0  ;;  %v2957_v32 = vmul.f32 %v2836_v57, %v216_v42  ;;  %v3282_v57 = vld [vmem:[#allocation2 + $0x560] sm:$0xff]  ;;  %v3251_v42 = vld [vmem:[#allocation2 + $0x468] sm:$0xff] }
0x1249   :  { %v2965_v40 = vmul.f32 %v9002_v4, %v224_v58  ;;  %v2838_v6 = vpop.f32.mrf.mxu1  ;;  %v3171_v58 = vld [vmem:[#allocation2 + $0x1e8] sm:$0xff]  ;;  %v3270_v2 = vld [vmem:[#allocation2 + $0x500] sm:$0xff] }
0x124a   :  { %v2939_v0 = vpop.f32.mrf.mxu0  ;;  %v2958_v53 = vmul.f32 %v2838_v6, %v217_v33  ;;  %v3167_v4 = vld [vmem:[#allocation2 + $0x1c8] sm:$0xff]  ;;  %v3162_v6 = vld [vmem:[#allocation2 + $0x1a0] sm:$0xff] }
0x124b   :  { %v2962_v7 = vmul.f32 %v2939_v0, %v221_v3  ;;  %v2842_v56 = vpop.f32.mrf.mxu1  ;;  %9004 = vmatpush3.msra.mxu1 %v2965_v40  ;;  %v3278_v3 = vld [vmem:[#allocation2 + $0x540] sm:$0xff]  ;;  %v3163_v40 = vld [vmem:[#allocation2 + $0x1a8] sm:$0xff] }
0x124c   :  { %9005 = vmatprep.subr.mxu1 %v12561_v52  ;;  %v2960_v11 = vmul.f32 %v2842_v56, %v219_v47  ;;  %v3159_v0 = vld [vmem:[#allocation2 + $0x188] sm:$0xff]  ;;  %v3158_v56 = vld [vmem:[#allocation2 + $0x180] sm:$0xff] }
0x124d   :  { %v2844_v46 = vpop.f32.mrf.mxu1  ;;  %9006 = vmatpush3.msra.mxu1 %v2962_v7  ;;  %v3271_v7 = vld [vmem:[#allocation2 + $0x508] sm:$0xff]  ;;  %v3258_v47 = vld [vmem:[#allocation2 + $0x4a0] sm:$0xff] }
0x124e   :  { %9007 = vmatprep.subr.mxu1 %v12561_v52  ;;  %v2961_v51 = vmul.f32 %v2844_v46, %v220_v24  ;;  %v3267_v46 = vld [vmem:[#allocation2 + $0x4e8] sm:$0xff]  ;;  %v3142_v33 = vld [vmem:[#allocation2 + $0x100] sm:$0xff] }
0x124f   :  { %v2848_v54 = vpop.f32.mrf.mxu1  ;;  %9008 = vmatpush3.msra.mxu1 %v2959_v38  ;;  %v3155_v38 = vld [vmem:[#allocation2 + $0x168] sm:$0xff]  ;;  %v3118_v27 = vld [vmem:[#allocation2 + $0x40] sm:$0xff] }
0x1250   :  { %9009 = vmatprep.subr.mxu1 %v12561_v52  ;;  %v2963_v30 = vmul.f32 %v2848_v54, %v222_v28  ;;  %v3151_v54 = vld [vmem:[#allocation2 + $0x148] sm:$0xff]  ;;  %v3262_v28 = vld [vmem:[#allocation2 + $0x4c0] sm:$0xff] }
0x1251   :  { %v2850_v37 = vpop.f32.mrf.mxu1  ;;  %9010 = vmatpush3.msra.mxu1 %v2956_v29  ;;  %v3266_v29 = vld [vmem:[#allocation2 + $0x4e0] sm:$0xff]  ;;  %v3259_v24 = vld [vmem:[#allocation2 + $0x4a8] sm:$0xff] }
0x1252   :  { %v2964_v19 = vmul.f32 %v2850_v37, %v223_v22  ;;  %9011 = vmatprep.subr.mxu1 %v12561_v52  ;;  %v3263_v22 = vld [vmem:[#allocation2 + $0x4c8] sm:$0xff]  ;;  %v3146_v37 = vld [vmem:[#allocation2 + $0x120] sm:$0xff] }
0x1253   :  { %9012 = vmatpush3.msra.mxu1 %v2953_v34  ;;  %v3147_v34 = vld [vmem:[#allocation2 + $0x128] sm:$0xff] }
0x1254   :  { %2989 = vmatprep.subr.mxu0 %v2964_v19  ;;  %9013 = vmatprep.subr.mxu1 %v12561_v52  ;;  %v3143_v19 = vld [vmem:[#allocation2 + $0x108] sm:$0xff] }
0x1255   :  { %2990 = vmatpush1.msra.mxu0 %v2963_v30  ;;  %9014 = vmatpush3.msra.mxu1 %v2950_v60  ;;  %v3255_v60 = vld [vmem:[#allocation2 + $0x488] sm:$0xff]  ;;  %v3254_v30 = vld [vmem:[#allocation2 + $0x480] sm:$0xff] }
0x1256   :  { %2991 = vmatprep.subr.mxu0 %v2961_v51  ;;  %9016 = vmatmul.mubr.msk.f32.vlgmr.msra.gmra.mxu1 %vm1162_vm6, %v225_v43  ;;  %v3138_v51 = vld [vmem:[#allocation2 + $0xe0] sm:$0xff]  ;;  %v3123_v26 = vld [vmem:[#allocation2 + $0x68] sm:$0xff] }
0x1257   :  { %2992 = vmatpush1.msra.mxu0 %v2960_v11  ;;  %3395 = vmatprep.subr.mxu1 %v3299_v36  ;;  %v3250_v36 = vld [vmem:[#allocation2 + $0x460] sm:$0xff]  ;;  %v3247_v11 = vld [vmem:[#allocation2 + $0x448] sm:$0xff] }
0x1258   :  { %2993 = vmatprep.subr.mxu0 %v2958_v53  ;;  %3396 = vmatpush1.msra.mxu1 %v3298_v8  ;;  %v3134_v8 = vld [vmem:[#allocation2 + $0xc0] sm:$0xff]  ;;  %v3131_v53 = vld [vmem:[#allocation2 + $0xa8] sm:$0xff] }
0x1259   :  { %2994 = vmatpush1.msra.mxu0 %v2957_v32  ;;  %3397 = vmatprep.subr.mxu1 %v3295_v10  ;;  %v3243_v10 = vld [vmem:[#allocation2 + $0x428] sm:$0xff]  ;;  %v3242_v32 = vld [vmem:[#allocation2 + $0x420] sm:$0xff] }
0x125a   :  { %2995 = vmatprep.subr.mxu0 %v2955_v12  ;;  %3398 = vmatpush1.msra.mxu1 %v3294_v15  ;;  %v3127_v15 = vld [vmem:[#allocation2 + $0x88] sm:$0xff]  ;;  %v3126_v12 = vld [vmem:[#allocation2 + $0x80] sm:$0xff] }
0x125b   :  { %2996 = vmatpush1.msra.mxu0 %v2954_v45  ;;  %3399 = vmatprep.subr.mxu1 %v3291_v48  ;;  %v3238_v48 = vld [vmem:[#allocation2 + $0x400] sm:$0xff] }
0x125c   :  { %2997 = vmatprep.subr.mxu0 %v2952_v59  ;;  %3400 = vmatpush1.msra.mxu1 %v3290_v35  ;;  %v3122_v45 = vld [vmem:[#allocation2 + $0x60] sm:$0xff]  ;;  %v3119_v35 = vld [vmem:[#allocation2 + $0x48] sm:$0xff] }
0x125d   :  { %2998 = vmatpush1.msra.mxu0 %v2951_v25  ;;  %3401 = vmatprep.subr.mxu1 %v3287_v62  ;;  %v3115_v59 = vld [vmem:[#allocation2 + $0x28] sm:$0xff]  ;;  %v3114_v62 = vld [vmem:[#allocation2 + $0x20] sm:$0xff] }
0x125e   :  { %2999 = vmatprep.subr.mxu0 %v2949_v17  ;;  %3402 = vmatpush1.msra.mxu1 %v3286_v63  ;;  %v3111_v25 = vld [vmem:[#allocation2 + $0x8] sm:$0xff]  ;;  %v3110_v63 = vld [vmem:[#allocation2] sm:$0xff] }
0x125f   :  { %3000 = vmatpush1.msra.mxu0 %v2948_v14  ;;  %3403 = vmatprep.subr.mxu1 %v3283_v21  ;;  %v3235_v17 = vld [vmem:[#allocation2 + $0x3e8] sm:$0xff]  ;;  %v3234_v21 = vld [vmem:[#allocation2 + $0x3e0] sm:$0xff] }
0x1260   :  { %8061 = vmatmul.mubr.msk.f32.vlgmr.msra.gmra.mxu0 %vm1162_vm6, %v225_v43  ;;  %3324 = vmatprep.subr.mxu0 %v3171_v58  ;;  %v3139_v43 = vld [vmem:[#allocation2 + $0xe8] sm:$0xff]  ;;  %v3230_v58 = vld [vmem:[#allocation2 + $0x3c0] sm:$0xff] }
0x1261   :  { %3325 = vmatpush1.msra.mxu0 %v3170_v16  ;;  %3404 = vmatpush1.msra.mxu1 %v3282_v57  ;;  %v3231_v14 = vld [vmem:[#allocation2 + $0x3c8] sm:$0xff]  ;;  %v3226_v57 = vld [vmem:[#allocation2 + $0x3a0] sm:$0xff] }
0x1262   :  { %3326 = vmatprep.subr.mxu0 %v3167_v4  ;;  %3405 = vmatprep.subr.mxu1 %v3279_v18  ;;  %v3227_v16 = vld [vmem:[#allocation2 + $0x3a8] sm:$0xff]  ;;  %v3222_v18 = vld [vmem:[#allocation2 + $0x380] sm:$0xff] }
0x1263   :  { %3327 = vmatpush1.msra.mxu0 %v3166_v55  ;;  %3406 = vmatpush1.msra.mxu1 %v3278_v3  ;;  %v3223_v4 = vld [vmem:[#allocation2 + $0x388] sm:$0xff]  ;;  %v3218_v3 = vld [vmem:[#allocation2 + $0x360] sm:$0xff] }
0x1264   :  { %3328 = vmatprep.subr.mxu0 %v3163_v40  ;;  %3407 = vmatprep.subr.mxu1 %v3275_v5  ;;  %v3219_v55 = vld [vmem:[#allocation2 + $0x368] sm:$0xff]  ;;  %v3214_v5 = vld [vmem:[#allocation2 + $0x340] sm:$0xff] }
0x1265   :  { %3329 = vmatpush1.msra.mxu0 %v3162_v6  ;;  %3408 = vmatpush1.msra.mxu1 %v3274_v31  ;;  %v3215_v40 = vld [vmem:[#allocation2 + $0x348] sm:$0xff]  ;;  %v3210_v31 = vld [vmem:[#allocation2 + $0x320] sm:$0xff] }
0x1266   :  { %3330 = vmatprep.subr.mxu0 %v3159_v0  ;;  %3409 = vmatprep.subr.mxu1 %v3271_v7  ;;  %v3211_v6 = vld [vmem:[#allocation2 + $0x328] sm:$0xff]  ;;  %v3206_v7 = vld [vmem:[#allocation2 + $0x300] sm:$0xff] }
0x1267   :  { %3331 = vmatpush1.msra.mxu0 %v3158_v56  ;;  %3410 = vmatpush1.msra.mxu1 %v3270_v2  ;;  %v3207_v0 = vld [vmem:[#allocation2 + $0x308] sm:$0xff]  ;;  %v3202_v2 = vld [vmem:[#allocation2 + $0x2e0] sm:$0xff] }
0x1268   :  { %3332 = vmatprep.subr.mxu0 %v3155_v38  ;;  %3411 = vmatprep.subr.mxu1 %v3267_v46  ;;  %v3203_v56 = vld [vmem:[#allocation2 + $0x2e8] sm:$0xff]  ;;  %v3198_v46 = vld [vmem:[#allocation2 + $0x2c0] sm:$0xff] }
0x1269   :  { %3333 = vmatpush1.msra.mxu0 %v3154_v23  ;;  %3412 = vmatpush1.msra.mxu1 %v3266_v29  ;;  %v3199_v38 = vld [vmem:[#allocation2 + $0x2c8] sm:$0xff]  ;;  %v3173_v23 = vld [vmem:[#allocation2 + $0x1f8] sm:$0xff] }
0x126a   :  { %3334 = vmatprep.subr.mxu0 %v3151_v54  ;;  %3413 = vmatprep.subr.mxu1 %v3263_v22  ;;  %v3195_v29 = vld [vmem:[#allocation2 + $0x2a8] sm:$0xff]  ;;  %v3194_v54 = vld [vmem:[#allocation2 + $0x2a0] sm:$0xff] }
0x126b   :  { %3335 = vmatpush1.msra.mxu0 %v3150_v1  ;;  %3414 = vmatpush1.msra.mxu1 %v3262_v28  ;;  %v3191_v22 = vld [vmem:[#allocation2 + $0x288] sm:$0xff]  ;;  %v3190_v1 = vld [vmem:[#allocation2 + $0x280] sm:$0xff] }
0x126c   :  { %3336 = vmatprep.subr.mxu0 %v3147_v34  ;;  %3415 = vmatprep.subr.mxu1 %v3259_v24  ;;  %v3187_v28 = vld [vmem:[#allocation2 + $0x268] sm:$0xff]  ;;  %v3186_v34 = vld [vmem:[#allocation2 + $0x260] sm:$0xff] }
0x126d   :  { %3337 = vmatpush1.msra.mxu0 %v3146_v37  ;;  %3416 = vmatpush1.msra.mxu1 %v3258_v47  ;;  %v3183_v24 = vld [vmem:[#allocation2 + $0x248] sm:$0xff]  ;;  %v3182_v37 = vld [vmem:[#allocation2 + $0x240] sm:$0xff] }
0x126e   :  { %3338 = vmatprep.subr.mxu0 %v3143_v19  ;;  %3417 = vmatprep.subr.mxu1 %v3255_v60  ;;  %v3179_v47 = vld [vmem:[#allocation2 + $0x228] sm:$0xff]  ;;  %v3178_v19 = vld [vmem:[#allocation2 + $0x220] sm:$0xff] }
0x126f   :  { %3339 = vmatpush1.msra.mxu0 %v3142_v33  ;;  %3418 = vmatpush1.msra.mxu1 %v3254_v30  ;;  %v3175_v60 = vld [vmem:[#allocation2 + $0x208] sm:$0xff]  ;;  %v3174_v33 = vld [vmem:[#allocation2 + $0x200] sm:$0xff]  ;;  %v3301_v30 = vld [vmem:[#allocation2 + $0x5f8] sm:$0xff] }
0x1270   :  { %3340 = vmatprep.subr.mxu0 %v3139_v43  ;;  %3419 = vmatprep.subr.mxu1 %v3251_v42  ;;  %v3172_v43 = vld [vmem:[#allocation2 + $0x1f0] sm:$0xff] }
0x1271   :  { %3341 = vmatpush1.msra.mxu0 %v3138_v51  ;;  %3420 = vmatpush1.msra.mxu1 %v3250_v36  ;;  %v3169_v51 = vld [vmem:[#allocation2 + $0x1d8] sm:$0xff]  ;;  %v3168_v36 = vld [vmem:[#allocation2 + $0x1d0] sm:$0xff] }
0x1272   :  { %3342 = vmatprep.subr.mxu0 %v3135_v39  ;;  %3421 = vmatprep.subr.mxu1 %v3247_v11  ;;  %v3165_v11 = vld [vmem:[#allocation2 + $0x1b8] sm:$0xff] }
0x1273   :  { %3343 = vmatpush1.msra.mxu0 %v3134_v8  ;;  %3422 = vmatpush1.msra.mxu1 %v3246_v9  ;;  %v3164_v8 = vld [vmem:[#allocation2 + $0x1b0] sm:$0xff]  ;;  %v3161_v9 = vld [vmem:[#allocation2 + $0x198] sm:$0xff] }
0x1274   :  { %3344 = vmatprep.subr.mxu0 %v3131_v53  ;;  %3423 = vmatprep.subr.mxu1 %v3243_v10  ;;  %v3160_v53 = vld [vmem:[#allocation2 + $0x190] sm:$0xff]  ;;  %v3157_v10 = vld [vmem:[#allocation2 + $0x178] sm:$0xff] }
0x1275   :  { %3345 = vmatpush1.msra.mxu0 %v3130_v13  ;;  %3424 = vmatpush1.msra.mxu1 %v3242_v32  ;;  %v3156_v13 = vld [vmem:[#allocation2 + $0x170] sm:$0xff]  ;;  %v3153_v32 = vld [vmem:[#allocation2 + $0x158] sm:$0xff] }
0x1276   :  { %3346 = vmatprep.subr.mxu0 %v3127_v15  ;;  %3425 = vmatprep.subr.mxu1 %v3239_v20  ;;  %v3152_v15 = vld [vmem:[#allocation2 + $0x150] sm:$0xff] }
0x1277   :  { %3347 = vmatpush1.msra.mxu0 %v3126_v12  ;;  %3426 = vmatpush1.msra.mxu1 %v3238_v48  ;;  %v3149_v12 = vld [vmem:[#allocation2 + $0x138] sm:$0xff]  ;;  %v3148_v48 = vld [vmem:[#allocation2 + $0x130] sm:$0xff] }
0x1278   :  { %3348 = vmatprep.subr.mxu0 %v3123_v26  ;;  %3459 = vmatprep.mubr.f32.mxu1 %v12561_v52 }
0x1279   :  { %3349 = vmatpush1.msra.mxu0 %v3122_v45  ;;  %3466 = vmatprep.subr.mxu1 %v3173_v23  ;;  %v3145_v45 = vld [vmem:[#allocation2 + $0x118] sm:$0xff] }
0x127a   :  { %3350 = vmatprep.subr.mxu0 %v3119_v35  ;;  %v3300_v35 = vld [vmem:[#allocation2 + $0x5f0] sm:$0xff]  ;;  %v3273_v23 = vld [vmem:[#allocation2 + $0x518] sm:$0xff] }
0x127b   :  { %3351 = vmatpush1.msra.mxu0 %v3118_v27  ;;  %v3144_v27 = vld [vmem:[#allocation2 + $0x110] sm:$0xff] }
0x127c   :  { %3352 = vmatprep.subr.mxu0 %v3115_v59  ;;  %v3297_v59 = vld [vmem:[#allocation2 + $0x5d8] sm:$0xff] }
0x127d   :  { %3353 = vmatpush1.msra.mxu0 %v3114_v62  ;;  %v3141_v62 = vld [vmem:[#allocation2 + $0xf8] sm:$0xff] }
0x127e   :  { %3354 = vmatprep.subr.mxu0 %v3111_v25  ;;  %v3296_v25 = vld [vmem:[#allocation2 + $0x5d0] sm:$0xff] }
0x127f   :  { %3355 = vmatpush1.msra.mxu0 %v3110_v63  ;;  %v3140_v63 = vld [vmem:[#allocation2 + $0xf0] sm:$0xff] }
0x1280   :  { %3356 = vmatprep.subr.mxu0 %v3235_v17  ;;  %v3293_v17 = vld [vmem:[#allocation2 + $0x5b8] sm:$0xff] }
0x1281   :  { %3357 = vmatpush2.msra.mxu0 %v3234_v21  ;;  %v3137_v21 = vld [vmem:[#allocation2 + $0xd8] sm:$0xff] }
0x1282   :  { %3358 = vmatprep.subr.mxu0 %v3231_v14  ;;  %v3292_v14 = vld [vmem:[#allocation2 + $0x5b0] sm:$0xff] }
0x1283   :  { %3359 = vmatpush2.msra.mxu0 %v3230_v58  ;;  %v3136_v58 = vld [vmem:[#allocation2 + $0xd0] sm:$0xff] }
0x1284   :  { %3360 = vmatprep.subr.mxu0 %v3227_v16  ;;  %v3289_v16 = vld [vmem:[#allocation2 + $0x598] sm:$0xff] }
0x1285   :  { %3361 = vmatpush2.msra.mxu0 %v3226_v57  ;;  %v3133_v57 = vld [vmem:[#allocation2 + $0xb8] sm:$0xff] }
0x1286   :  { %3362 = vmatprep.subr.mxu0 %v3223_v4  ;;  %v3288_v4 = vld [vmem:[#allocation2 + $0x590] sm:$0xff] }
0x1287   :  { %3363 = vmatpush2.msra.mxu0 %v3222_v18  ;;  %v3132_v18 = vld [vmem:[#allocation2 + $0xb0] sm:$0xff] }
0x1288   :  { %3364 = vmatprep.subr.mxu0 %v3219_v55  ;;  %v3285_v55 = vld [vmem:[#allocation2 + $0x578] sm:$0xff] }
0x1289   :  { %3365 = vmatpush2.msra.mxu0 %v3218_v3  ;;  %v3129_v3 = vld [vmem:[#allocation2 + $0x98] sm:$0xff] }
0x128a   :  { %3366 = vmatprep.subr.mxu0 %v3215_v40  ;;  %v3284_v40 = vld [vmem:[#allocation2 + $0x570] sm:$0xff] }
0x128b   :  { %3367 = vmatpush2.msra.mxu0 %v3214_v5  ;;  %v3128_v5 = vld [vmem:[#allocation2 + $0x90] sm:$0xff] }
0x128c   :  { %3368 = vmatprep.subr.mxu0 %v3211_v6  ;;  %v3281_v6 = vld [vmem:[#allocation2 + $0x558] sm:$0xff] }
0x128d   :  { %3369 = vmatpush2.msra.mxu0 %v3210_v31  ;;  %v3125_v31 = vld [vmem:[#allocation2 + $0x78] sm:$0xff] }
0x128e   :  { %3370 = vmatprep.subr.mxu0 %v3207_v0  ;;  %v3280_v0 = vld [vmem:[#allocation2 + $0x550] sm:$0xff] }
0x128f   :  { %3371 = vmatpush2.msra.mxu0 %v3206_v7  ;;  %v3124_v7 = vld [vmem:[#allocation2 + $0x70] sm:$0xff] }
0x1290   :  { %3372 = vmatprep.subr.mxu0 %v3203_v56  ;;  %v3277_v56 = vld [vmem:[#allocation2 + $0x538] sm:$0xff] }
0x1291   :  { %3373 = vmatpush2.msra.mxu0 %v3202_v2  ;;  %v3121_v2 = vld [vmem:[#allocation2 + $0x58] sm:$0xff] }
0x1292   :  { %3374 = vmatprep.subr.mxu0 %v3199_v38  ;;  %v3276_v38 = vld [vmem:[#allocation2 + $0x530] sm:$0xff] }
0x1293   :  { %3375 = vmatpush2.msra.mxu0 %v3198_v46  ;;  %v3120_v46 = vld [vmem:[#allocation2 + $0x50] sm:$0xff] }
0x1294   :  { %3376 = vmatprep.subr.mxu0 %v3195_v29  ;;  %v3117_v29 = vld [vmem:[#allocation2 + $0x38] sm:$0xff] }
0x1295   :  { %3377 = vmatpush2.msra.mxu0 %v3194_v54  ;;  %v3272_v54 = vld [vmem:[#allocation2 + $0x510] sm:$0xff] }
0x1296   :  { %3378 = vmatprep.subr.mxu0 %v3191_v22  ;;  %v3116_v22 = vld [vmem:[#allocation2 + $0x30] sm:$0xff] }
0x1297   :  { %3379 = vmatpush2.msra.mxu0 %v3190_v1  ;;  %v3269_v1 = vld [vmem:[#allocation2 + $0x4f8] sm:$0xff] }
0x1298   :  { %3380 = vmatprep.subr.mxu0 %v3187_v28  ;;  %v3113_v28 = vld [vmem:[#allocation2 + $0x18] sm:$0xff] }
0x1299   :  { %3381 = vmatpush2.msra.mxu0 %v3186_v34  ;;  %v3268_v34 = vld [vmem:[#allocation2 + $0x4f0] sm:$0xff] }
0x129a   :  { %3382 = vmatprep.subr.mxu0 %v3183_v24  ;;  %v3112_v24 = vld [vmem:[#allocation2 + $0x10] sm:$0xff] }
0x129b   :  { %3383 = vmatpush2.msra.mxu0 %v3182_v37  ;;  %v3265_v37 = vld [vmem:[#allocation2 + $0x4d8] sm:$0xff] }
0x129c   :  { %3384 = vmatprep.subr.mxu0 %v3179_v47  ;;  %v3237_v47 = vld [vmem:[#allocation2 + $0x3f8] sm:$0xff] }
0x129d   :  { %3385 = vmatpush2.msra.mxu0 %v3178_v19  ;;  %v3264_v19 = vld [vmem:[#allocation2 + $0x4d0] sm:$0xff] }
0x129e   :  { %3386 = vmatprep.subr.mxu0 %v3175_v60  ;;  %v3236_v60 = vld [vmem:[#allocation2 + $0x3f0] sm:$0xff] }
0x129f   :  { %3387 = vmatpush2.msra.mxu0 %v3174_v33  ;;  %v3261_v33 = vld [vmem:[#allocation2 + $0x4b8] sm:$0xff] }
0x12a0   :  { %3537 = vmatprep.subr.mxu0 %v3301_v30  ;;  %v3233_v30 = vld [vmem:[#allocation2 + $0x3d8] sm:$0xff] }
0x1316   :  { %v11287_v42 = vpop.f32.mrf.mxu1 }
0x1317   :  { %3460 = vmatmul.mubr.f32.vlgmr.msra.gmra.mxu1 %v11287_v42 }
0x1318   :  { %3467 = vmatpush1.msra.mxu1 %v3172_v43  ;;  %v9017_v39 = vpop.f32.mrf.mxu1  ;;  %v3260_v43 = vld [vmem:[#allocation2 + $0x4b0] sm:$0xff] }
0x1319   :  { %3468 = vmatprep.subr.mxu1 %v3169_v51  ;;  %v3232_v51 = vld [vmem:[#allocation2 + $0x3d0] sm:$0xff]  ;;  %v3229_v39 = vld [vmem:[#allocation2 + $0x3b8] sm:$0xff] }
0x131a   :  { %3469 = vmatpush1.msra.mxu1 %v3168_v36  ;;  %v3257_v36 = vld [vmem:[#allocation2 + $0x498] sm:$0xff] }
0x131b   :  { %3470 = vmatprep.subr.mxu1 %v3165_v11  ;;  %v3256_v11 = vld [vmem:[#allocation2 + $0x490] sm:$0xff] }
0x131c   :  { %3471 = vmatpush1.msra.mxu1 %v3164_v8  ;;  %v3228_v8 = vld [vmem:[#allocation2 + $0x3b0] sm:$0xff] }
0x131d   :  { %3472 = vmatprep.subr.mxu1 %v3161_v9  ;;  %v3253_v9 = vld [vmem:[#allocation2 + $0x478] sm:$0xff] }
0x131e   :  { %3473 = vmatpush1.msra.mxu1 %v3160_v53  ;;  %v3225_v53 = vld [vmem:[#allocation2 + $0x398] sm:$0xff] }
0x131f   :  { %3474 = vmatprep.subr.mxu1 %v3157_v10  ;;  %v3252_v10 = vld [vmem:[#allocation2 + $0x470] sm:$0xff] }
0x1320   :  { %3475 = vmatpush1.msra.mxu1 %v3156_v13  ;;  %v11290_v20 = vpop.f32.mrf.mxu0  ;;  %v3224_v13 = vld [vmem:[#allocation2 + $0x390] sm:$0xff] }
0x1321   :  { %3476 = vmatprep.subr.mxu1 %v3153_v32  ;;  %v3249_v32 = vld [vmem:[#allocation2 + $0x458] sm:$0xff] }
0x1322   :  { %3477 = vmatpush1.msra.mxu1 %v3152_v15  ;;  %v11292_v26 = vpop.f32.mrf.mxu0  ;;  %v3221_v15 = vld [vmem:[#allocation2 + $0x378] sm:$0xff] }
0x1323   :  { %3478 = vmatprep.subr.mxu1 %v3149_v12  ;;  %3388 = vmatprep.mubr.f32.mxu0 %v11292_v26  ;;  %v3248_v12 = vld [vmem:[#allocation2 + $0x450] sm:$0xff] }
0x1324   :  { %3479 = vmatpush1.msra.mxu1 %v3148_v48  ;;  %3389 = vmatmul.mubr.f32.vlgmr.msra.gmra.mxu0 %v11290_v20  ;;  %v3220_v48 = vld [vmem:[#allocation2 + $0x370] sm:$0xff] }
0x1325   :  { %3480 = vmatprep.subr.mxu1 %v3145_v45  ;;  %3538 = vmatpush1.msra.mxu0 %v3300_v35  ;;  %v3217_v45 = vld [vmem:[#allocation2 + $0x358] sm:$0xff]  ;;  %v3244_v35 = vld [vmem:[#allocation2 + $0x430] sm:$0xff] }
0x1326   :  { %3481 = vmatpush1.msra.mxu1 %v3144_v27  ;;  %3539 = vmatprep.subr.mxu0 %v3297_v59  ;;  %v3216_v27 = vld [vmem:[#allocation2 + $0x350] sm:$0xff]  ;;  %v3241_v59 = vld [vmem:[#allocation2 + $0x418] sm:$0xff] }
0x1327   :  { %3482 = vmatprep.subr.mxu1 %v3141_v62  ;;  %3540 = vmatpush1.msra.mxu0 %v3296_v25  ;;  %v3213_v62 = vld [vmem:[#allocation2 + $0x338] sm:$0xff]  ;;  %v3240_v25 = vld [vmem:[#allocation2 + $0x410] sm:$0xff] }
0x1328   :  { %3483 = vmatpush1.msra.mxu1 %v3140_v63  ;;  %3541 = vmatprep.subr.mxu0 %v3293_v17  ;;  %v3212_v63 = vld [vmem:[#allocation2 + $0x330] sm:$0xff]  ;;  %v3209_v17 = vld [vmem:[#allocation2 + $0x318] sm:$0xff] }
0x1329   :  { %3484 = vmatprep.subr.mxu1 %v3137_v21  ;;  %3542 = vmatpush1.msra.mxu0 %v3292_v14  ;;  %v3651_v21 = vld [vmem:[%s12569_s1 + $0xf8] sm:$0xff]  ;;  %v3208_v14 = vld [vmem:[#allocation2 + $0x310] sm:$0xff] }
0x132a   :  { %3485 = vmatpush1.msra.mxu1 %v3136_v58  ;;  %3543 = vmatprep.subr.mxu0 %v3289_v16  ;;  %v3635_v58 = vld [vmem:[%s12569_s1 + $0x78] sm:$0xff] }
0x132b   :  { %3486 = vmatprep.subr.mxu1 %v3133_v57  ;;  %3544 = vmatpush1.msra.mxu0 %v3288_v4  ;;  %v3205_v16 = vld [vmem:[#allocation2 + $0x2f8] sm:$0xff]  ;;  %v3650_v57 = vld [vmem:[%s12569_s1 + $0xf0] sm:$0xff] }
0x132c   :  { %3487 = vmatpush1.msra.mxu1 %v3132_v18  ;;  %3545 = vmatprep.subr.mxu0 %v3285_v55  ;;  %v3204_v4 = vld [vmem:[#allocation2 + $0x2f0] sm:$0xff]  ;;  %v3201_v55 = vld [vmem:[#allocation2 + $0x2d8] sm:$0xff] }
0x132d   :  { %3488 = vmatprep.subr.mxu1 %v3129_v3  ;;  %3546 = vmatpush1.msra.mxu0 %v3284_v40  ;;  %v3634_v18 = vld [vmem:[%s12569_s1 + $0x70] sm:$0xff]  ;;  %v3649_v3 = vld [vmem:[%s12569_s1 + $0xe8] sm:$0xff] }
0x132e   :  { %3489 = vmatpush1.msra.mxu1 %v3128_v5  ;;  %3547 = vmatprep.subr.mxu0 %v3281_v6  ;;  %v3200_v40 = vld [vmem:[#allocation2 + $0x2d0] sm:$0xff]  ;;  %v3633_v5 = vld [vmem:[%s12569_s1 + $0x68] sm:$0xff]  ;;  %v3197_v6 = vld [vmem:[#allocation2 + $0x2b8] sm:$0xff] }
0x132f   :  { %3490 = vmatprep.subr.mxu1 %v3125_v31  ;;  %3548 = vmatpush1.msra.mxu0 %v3280_v0  ;;  %v3196_v31 = vld [vmem:[#allocation2 + $0x2b0] sm:$0xff]  ;;  %v3632_v0 = vld [vmem:[%s12569_s1 + $0x60] sm:$0xff] }
0x1330   :  { %3491 = vmatpush1.msra.mxu1 %v3124_v7  ;;  %3549 = vmatprep.subr.mxu0 %v3277_v56  ;;  %v3193_v7 = vld [vmem:[#allocation2 + $0x298] sm:$0xff]  ;;  %v3192_v56 = vld [vmem:[#allocation2 + $0x290] sm:$0xff] }
0x1331   :  { %3492 = vmatprep.subr.mxu1 %v3121_v2  ;;  %3550 = vmatpush1.msra.mxu0 %v3276_v38  ;;  %v3189_v2 = vld [vmem:[#allocation2 + $0x278] sm:$0xff]  ;;  %v3188_v38 = vld [vmem:[#allocation2 + $0x270] sm:$0xff] }
0x1332   :  { %3493 = vmatpush1.msra.mxu1 %v3120_v46  ;;  %3551 = vmatprep.subr.mxu0 %v3273_v23  ;;  %v3185_v46 = vld [vmem:[#allocation2 + $0x258] sm:$0xff]  ;;  %v3184_v23 = vld [vmem:[#allocation2 + $0x250] sm:$0xff] }
0x1333   :  { %3494 = vmatprep.subr.mxu1 %v3117_v29  ;;  %3552 = vmatpush1.msra.mxu0 %v3272_v54  ;;  %v3181_v29 = vld [vmem:[#allocation2 + $0x238] sm:$0xff]  ;;  %v3180_v54 = vld [vmem:[#allocation2 + $0x230] sm:$0xff] }
0x1334   :  { %3495 = vmatpush1.msra.mxu1 %v3116_v22  ;;  %3553 = vmatprep.subr.mxu0 %v3269_v1  ;;  %v3177_v22 = vld [vmem:[#allocation2 + $0x218] sm:$0xff]  ;;  %v3176_v1 = vld [vmem:[#allocation2 + $0x210] sm:$0xff] }
0x1335   :  { %3496 = vmatprep.subr.mxu1 %v3113_v28  ;;  %3554 = vmatpush1.msra.mxu0 %v3268_v34  ;;  %v3647_v28 = vld [vmem:[%s12569_s1 + $0xd8] sm:$0xff] }
0x1336   :  { %3497 = vmatpush1.msra.mxu1 %v3112_v24  ;;  %3555 = vmatprep.subr.mxu0 %v3265_v37  ;;  %v3631_v34 = vld [vmem:[%s12569_s1 + $0x58] sm:$0xff]  ;;  %v3646_v24 = vld [vmem:[%s12569_s1 + $0xd0] sm:$0xff] }
0x1337   :  { %3498 = vmatprep.subr.mxu1 %v3237_v47  ;;  %3530 = vmatprep.mubr.f32.mxu1 %v11292_v26  ;;  %v3245_v26 = vld [vmem:[#allocation2 + $0x438] sm:$0xff]  ;;  %v3630_v37 = vld [vmem:[%s12569_s1 + $0x50] sm:$0xff]  ;;  %v3645_v47 = vld [vmem:[%s12569_s1 + $0xc8] sm:$0xff] }
0x1338   :  { %3556 = vmatpush1.msra.mxu0 %v3264_v19  ;;  %3499 = vmatpush2.msra.mxu1 %v3236_v60  ;;  %v3629_v19 = vld [vmem:[%s12569_s1 + $0x48] sm:$0xff]  ;;  %v3644_v60 = vld [vmem:[%s12569_s1 + $0xc0] sm:$0xff] }
0x1339   :  { %3557 = vmatprep.subr.mxu0 %v3261_v33  ;;  %3500 = vmatprep.subr.mxu1 %v3233_v30  ;;  %v3628_v33 = vld [vmem:[%s12569_s1 + $0x40] sm:$0xff]  ;;  %v3643_v30 = vld [vmem:[%s12569_s1 + $0xb8] sm:$0xff] }
0x133a   :  { %3558 = vmatpush1.msra.mxu0 %v3260_v43  ;;  %3501 = vmatpush2.msra.mxu1 %v3232_v51  ;;  %v3642_v43 = vld [vmem:[%s12569_s1 + $0xb0] sm:$0xff] }
0x133b   :  { %3559 = vmatprep.subr.mxu0 %v3257_v36  ;;  %3502 = vmatprep.subr.mxu1 %v3229_v39  ;;  %v3626_v51 = vld [vmem:[%s12569_s1 + $0x30] sm:$0xff]  ;;  %v3641_v36 = vld [vmem:[%s12569_s1 + $0xa8] sm:$0xff] }
0x133c   :  { %3560 = vmatpush1.msra.mxu0 %v3256_v11  ;;  %3503 = vmatpush2.msra.mxu1 %v3228_v8  ;;  %v3625_v39 = vld [vmem:[%s12569_s1 + $0x28] sm:$0xff]  ;;  %v3640_v11 = vld [vmem:[%s12569_s1 + $0xa0] sm:$0xff] }
0x133d   :  { %3561 = vmatprep.subr.mxu0 %v3253_v9  ;;  %3504 = vmatprep.subr.mxu1 %v3225_v53  ;;  %v3624_v8 = vld [vmem:[%s12569_s1 + $0x20] sm:$0xff]  ;;  %v3639_v9 = vld [vmem:[%s12569_s1 + $0x98] sm:$0xff] }
0x133e   :  { %3562 = vmatpush1.msra.mxu0 %v3252_v10  ;;  %3505 = vmatpush2.msra.mxu1 %v3224_v13  ;;  %v3623_v53 = vld [vmem:[%s12569_s1 + $0x18] sm:$0xff]  ;;  %v3638_v10 = vld [vmem:[%s12569_s1 + $0x90] sm:$0xff] }
0x133f   :  { %3563 = vmatprep.subr.mxu0 %v3249_v32  ;;  %3506 = vmatprep.subr.mxu1 %v3221_v15  ;;  %v3622_v13 = vld [vmem:[%s12569_s1 + $0x10] sm:$0xff]  ;;  %v3637_v32 = vld [vmem:[%s12569_s1 + $0x88] sm:$0xff] }
0x1340   :  { %3564 = vmatpush1.msra.mxu0 %v3248_v12  ;;  %3507 = vmatpush2.msra.mxu1 %v3220_v48  ;;  %v3621_v15 = vld [vmem:[%s12569_s1 + $0x8] sm:$0xff]  ;;  %v3636_v12 = vld [vmem:[%s12569_s1 + $0x80] sm:$0xff] }
0x1341   :  { %3565 = vmatprep.subr.mxu0 %v3245_v26  ;;  %3508 = vmatprep.subr.mxu1 %v3217_v45  ;;  %v3620_v48 = vld [vmem:[%s12569_s1] sm:$0xff]  ;;  %v3683_v26 = vld [vmem:[%s12569_s1 + $0x1f8] sm:$0xff] }
0x1342   :  { %3566 = vmatpush1.msra.mxu0 %v3244_v35  ;;  %3509 = vmatpush2.msra.mxu1 %v3216_v27  ;;  %v3667_v45 = vld [vmem:[%s12569_s1 + $0x178] sm:$0xff]  ;;  %v3682_v35 = vld [vmem:[%s12569_s1 + $0x1f0] sm:$0xff] }
0x1343   :  { %3567 = vmatprep.subr.mxu0 %v3241_v59  ;;  %3510 = vmatprep.subr.mxu1 %v3213_v62  ;;  %v3666_v27 = vld [vmem:[%s12569_s1 + $0x170] sm:$0xff]  ;;  %v3681_v59 = vld [vmem:[%s12569_s1 + $0x1e8] sm:$0xff] }
0x1344   :  { %3568 = vmatpush1.msra.mxu0 %v3240_v25  ;;  %3601 = vmatprep.mubr.f32.mxu0 %v12561_v52  ;;  %v3665_v62 = vld [vmem:[%s12569_s1 + $0x168] sm:$0xff]  ;;  %v3680_v25 = vld [vmem:[%s12569_s1 + $0x1e0] sm:$0xff] }
0x1345   :  { %3511 = vmatpush2.msra.mxu1 %v3212_v63  ;;  %3602 = vmatmul.mubr.f32.vlgmr.msra.gmra.mxu0 %v11287_v42  ;;  %v3648_v42 = vld [vmem:[%s12569_s1 + $0xe0] sm:$0xff] }
0x1346   :  { %3512 = vmatprep.subr.mxu1 %v3209_v17  ;;  %8355 = vmatprep.subr.mxu0 %v3651_v21  ;;  %v3664_v63 = vld [vmem:[%s12569_s1 + $0x160] sm:$0xff]  ;;  %v3679_v17 = vld [vmem:[%s12569_s1 + $0x1d8] sm:$0xff] }
0x1347   :  { %3513 = vmatpush2.msra.mxu1 %v3208_v14  ;;  %8356 = vmatpush3.msra.mxu0 %v3635_v58  ;;  %v3663_v21 = vld [vmem:[%s12569_s1 + $0x158] sm:$0xff]  ;;  %v3678_v14 = vld [vmem:[%s12569_s1 + $0x1d0] sm:$0xff] }
0x1348   :  { %3514 = vmatprep.subr.mxu1 %v3205_v16  ;;  %8357 = vmatprep.subr.mxu0 %v3650_v57  ;;  %v3662_v58 = vld [vmem:[%s12569_s1 + $0x150] sm:$0xff]  ;;  %v3677_v16 = vld [vmem:[%s12569_s1 + $0x1c8] sm:$0xff] }
0x1349   :  { %3515 = vmatpush2.msra.mxu1 %v3204_v4  ;;  %8358 = vmatpush3.msra.mxu0 %v3634_v18  ;;  %v3661_v57 = vld [vmem:[%s12569_s1 + $0x148] sm:$0xff]  ;;  %v3676_v4 = vld [vmem:[%s12569_s1 + $0x1c0] sm:$0xff] }
0x134a   :  { %3516 = vmatprep.subr.mxu1 %v3201_v55  ;;  %8359 = vmatprep.subr.mxu0 %v3649_v3  ;;  %v3660_v18 = vld [vmem:[%s12569_s1 + $0x140] sm:$0xff]  ;;  %v3675_v55 = vld [vmem:[%s12569_s1 + $0x1b8] sm:$0xff] }
0x134b   :  { %3517 = vmatpush2.msra.mxu1 %v3200_v40  ;;  %8360 = vmatpush3.msra.mxu0 %v3633_v5  ;;  %v3659_v3 = vld [vmem:[%s12569_s1 + $0x138] sm:$0xff]  ;;  %v3674_v40 = vld [vmem:[%s12569_s1 + $0x1b0] sm:$0xff] }
0x134c   :  { %3518 = vmatprep.subr.mxu1 %v3197_v6  ;;  %8361 = vmatprep.subr.mxu0 %v3648_v42  ;;  %v3658_v5 = vld [vmem:[%s12569_s1 + $0x130] sm:$0xff]  ;;  %v3673_v6 = vld [vmem:[%s12569_s1 + $0x1a8] sm:$0xff] }
0x134d   :  { %3519 = vmatpush2.msra.mxu1 %v3196_v31  ;;  %8362 = vmatpush3.msra.mxu0 %v3632_v0  ;;  %v3657_v42 = vld [vmem:[%s12569_s1 + $0x128] sm:$0xff]  ;;  %v3672_v31 = vld [vmem:[%s12569_s1 + $0x1a0] sm:$0xff] }
0x134e   :  { %3520 = vmatprep.subr.mxu1 %v3193_v7  ;;  %8363 = vmatprep.subr.mxu0 %v3647_v28  ;;  %v3656_v0 = vld [vmem:[%s12569_s1 + $0x120] sm:$0xff]  ;;  %v3671_v7 = vld [vmem:[%s12569_s1 + $0x198] sm:$0xff] }
0x134f   :  { %3521 = vmatpush2.msra.mxu1 %v3192_v56  ;;  %8364 = vmatpush3.msra.mxu0 %v3631_v34  ;;  %v3655_v56 = vld [vmem:[%s12569_s1 + $0x118] sm:$0xff]  ;;  %v12572_v34 = vsub.s32 1, %v10541_v41 }
0x1350   :  { %3522 = vmatprep.subr.mxu1 %v3189_v2  ;;  %8365 = vmatprep.subr.mxu0 %v3646_v24  ;;  %v3670_v2 = vld [vmem:[%s12569_s1 + $0x190] sm:$0xff] }
0x1351   :  { %3523 = vmatpush2.msra.mxu1 %v3188_v38  ;;  %8366 = vmatpush3.msra.mxu0 %v3630_v37  ;;  %v3654_v38 = vld [vmem:[%s12569_s1 + $0x110] sm:$0xff] }
0x1352   :  { %3524 = vmatprep.subr.mxu1 %v3185_v46  ;;  %8367 = vmatprep.subr.mxu0 %v3645_v47  ;;  %v3669_v46 = vld [vmem:[%s12569_s1 + $0x188] sm:$0xff] }
0x1353   :  { %3525 = vmatpush2.msra.mxu1 %v3184_v23  ;;  %8368 = vmatpush3.msra.mxu0 %v3629_v19  ;;  %v3653_v23 = vld [vmem:[%s12569_s1 + $0x108] sm:$0xff] }
0x1354   :  { %3526 = vmatprep.subr.mxu1 %v3181_v29  ;;  %8369 = vmatprep.subr.mxu0 %v3644_v60  ;;  %v3668_v29 = vld [vmem:[%s12569_s1 + $0x180] sm:$0xff] }
0x1355   :  { %3527 = vmatpush2.msra.mxu1 %v3180_v54  ;;  %8370 = vmatpush3.msra.mxu0 %v3628_v33  ;;  %v3652_v54 = vld [vmem:[%s12569_s1 + $0x100] sm:$0xff] }
0x1356   :  { %3528 = vmatprep.subr.mxu1 %v3177_v22  ;;  %8371 = vmatprep.subr.mxu0 %v3643_v30  ;;  %v3302_v22 = vld [vmem:[%s12570_s11] sm:$0xf]  ;;  %s12573_s11 = sld [smem:[#allocation20_spill]] }
0x1357   :  { %3529 = vmatpush2.msra.mxu1 %v3176_v1  ;;  %v12571_v1 = vsub.s32 0, %v10541_v41  ;;  %v11373_v24 = vrot.slane %v3302_v22, %v12572_v34 }
0x1358   :  { %3531 = vmatmul.mubr.f32.vlgmr.msra.gmra.mxu1 %v11290_v20  ;;  %v3627_v20 = vld [vmem:[%s12569_s1 + $0x38] sm:$0xff]  ;;  %8390 = vmatprep.subr.mxu1 %v3683_v26 }
0x1359   :  { %8372 = vmatpush3.msra.mxu0 %v3627_v20  ;;  %8391 = vmatpush3.msra.mxu1 %v3667_v45  ;;  %v11369_v28 = vrot.slane %v3302_v22, %v12571_v1 }
0x135a   :  { %8373 = vmatprep.subr.mxu0 %v3642_v43  ;;  %8392 = vmatprep.subr.mxu1 %v3682_v35 }
0x135b   :  { %8374 = vmatpush3.msra.mxu0 %v3626_v51  ;;  %8393 = vmatpush3.msra.mxu1 %v3666_v27 }
0x135c   :  { %8375 = vmatprep.subr.mxu0 %v3641_v36  ;;  %8394 = vmatprep.subr.mxu1 %v3681_v59 }
0x135d   :  { %8376 = vmatpush3.msra.mxu0 %v3625_v39  ;;  %8395 = vmatpush3.msra.mxu1 %v3665_v62 }
0x135e   :  { %8377 = vmatprep.subr.mxu0 %v3640_v11  ;;  %8396 = vmatprep.subr.mxu1 %v3680_v25  ;;  %v3835_v25 = vld [vmem:[%s12573_s11 + $0x10] sm:$0xff] }
0x135f   :  { %8378 = vmatpush3.msra.mxu0 %v3624_v8  ;;  %8397 = vmatpush3.msra.mxu1 %v3664_v63  ;;  %v3314_v8 = vsub.s32 2, %v10541_v41  ;;  %v3834_v63 = vld [vmem:[%s12573_s11 + $0x8] sm:$0xff] }
0x1360   :  { %8379 = vmatprep.subr.mxu0 %v3639_v9  ;;  %8398 = vmatprep.subr.mxu1 %v3679_v17  ;;  %v3318_v9 = vsub.s32 3, %v10541_v41  ;;  %v3833_v17 = vld [vmem:[%s12573_s11] sm:$0xff]  ;;  %s12524_s11 = smov 127  }
0x1361   :  { %8380 = vmatpush3.msra.mxu0 %v3623_v53  ;;  %8399 = vmatpush3.msra.mxu1 %v3663_v21  ;;  %v11381_v53 = vrot.slane %v3302_v22, %v3314_v8 }
0x1362   :  { %8381 = vmatprep.subr.mxu0 %v3638_v10  ;;  %8400 = vmatprep.subr.mxu1 %v3678_v14  ;;  %v11383_v10 = vrot.slane %v3302_v22, %v3318_v9 }
0x1363   :  { %8382 = vmatpush3.msra.mxu0 %v3622_v13  ;;  %8401 = vmatpush3.msra.mxu1 %v3662_v58 }
0x1364   :  { %8383 = vmatprep.subr.mxu0 %v3637_v32  ;;  %8402 = vmatprep.subr.mxu1 %v3677_v16  ;;  %v8063_v16 = vld [vmem:[%s12574_s10] ss:$0 sm:$0xff]  ;;  %s12578_s10 = sld [smem:[#allocation24_spill]] }
0x1365   :  { %8384 = vmatpush3.msra.mxu0 %v3621_v15  ;;  %8403 = vmatpush3.msra.mxu1 %v3661_v57 }
0x1366   :  { %8385 = vmatprep.subr.mxu0 %v3636_v12  ;;  %8404 = vmatprep.subr.mxu1 %v3676_v4 }
0x1367   :  { %8386 = vmatpush3.msra.mxu0 %v3620_v48  ;;  %8405 = vmatpush3.msra.mxu1 %v3660_v18 }
0x1368   :  { %9018 = vmatprep.subr.mxu0 %v12561_v52  ;;  %8406 = vmatprep.subr.mxu1 %v3675_v55 }
0x1369   :  { %8407 = vmatpush3.msra.mxu1 %v3659_v3 }
0x136a   :  { %8408 = vmatprep.subr.mxu1 %v3674_v40  ;;  %v4034_v34 = vld [vmem:[%s12578_s10 + $0x60] sm:$0x7f] }
0x136b   :  { %8409 = vmatpush3.msra.mxu1 %v3658_v5  ;;  %v3930_v5 = vld [vmem:[%s12575_s7 + $0x40] sm:$0x7f] }
0x136c   :  { %8410 = vmatprep.subr.mxu1 %v3673_v6  ;;  %v3929_v6 = vld [vmem:[%s12575_s7 + $0x38] sm:$0xff] }
0x136d   :  { %8411 = vmatpush3.msra.mxu1 %v3657_v42  ;;  %v3928_v42 = vld [vmem:[%s12575_s7 + $0x30] sm:$0xff] }
0x136e   :  { %8412 = vmatprep.subr.mxu1 %v3672_v31  ;;  %v3926_v31 = vld [vmem:[%s12575_s7 + $0x20] sm:$0xff] }
0x136f   :  { %8413 = vmatpush3.msra.mxu1 %v3656_v0  ;;  %v3925_v0 = vld [vmem:[%s12575_s7 + $0x18] sm:$0xff] }
0x1370   :  { %8414 = vmatprep.subr.mxu1 %v3671_v7  ;;  %v3924_v7 = vld [vmem:[%s12575_s7 + $0x10] sm:$0xff] }
0x1371   :  { %8415 = vmatpush3.msra.mxu1 %v3655_v56  ;;  %v3923_v56 = vld [vmem:[%s12575_s7 + $0x8] sm:$0xff] }
0x1372   :  { %8416 = vmatprep.subr.mxu1 %v3670_v2  ;;  %v3922_v2 = vld [vmem:[%s12575_s7] sm:$0xff] }
0x1373   :  { %8417 = vmatpush3.msra.mxu1 %v3654_v38  ;;  %v8064_v38 = vld [vmem:[%s12577_s20] ss:$0 sm:$0xff]  ;;  %s12580_s20 = smov 127  }
0x1374   :  { %8418 = vmatprep.subr.mxu1 %v3669_v46 }
0x1375   :  { %8419 = vmatpush3.msra.mxu1 %v3653_v23 }
0x1376   :  { %8420 = vmatprep.subr.mxu1 %v3668_v29 }
0x1377   :  { %8421 = vmatpush3.msra.mxu1 %v3652_v54 }
0x1378   :  { %9048 = vmatprep.subr.mxu1 %v12561_v52 }
0x13d7   :  { %v3461_v37 = vpop.f32.mrf.mxu1 }
0x13d9   :  { %v3463_v20 = vpop.f32.mrf.mxu1 }
0x13e4   :  { %v3390_v47 = vpop.f32.mrf.mxu0 }
0x13e5   :  { %v3391_v19 = vadd.f32 %v3390_v47, %v11369_v28  ;;  %v4032_v47 = vld [vmem:[%s12578_s10 + $0x50] sm:$0xff] }
0x13e6   :  { %v3392_v60 = vpop.f32.mrf.mxu0 }
0x13e7   :  { %v3462_v33 = vadd.f32 %v3461_v37, %v3391_v19  ;;  %v3393_v30 = vadd.f32 %v3392_v60, %v11373_v24  ;;  %v4033_v37 = vld [vmem:[%s12578_s10 + $0x58] sm:$0xff]  ;;  %v4031_v19 = vld [vmem:[%s12578_s10 + $0x48] sm:$0xff]  ;;  %v4030_v60 = vld [vmem:[%s12578_s10 + $0x40] sm:$0xff] }
0x13e9   :  { %v3464_v43 = vadd.f32 %v3463_v20, %v3393_v30  ;;  %v3612_v51 = vmul.f32 0.01, %v3462_v33  ;;  %vm3608_vm9 = vcmp.ge.f32.partialorder %v3462_v33, 0.0  ;;  %v4028_v30 = vld [vmem:[%s12578_s10 + $0x30] sm:$0xff]  ;;  %v4027_v20 = vld [vmem:[%s12578_s10 + $0x28] sm:$0xff] }
0x13eb   :  { %vm3609_vm8 = vcmp.ge.f32.partialorder %v3464_v43, 0.0  ;;  %v3613_v36 = vmul.f32 0.01, %v3464_v43  ;;  %v3616_v11 = vsel %vm3608_vm9, %v3462_v33, %v3612_v51  ;;  %v4029_v33 = vld [vmem:[%s12578_s10 + $0x38] sm:$0xff] }
0x13ec   :  { %v4025_v51 = vld [vmem:[%s12578_s10 + $0x18] sm:$0xff] }
0x13ed   :  { %v3617_v39 = vsel %vm3609_vm8, %v3464_v43, %v3613_v36  ;;  %v4026_v43 = vld [vmem:[%s12578_s10 + $0x20] sm:$0xff]  ;;  %v4024_v36 = vld [vmem:[%s12578_s10 + $0x10] sm:$0xff]  ;;  %vm4134_vm8 = vcmask 72704  }
0x13ee   :  { %3755 = vmatprep.mubr.f32.mxu0 %v3617_v39  ;;  %v4023_v39 = vld [vmem:[%s12578_s10 + $0x8] sm:$0xff] }
0x13ef   :  { %3756 = vmatmul.mubr.f32.vlgmr.msra.gmra.mxu0 %v3616_v11  ;;  %v4022_v11 = vld [vmem:[%s12578_s10] sm:$0xff]  ;;  %s12582_s10 = sld [smem:[#allocation25_spill]] }
0x13f0   :  { %9024 = vmatprep.mubr.msk.f32.mxu0 %vm10181_vm0, %v12561_v52  ;;  %9019 = vmatpush3.msra.mxu0 %v3835_v25 }
0x13f1   :  { %9020 = vmatprep.subr.mxu0 %v12561_v52 }
0x13f2   :  { %9021 = vmatpush3.msra.mxu0 %v3834_v63 }
0x13f3   :  { %9022 = vmatprep.subr.mxu0 %v12561_v52 }
0x13f4   :  { %9023 = vmatpush3.msra.mxu0 %v3833_v17 }
0x13f5   :  { %9027 = vmatprep.subr.mxu0 %v12561_v52 }
0x1405   :  { %v3603_v13 = vpop.f32.mrf.mxu0 }
0x1407   :  { %v3605_v45 = vpop.f32.mrf.mxu0 }
0x1418   :  { %v3532_v32 = vpop.f32.mrf.mxu1 }
0x1419   :  { %v3533_v15 = vadd.f32 %v3532_v32, %v11381_v53 }
0x141a   :  { %v3534_v12 = vpop.f32.mrf.mxu1 }
0x141b   :  { %v3604_v48 = vadd.f32 %v3603_v13, %v3533_v15  ;;  %v3535_v26 = vadd.f32 %v3534_v12, %v11383_v10 }
0x141d   :  { %v3606_v35 = vadd.f32 %v3605_v45, %v3535_v26  ;;  %v3614_v27 = vmul.f32 0.01, %v3604_v48  ;;  %vm3610_vm11 = vcmp.ge.f32.partialorder %v3604_v48, 0.0  ;;  %v9733_v26 = vld [vmem:[%s10204_s9 + $0x10] sm:$0xff]  ;;  %v9734_v45 = vld [vmem:[%s10204_s9 + $0x8] sm:$0xff] }
0x141f   :  { %vm3611_vm10 = vcmp.ge.f32.partialorder %v3606_v35, 0.0  ;;  %v3615_v41 = vmul.f32 0.01, %v3606_v35  ;;  %v3618_v62 = vsel %vm3610_vm11, %v3604_v48, %v3614_v27 }
0x1421   :  { %v3619_v59 = vsel %vm3611_vm10, %v3606_v35, %v3615_v41  ;;  %v9735_v35 = vld [vmem:[%s10204_s9] sm:$0xff]  ;;  %s12585_s9 = smov 64  }
0x1422   :  { %3825 = vmatprep.mubr.f32.mxu1 %v3619_v59  ;;  %v8069_v59 = vld [vmem:[%s12582_s10] ss:$0 sm:$0xff] }
0x1423   :  { %3826 = vmatmul.mubr.f32.vlgmr.msra.gmra.mxu1 %v3618_v62 }
0x1424   :  { %9074 = vmatprep.mubr.msk.f32.mxu1 %vm10181_vm0, %v12561_v52  ;;  %9049 = vmatpush3.msk.msra.mxu1 %vm3942_vm12, %v4034_v34 }
0x1425   :  { %9050 = vmatprep.subr.mxu1 %v12561_v52 }
0x1426   :  { %9051 = vmatpush3.msra.mxu1 %v4033_v37  ;;  %v9744_v37 = vld [vmem:[%s10209_s13] ss:$0 sm:$0xff]  ;;  %s12586_s13 = smov 48  }
0x1427   :  { %9052 = vmatprep.subr.mxu1 %v12561_v52 }
0x1428   :  { %9053 = vmatpush3.msra.mxu1 %v4032_v47 }
0x1429   :  { %9054 = vmatprep.subr.mxu1 %v12561_v52 }
0x142a   :  { %9055 = vmatpush3.msra.mxu1 %v4031_v19 }
0x142b   :  { %9056 = vmatprep.subr.mxu1 %v12561_v52 }
0x142c   :  { %9057 = vmatpush3.msra.mxu1 %v4030_v60 }
0x142d   :  { %9058 = vmatprep.subr.mxu1 %v12561_v52 }
0x142e   :  { %9059 = vmatpush3.msra.mxu1 %v4029_v33  ;;  %v9745_v33 = vld [vmem:[%s10234_s3 + $0x18] sm:$0xff] }
0x142f   :  { %9060 = vmatprep.subr.mxu1 %v12561_v52 }
0x1430   :  { %9061 = vmatpush3.msra.mxu1 %v4028_v30  ;;  %v9746_v30 = vld [vmem:[%s10234_s3 + $0x10] sm:$0xff] }
0x1431   :  { %9062 = vmatprep.subr.mxu1 %v12561_v52 }
0x1432   :  { %9063 = vmatpush3.msra.mxu1 %v4027_v20  ;;  %v9747_v20 = vld [vmem:[%s10234_s3 + $0x8] sm:$0xff] }
0x1433   :  { %9064 = vmatprep.subr.mxu1 %v12561_v52 }
0x1434   :  { %9065 = vmatpush3.msra.mxu1 %v4026_v43  ;;  %v9748_v43 = vld [vmem:[%s10234_s3] sm:$0xff]  ;;  %s12591_s3 = smov 80  }
0x1435   :  { %9066 = vmatprep.subr.mxu1 %v12561_v52 }
0x1436   :  { %9067 = vmatpush3.msra.mxu1 %v4025_v51 }
0x1437   :  { %9068 = vmatprep.subr.mxu1 %v12561_v52 }
0x1438   :  { %9069 = vmatpush3.msra.mxu1 %v4024_v36  ;;  %v9749_v36 = vld [vmem:[%s10219_s21] ss:$0 sm:$0xff]  ;;  %s12588_s21 = smov 32  }
0x1439   :  { %9070 = vmatprep.subr.mxu1 %v12561_v52 }
0x143a   :  { %9071 = vmatpush3.msra.mxu1 %v4023_v39 }
0x143b   :  { %9072 = vmatprep.subr.mxu1 %v12561_v52 }
0x143c   :  { %9073 = vmatpush3.msra.mxu1 %v4022_v11 }
0x143d   :  { %9095 = vmatprep.subr.mxu1 %v12561_v52 }
0x14af   :  { %v8387_v21 = vpop.f32.mrf.mxu0 }
0x14b1   :  { %v8388_v14 = vpop.f32.mrf.mxu0 }
0x14b2   :  { %v8389_v58 = vadd.f32 %v8388_v14, %v8387_v21 }
0x14b4   :  { %v3758_v18 = vadd.f32 %v8389_v58, %v8063_v16  ;;  %v4218_v58 = vld [vmem:[%s10384_s27 + $0x18] sm:$0xff]  ;;  %v4217_v16 = vld [vmem:[%s10384_s27 + $0x10] sm:$0xff] }
0x14e3   :  { %v8422_v57 = vpop.f32.mrf.mxu1 }
0x14e5   :  { %v8423_v4 = vpop.f32.mrf.mxu1 }
0x14e6   :  { %v8424_v55 = vadd.f32 %v8423_v4, %v8422_v57  ;;  %v4216_v57 = vld [vmem:[%s10384_s27 + $0x8] sm:$0xff]  ;;  %v4215_v4 = vld [vmem:[%s10384_s27] sm:$0xff] }
0x14e8   :  { %v11396_v3 = vadd.f32 %v8424_v55, %v3758_v18  ;;  %v8072_v18 = vld [vmem:[%s10379_s12] ss:$0 sm:$0xff] }
0x14ea   :  { %12576 = vst [vmem:[#allocation29_spill] sm:$0xff] %v11396_v3  ;;  %v11400_v40 = vsub.f32 %v10474_v50, %v11396_v3  ;;  %v3927_v50 = vld [vmem:[%s12575_s7 + $0x28] sm:$0xff]  ;;  %s12581_s7 = sld [smem:[#allocation26_spill]] }
0x14ec   :  { %9025 = vmatmul.mubr.msk.f32.vlgmr.msra.gmra.mxu0 %vm236_vm1, %v11400_v40 }
0x14ed   :  { %9045 = vmatprep.mubr.msk.f32.mxu0 %vm10181_vm0, %v12561_v52  ;;  %9028 = vmatpush3.msk.msra.mxu0 %vm3942_vm12, %v3930_v5 }
0x14ee   :  { %9029 = vmatprep.subr.mxu0 %v12561_v52 }
0x14ef   :  { %9030 = vmatpush3.msra.mxu0 %v3929_v6 }
0x14f0   :  { %9031 = vmatprep.subr.mxu0 %v12561_v52  ;;  %v4126_v27 = vld [vmem:[%s12581_s7 + $0x8] sm:$0x1]  ;;  %v4125_v41 = vld [vmem:[%s12581_s7] sm:$0xff] }
0x14f1   :  { %9032 = vmatpush3.msra.mxu0 %v3928_v42 }
0x14f2   :  { %9033 = vmatprep.subr.mxu0 %v12561_v52 }
0x14f3   :  { %9034 = vmatpush3.msra.mxu0 %v3927_v50 }
0x14f4   :  { %9035 = vmatprep.subr.mxu0 %v12561_v52 }
0x14f5   :  { %9036 = vmatpush3.msra.mxu0 %v3926_v31  ;;  %v9736_v31 = vld [vmem:[%s10214_s17 + $0x18] sm:$0xff] }
0x14f6   :  { %9037 = vmatprep.subr.mxu0 %v12561_v52 }
0x14f7   :  { %9038 = vmatpush3.msra.mxu0 %v3925_v0  ;;  %v9737_v0 = vld [vmem:[%s10214_s17 + $0x10] sm:$0xff] }
0x14f8   :  { %9039 = vmatprep.subr.mxu0 %v12561_v52 }
0x14f9   :  { %9040 = vmatpush3.msra.mxu0 %v3924_v7  ;;  %v9738_v7 = vld [vmem:[%s10214_s17 + $0x8] sm:$0xff] }
0x14fa   :  { %9041 = vmatprep.subr.mxu0 %v12561_v52 }
0x14fb   :  { %9042 = vmatpush3.msra.mxu0 %v3923_v56  ;;  %v9739_v56 = vld [vmem:[%s10214_s17] sm:$0xff]  ;;  %s12587_s17 = smov 112  }
0x14fc   :  { %9043 = vmatprep.subr.mxu0 %v12561_v52 }
0x14fd   :  { %9044 = vmatpush3.msra.mxu0 %v3922_v2  ;;  %v8075_v2 = vld [vmem:[%s10389_s30] ss:$0 sm:$0xff] }
0x14fe   :  { %9077 = vmatprep.subr.mxu0 %v12561_v52 }
0x15ac   :  { %v3912_v46 = vpop.f32.mrf.mxu0 }
0x15ad   :  { %v3913_v23 = vadd.f32 %v8064_v38, %v3912_v46 }
0x15ae   :  { %v9026_v29 = vpop.f32.mrf.mxu0 }
0x15af   :  { %v3916_v54 = vmax.f32 %v3913_v23, 0.0 }
0x15b1   :  { %3918 = vrot.lane.b32.xlu0 %v3916_v54, %s12524_s11  ;;  %s12579_s11 = sld [smem:[#allocation23_spill]] }
0x15b7   :  { %v8066_v8 = vld [vmem:[%s12579_s11] ss:$0 sm:$0xff] }
0x1623   :  { %v3919_v22 = vpop.permute.xlu0 %3918 }
0x1624   :  { %v3921_v1 = vmax.f32 %v3916_v54, %v3919_v22  ;;  %v9740_v54 = vld [vmem:[%s10224_s25 + $0x18] sm:$0xff]  ;;  %v9741_v22 = vld [vmem:[%s10224_s25 + $0x10] sm:$0xff] }
0x1626   :  { %9046 = vmatmul.mubr.msk.f32.vlgmr.msra.gmra.mxu0 %vm3938_vm13, %v3921_v1  ;;  %v9742_v1 = vld [vmem:[%s10224_s25 + $0x8] sm:$0xff] }
0x1627   :  { %9081 = vmatprep.mubr.msk.f32.mxu0 %vm10181_vm0, %v12561_v52  ;;  %9078 = vmatpush3.msk.msra.mxu0 %vm4138_vm15, %v4126_v27  ;;  %v9755_v27 = vld [vmem:[%s10254_s24 + $0x8] sm:$0xff] }
0x1628   :  { %9079 = vmatprep.subr.mxu0 %v12561_v52 }
0x1629   :  { %9080 = vmatpush3.msra.mxu0 %v4125_v41  ;;  %v9756_v41 = vld [vmem:[%s10254_s24] sm:$0xff]  ;;  %s12595_s24 = sld [smem:[#allocation22_spill]] }
0x162a   :  { %9084 = vmatprep.subr.mxu0 %v12561_v52 }
0x16e6   :  { %v4012_v9 = vpop.f32.mrf.mxu0 }
0x16e7   :  { %v4013_v13 = vadd.f32 %v8066_v8, %v4012_v9  ;;  %v9750_v9 = vld [vmem:[%s10244_s14 + $0x18] sm:$0xff] }
0x16e8   :  { %v9047_v32 = vpop.f32.mrf.mxu0 }
0x16e9   :  { %v4016_v15 = vmax.f32 %v4013_v13, 0.0  ;;  %v9751_v13 = vld [vmem:[%s10244_s14 + $0x10] sm:$0xff]  ;;  %v9752_v32 = vld [vmem:[%s10244_s14 + $0x8] sm:$0xff] }
0x16eb   :  { %4018 = vrot.lane.b32.xlu1 %v4016_v15, %s12580_s20 }
0x175d   :  { %v4019_v12 = vpop.permute.xlu1 %4018 }
0x175e   :  { %v4021_v48 = vmax.f32 %v4016_v15, %v4019_v12  ;;  %v9753_v15 = vld [vmem:[%s10244_s14] sm:$0xff]  ;;  %s12593_s14 = sld [smem:[#allocation24_spill]] }
0x1760   :  { %9075 = vmatmul.mubr.msk.f32.vlgmr.msra.gmra.mxu1 %vm4042_vm14, %v4021_v48  ;;  %v9754_v48 = vld [vmem:[%s10229_s29] ss:$0 sm:$0xff]  ;;  %s12590_s29 = smov 16  }
0x1761   :  { %9096 = vmatpush3.msra.mxu1 %v9733_v26  ;;  %9101 = vmatprep.mubr.msk.f32.mxu1 %vm10181_vm0, %v12561_v52 }
0x1762   :  { %9097 = vmatprep.subr.mxu1 %v12561_v52 }
0x1763   :  { %9098 = vmatpush3.msra.mxu1 %v9734_v45 }
0x1764   :  { %9099 = vmatprep.subr.mxu1 %v12561_v52 }
0x1765   :  { %9100 = vmatpush3.msra.mxu1 %v9735_v35 }
0x1766   :  { %9115 = vmatprep.subr.mxu1 %v12561_v52 }
0x1820   :  { %v4115_v62 = vpop.f32.mrf.mxu1 }
0x1821   :  { %v4116_v25 = vadd.f32 %v8069_v59, %v4115_v62  ;;  %v9757_v59 = vld [vmem:[%s12556_s0 + $0x18] sm:$0xff] }
0x1822   :  { %v9076_v63 = vpop.f32.mrf.mxu1 }
0x1823   :  { %v4119_v17 = vmax.f32 %v4116_v25, 0.0  ;;  %v9758_v25 = vld [vmem:[%s10239_s8] ss:$0 sm:$0xff]  ;;  %s12592_s8 = sld [smem:[#allocation20_spill]] }
0x1825   :  { %4121 = vrot.lane.b32.xlu1 %v4119_v17, %s12580_s20 }
0x1897   :  { %v4122_v21 = vpop.permute.xlu1 %4121 }
0x1898   :  { %v4124_v14 = vmax.f32 %v4119_v17, %v4122_v21 }
0x189a   :  { %9082 = vmatmul.mubr.msk.f32.vlgmr.msra.gmra.mxu0 %vm4134_vm8, %v4124_v14  ;;  %v9759_v14 = vld [vmem:[%s10264_s6] sm:$0xff] }
0x189b   :  { %9085 = vmatpush3.msra.mxu0 %v4218_v58  ;;  %9092 = vmatprep.mubr.msk.f32.mxu0 %vm10181_vm0, %v12561_v52 }
0x189c   :  { %9086 = vmatprep.subr.mxu0 %v12561_v52 }
0x189d   :  { %9087 = vmatpush3.msra.mxu0 %v4217_v16  ;;  %v9760_v16 = vld [vmem:[%s10249_s19] ss:$0 sm:$0xff]  ;;  %s12594_s19 = sld [smem:[#allocation19_spill]] }
0x189e   :  { %9088 = vmatprep.subr.mxu0 %v12561_v52 }
0x189f   :  { %9089 = vmatpush3.msra.mxu0 %v4216_v57 }
0x18a0   :  { %9090 = vmatprep.subr.mxu0 %v12561_v52 }
0x18a1   :  { %9091 = vmatpush3.msra.mxu0 %v4215_v4 }
0x18a2   :  { %9104 = vmatprep.subr.mxu0 %v12561_v52 }
0x195a   :  { %v4208_v55 = vpop.f32.mrf.mxu0 }
0x195b   :  { %v4209_v5 = vadd.f32 %v8072_v18, %v4208_v55  ;;  %v9761_v55 = vld [vmem:[%s12556_s0 + $0x10] sm:$0xff] }
0x195c   :  { %v9083_v6 = vpop.f32.mrf.mxu0 }
0x195d   :  { %vm4212_vm9 = vcmp.ge.f32.partialorder %v4209_v5, 0.0  ;;  %v4213_v42 = vmul.f32 0.01, %v4209_v5  ;;  %v9763_v6 = vld [vmem:[%s12556_s0] sm:$0xff] }
0x195f   :  { %v4214_v50 = vsel %vm4212_vm9, %v4209_v5, %v4213_v42  ;;  %v9762_v5 = vld [vmem:[%s12556_s0 + $0x8] sm:$0xff] }
0x1960   :  { %9093 = vmatmul.mubr.msk.f32.vlgmr.msra.gmra.mxu0 %vm322_vm2, %v4214_v50 }
0x1961   :  { %9105 = vmatpush3.msra.mxu0 %v9736_v31  ;;  %9112 = vmatprep.mubr.msk.f32.mxu0 %vm10181_vm0, %v12561_v52 }
0x1962   :  { %9106 = vmatprep.subr.mxu0 %v12561_v52 }
0x1963   :  { %9107 = vmatpush3.msra.mxu0 %v9737_v0  ;;  %v9764_v0 = vld [vmem:[%s10264_s6 + $0x8] sm:$0xff] }
0x1964   :  { %9108 = vmatprep.subr.mxu0 %v12561_v52 }
0x1965   :  { %9109 = vmatpush3.msra.mxu0 %v9738_v7  ;;  %v9765_v7 = vld [vmem:[%s10264_s6 + $0x10] sm:$0xff] }
0x1966   :  { %9110 = vmatprep.subr.mxu0 %v12561_v52 }
0x1967   :  { %9111 = vmatpush3.msra.mxu0 %v9739_v56  ;;  %v9766_v56 = vld [vmem:[%s10264_s6 + $0x18] sm:$0xff] }
0x1968   :  { %9126 = vmatprep.subr.mxu0 %v12561_v52 }
0x1a20   :  { %v4295_v38 = vpop.f32.mrf.mxu0 }
0x1a21   :  { %v11499_v46 = vadd.f32 %v8075_v2, %v4295_v38  ;;  %v9767_v2 = vld [vmem:[%s10264_s6 + $0x20] sm:$0xff]  ;;  %v9768_v38 = vld [vmem:[%s10264_s6 + $0x28] sm:$0xff]  ;;  %s12596_s6 = sld [smem:[#allocation21_spill]] }
0x1a22   :  { %v9094_v23 = vpop.f32.mrf.mxu0 }
0x1a23   :  { %12583 = vst [vmem:[#allocation30_spill] sm:$0xff] %v11499_v46  ;;  %v11503_v29 = vsub.f32 %v11400_v40, %v11499_v46  ;;  %v9743_v40 = vld [vmem:[%s10224_s25] sm:$0xff]  ;;  %s12589_s25 = smov 96  }
0x1a25   :  { %9102 = vmatmul.mubr.msk.f32.vlgmr.msra.gmra.mxu1 %vm236_vm1, %v11503_v29 }
0x1a26   :  { %9116 = vmatpush3.msra.mxu1 %v9740_v54  ;;  %9123 = vmatprep.mubr.msk.f32.mxu1 %vm10181_vm0, %v12561_v52 }
0x1a27   :  { %9117 = vmatprep.subr.mxu1 %v12561_v52 }
0x1a28   :  { %9118 = vmatpush3.msra.mxu1 %v9741_v22 }
0x1a29   :  { %9119 = vmatprep.subr.mxu1 %v12561_v52 }
0x1a2a   :  { %9120 = vmatpush3.msra.mxu1 %v9742_v1  ;;  %v9770_v1 = vld [vmem:[%s12557_s5] sm:$0xff] }
0x1a2b   :  { %9121 = vmatprep.subr.mxu1 %v12561_v52 }
0x1a2c   :  { %9122 = vmatpush3.msra.mxu1 %v9743_v40 }
0x1a2d   :  { %9137 = vmatprep.subr.mxu1 %v12561_v52 }
0x1ae5   :  { %v4370_v34 = vpop.f32.mrf.mxu1 }
0x1ae6   :  { %v4371_v47 = vadd.f32 %v9744_v37, %v4370_v34 }
0x1ae7   :  { %v9103_v19 = vpop.f32.mrf.mxu1 }
0x1ae8   :  { %v4374_v60 = vmax.f32 %v4371_v47, 0.0 }
0x1aea   :  { %9113 = vmatmul.mubr.msk.f32.vlgmr.msra.gmra.mxu0 %vm322_vm2, %v4374_v60  ;;  %v9771_v60 = vld [vmem:[%s12557_s5 + $0x10] sm:$0xff] }
0x1aeb   :  { %9127 = vmatpush3.msra.mxu0 %v9745_v33  ;;  %9134 = vmatprep.mubr.msk.f32.mxu0 %vm10181_vm0, %v12561_v52 }
0x1aec   :  { %9128 = vmatprep.subr.mxu0 %v12561_v52 }
0x1aed   :  { %9129 = vmatpush3.msra.mxu0 %v9746_v30 }
0x1aee   :  { %9130 = vmatprep.subr.mxu0 %v12561_v52 }
0x1aef   :  { %9131 = vmatpush3.msra.mxu0 %v9747_v20  ;;  %v9772_v20 = vld [vmem:[%s12557_s5 + $0x18] sm:$0xff] }
0x1af0   :  { %9132 = vmatprep.subr.mxu0 %v12561_v52 }
0x1af1   :  { %9133 = vmatpush3.msra.mxu0 %v9748_v43 }
0x1af2   :  { %9148 = vmatprep.subr.mxu0 %v12561_v52 }
0x1baa   :  { %v4444_v51 = vpop.f32.mrf.mxu0 }
0x1bab   :  { %v4445_v39 = vadd.f32 %v9749_v36, %v4444_v51 }
0x1bac   :  { %v9114_v11 = vpop.f32.mrf.mxu0 }
0x1bad   :  { %v4448_v8 = vmax.f32 %v4445_v39, 0.0  ;;  %v9773_v39 = vld [vmem:[%s12557_s5 + $0x28] sm:$0xff] }
0x1baf   :  { %9124 = vmatmul.mubr.msk.f32.vlgmr.msra.gmra.mxu1 %vm322_vm2, %v4448_v8  ;;  %v9774_v8 = vld [vmem:[%s12557_s5 + $0x20] sm:$0xff] }
0x1bb0   :  { %9138 = vmatpush3.msra.mxu1 %v9750_v9  ;;  %9145 = vmatprep.mubr.msk.f32.mxu1 %vm10181_vm0, %v12561_v52 }
0x1bb1   :  { %9139 = vmatprep.subr.mxu1 %v12561_v52 }
0x1bb2   :  { %9140 = vmatpush3.msra.mxu1 %v9751_v13 }
0x1bb3   :  { %9141 = vmatprep.subr.mxu1 %v12561_v52 }
0x1bb4   :  { %9142 = vmatpush3.msra.mxu1 %v9752_v32 }
0x1bb5   :  { %9143 = vmatprep.subr.mxu1 %v12561_v52 }
0x1bb6   :  { %9144 = vmatpush3.msra.mxu1 %v9753_v15 }
0x1c6f   :  { %v4518_v12 = vpop.f32.mrf.mxu1 }
0x1c70   :  { %v4519_v26 = vadd.f32 %v9754_v48, %v4518_v12 }
0x1c71   :  { %v9125_v45 = vpop.f32.mrf.mxu1 }
0x1c72   :  { %v4522_v35 = vmax.f32 %v4519_v26, 0.0  ;;  %v9775_v26 = vld [vmem:[%s12558_s4] sm:$0xff] }
0x1c74   :  { %9135 = vmatmul.mubr.msk.f32.vlgmr.msra.gmra.mxu0 %vm322_vm2, %v4522_v35 }
0x1c75   :  { %9149 = vmatpush3.msra.mxu0 %v9755_v27  ;;  %9152 = vmatprep.mubr.msk.f32.mxu0 %vm10181_vm0, %v12561_v52  ;;  %v9776_v27 = vld [vmem:[%s12558_s4 + $0x8] sm:$0xff] }
0x1c76   :  { %9150 = vmatprep.subr.mxu0 %v12561_v52 }
0x1c77   :  { %9151 = vmatpush3.msra.mxu0 %v9756_v41 }
0x1c78   :  { %4920 = vmatprep.subr.mxu0 %v9757_v59  ;;  %v9777_v59 = vld [vmem:[%s12558_s4 + $0x10] sm:$0xff] }
0x1d34   :  { %v4592_v62 = vpop.f32.mrf.mxu0 }
0x1d35   :  { %v4593_v63 = vadd.f32 %v9758_v25, %v4592_v62 }
0x1d36   :  { %v9136_v17 = vpop.f32.mrf.mxu0 }
0x1d37   :  { %v4596_v21 = vmax.f32 %v4593_v63, 0.0  ;;  %v9778_v63 = vld [vmem:[%s12558_s4 + $0x18] sm:$0xff] }
0x1d39   :  { %9146 = vmatmul.mubr.msk.f32.vlgmr.msra.gmra.mxu1 %vm322_vm2, %v4596_v21 }
0x1d3a   :  { %9157 = vmatprep.mubr.msk.f32.mxu1 %vm730_vm4, %v9759_v14  ;;  %v9779_v14 = vld [vmem:[%s12558_s4 + $0x20] sm:$0xff] }
0x1df9   :  { %v4666_v58 = vpop.f32.mrf.mxu1 }
0x1dfa   :  { %v4667_v57 = vadd.f32 %v9760_v16, %v4666_v58 }
0x1dfb   :  { %v9147_v4 = vpop.f32.mrf.mxu1 }
0x1dfc   :  { %v4670_v18 = vmax.f32 %v4667_v57, 0.0  ;;  %v9780_v57 = vld [vmem:[%s12558_s4 + $0x28] sm:$0xff] }
0x1dfe   :  { %9153 = vmatmul.mubr.msk.f32.vlgmr.msra.gmra.mxu0 %vm654_vm3, %v4670_v18 }
0x1dff   :  { %4921 = vmatpush1.msra.mxu0 %v9761_v55  ;;  %4956 = vmatprep.mubr.f32.mxu0 %v12561_v52 }
0x1e00   :  { %4922 = vmatprep.subr.mxu0 %v9762_v5 }
0x1e01   :  { %4923 = vmatpush1.msra.mxu0 %v9763_v6 }
0x1ebe   :  { %v11558_v42 = vpop.f32.mrf.mxu0 }
0x1ebf   :  { %12584 = vst [vmem:[#allocation31_spill] sm:$0xff] %v11558_v42  ;;  %v11562_v50 = vsub.f32 %v11503_v29, %v11558_v42  ;;  %v9769_v29 = vld [vmem:[%s12557_s5 + $0x8] sm:$0xff] }
0x1ec0   :  { %v9154_v31 = vpop.f32.mrf.mxu0 }
0x1ec1   :  { %9155 = vmatprep.subr.msk.mxu1 %vm749_vm5, %v11562_v50 }
0x1ec2   :  { %9156 = vmatpush3.msk.msra.mxu1 %vm749_vm5, %v11562_v50 }
0x1ec3   :  { %9158 = vmatmul.mubr.msk.f32.vlgmr.msra.gmra.mxu1 %vm730_vm4, %v9764_v0 }
0x1ec4   :  { %9160 = vmatprep.mubr.msk.f32.mxu1 %vm730_vm4, %v9765_v7 }
0x1ec7   :  { %9161 = vmatmul.mubr.msk.f32.gmra.mxu1 %vm730_vm4, %v9766_v56 }
0x1ec8   :  { %9163 = vmatprep.mubr.msk.f32.mxu1 %vm730_vm4, %v9767_v2 }
0x1ecb   :  { %9164 = vmatmul.mubr.msk.f32.gmra.mxu1 %vm730_vm4, %v9768_v38 }
0x1f83   :  { %v9159_v23 = vpop.f32.mrf.mxu1 }
0x1f84   :  { %v4845_v54 = vmul.f32 %v9769_v29, %v9159_v23 }
0x1f85   :  { %v4815_v22 = vpop.f32.mrf.mxu1 }
0x1f86   :  { %v4844_v40 = vmul.f32 %v9770_v1, %v4815_v22  ;;  %v4853_v34 = vsel %vm236_vm1, %v4845_v54, 0.0 }
0x1f87   :  { %4854 = vadd.xlane.f32.xlu0 %v4853_v34  ;;  %v9162_v37 = vpop.f32.mrf.mxu1 }
0x1f88   :  { %v4850_v47 = vsel %vm236_vm1, %v4844_v40, 0.0  ;;  %v4847_v43 = vmul.f32 %v9772_v20, %v9162_v37 }
0x1f89   :  { %4851 = vadd.xlane.f32.xlu1 %v4850_v47  ;;  %v4825_v19 = vpop.f32.mrf.mxu1 }
0x1f8a   :  { %v4846_v33 = vmul.f32 %v9771_v60, %v4825_v19  ;;  %v4859_v13 = vsel %vm236_vm1, %v4847_v43, 0.0 }
0x1f8b   :  { %v9165_v30 = vpop.f32.mrf.mxu1 }
0x1f8c   :  { %v4856_v51 = vsel %vm236_vm1, %v4846_v33, 0.0  ;;  %v4849_v11 = vmul.f32 %v9773_v39, %v9165_v30 }
0x1f8d   :  { %4857 = vadd.xlane.f32.xlu0 %v4856_v51  ;;  %v4835_v36 = vpop.f32.mrf.mxu1 }
0x1f8e   :  { %v4848_v9 = vmul.f32 %v9774_v8, %v4835_v36  ;;  %v4865_v15 = vsel %vm236_vm1, %v4849_v11, 0.0 }
0x1f90   :  { %v4862_v32 = vsel %vm236_vm1, %v4848_v9, 0.0 }
0x1f91   :  { %4860 = vadd.xlane.f32.xlu0 %v4859_v13  ;;  %4863 = vadd.xlane.f32.xlu1 %v4862_v32 }
0x1f95   :  { %4866 = vadd.xlane.f32.xlu0 %v4865_v15 }
0x2010   :  { %v4855_v12 = vpop.xlane.xlu0 %4854 }
0x2011   :  { %v11597_v41 = vadd.f32 %v9776_v27, %v4855_v12 }
0x2012   :  { %v4852_v48 = vpop.xlane.xlu1 %4851 }
0x2013   :  { %v11591_v45 = vadd.f32 %v9775_v26, %v4852_v48 }
0x2015   :  { %8090 = vmatmul.mubr.msk.f32.vlgmr.msra.gmra.mxu0 %vm654_vm3, %v11591_v45 }
0x2016   :  { %v4858_v35 = vpop.xlane.xlu0 %4857  ;;  %4962 = vmatprep.mubr.f32.mxu0 %v12561_v52 }
0x2017   :  { %v11603_v62 = vadd.f32 %v9777_v59, %v4858_v35 }
0x2019   :  { %8091 = vmatmul.mubr.msk.f32.gmra.mxu0 %vm654_vm3, %v11597_v41 }
0x201a   :  { %4968 = vmatprep.mubr.f32.mxu0 %v12561_v52  ;;  %v4861_v25 = vpop.xlane.xlu0 %4860  ;;  %v4864_v21 = vpop.xlane.xlu1 %4863 }
0x201b   :  { %v11609_v17 = vadd.f32 %v9778_v63, %v4861_v25  ;;  %v11615_v58 = vadd.f32 %v9779_v14, %v4864_v21 }
0x201d   :  { %8092 = vmatmul.mubr.msk.f32.gmra.mxu0 %vm654_vm3, %v11603_v62 }
0x201e   :  { %4974 = vmatprep.mubr.f32.mxu0 %v12561_v52  ;;  %v4867_v16 = vpop.xlane.xlu0 %4866 }
0x201f   :  { %v11621_v4 = vadd.f32 %v9780_v57, %v4867_v16 }
0x2021   :  { %8093 = vmatmul.mubr.msk.f32.gmra.mxu0 %vm654_vm3, %v11609_v17 }
0x2022   :  { %4980 = vmatprep.mubr.f32.mxu0 %v12561_v52 }
0x2025   :  { %8094 = vmatmul.mubr.msk.f32.gmra.mxu0 %vm654_vm3, %v11615_v58 }
0x2026   :  { %4986 = vmatprep.mubr.f32.mxu0 %v12561_v52 }
0x2029   :  { %8095 = vmatmul.mubr.msk.f32.gmra.mxu0 %vm654_vm3, %v11621_v4 }
0x20d5   :  { %v4958_v18 = vpop.f32.mrf.mxu0 }
0x20d6   :  { %v11626_v55 = vadd.f32 %v4958_v18, %v10547_v44 }
0x20d7   :  { %v4960_v5 = vpop.f32.mrf.mxu0 }
0x20d8   :  { %9178 = vmatprep.mubr.msk.f32.mxu1 %vm654_vm3, %v11626_v55  ;;  %v11680_v30 = vadd.f32 %v4960_v5, %v10562_v61 }
0x20d9   :  { %v4964_v6 = vpop.f32.mrf.mxu0 }
0x20da   :  { %v11683_v20 = vadd.f32 %v4964_v6, %v10547_v44  ;;  %v11777_v6 = vld [vmem:[%s12560_s15 + $0x8] sm:$0xff] }
0x20db   :  { %v4966_v31 = vpop.f32.mrf.mxu0 }
0x20dc   :  { %v11671_v33 = vadd.f32 %v4966_v31, %v10562_v61 }
0x20dd   :  { %v4970_v0 = vpop.f32.mrf.mxu0 }
0x20de   :  { %v11663_v19 = vadd.f32 %v4970_v0, %v10547_v44 }
0x20df   :  { %v4972_v7 = vpop.f32.mrf.mxu0 }
0x20e0   :  { %v11666_v60 = vadd.f32 %v4972_v7, %v10562_v61 }
0x20e1   :  { %v4976_v56 = vpop.f32.mrf.mxu0 }
0x20e2   :  { %v11646_v34 = vadd.f32 %v4976_v56, %v10547_v44  ;;  %v11783_v56 = vld [vmem:[%s12560_s15] sm:$0xff] }
0x20e3   :  { %v4978_v2 = vpop.f32.mrf.mxu0 }
0x20e4   :  { %v11654_v47 = vadd.f32 %v4978_v2, %v10562_v61 }
0x20e5   :  { %v4982_v38 = vpop.f32.mrf.mxu0 }
0x20e6   :  { %v11631_v23 = vadd.f32 %v4982_v38, %v10547_v44 }
0x20e7   :  { %v4984_v29 = vpop.f32.mrf.mxu0 }
0x20e8   :  { %5007 = vrot.lane.b32.xlu0 %v11631_v23, %s12585_s9  ;;  %v11649_v37 = vadd.f32 %v4984_v29, %v10562_v61 }
0x20e9   :  { %v4988_v54 = vpop.f32.mrf.mxu0 }
0x20ea   :  { %v11636_v22 = vadd.f32 %v4988_v54, %v10547_v44 }
0x20eb   :  { %v4990_v1 = vpop.f32.mrf.mxu0 }
0x20ec   :  { %v11639_v40 = vadd.f32 %v4990_v1, %v10562_v61  ;;  %5009 = vrot.lane.b32.xlu1 %v11636_v22, %s12585_s9  ;;  %4999 = vrot.lane.b32.xlu0 %v11626_v55, %s12585_s9  ;;  %v11791_v1 = vld [vmem:[%s12560_s15 + $0x18] sm:$0xff] }
0x20ee   :  { %9187 = vmatprep.subr.mxu0 %v11639_v40 }
0x20ef   :  { %9188 = vmatpush3.msra.mxu0 %v11639_v40 }
0x20f0   :  { %9189 = vmatprep.subr.mxu0 %v11649_v37  ;;  %5005 = vrot.lane.b32.xlu1 %v11646_v34, %s12585_s9 }
0x20f1   :  { %5341 = vrot.lane.b32.xlu0 %v11631_v23, %s12586_s13  ;;  %9190 = vmatpush3.msra.mxu0 %v11649_v37 }
0x20f2   :  { %9191 = vmatprep.subr.mxu0 %v11654_v47 }
0x20f3   :  { %9192 = vmatpush3.msra.mxu0 %v11654_v47 }
0x20f4   :  { %9193 = vmatprep.subr.mxu0 %v11666_v60  ;;  %5003 = vrot.lane.b32.xlu1 %v11663_v19, %s12585_s9 }
0x20f5   :  { %5337 = vrot.lane.b32.xlu0 %v11663_v19, %s12586_s13  ;;  %9194 = vmatpush3.msra.mxu0 %v11666_v60 }
0x20f6   :  { %9195 = vmatprep.subr.mxu0 %v11671_v33 }
0x20f7   :  { %9196 = vmatpush3.msra.mxu0 %v11671_v33 }
0x20f8   :  { %5001 = vrot.lane.b32.xlu1 %v11683_v20, %s12585_s9  ;;  %9197 = vmatprep.subr.mxu0 %v11680_v30 }
0x20f9   :  { %5333 = vrot.lane.b32.xlu0 %v11626_v55, %s12586_s13  ;;  %9198 = vmatpush3.msra.mxu0 %v11680_v30 }
0x20fc   :  { %5343 = vrot.lane.b32.xlu1 %v11636_v22, %s12586_s13 }
0x20fd   :  { %5323 = vrot.lane.b32.xlu0 %v11683_v20, %s12587_s17 }
0x2100   :  { %5339 = vrot.lane.b32.xlu1 %v11646_v34, %s12586_s13 }
0x2101   :  { %5327 = vrot.lane.b32.xlu0 %v11646_v34, %s12587_s17 }
0x2104   :  { %5335 = vrot.lane.b32.xlu1 %v11683_v20, %s12586_s13 }
0x2105   :  { %5331 = vrot.lane.b32.xlu0 %v11636_v22, %s12587_s17 }
0x2108   :  { %5321 = vrot.lane.b32.xlu1 %v11626_v55, %s12587_s17 }
0x2109   :  { %5556 = vrot.lane.b32.xlu0 %v11649_v37, %s12587_s17 }
0x210c   :  { %5325 = vrot.lane.b32.xlu1 %v11663_v19, %s12587_s17 }
0x210d   :  { %5552 = vrot.lane.b32.xlu0 %v11666_v60, %s12587_s17 }
0x2110   :  { %5329 = vrot.lane.b32.xlu1 %v11631_v23, %s12587_s17 }
0x2114   :  { %5554 = vrot.lane.b32.xlu1 %v11654_v47, %s12587_s17 }
0x2118   :  { %5550 = vrot.lane.b32.xlu1 %v11671_v33, %s12587_s17 }
0x211c   :  { %5548 = vrot.lane.b32.xlu1 %v11680_v30, %s12587_s17 }
0x2120   :  { %5701 = vrot.lane.b32.xlu1 %v11636_v22, %s12588_s21 }
0x2124   :  { %5558 = vrot.lane.b32.xlu1 %v11639_v40, %s12587_s17 }
0x215a   :  { %v5008_v61 = vpop.permute.xlu0 %5007 }
0x215e   :  { %v5010_v44 = vpop.permute.xlu1 %5009  ;;  %v5000_v11 = vpop.permute.xlu0 %4999 }
0x215f   :  { %9166 = vmatprep.subr.msk.mxu1 %vm654_vm3, %v5010_v44 }
0x2160   :  { %9167 = vmatpush3.xpose.msk.msra.mxu1 %vm654_vm3, %v5010_v44 }
0x2161   :  { %9168 = vmatprep.subr.msk.mxu1 %vm654_vm3, %v5008_v61 }
0x2162   :  { %v5006_v43 = vpop.permute.xlu1 %5005 }
0x2163   :  { %v5342_v13 = vpop.permute.xlu0 %5341 }
0x2164   :  { %9169 = vmatpush3.xpose.msk.msra.mxu1 %vm654_vm3, %v5008_v61 }
0x2165   :  { %9170 = vmatprep.subr.msk.mxu1 %vm654_vm3, %v5006_v43 }
0x2166   :  { %v5004_v51 = vpop.permute.xlu1 %5003 }
0x2167   :  { %v5338_v15 = vpop.permute.xlu0 %5337 }
0x2168   :  { %9171 = vmatpush3.xpose.msk.msra.mxu1 %vm654_vm3, %v5006_v43 }
0x2169   :  { %9172 = vmatprep.subr.msk.mxu1 %vm654_vm3, %v5004_v51 }
0x216a   :  { %v5002_v36 = vpop.permute.xlu1 %5001 }
0x216b   :  { %v5334_v26 = vpop.permute.xlu0 %5333 }
0x216c   :  { %9173 = vmatpush3.xpose.msk.msra.mxu1 %vm654_vm3, %v5004_v51 }
0x216d   :  { %9174 = vmatprep.subr.msk.mxu1 %vm654_vm3, %v5002_v36 }
0x216e   :  { %v5344_v39 = vpop.permute.xlu1 %5343 }
0x216f   :  { %v5324_v27 = vpop.permute.xlu0 %5323 }
0x2170   :  { %9175 = vmatpush3.xpose.msk.msra.mxu1 %vm654_vm3, %v5002_v36  ;;  %v11799_v36 = vld [vmem:[%s12560_s15 + $0x10] sm:$0xff] }
0x2171   :  { %9176 = vmatprep.subr.msk.mxu1 %vm654_vm3, %v5000_v11 }
0x2172   :  { %v5340_v8 = vpop.permute.xlu1 %5339 }
0x2173   :  { %v5328_v63 = vpop.permute.xlu0 %5327 }
0x2174   :  { %9177 = vmatpush3.xpose.msk.msra.mxu1 %vm654_vm3, %v5000_v11 }
0x2175   :  { %9208 = vmatprep.subr.msk.mxu1 %vm654_vm3, %v5344_v39 }
0x2176   :  { %v5336_v9 = vpop.permute.xlu1 %5335 }
0x2177   :  { %9179 = vmatmul.mubr.msk.f32.vlgmr.msra.gmra.mxu1 %vm654_vm3, %v11683_v20  ;;  %v5332_v14 = vpop.permute.xlu0 %5331 }
0x2178   :  { %9181 = vmatprep.mubr.msk.f32.mxu1 %vm654_vm3, %v11663_v19  ;;  %9209 = vmatpush3.xpose.msk.msra.mxu1 %vm654_vm3, %v5344_v39 }
0x2179   :  { %9210 = vmatprep.subr.msk.mxu1 %vm654_vm3, %v5342_v13 }
0x217a   :  { %v5322_v32 = vpop.permute.xlu1 %5321 }
0x217b   :  { %9182 = vmatmul.mubr.msk.f32.gmra.mxu1 %vm654_vm3, %v11646_v34 }
0x217c   :  { %9184 = vmatprep.mubr.msk.f32.mxu1 %vm654_vm3, %v11631_v23  ;;  %9211 = vmatpush3.xpose.msk.msra.mxu1 %vm654_vm3, %v5342_v13 }
0x217d   :  { %9212 = vmatprep.subr.msk.mxu1 %vm654_vm3, %v5340_v8 }
0x217e   :  { %v5326_v12 = vpop.permute.xlu1 %5325 }
0x217f   :  { %9185 = vmatmul.mubr.msk.f32.gmra.mxu1 %vm654_vm3, %v11636_v22 }
0x2180   :  { %9213 = vmatpush3.xpose.msk.msra.mxu1 %vm654_vm3, %v5340_v8  ;;  %9220 = vmatprep.mubr.msk.f32.mxu1 %vm654_vm3, %v5322_v32  ;;  %v11807_v32 = vld [vmem:[%s12560_s15 + $0x28] sm:$0xff] }
0x2181   :  { %9214 = vmatprep.subr.msk.mxu1 %vm654_vm3, %v5338_v15 }
0x2182   :  { %v5330_v48 = vpop.permute.xlu1 %5329 }
0x2184   :  { %9215 = vmatpush3.xpose.msk.msra.mxu1 %vm654_vm3, %v5338_v15 }
0x2185   :  { %9216 = vmatprep.subr.msk.mxu1 %vm654_vm3, %v5336_v9 }
0x2186   :  { %v11757_v35 = vpop.permute.xlu1 %5554 }
0x2188   :  { %9217 = vmatpush3.xpose.msk.msra.mxu1 %vm654_vm3, %v5336_v9 }
0x2189   :  { %9218 = vmatprep.subr.msk.mxu1 %vm654_vm3, %v5334_v26 }
0x218a   :  { %v11761_v59 = vpop.permute.xlu1 %5550 }
0x218c   :  { %9219 = vmatpush3.xpose.msk.msra.mxu1 %vm654_vm3, %v5334_v26 }
0x218e   :  { %v11764_v25 = vpop.permute.xlu1 %5548 }
0x218f   :  { %9221 = vmatmul.mubr.msk.f32.vlgmr.msra.gmra.mxu1 %vm654_vm3, %v5324_v27 }
0x2190   :  { %9223 = vmatprep.mubr.msk.f32.mxu1 %vm654_vm3, %v5326_v12  ;;  %v11813_v12 = vld [vmem:[%s12560_s15 + $0x20] sm:$0xff] }
0x2192   :  { %v11768_v21 = vpop.permute.xlu1 %5701 }
0x2193   :  { %9224 = vmatmul.mubr.msk.f32.gmra.mxu1 %vm654_vm3, %v5328_v63 }
0x2194   :  { %9226 = vmatprep.mubr.msk.f32.mxu1 %vm654_vm3, %v5330_v48 }
0x2196   :  { %v11772_v16 = vpop.permute.xlu1 %5558 }
0x2197   :  { %9227 = vmatmul.mubr.msk.f32.gmra.mxu1 %vm654_vm3, %v5332_v14  ;;  %9229 = vmatprep.subr.mxu0 %v11772_v16 }
0x2237   :  { %v9180_v57 = vpop.f32.mrf.mxu1 }
0x2238   :  { %v5131_v18 = vmul.f32 0.25, %v9180_v57 }
0x2239   :  { %v5101_v5 = vpop.f32.mrf.mxu1 }
0x223a   :  { %v11780_v31 = vadd.f32 %v11777_v6, %v5131_v18  ;;  %v5130_v0 = vmul.f32 0.25, %v5101_v5 }
0x223b   :  { %v9183_v7 = vpop.f32.mrf.mxu1 }
0x223c   :  { %v11786_v2 = vadd.f32 %v11783_v56, %v5130_v0  ;;  %v5133_v38 = vmul.f32 0.25, %v9183_v7  ;;  %v5145_v29 = vsel %vm1162_vm6, %v11780_v31, -inf }
0x223d   :  { %5146 = vmax.xlane.f32.xlu0 %v5145_v29  ;;  %v5111_v54 = vpop.f32.mrf.mxu1 }
0x223e   :  { %v11794_v44 = vadd.f32 %v11791_v1, %v5133_v38  ;;  %v5132_v61 = vmul.f32 0.25, %v5111_v54  ;;  %v5142_v43 = vsel %vm1162_vm6, %v11786_v2, -inf }
0x223f   :  { %5143 = vmax.xlane.f32.xlu1 %v5142_v43  ;;  %v9186_v51 = vpop.f32.mrf.mxu1 }
0x2240   :  { %v11802_v39 = vadd.f32 %v11799_v36, %v5132_v61  ;;  %v5135_v11 = vmul.f32 0.25, %v9186_v51  ;;  %v5151_v8 = vsel %vm1162_vm6, %v11794_v44, -inf }
0x2241   :  { %5152 = vmax.xlane.f32.xlu0 %v5151_v8  ;;  %v5121_v9 = vpop.f32.mrf.mxu1 }
0x2242   :  { %v5134_v13 = vmul.f32 0.25, %v5121_v9  ;;  %v11810_v15 = vadd.f32 %v11807_v32, %v5135_v11  ;;  %v5148_v26 = vsel %vm1162_vm6, %v11802_v39, -inf }
0x2244   :  { %v5140_v48 = vadd.f32 %v11813_v12, %v5134_v13  ;;  %v5157_v63 = vsel %vm1162_vm6, %v11810_v15, -inf }
0x2245   :  { %5149 = vmax.xlane.f32.xlu0 %v5148_v26 }
0x2246   :  { %v5154_v27 = vsel %vm1162_vm6, %v5140_v48, -inf }
0x2247   :  { %5155 = vmax.xlane.f32.xlu1 %v5154_v27 }
0x2249   :  { %5158 = vmax.xlane.f32.xlu0 %v5157_v63 }
0x224f   :  { %v9222_v14 = vpop.f32.mrf.mxu1 }
0x2250   :  { %v5465_v57 = vmul.f32 0.25, %v9222_v14 }
0x2251   :  { %v5435_v18 = vpop.f32.mrf.mxu1 }
0x2252   :  { %v11822_v5 = vadd.f32 %v11777_v6, %v5465_v57  ;;  %v5464_v0 = vmul.f32 0.25, %v5435_v18 }
0x2253   :  { %v9225_v7 = vpop.f32.mrf.mxu1 }
0x2254   :  { %v11825_v38 = vadd.f32 %v11783_v56, %v5464_v0  ;;  %v5467_v29 = vmul.f32 0.25, %v9225_v7  ;;  %v5479_v54 = vsel %vm1162_vm6, %v11822_v5, -inf }
0x2255   :  { %5480 = vmax.xlane.f32.xlu0 %v5479_v54  ;;  %v5445_v61 = vpop.f32.mrf.mxu1 }
0x2256   :  { %v11830_v43 = vadd.f32 %v11791_v1, %v5467_v29  ;;  %v5466_v51 = vmul.f32 0.25, %v5445_v61  ;;  %v5476_v11 = vsel %vm1162_vm6, %v11825_v38, -inf  ;;  %v11855_v29 = vpop.permute.xlu0 %5556 }
0x2257   :  { %v9228_v8 = vpop.f32.mrf.mxu1  ;;  %5477 = vmax.xlane.f32.xlu1 %v5476_v11 }
0x2258   :  { %v11835_v9 = vadd.f32 %v11799_v36, %v5466_v51  ;;  %v5469_v13 = vmul.f32 0.25, %v9228_v8  ;;  %v5485_v26 = vsel %vm1162_vm6, %v11830_v43, -inf }
0x2259   :  { %5486 = vmax.xlane.f32.xlu0 %v5485_v26  ;;  %v5455_v27 = vpop.f32.mrf.mxu1 }
0x225a   :  { %v11840_v63 = vadd.f32 %v11807_v32, %v5469_v13  ;;  %v5468_v14 = vmul.f32 0.25, %v5455_v27  ;;  %v5482_v57 = vsel %vm1162_vm6, %v11835_v9, -inf  ;;  %v11857_v54 = vpop.permute.xlu0 %5552 }
0x225b   :  { %5483 = vmax.xlane.f32.xlu1 %v5482_v57 }
0x225c   :  { %v11845_v18 = vadd.f32 %v11813_v12, %v5468_v14  ;;  %v5491_v0 = vsel %vm1162_vm6, %v11840_v63, -inf }
0x225d   :  { %5492 = vmax.xlane.f32.xlu0 %v5491_v0 }
0x225e   :  { %v5488_v7 = vsel %vm1162_vm6, %v11845_v18, -inf }
0x225f   :  { %5489 = vmax.xlane.f32.xlu1 %v5488_v7 }
0x2270   :  { %5697 = vrot.lane.b32.xlu1 %v11646_v34, %s12588_s21 }
0x2273   :  { %5699 = vrot.lane.b32.xlu0 %v11631_v23, %s12588_s21 }
0x22c6   :  { %v5147_v61 = vpop.xlane.xlu0 %5146 }
0x22c7   :  { %v5161_v51 = vsub.f32 %v11780_v31, %v5147_v61 }
0x22c8   :  { %v5144_v11 = vpop.xlane.xlu1 %5143 }
0x22c9   :  { %v5168_v8 = vmul.f32 1.442695, %v5161_v51  ;;  %v5160_v13 = vsub.f32 %v11786_v2, %v5144_v11 }
0x22ca   :  { %v5153_v26 = vpop.xlane.xlu0 %5152 }
0x22cb   :  { %9625 = vpow2.f32 %v5168_v8  ;;  %v5166_v27 = vmul.f32 1.442695, %v5160_v13  ;;  %v5163_v14 = vsub.f32 %v11794_v44, %v5153_v26 }
0x22cd   :  { %9627 = vpow2.f32 %v5166_v27  ;;  %v5172_v57 = vmul.f32 1.442695, %v5163_v14 }
0x22ce   :  { %v5150_v0 = vpop.xlane.xlu0 %5149 }
0x22cf   :  { %9629 = vpow2.f32 %v5172_v57  ;;  %v5162_v7 = vsub.f32 %v11802_v39, %v5150_v0 }
0x22d0   :  { %v5156_v46 = vpop.xlane.xlu1 %5155 }
0x22d1   :  { %v5170_v42 = vmul.f32 1.442695, %v5162_v7  ;;  %v5164_v49 = vsub.f32 %v5140_v48, %v5156_v46 }
0x22d2   :  { %v5159_v3 = vpop.xlane.xlu0 %5158 }
0x22d3   :  { %9631 = vpow2.f32 %v5170_v42  ;;  %v5174_v31 = vmul.f32 1.442695, %v5164_v49  ;;  %v5165_v61 = vsub.f32 %v11810_v15, %v5159_v3 }
0x22d5   :  { %9633 = vpow2.f32 %v5174_v31  ;;  %v5176_v2 = vmul.f32 1.442695, %v5165_v61 }
0x22d7   :  { %9635 = vpow2.f32 %v5176_v2 }
0x22d8   :  { %v11864_v51 = vpop.eup %9625 }
0x22d9   :  { %v5181_v44 = vsel %vm1162_vm6, %v11864_v51, 0.0 }
0x22da   :  { %v11868_v11 = vpop.eup %9627  ;;  %5182 = vadd.xlane.f32.xlu0 %v5181_v44 }
0x22db   :  { %v5178_v39 = vsel %vm1162_vm6, %v11868_v11, 0.0 }
0x22dc   :  { %v11872_v46 = vpop.eup %9629  ;;  %5179 = vadd.xlane.f32.xlu1 %v5178_v39 }
0x22dd   :  { %v5187_v49 = vsel %vm1162_vm6, %v11872_v46, 0.0 }
0x22de   :  { %v5481_v3 = vpop.xlane.xlu0 %5480  ;;  %5188 = vadd.xlane.f32.xlu0 %v5187_v49 }
0x22df   :  { %v5495_v42 = vsub.f32 %v11822_v5, %v5481_v3 }
0x22e0   :  { %v11877_v15 = vpop.eup %9631  ;;  %v5478_v48 = vpop.xlane.xlu1 %5477 }
0x22e1   :  { %v5502_v8 = vmul.f32 1.442695, %v5495_v42  ;;  %v5494_v13 = vsub.f32 %v11825_v38, %v5478_v48  ;;  %v5184_v26 = vsel %vm1162_vm6, %v11877_v15, 0.0 }
0x22e2   :  { %v11882_v27 = vpop.eup %9633  ;;  %5185 = vadd.xlane.f32.xlu1 %v5184_v26  ;;  %v5487_v2 = vpop.xlane.xlu0 %5486 }
0x22e3   :  { %9637 = vpow2.f32 %v5502_v8  ;;  %v5500_v14 = vmul.f32 1.442695, %v5494_v13  ;;  %v5190_v0 = vsel %vm1162_vm6, %v11882_v27, 0.0  ;;  %v5497_v39 = vsub.f32 %v11830_v43, %v5487_v2 }
0x22e4   :  { %v11884_v57 = vpop.eup %9635  ;;  %v5484_v44 = vpop.xlane.xlu1 %5483 }
0x22e5   :  { %9639 = vpow2.f32 %v5500_v14  ;;  %v5193_v5 = vsel %vm1162_vm6, %v11884_v57, 0.0  ;;  %v5496_v3 = vsub.f32 %v11835_v9, %v5484_v44  ;;  %v5506_v48 = vmul.f32 1.442695, %v5497_v39 }
0x22e6   :  { %5194 = vadd.xlane.f32.xlu0 %v5193_v5  ;;  %5191 = vadd.xlane.f32.xlu1 %v5190_v0  ;;  %v5493_v49 = vpop.xlane.xlu0 %5492 }
0x22e7   :  { %v5499_v8 = vsub.f32 %v11840_v63, %v5493_v49  ;;  %v5504_v13 = vmul.f32 1.442695, %v5496_v3  ;;  %9641 = vpow2.f32 %v5506_v48 }
0x22e8   :  { %v5490_v42 = vpop.xlane.xlu1 %5489 }
0x22e9   :  { %v5498_v26 = vsub.f32 %v11845_v18, %v5490_v42  ;;  %v5510_v14 = vmul.f32 1.442695, %v5499_v8  ;;  %9643 = vpow2.f32 %v5504_v13 }
0x22ea   :  { %v5700_v44 = vpop.permute.xlu0 %5699 }
0x22eb   :  { %v5508_v5 = vmul.f32 1.442695, %v5498_v26  ;;  %9645 = vpow2.f32 %v5510_v14 }
0x22ec   :  { %v5698_v39 = vpop.permute.xlu1 %5697 }
0x22ed   :  { %9647 = vpow2.f32 %v5508_v5 }
0x22f0   :  { %v11890_v38 = vpop.eup %9637 }
0x22f1   :  { %v5515_v7 = vsel %vm1162_vm6, %v11890_v38, 0.0 }
0x22f2   :  { %v11894_v31 = vpop.eup %9639  ;;  %5516 = vadd.xlane.f32.xlu0 %v5515_v7 }
0x22f3   :  { %v5512_v61 = vsel %vm1162_vm6, %v11894_v31, 0.0 }
0x22f4   :  { %5513 = vadd.xlane.f32.xlu1 %v5512_v61  ;;  %v11906_v0 = vpop.eup %9641 }
0x22f5   :  { %v5521_v43 = vsel %vm1162_vm6, %v11906_v0, 0.0 }
0x22f6   :  { %v11908_v7 = vpop.eup %9643 }
0x22f7   :  { %v5518_v63 = vsel %vm1162_vm6, %v11908_v7, 0.0 }
0x22f8   :  { %v11912_v9 = vpop.eup %9645 }
0x22f9   :  { %v5527_v61 = vsel %vm1162_vm6, %v11912_v9, 0.0 }
0x22fa   :  { %v11916_v18 = vpop.eup %9647 }
0x22fb   :  { %v5524_v2 = vsel %vm1162_vm6, %v11916_v18, 0.0 }
0x2305   :  { %5693 = vrot.lane.b32.xlu1 %v11683_v20, %s12588_s21 }
0x2308   :  { %5695 = vrot.lane.b32.xlu0 %v11663_v19, %s12588_s21 }
0x2327   :  { %5522 = vadd.xlane.f32.xlu0 %v5521_v43 }
0x2329   :  { %5519 = vadd.xlane.f32.xlu1 %v5518_v63 }
0x232b   :  { %5528 = vadd.xlane.f32.xlu0 %v5527_v61 }
0x232d   :  { %5525 = vadd.xlane.f32.xlu1 %v5524_v2 }
0x233e   :  { %5679 = vrot.lane.b32.xlu1 %v11626_v55, %s12589_s25 }
0x2341   :  { %5691 = vrot.lane.b32.xlu0 %v11626_v55, %s12588_s21 }
0x2342   :  { %5683 = vrot.lane.b32.xlu1 %v11663_v19, %s12589_s25 }
0x2345   :  { %5681 = vrot.lane.b32.xlu0 %v11683_v20, %s12589_s25 }
0x2346   :  { %5687 = vrot.lane.b32.xlu1 %v11631_v23, %s12589_s25 }
0x2349   :  { %5685 = vrot.lane.b32.xlu0 %v11646_v34, %s12589_s25 }
0x234a   :  { %5910 = vrot.lane.b32.xlu1 %v11639_v40, %s12589_s25 }
0x234d   :  { %5689 = vrot.lane.b32.xlu0 %v11636_v22, %s12589_s25 }
0x234e   :  { %5906 = vrot.lane.b32.xlu1 %v11654_v47, %s12589_s25 }
0x2351   :  { %5908 = vrot.lane.b32.xlu0 %v11649_v37, %s12589_s25 }
0x2352   :  { %5902 = vrot.lane.b32.xlu1 %v11671_v33, %s12589_s25 }
0x2355   :  { %5904 = vrot.lane.b32.xlu0 %v11666_v60, %s12589_s25 }
0x2356   :  { %5900 = vrot.lane.b32.xlu1 %v11680_v30, %s12589_s25 }
0x235a   :  { %6053 = vrot.lane.b32.xlu1 %v11636_v22, %s12590_s29 }
0x2363   :  { %v5183_v49 = vpop.xlane.xlu0 %5182 }
0x2364   :  { %9649 = vrcp.f32 %v5183_v49 }
0x2365   :  { %v5180_v3 = vpop.xlane.xlu1 %5179 }
0x2366   :  { %9651 = vrcp.f32 %v5180_v3 }
0x2367   :  { %v5189_v42 = vpop.xlane.xlu0 %5188 }
0x2368   :  { %9653 = vrcp.f32 %v5189_v42 }
0x236b   :  { %v5186_v48 = vpop.xlane.xlu1 %5185 }
0x236c   :  { %9655 = vrcp.f32 %v5186_v48 }
0x236f   :  { %v5195_v8 = vpop.xlane.xlu0 %5194  ;;  %v5192_v13 = vpop.xlane.xlu1 %5191 }
0x2370   :  { %9657 = vrcp.f32 %v5195_v8 }
0x2371   :  { %9659 = vrcp.f32 %v5192_v13  ;;  %v9650_v26 = vpop.eup %9649 }
0x2372   :  { %v5199_v43 = vmul.f32 %v9650_v26, %v11864_v51 }
0x2373   :  { %v9652_v14 = vpop.eup %9651 }
0x2374   :  { %v5197_v5 = vmul.f32 %v9652_v14, %v11868_v11 }
0x2375   :  { %v9654_v63 = vpop.eup %9653 }
0x2376   :  { %9199 = vmatprep.mubr.msk.f32.mxu0 %vm1162_vm6, %v5197_v5  ;;  %v5203_v11 = vmul.f32 %v9654_v63, %v11872_v46 }
0x2377   :  { %9200 = vmatmul.mubr.msk.f32.vlgmr.msra.gmra.mxu0 %vm1162_vm6, %v5199_v43 }
0x2378   :  { %9230 = vmatpush3.msra.mxu0 %v11772_v16 }
0x2379   :  { %v9656_v61 = vpop.eup %9655  ;;  %9231 = vmatprep.subr.mxu0 %v11855_v29 }
0x237a   :  { %9232 = vmatpush3.msra.mxu0 %v11855_v29  ;;  %v5201_v2 = vmul.f32 %v9656_v61, %v11877_v15 }
0x237b   :  { %9233 = vmatprep.subr.mxu0 %v11757_v35  ;;  %v5517_v49 = vpop.xlane.xlu0 %5516 }
0x237c   :  { %9234 = vmatpush3.msra.mxu0 %v11757_v35  ;;  %9202 = vmatprep.mubr.msk.f32.mxu0 %vm1162_vm6, %v5201_v2  ;;  %9661 = vrcp.f32 %v5517_v49 }
0x237d   :  { %v9658_v51 = vpop.eup %9657  ;;  %9235 = vmatprep.subr.mxu0 %v11857_v54  ;;  %9203 = vmatmul.mubr.msk.f32.gmra.mxu0 %vm1162_vm6, %v5203_v11  ;;  %v5514_v16 = vpop.xlane.xlu1 %5513 }
0x237e   :  { %v9660_v3 = vpop.eup %9659  ;;  %9236 = vmatpush3.msra.mxu0 %v11857_v54  ;;  %9663 = vrcp.f32 %v5514_v16  ;;  %v5207_v29 = vmul.f32 %v9658_v51, %v11884_v57 }
0x237f   :  { %9237 = vmatprep.subr.mxu0 %v11761_v59  ;;  %v5205_v46 = vmul.f32 %v9660_v3, %v11882_v27 }
0x2380   :  { %9238 = vmatpush3.msra.mxu0 %v11761_v59  ;;  %v5696_v59 = vpop.permute.xlu0 %5695 }
0x2381   :  { %9205 = vmatprep.mubr.msk.f32.mxu0 %vm1162_vm6, %v5205_v46  ;;  %9239 = vmatprep.subr.mxu0 %v11764_v25 }
0x2382   :  { %9206 = vmatmul.mubr.msk.f32.gmra.mxu0 %vm1162_vm6, %v5207_v29 }
0x2383   :  { %9240 = vmatpush3.msra.mxu0 %v11764_v25  ;;  %v5694_v25 = vpop.permute.xlu1 %5693 }
0x2384   :  { %9250 = vmatprep.subr.msk.mxu0 %vm654_vm3, %v11768_v21 }
0x2389   :  { %v9662_v35 = vpop.eup %9661 }
0x238a   :  { %v5533_v57 = vmul.f32 %v9662_v35, %v11890_v38 }
0x238b   :  { %v9664_v54 = vpop.eup %9663 }
0x238c   :  { %v5531_v15 = vmul.f32 %v9664_v54, %v11894_v31 }
0x238e   :  { %9241 = vmatprep.mubr.msk.f32.mxu0 %vm1162_vm6, %v5531_v15 }
0x238f   :  { %9242 = vmatmul.mubr.msk.f32.vlgmr.msra.gmra.mxu0 %vm1162_vm6, %v5533_v57 }
0x2390   :  { %9251 = vmatpush3.xpose.msk.msra.mxu0 %vm654_vm3, %v11768_v21 }
0x2391   :  { %9252 = vmatprep.subr.msk.mxu0 %vm654_vm3, %v5700_v44 }
0x2394   :  { %9253 = vmatpush3.xpose.msk.msra.mxu0 %vm654_vm3, %v5700_v44 }
0x2395   :  { %9254 = vmatprep.subr.msk.mxu0 %vm654_vm3, %v5698_v39 }
0x2398   :  { %9255 = vmatpush3.xpose.msk.msra.mxu0 %vm654_vm3, %v5698_v39 }
0x2399   :  { %9256 = vmatprep.subr.msk.mxu0 %vm654_vm3, %v5696_v59 }
0x239c   :  { %9257 = vmatpush3.xpose.msk.msra.mxu0 %vm654_vm3, %v5696_v59 }
0x239d   :  { %9258 = vmatprep.subr.msk.mxu0 %vm654_vm3, %v5694_v25 }
0x23a0   :  { %9259 = vmatpush3.xpose.msk.msra.mxu0 %vm654_vm3, %v5694_v25 }
0x23b0   :  { %v5523_v27 = vpop.xlane.xlu0 %5522 }
0x23b1   :  { %9665 = vrcp.f32 %v5523_v27 }
0x23b2   :  { %v5520_v21 = vpop.xlane.xlu1 %5519 }
0x23b3   :  { %9667 = vrcp.f32 %v5520_v21 }
0x23b4   :  { %v5529_v38 = vpop.xlane.xlu0 %5528 }
0x23b5   :  { %9669 = vrcp.f32 %v5529_v38 }
0x23b6   :  { %v5526_v31 = vpop.xlane.xlu1 %5525 }
0x23b7   :  { %9671 = vrcp.f32 %v5526_v31 }
0x23b8   :  { %v5692_v44 = vpop.permute.xlu0 %5691 }
0x23b9   :  { %9260 = vmatprep.subr.msk.mxu0 %vm654_vm3, %v5692_v44 }
0x23ba   :  { %9261 = vmatpush3.xpose.msk.msra.mxu0 %vm654_vm3, %v5692_v44  ;;  %v5680_v39 = vpop.permute.xlu1 %5679 }
0x23bc   :  { %v5682_v42 = vpop.permute.xlu0 %5681 }
0x23be   :  { %v5684_v48 = vpop.permute.xlu1 %5683  ;;  %v9666_v8 = vpop.eup %9665 }
0x23bf   :  { %v5537_v43 = vmul.f32 %v9666_v8, %v11906_v0 }
0x23c0   :  { %v9668_v13 = vpop.eup %9667  ;;  %v5686_v26 = vpop.permute.xlu0 %5685 }
0x23c1   :  { %v5535_v14 = vmul.f32 %v9668_v13, %v11908_v7 }
0x23c2   :  { %v5688_v5 = vpop.permute.xlu1 %5687  ;;  %v9670_v63 = vpop.eup %9669 }
0x23c3   :  { %9244 = vmatprep.mubr.msk.f32.mxu0 %vm1162_vm6, %v5535_v14  ;;  %v5541_v51 = vmul.f32 %v9670_v63, %v11912_v9 }
0x23c4   :  { %v9672_v61 = vpop.eup %9671  ;;  %v5690_v2 = vpop.permute.xlu0 %5689  ;;  %9245 = vmatmul.mubr.msk.f32.gmra.mxu0 %vm1162_vm6, %v5537_v43 }
0x23c5   :  { %v5539_v49 = vmul.f32 %v9672_v61, %v11916_v18 }
0x23c6   :  { %v5911_v11 = vpop.permute.xlu1 %5910 }
0x23c7   :  { %9247 = vmatprep.mubr.msk.f32.mxu0 %vm1162_vm6, %v5539_v49  ;;  %9271 = vmatprep.subr.mxu1 %v5911_v11 }
0x23c8   :  { %v5909_v16 = vpop.permute.xlu0 %5908  ;;  %9248 = vmatmul.mubr.msk.f32.gmra.mxu0 %vm1162_vm6, %v5541_v51  ;;  %9272 = vmatpush3.msra.mxu1 %v5911_v11 }
0x23c9   :  { %9262 = vmatprep.mubr.msk.f32.mxu0 %vm654_vm3, %v5680_v39  ;;  %9273 = vmatprep.subr.mxu1 %v5909_v16 }
0x23ca   :  { %9274 = vmatpush3.msra.mxu1 %v5909_v16  ;;  %v5907_v0 = vpop.permute.xlu1 %5906 }
0x23cb   :  { %9275 = vmatprep.subr.mxu1 %v5907_v0 }
0x23cc   :  { %v5905_v7 = vpop.permute.xlu0 %5904  ;;  %9263 = vmatmul.mubr.msk.f32.vlgmr.msra.gmra.mxu0 %vm654_vm3, %v5682_v42  ;;  %9276 = vmatpush3.msra.mxu1 %v5907_v0 }
0x23cd   :  { %9265 = vmatprep.mubr.msk.f32.mxu0 %vm654_vm3, %v5684_v48  ;;  %9277 = vmatprep.subr.mxu1 %v5905_v7 }
0x23ce   :  { %9278 = vmatpush3.msra.mxu1 %v5905_v7  ;;  %v5903_v9 = vpop.permute.xlu1 %5902 }
0x23cf   :  { %9279 = vmatprep.subr.mxu1 %v5903_v9 }
0x23d0   :  { %9266 = vmatmul.mubr.msk.f32.gmra.mxu0 %vm654_vm3, %v5686_v26  ;;  %9280 = vmatpush3.msra.mxu1 %v5903_v9 }
0x23d1   :  { %9268 = vmatprep.mubr.msk.f32.mxu0 %vm654_vm3, %v5688_v5 }
0x23d2   :  { %v5901_v18 = vpop.permute.xlu1 %5900 }
0x23d3   :  { %9281 = vmatprep.subr.mxu1 %v5901_v18 }
0x23d4   :  { %9269 = vmatmul.mubr.msk.f32.gmra.mxu0 %vm654_vm3, %v5690_v2  ;;  %9282 = vmatpush3.msra.mxu1 %v5901_v18 }
0x23d6   :  { %v12005_v3 = vpop.permute.xlu1 %6053 }
0x23d7   :  { %9292 = vmatprep.subr.msk.mxu1 %vm654_vm3, %v12005_v3 }
0x2437   :  { %v12009_v29 = vpop.f32.mrf.mxu0 }
0x2439   :  { %v12011_v46 = vpop.f32.mrf.mxu0 }
0x243d   :  { %v12013_v35 = vpop.f32.mrf.mxu0 }
0x243f   :  { %v12015_v54 = vpop.f32.mrf.mxu0 }
0x2442   :  { %v12017_v15 = vpop.f32.mrf.mxu0 }
0x2444   :  { %v12019_v57 = vpop.f32.mrf.mxu0 }
0x244f   :  { %v12021_v59 = vpop.f32.mrf.mxu0 }
0x2451   :  { %v12023_v25 = vpop.f32.mrf.mxu0 }
0x2484   :  { %v12025_v27 = vpop.f32.mrf.mxu0 }
0x2486   :  { %v12027_v21 = vpop.f32.mrf.mxu0 }
0x2488   :  { %v12029_v38 = vpop.f32.mrf.mxu0 }
0x248a   :  { %v12031_v31 = vpop.f32.mrf.mxu0 }
0x248c   :  { %v9264_v44 = vpop.f32.mrf.mxu0 }
0x248d   :  { %v5823_v39 = vmul.f32 0.25, %v9264_v44 }
0x248e   :  { %v5793_v42 = vpop.f32.mrf.mxu0 }
0x248f   :  { %v5829_v48 = vadd.f32 %v11777_v6, %v5823_v39  ;;  %v5822_v8 = vmul.f32 0.25, %v5793_v42 }
0x2490   :  { %v9267_v13 = vpop.f32.mrf.mxu0 }
0x2491   :  { %v5828_v26 = vadd.f32 %v11783_v56, %v5822_v8  ;;  %v5825_v14 = vmul.f32 0.25, %v9267_v13  ;;  %v5837_v5 = vsel %vm1162_vm6, %v5829_v48, -inf }
0x2492   :  { %5838 = vmax.xlane.f32.xlu0 %v5837_v5  ;;  %v5803_v43 = vpop.f32.mrf.mxu0 }
0x2493   :  { %v5831_v63 = vadd.f32 %v11791_v1, %v5825_v14  ;;  %v5824_v61 = vmul.f32 0.25, %v5803_v43  ;;  %v5834_v2 = vsel %vm1162_vm6, %v5828_v26, -inf }
0x2494   :  { %5835 = vmax.xlane.f32.xlu1 %v5834_v2  ;;  %v9270_v49 = vpop.f32.mrf.mxu0 }
0x2495   :  { %v5830_v11 = vadd.f32 %v11799_v36, %v5824_v61  ;;  %v5827_v51 = vmul.f32 0.25, %v9270_v49  ;;  %v5843_v16 = vsel %vm1162_vm6, %v5831_v63, -inf }
0x2496   :  { %5844 = vmax.xlane.f32.xlu0 %v5843_v16  ;;  %v5813_v18 = vpop.f32.mrf.mxu0 }
0x2497   :  { %v5833_v0 = vadd.f32 %v11807_v32, %v5827_v51  ;;  %v5840_v7 = vsel %vm1162_vm6, %v5830_v11, -inf  ;;  %v5826_v44 = vmul.f32 0.25, %v5813_v18 }
0x2499   :  { %v5849_v9 = vsel %vm1162_vm6, %v5833_v0, -inf  ;;  %v5832_v39 = vadd.f32 %v11813_v12, %v5826_v44 }
0x249a   :  { %5841 = vmax.xlane.f32.xlu0 %v5840_v7 }
0x249b   :  { %v5846_v42 = vsel %vm1162_vm6, %v5832_v39, -inf }
0x249e   :  { %5850 = vmax.xlane.f32.xlu0 %v5849_v9 }
0x24a5   :  { %6049 = vrot.lane.b32.xlu1 %v11646_v34, %s12590_s29 }
0x24b4   :  { %6051 = vrot.lane.b32.xlu0 %v11631_v23, %s12590_s29 }
0x24c9   :  { %5847 = vmax.xlane.f32.xlu1 %v5846_v42 }
0x24da   :  { %6045 = vrot.lane.b32.xlu1 %v11683_v20, %s12590_s29 }
0x251b   :  { %v5839_v8 = vpop.xlane.xlu0 %5838 }
0x251c   :  { %v5853_v13 = vsub.f32 %v5829_v48, %v5839_v8 }
0x251d   :  { %v5836_v14 = vpop.xlane.xlu1 %5835 }
0x251e   :  { %v5860_v5 = vmul.f32 1.442695, %v5853_v13  ;;  %v5852_v43 = vsub.f32 %v5828_v26, %v5836_v14 }
0x251f   :  { %v5845_v61 = vpop.xlane.xlu0 %5844 }
0x2520   :  { %9673 = vpow2.f32 %v5860_v5  ;;  %v5858_v2 = vmul.f32 1.442695, %v5852_v43  ;;  %v5855_v26 = vsub.f32 %v5831_v63, %v5845_v61 }
0x2521   :  { %v6050_v8 = vpop.permute.xlu1 %6049 }
0x2522   :  { %9675 = vpow2.f32 %v5858_v2  ;;  %v5864_v13 = vmul.f32 1.442695, %v5855_v26 }
0x2523   :  { %v5842_v49 = vpop.xlane.xlu0 %5841 }
0x2524   :  { %v5854_v51 = vsub.f32 %v5830_v11, %v5842_v49 }
0x2526   :  { %v5862_v16 = vmul.f32 1.442695, %v5854_v51 }
0x2527   :  { %v5851_v11 = vpop.xlane.xlu0 %5850 }
0x2528   :  { %9677 = vpow2.f32 %v5862_v16  ;;  %v5857_v14 = vsub.f32 %v5833_v0, %v5851_v11 }
0x2529   :  { %9679 = vpow2.f32 %v5864_v13 }
0x252a   :  { %v5868_v43 = vmul.f32 1.442695, %v5857_v14 }
0x252b   :  { %v6052_v0 = vpop.permute.xlu0 %6051 }
0x252c   :  { %9681 = vpow2.f32 %v5868_v43 }
0x252d   :  { %v9674_v7 = vpop.eup %9673 }
0x252e   :  { %v5873_v9 = vsel %vm1162_vm6, %v9674_v7, 0.0 }
0x252f   :  { %v9676_v18 = vpop.eup %9675  ;;  %5874 = vadd.xlane.f32.xlu0 %v5873_v9 }
0x2530   :  { %v5870_v44 = vsel %vm1162_vm6, %v9676_v18, 0.0 }
0x2531   :  { %5871 = vadd.xlane.f32.xlu1 %v5870_v44 }
0x2535   :  { %v9678_v48 = vpop.eup %9677 }
0x2536   :  { %v5876_v42 = vsel %vm1162_vm6, %v9678_v48, 0.0  ;;  %v9680_v51 = vpop.eup %9679 }
0x2537   :  { %5877 = vadd.xlane.f32.xlu1 %v5876_v42  ;;  %v5879_v16 = vsel %vm1162_vm6, %v9680_v51, 0.0 }
0x2539   :  { %v9682_v9 = vpop.eup %9681 }
0x253a   :  { %v5885_v44 = vsel %vm1162_vm6, %v9682_v9, 0.0 }
0x2545   :  { %6047 = vrot.lane.b32.xlu0 %v11663_v19, %s12590_s29 }
0x2548   :  { %6031 = vrot.lane.b32.xlu1 %v11626_v55, %s12591_s3 }
0x2552   :  { %v5848_v5 = vpop.xlane.xlu1 %5847 }
0x2553   :  { %v5856_v2 = vsub.f32 %v5832_v39, %v5848_v5 }
0x2555   :  { %v5866_v49 = vmul.f32 1.442695, %v5856_v2 }
0x2556   :  { %v6046_v39 = vpop.permute.xlu1 %6045 }
0x2557   :  { %9683 = vpow2.f32 %v5866_v49 }
0x2564   :  { %5880 = vadd.xlane.f32.xlu0 %v5879_v16  ;;  %v9684_v42 = vpop.eup %9683 }
0x2565   :  { %v5882_v63 = vsel %vm1162_vm6, %v9684_v42, 0.0 }
0x2568   :  { %5886 = vadd.xlane.f32.xlu0 %v5885_v44 }
0x256c   :  { %5883 = vadd.xlane.f32.xlu1 %v5882_v63 }
0x257d   :  { %6035 = vrot.lane.b32.xlu1 %v11663_v19, %s12591_s3 }
0x257e   :  { %6043 = vrot.lane.b32.xlu0 %v11626_v55, %s12590_s29 }
0x2581   :  { %6039 = vrot.lane.b32.xlu1 %v11631_v23, %s12591_s3 }
0x2582   :  { %6033 = vrot.lane.b32.xlu0 %v11683_v20, %s12591_s3 }
0x2586   :  { %6037 = vrot.lane.b32.xlu0 %v11646_v34, %s12591_s3 }
0x258a   :  { %6041 = vrot.lane.b32.xlu0 %v11636_v22, %s12591_s3 }
0x25b8   :  { %v5875_v61 = vpop.xlane.xlu0 %5874 }
0x25b9   :  { %9685 = vrcp.f32 %v5875_v61  ;;  %v9789_v61 = vld [vmem:[%s12564_s28 + $0x8] sm:$0xff] }
0x25ba   :  { %v5872_v19 = vpop.xlane.xlu1 %5871 }
0x25bb   :  { %9687 = vrcp.f32 %v5872_v19  ;;  %v9790_v19 = vld [vmem:[%s12564_s28] sm:$0xff] }
0x25bc   :  { %v6048_v20 = vpop.permute.xlu0 %6047 }
0x25c0   :  { %v5878_v26 = vpop.xlane.xlu1 %5877 }
0x25c1   :  { %9689 = vrcp.f32 %v5878_v26 }
0x25c6   :  { %v9686_v55 = vpop.eup %9685 }
0x25c7   :  { %v5891_v13 = vmul.f32 %v9686_v55, %v9674_v7  ;;  %v6032_v7 = vpop.permute.xlu1 %6031 }
0x25c8   :  { %v9688_v11 = vpop.eup %9687 }
0x25c9   :  { %v5889_v23 = vmul.f32 %v9688_v11, %v9676_v18 }
0x25cb   :  { %9283 = vmatprep.mubr.msk.f32.mxu1 %vm1162_vm6, %v5889_v23 }
0x25cc   :  { %9284 = vmatmul.mubr.msk.f32.vlgmr.msra.gmra.mxu1 %vm1162_vm6, %v5891_v13 }
0x25cd   :  { %9293 = vmatpush3.xpose.msk.msra.mxu1 %vm654_vm3, %v12005_v3 }
0x25ce   :  { %v9690_v22 = vpop.eup %9689  ;;  %9294 = vmatprep.subr.msk.mxu1 %vm654_vm3, %v6052_v0 }
0x25cf   :  { %v5893_v34 = vmul.f32 %v9690_v22, %v9678_v48 }
0x25d1   :  { %9295 = vmatpush3.xpose.msk.msra.mxu1 %vm654_vm3, %v6052_v0  ;;  %9286 = vmatprep.mubr.msk.f32.mxu1 %vm1162_vm6, %v5893_v34 }
0x25d2   :  { %9296 = vmatprep.subr.msk.mxu1 %vm654_vm3, %v6050_v8 }
0x25d5   :  { %9297 = vmatpush3.xpose.msk.msra.mxu1 %vm654_vm3, %v6050_v8  ;;  %v9787_v8 = vld [vmem:[%s12564_s28 + $0x20] sm:$0xff] }
0x25d6   :  { %9298 = vmatprep.subr.msk.mxu1 %vm654_vm3, %v6048_v20 }
0x25d9   :  { %9299 = vmatpush3.xpose.msk.msra.mxu1 %vm654_vm3, %v6048_v20 }
0x25da   :  { %9300 = vmatprep.subr.msk.mxu1 %vm654_vm3, %v6046_v39 }
0x25dd   :  { %9301 = vmatpush3.xpose.msk.msra.mxu1 %vm654_vm3, %v6046_v39 }
0x25ed   :  { %v5881_v3 = vpop.xlane.xlu0 %5880 }
0x25ee   :  { %9691 = vrcp.f32 %v5881_v3 }
0x25f1   :  { %v5887_v18 = vpop.xlane.xlu0 %5886 }
0x25f2   :  { %9693 = vrcp.f32 %v5887_v18 }
0x25f5   :  { %v6044_v48 = vpop.permute.xlu0 %6043  ;;  %v5884_v14 = vpop.xlane.xlu1 %5883 }
0x25f6   :  { %9695 = vrcp.f32 %v5884_v14  ;;  %9302 = vmatprep.subr.msk.mxu1 %vm654_vm3, %v6044_v48 }
0x25f7   :  { %9303 = vmatpush3.xpose.msk.msra.mxu1 %vm654_vm3, %v6044_v48 }
0x25f8   :  { %6728 = vmatprep.subr.mxu1 %v9787_v8 }
0x25f9   :  { %v6034_v63 = vpop.permute.xlu0 %6033  ;;  %v6036_v0 = vpop.permute.xlu1 %6035 }
0x25fb   :  { %v9692_v5 = vpop.eup %9691 }
0x25fc   :  { %v5895_v43 = vmul.f32 %v9692_v5, %v9680_v51  ;;  %v9788_v51 = vld [vmem:[%s12564_s28 + $0x18] sm:$0xff] }
0x25fd   :  { %v6038_v39 = vpop.permute.xlu0 %6037 }
0x25fe   :  { %9287 = vmatmul.mubr.msk.f32.gmra.mxu1 %vm1162_vm6, %v5895_v43 }
0x25ff   :  { %v9694_v2 = vpop.eup %9693 }
0x2600   :  { %v5899_v44 = vmul.f32 %v9694_v2, %v9682_v9  ;;  %v6040_v9 = vpop.permute.xlu1 %6039 }
0x2603   :  { %v9696_v49 = vpop.eup %9695 }
0x2604   :  { %v5897_v16 = vmul.f32 %v9696_v49, %v9684_v42  ;;  %v6042_v42 = vpop.permute.xlu0 %6041 }
0x2606   :  { %9289 = vmatprep.mubr.msk.f32.mxu1 %vm1162_vm6, %v5897_v16 }
0x2607   :  { %9290 = vmatmul.mubr.msk.f32.gmra.mxu1 %vm1162_vm6, %v5899_v44 }
0x2608   :  { %9304 = vmatprep.mubr.msk.f32.mxu1 %vm654_vm3, %v6032_v7 }
0x260b   :  { %9305 = vmatmul.mubr.msk.f32.vlgmr.msra.gmra.mxu1 %vm654_vm3, %v6034_v63 }
0x260c   :  { %9307 = vmatprep.mubr.msk.f32.mxu1 %vm654_vm3, %v6036_v0  ;;  %6729 = vmatpush1.msra.mxu1 %v9788_v51 }
0x260d   :  { %6730 = vmatprep.subr.mxu1 %v9789_v61 }
0x260e   :  { %6731 = vmatpush1.msra.mxu1 %v9790_v19 }
0x260f   :  { %9308 = vmatmul.mubr.msk.f32.gmra.mxu1 %vm654_vm3, %v6038_v39  ;;  %9372 = vmatprep.subr.mxu1 %v12561_v52 }
0x2610   :  { %9310 = vmatprep.mubr.msk.f32.mxu1 %vm654_vm3, %v6040_v9 }
0x2613   :  { %9311 = vmatmul.mubr.msk.f32.gmra.mxu1 %vm654_vm3, %v6042_v42 }
0x2614   :  { %6764 = vmatprep.mubr.f32.mxu1 %v12561_v52 }
0x268c   :  { %v12103_v26 = vpop.f32.mrf.mxu1 }
0x268e   :  { %v12105_v55 = vpop.f32.mrf.mxu1 }
0x26be   :  { %v12107_v11 = vpop.f32.mrf.mxu1 }
0x26c0   :  { %v12109_v23 = vpop.f32.mrf.mxu1 }
0x26c7   :  { %v12111_v13 = vpop.f32.mrf.mxu1 }
0x26c9   :  { %v12113_v22 = vpop.f32.mrf.mxu1 }
0x26cb   :  { %v9306_v34 = vpop.f32.mrf.mxu1 }
0x26cc   :  { %v6175_v20 = vmul.f32 0.25, %v9306_v34 }
0x26cd   :  { %v6145_v3 = vpop.f32.mrf.mxu1 }
0x26ce   :  { %v6181_v7 = vadd.f32 %v11777_v6, %v6175_v20  ;;  %v6174_v18 = vmul.f32 0.25, %v6145_v3 }
0x26cf   :  { %v9309_v48 = vpop.f32.mrf.mxu1 }
0x26d0   :  { %v6180_v14 = vadd.f32 %v11783_v56, %v6174_v18  ;;  %v6189_v8 = vsel %vm1162_vm6, %v6181_v7, -inf  ;;  %v6177_v43 = vmul.f32 0.25, %v9309_v48 }
0x26d1   :  { %6190 = vmax.xlane.f32.xlu0 %v6189_v8  ;;  %v6155_v5 = vpop.f32.mrf.mxu1 }
0x26d2   :  { %v6176_v2 = vmul.f32 0.25, %v6155_v5  ;;  %v6186_v49 = vsel %vm1162_vm6, %v6180_v14, -inf  ;;  %v6183_v0 = vadd.f32 %v11791_v1, %v6177_v43 }
0x26d3   :  { %6187 = vmax.xlane.f32.xlu1 %v6186_v49  ;;  %v9312_v16 = vpop.f32.mrf.mxu1 }
0x26d4   :  { %v6182_v44 = vadd.f32 %v11799_v36, %v6176_v2  ;;  %v6179_v6 = vmul.f32 0.25, %v9312_v16  ;;  %v6195_v19 = vsel %vm1162_vm6, %v6183_v0, -inf }
0x26d5   :  { %v6165_v63 = vpop.f32.mrf.mxu1 }
0x26d6   :  { %v6178_v39 = vmul.f32 0.25, %v6165_v63  ;;  %v6192_v51 = vsel %vm1162_vm6, %v6182_v44, -inf  ;;  %v6185_v61 = vadd.f32 %v11807_v32, %v6179_v6 }
0x26d7   :  { %6193 = vmax.xlane.f32.xlu0 %v6192_v51 }
0x26d8   :  { %v6184_v56 = vadd.f32 %v11813_v12, %v6178_v39  ;;  %v6201_v36 = vsel %vm1162_vm6, %v6185_v61, -inf }
0x26da   :  { %v6198_v9 = vsel %vm1162_vm6, %v6184_v56, -inf }
0x26db   :  { %6196 = vmax.xlane.f32.xlu0 %v6195_v19  ;;  %6199 = vmax.xlane.f32.xlu1 %v6198_v9 }
0x26df   :  { %6202 = vmax.xlane.f32.xlu0 %v6201_v36 }
0x26ec   :  { %6262 = vrot.lane.b32.xlu1 %v11639_v40, %s12591_s3 }
0x26f0   :  { %6258 = vrot.lane.b32.xlu1 %v11654_v47, %s12591_s3 }
0x26f4   :  { %6256 = vrot.lane.b32.xlu1 %v11666_v60, %s12591_s3 }
0x26f5   :  { %6260 = vrot.lane.b32.xlu0 %v11649_v37, %s12591_s3 }
0x275a   :  { %v6191_v1 = vpop.xlane.xlu0 %6190 }
0x275b   :  { %v6205_v32 = vsub.f32 %v6181_v7, %v6191_v1 }
0x275c   :  { %v6188_v12 = vpop.xlane.xlu1 %6187 }
0x275d   :  { %v6212_v42 = vmul.f32 1.442695, %v6205_v32  ;;  %v6204_v34 = vsub.f32 %v6180_v14, %v6188_v12  ;;  %v9791_v12 = vld [vmem:[%s12562_s23 + $0x38] sm:$0xff] }
0x275f   :  { %9697 = vpow2.f32 %v6212_v42  ;;  %v6210_v20 = vmul.f32 1.442695, %v6204_v34  ;;  %v9792_v42 = vld [vmem:[%s12562_s23 + $0x30] sm:$0xff] }
0x2760   :  { %v6194_v3 = vpop.xlane.xlu0 %6193 }
0x2761   :  { %9699 = vpow2.f32 %v6210_v20  ;;  %v6206_v18 = vsub.f32 %v6182_v44, %v6194_v3 }
0x2763   :  { %v6214_v40 = vmul.f32 1.442695, %v6206_v18  ;;  %v9793_v18 = vld [vmem:[%s12562_s23 + $0x28] sm:$0xff] }
0x2764   :  { %v6197_v48 = vpop.xlane.xlu0 %6196  ;;  %v6200_v8 = vpop.xlane.xlu1 %6199 }
0x2765   :  { %9701 = vpow2.f32 %v6214_v40  ;;  %v6207_v47 = vsub.f32 %v6183_v0, %v6197_v48  ;;  %v6208_v5 = vsub.f32 %v6184_v56, %v6200_v8  ;;  %v9794_v48 = vld [vmem:[%s12562_s23 + $0x20] sm:$0xff] }
0x2767   :  { %v6216_v60 = vmul.f32 1.442695, %v6207_v47  ;;  %v6218_v43 = vmul.f32 1.442695, %v6208_v5  ;;  %v9795_v5 = vld [vmem:[%s12562_s23 + $0x18] sm:$0xff] }
0x2768   :  { %v6203_v2 = vpop.xlane.xlu0 %6202  ;;  %v6263_v37 = vpop.permute.xlu1 %6262 }
0x2769   :  { %9703 = vpow2.f32 %v6216_v60  ;;  %v6209_v7 = vsub.f32 %v6185_v61, %v6203_v2  ;;  %9313 = vmatprep.subr.mxu0 %v6263_v37  ;;  %v9796_v60 = vld [vmem:[%s12562_s23 + $0x10] sm:$0xff]  ;;  %v9798_v2 = vld [vmem:[%s12562_s23] sm:$0xff] }
0x276a   :  { %9705 = vpow2.f32 %v6218_v43  ;;  %9314 = vmatpush3.msra.mxu0 %v6263_v37  ;;  %v9797_v43 = vld [vmem:[%s12562_s23 + $0x8] sm:$0xff] }
0x276b   :  { %v6220_v14 = vmul.f32 1.442695, %v6209_v7  ;;  %v9799_v37 = vld [vmem:[%s12564_s28 + $0x28] sm:$0xff] }
0x276c   :  { %v9698_v49 = vpop.eup %9697  ;;  %v6261_v16 = vpop.permute.xlu0 %6260 }
0x276d   :  { %v6259_v63 = vpop.permute.xlu1 %6258  ;;  %9707 = vpow2.f32 %v6220_v14  ;;  %9315 = vmatprep.subr.mxu0 %v6261_v16  ;;  %v6225_v44 = vsel %vm1162_vm6, %v9698_v49, 0.0 }
0x276e   :  { %v9700_v6 = vpop.eup %9699  ;;  %6226 = vadd.xlane.f32.xlu0 %v6225_v44  ;;  %9316 = vmatpush3.msra.mxu0 %v6261_v16 }
0x276f   :  { %9317 = vmatprep.subr.mxu0 %v6259_v63  ;;  %v6222_v0 = vsel %vm1162_vm6, %v9700_v6, 0.0 }
0x2770   :  { %6223 = vadd.xlane.f32.xlu1 %v6222_v0  ;;  %9318 = vmatpush3.msra.mxu0 %v6259_v63 }
0x2771   :  { %v6257_v39 = vpop.permute.xlu1 %6256 }
0x2772   :  { %9319 = vmatprep.subr.mxu0 %v6257_v39  ;;  %v9702_v51 = vpop.eup %9701 }
0x2773   :  { %9320 = vmatpush3.msra.mxu0 %v6257_v39  ;;  %v6228_v56 = vsel %vm1162_vm6, %v9702_v51, 0.0 }
0x2774   :  { %6229 = vadd.xlane.f32.xlu1 %v6228_v56 }
0x2776   :  { %v9704_v61 = vpop.eup %9703 }
0x2777   :  { %v9706_v19 = vpop.eup %9705  ;;  %v6231_v9 = vsel %vm1162_vm6, %v9704_v61, 0.0 }
0x2778   :  { %6232 = vadd.xlane.f32.xlu0 %v6231_v9  ;;  %v6234_v36 = vsel %vm1162_vm6, %v9706_v19, 0.0 }
0x2779   :  { %6235 = vadd.xlane.f32.xlu1 %v6234_v36 }
0x277a   :  { %v12140_v1 = vpop.eup %9707 }
0x277b   :  { %v6237_v32 = vsel %vm1162_vm6, %v12140_v1, 0.0 }
0x277c   :  { %6238 = vadd.xlane.f32.xlu0 %v6237_v32 }
0x278a   :  { %6254 = vrot.lane.b32.xlu1 %v11671_v33, %s12591_s3 }
0x278e   :  { %6389 = vrot.lane.b32.xlu1 %v12023_v25, %s12590_s29 }
0x2792   :  { %6413 = vrot.lane.b32.xlu1 %v12105_v55, %s12588_s21  ;;  %6252 = vrot.lane.b32.xlu0 %v11680_v30, %s12591_s3 }
0x2796   :  { %6393 = vrot.lane.b32.xlu1 %v12027_v21, %s12590_s29  ;;  %6391 = vrot.lane.b32.xlu0 %v12021_v59, %s12590_s29 }
0x279a   :  { %6417 = vrot.lane.b32.xlu1 %v12109_v23, %s12588_s21  ;;  %6415 = vrot.lane.b32.xlu0 %v12103_v26, %s12588_s21 }
0x279e   :  { %6397 = vrot.lane.b32.xlu1 %v12031_v31, %s12590_s29  ;;  %6395 = vrot.lane.b32.xlu0 %v12025_v27, %s12590_s29 }
0x27a2   :  { %6421 = vrot.lane.b32.xlu1 %v12113_v22, %s12588_s21  ;;  %6419 = vrot.lane.b32.xlu0 %v12107_v11, %s12588_s21 }
0x27a6   :  { %6399 = vrot.lane.b32.xlu0 %v12029_v38, %s12590_s29 }
0x27aa   :  { %6423 = vrot.lane.b32.xlu0 %v12111_v13, %s12588_s21 }
0x27f7   :  { %v6227_v33 = vpop.xlane.xlu0 %6226 }
0x27f8   :  { %9709 = vrcp.f32 %v6227_v33 }
0x27f9   :  { %v6224_v30 = vpop.xlane.xlu1 %6223 }
0x27fa   :  { %9711 = vrcp.f32 %v6224_v30 }
0x27fd   :  { %v6230_v59 = vpop.xlane.xlu1 %6229 }
0x27fe   :  { %9713 = vrcp.f32 %v6230_v59 }
0x2801   :  { %v6233_v25 = vpop.xlane.xlu0 %6232 }
0x2802   :  { %9715 = vrcp.f32 %v6233_v25  ;;  %v6236_v27 = vpop.xlane.xlu1 %6235 }
0x2803   :  { %9717 = vrcp.f32 %v6236_v27 }
0x2805   :  { %v6239_v21 = vpop.xlane.xlu0 %6238  ;;  %v9710_v31 = vpop.eup %9709 }
0x2806   :  { %9719 = vrcp.f32 %v6239_v21  ;;  %v6255_v26 = vpop.permute.xlu1 %6254  ;;  %v6243_v23 = vmul.f32 %v9710_v31, %v9698_v49 }
0x2807   :  { %v9712_v55 = vpop.eup %9711  ;;  %9321 = vmatprep.subr.mxu0 %v6255_v26 }
0x2808   :  { %9322 = vmatpush3.msra.mxu0 %v6255_v26  ;;  %v6241_v38 = vmul.f32 %v9712_v55, %v9700_v6 }
0x2809   :  { %v6253_v11 = vpop.permute.xlu0 %6252 }
0x280a   :  { %9323 = vmatprep.subr.mxu0 %v6253_v11  ;;  %9325 = vmatprep.mubr.msk.f32.mxu0 %vm1162_vm6, %v6241_v38  ;;  %v6390_v0 = vpop.permute.xlu1 %6389 }
0x280b   :  { %v9714_v13 = vpop.eup %9713  ;;  %9324 = vmatpush3.msra.mxu0 %v6253_v11  ;;  %v6455_v30 = vsel %vm654_vm3, %v12011_v46, %v6390_v0  ;;  %v9800_v11 = vld [vmem:[%s12564_s28 + $0x10] sm:$0xff] }
0x280c   :  { %9326 = vmatmul.mubr.msk.f32.vlgmr.msra.gmra.mxu0 %vm1162_vm6, %v6243_v23  ;;  %v6245_v22 = vmul.f32 %v9714_v13, %v9702_v51  ;;  %9334 = vmatprep.subr.mxu0 %v9791_v12 }
0x280d   :  { %9335 = vmatpush3.msra.mxu0 %v9791_v12  ;;  %v6392_v6 = vpop.permute.xlu0 %6391 }
0x280e   :  { %9328 = vmatprep.mubr.msk.f32.mxu0 %vm1162_vm6, %v6245_v22  ;;  %9336 = vmatprep.subr.mxu0 %v9792_v42  ;;  %v6414_v51 = vpop.permute.xlu1 %6413  ;;  %v6456_v25 = vsel %vm654_vm3, %v12009_v29, %v6392_v6 }
0x280f   :  { %v9716_v34 = vpop.eup %9715  ;;  %9337 = vmatpush3.msra.mxu0 %v9792_v42  ;;  %v6461_v27 = vsel %vm322_vm2, %v6455_v30, %v6414_v51 }
0x2810   :  { %v9718_v20 = vpop.eup %9717  ;;  %v6247_v3 = vmul.f32 %v9716_v34, %v9704_v61  ;;  %9338 = vmatprep.subr.mxu0 %v9793_v18 }
0x2811   :  { %v6249_v40 = vmul.f32 %v9718_v20, %v9706_v19  ;;  %9339 = vmatpush3.msra.mxu0 %v9793_v18  ;;  %v6416_v39 = vpop.permute.xlu0 %6415 }
0x2812   :  { %9329 = vmatmul.mubr.msk.f32.gmra.mxu0 %vm1162_vm6, %v6247_v3  ;;  %9340 = vmatprep.subr.mxu0 %v9794_v48  ;;  %v6394_v61 = vpop.permute.xlu1 %6393  ;;  %v6462_v31 = vsel %vm322_vm2, %v6456_v25, %v6416_v39 }
0x2813   :  { %v9720_v8 = vpop.eup %9719  ;;  %9331 = vmatprep.mubr.msk.f32.mxu0 %vm1162_vm6, %v6249_v40  ;;  %9341 = vmatpush3.msra.mxu0 %v9794_v48  ;;  %v6457_v46 = vsel %vm654_vm3, %v12015_v54, %v6394_v61 }
0x2814   :  { %v6251_v47 = vmul.f32 %v9720_v8, %v12140_v1  ;;  %9342 = vmatprep.subr.mxu0 %v9795_v5  ;;  %v9801_v8 = vld [vmem:[%s12563_s26] ss:$0 sm:$0xff] }
0x2815   :  { %9343 = vmatpush3.msra.mxu0 %v9795_v5  ;;  %v6396_v56 = vpop.permute.xlu0 %6395 }
0x2816   :  { %9332 = vmatmul.mubr.msk.f32.gmra.mxu0 %vm1162_vm6, %v6251_v47  ;;  %9344 = vmatprep.subr.mxu0 %v9796_v60  ;;  %v6418_v9 = vpop.permute.xlu1 %6417  ;;  %v6458_v29 = vsel %vm654_vm3, %v12013_v35, %v6396_v56 }
0x2817   :  { %9345 = vmatpush3.msra.mxu0 %v9796_v60  ;;  %v6463_v23 = vsel %vm322_vm2, %v6457_v46, %v6418_v9 }
0x2818   :  { %9346 = vmatprep.subr.mxu0 %v9797_v43 }
0x2819   :  { %9347 = vmatpush3.msra.mxu0 %v9797_v43  ;;  %v6420_v19 = vpop.permute.xlu0 %6419 }
0x281a   :  { %9348 = vmatprep.subr.mxu0 %v9798_v2  ;;  %v6398_v1 = vpop.permute.xlu1 %6397  ;;  %v6464_v22 = vsel %vm322_vm2, %v6458_v29, %v6420_v19 }
0x281b   :  { %9349 = vmatpush3.msra.mxu0 %v9798_v2  ;;  %v6459_v54 = vsel %vm654_vm3, %v12019_v57, %v6398_v1 }
0x281c   :  { %9359 = vmatprep.subr.mxu0 %v9799_v37 }
0x281d   :  { %v6400_v36 = vpop.permute.xlu0 %6399 }
0x281e   :  { %v6422_v33 = vpop.permute.xlu1 %6421  ;;  %v6460_v35 = vsel %vm654_vm3, %v12017_v15, %v6400_v36 }
0x281f   :  { %v6465_v20 = vsel %vm322_vm2, %v6459_v54, %v6422_v33 }
0x2821   :  { %v6424_v32 = vpop.permute.xlu0 %6423 }
0x2822   :  { %v6466_v18 = vsel %vm322_vm2, %v6460_v35, %v6424_v32 }
0x28cc   :  { %v9327_v7 = vpop.f32.mrf.mxu0 }
0x28cd   :  { %6439 = vrot.lane.b32.xlu0 %v9327_v7, %s12586_s13 }
0x28ce   :  { %v6354_v14 = vpop.f32.mrf.mxu0 }
0x28cf   :  { %6437 = vrot.lane.b32.xlu1 %v6354_v14, %s12586_s13 }
0x28d2   :  { %v9330_v49 = vpop.f32.mrf.mxu0 }
0x28d3   :  { %6443 = vrot.lane.b32.xlu0 %v9330_v49, %s12586_s13 }
0x28d4   :  { %v6364_v16 = vpop.f32.mrf.mxu0 }
0x28d5   :  { %6441 = vrot.lane.b32.xlu1 %v6364_v16, %s12586_s13 }
0x28d6   :  { %v9333_v63 = vpop.f32.mrf.mxu0 }
0x28d7   :  { %6447 = vrot.lane.b32.xlu0 %v9333_v63, %s12586_s13 }
0x28d8   :  { %v6374_v44 = vpop.f32.mrf.mxu0 }
0x28d9   :  { %6445 = vrot.lane.b32.xlu1 %v6374_v44, %s12586_s13 }
0x293f   :  { %v6440_v59 = vpop.permute.xlu0 %6439 }
0x2940   :  { %v6468_v55 = vsel %vm1162_vm6, %v6462_v31, %v6440_v59 }
0x2941   :  { %v6438_v21 = vpop.permute.xlu1 %6437 }
0x2942   :  { %v6467_v26 = vsel %vm1162_vm6, %v6461_v27, %v6438_v21 }
0x2943   :  { %9350 = vmatprep.mubr.msk.f32.mxu0 %vm2509_vm7, %v6467_v26 }
0x2944   :  { %9351 = vmatmul.mubr.msk.f32.vlgmr.msra.gmra.mxu0 %vm2509_vm7, %v6468_v55 }
0x2945   :  { %v6444_v38 = vpop.permute.xlu0 %6443  ;;  %9360 = vmatpush3.msra.mxu0 %v9799_v37 }
0x2946   :  { %9361 = vmatprep.subr.mxu0 %v9800_v11  ;;  %v6470_v42 = vsel %vm1162_vm6, %v6464_v22, %v6444_v38 }
0x2947   :  { %v6442_v13 = vpop.permute.xlu1 %6441  ;;  %9362 = vmatpush3.msra.mxu0 %v9800_v11 }
0x2948   :  { %v6469_v12 = vsel %vm1162_vm6, %v6463_v23, %v6442_v13 }
0x2949   :  { %9353 = vmatprep.mubr.msk.f32.mxu0 %vm2509_vm7, %v6469_v12  ;;  %v6448_v34 = vpop.permute.xlu0 %6447 }
0x294a   :  { %9354 = vmatmul.mubr.msk.f32.gmra.mxu0 %vm2509_vm7, %v6470_v42  ;;  %v6472_v48 = vsel %vm1162_vm6, %v6466_v18, %v6448_v34 }
0x294b   :  { %v6446_v3 = vpop.permute.xlu1 %6445 }
0x294c   :  { %v6471_v40 = vsel %vm1162_vm6, %v6465_v20, %v6446_v3 }
0x294d   :  { %9356 = vmatprep.mubr.msk.f32.mxu0 %vm2509_vm7, %v6471_v40 }
0x294e   :  { %9357 = vmatmul.mubr.msk.f32.gmra.mxu0 %vm2509_vm7, %v6472_v48 }
0x2a04   :  { %v9352_v57 = vpop.f32.mrf.mxu0 }
0x2a05   :  { %v6563_v47 = vadd.f32 %v9801_v8, %v9352_v57 }
0x2a06   :  { %v6557_v5 = vpop.f32.mrf.mxu0 }
0x2a07   :  { %v6587_v60 = vadd.f32 %v6563_v47, %v11597_v41  ;;  %v6558_v15 = vadd.f32 %v9801_v8, %v6557_v5 }
0x2a09   :  { %v6586_v43 = vadd.f32 %v6558_v15, %v11591_v45  ;;  %v6595_v2 = vsel %vm654_vm3, %v6587_v60, 0.0 }
0x2a0a   :  { %6596 = vadd.xlane.f32.xlu0 %v6595_v2  ;;  %v9355_v37 = vpop.f32.mrf.mxu0 }
0x2a0b   :  { %v6592_v7 = vsel %vm654_vm3, %v6586_v43, 0.0  ;;  %v6573_v49 = vadd.f32 %v9801_v8, %v9355_v37 }
0x2a0c   :  { %6593 = vadd.xlane.f32.xlu1 %v6592_v7  ;;  %v6567_v14 = vpop.f32.mrf.mxu0 }
0x2a0d   :  { %v6568_v16 = vadd.f32 %v9801_v8, %v6567_v14  ;;  %v6589_v0 = vadd.f32 %v6573_v49, %v11609_v17 }
0x2a0e   :  { %v9358_v63 = vpop.f32.mrf.mxu0 }
0x2a0f   :  { %v6588_v44 = vadd.f32 %v6568_v16, %v11603_v62  ;;  %v6583_v41 = vadd.f32 %v9801_v8, %v9358_v63  ;;  %v6601_v61 = vsel %vm654_vm3, %v6589_v0, 0.0 }
0x2a10   :  { %v6577_v6 = vpop.f32.mrf.mxu0 }
0x2a11   :  { %v6578_v39 = vadd.f32 %v9801_v8, %v6577_v6  ;;  %v6598_v45 = vsel %vm654_vm3, %v6588_v44, 0.0  ;;  %v6591_v56 = vadd.f32 %v6583_v41, %v11621_v4 }
0x2a12   :  { %6599 = vadd.xlane.f32.xlu0 %v6598_v45  ;;  %v9802_v45 = vld [vmem:[%s12565_s2] ss:$0 sm:$0xff] }
0x2a13   :  { %v6590_v51 = vadd.f32 %v6578_v39, %v11615_v58  ;;  %v6607_v62 = vsel %vm654_vm3, %v6591_v56, 0.0 }
0x2a15   :  { %v6604_v19 = vsel %vm654_vm3, %v6590_v51, 0.0 }
0x2a16   :  { %6602 = vadd.xlane.f32.xlu0 %v6601_v61  ;;  %6605 = vadd.xlane.f32.xlu1 %v6604_v19  ;;  %v9803_v61 = vld [vmem:[%s12566_s22] ss:$0 sm:$0xff] }
0x2a1a   :  { %6608 = vadd.xlane.f32.xlu0 %v6607_v62 }
0x2a93   :  { %v6597_v9 = vpop.xlane.xlu0 %6596 }
0x2a94   :  { %v6611_v17 = vmul.f32 0.0625, %v6597_v9 }
0x2a95   :  { %v6594_v36 = vpop.xlane.xlu1 %6593 }
0x2a96   :  { %v6617_v1 = vsub.f32 %v6587_v60, %v6611_v17  ;;  %v6610_v32 = vmul.f32 0.0625, %v6594_v36 }
0x2a98   :  { %v6616_v33 = vsub.f32 %v6586_v43, %v6610_v32  ;;  %v6623_v30 = vmul.f32 %v6617_v1, %v6617_v1 }
0x2a9a   :  { %v6631_v58 = vsel %vm654_vm3, %v6623_v30, 0.0  ;;  %v6622_v59 = vmul.f32 %v6616_v33, %v6616_v33 }
0x2a9b   :  { %v6600_v4 = vpop.xlane.xlu0 %6599  ;;  %6632 = vadd.xlane.f32.xlu0 %v6631_v58 }
0x2a9c   :  { %v6612_v25 = vmul.f32 0.0625, %v6600_v4  ;;  %v6628_v27 = vsel %vm654_vm3, %v6622_v59, 0.0 }
0x2a9d   :  { %6629 = vadd.xlane.f32.xlu1 %v6628_v27 }
0x2a9e   :  { %v6618_v21 = vsub.f32 %v6588_v44, %v6612_v25 }
0x2a9f   :  { %v6603_v31 = vpop.xlane.xlu0 %6602  ;;  %v6606_v26 = vpop.xlane.xlu1 %6605 }
0x2aa0   :  { %v6613_v55 = vmul.f32 0.0625, %v6603_v31  ;;  %v6614_v38 = vmul.f32 0.0625, %v6606_v26  ;;  %v6624_v46 = vmul.f32 %v6618_v21, %v6618_v21 }
0x2aa2   :  { %v6619_v11 = vsub.f32 %v6589_v0, %v6613_v55  ;;  %v6620_v29 = vsub.f32 %v6590_v51, %v6614_v38  ;;  %v6634_v23 = vsel %vm654_vm3, %v6624_v46, 0.0 }
0x2aa3   :  { %v6609_v13 = vpop.xlane.xlu0 %6608  ;;  %6635 = vadd.xlane.f32.xlu1 %v6634_v23 }
0x2aa4   :  { %v6615_v22 = vmul.f32 0.0625, %v6609_v13  ;;  %v6625_v12 = vmul.f32 %v6619_v11, %v6619_v11  ;;  %v6626_v42 = vmul.f32 %v6620_v29, %v6620_v29 }
0x2aa6   :  { %v6621_v54 = vsub.f32 %v6591_v56, %v6615_v22  ;;  %v6637_v34 = vsel %vm654_vm3, %v6625_v12, 0.0  ;;  %v6640_v35 = vsel %vm654_vm3, %v6626_v42, 0.0 }
0x2aa7   :  { %6638 = vadd.xlane.f32.xlu0 %v6637_v34  ;;  %6641 = vadd.xlane.f32.xlu1 %v6640_v35 }
0x2aa8   :  { %v6627_v20 = vmul.f32 %v6621_v54, %v6621_v54 }
0x2aaa   :  { %v6643_v3 = vsel %vm654_vm3, %v6627_v20, 0.0 }
0x2aab   :  { %6644 = vadd.xlane.f32.xlu0 %v6643_v3  ;;  %v9804_v3 = vld [vmem:[%s12567_s18 + $0x88] sm:$0xff] }
0x2b24   :  { %v6633_v18 = vpop.xlane.xlu0 %6632 }
0x2b25   :  { %v6647_v40 = vmul.f32 0.0625, %v6633_v18 }
0x2b26   :  { %v6630_v48 = vpop.xlane.xlu1 %6629 }
0x2b27   :  { %v6653_v57 = vadd.f32 1e-05, %v6647_v40  ;;  %v6646_v8 = vmul.f32 0.0625, %v6630_v48 }
0x2b29   :  { %9721 = vrsqrt.f32 %v6653_v57  ;;  %v6652_v47 = vadd.f32 1e-05, %v6646_v8  ;;  %v9805_v57 = vld [vmem:[%s12567_s18 + $0x70] sm:$0xff] }
0x2b2b   :  { %9723 = vrsqrt.f32 %v6652_v47 }
0x2b2c   :  { %v6636_v5 = vpop.xlane.xlu1 %6635 }
0x2b2d   :  { %v6648_v60 = vmul.f32 0.0625, %v6636_v5  ;;  %v9806_v5 = vld [vmem:[%s12567_s18 + $0x58] sm:$0xff] }
0x2b2f   :  { %v6654_v15 = vadd.f32 1e-05, %v6648_v60 }
0x2b30   :  { %v6639_v43 = vpop.xlane.xlu0 %6638  ;;  %v6642_v2 = vpop.xlane.xlu1 %6641 }
0x2b31   :  { %9725 = vrsqrt.f32 %v6654_v15  ;;  %v6649_v37 = vmul.f32 0.0625, %v6639_v43  ;;  %v6650_v7 = vmul.f32 0.0625, %v6642_v2  ;;  %v9807_v43 = vld [vmem:[%s12567_s18 + $0x40] sm:$0xff] }
0x2b33   :  { %v6655_v14 = vadd.f32 1e-05, %v6649_v37  ;;  %v6656_v49 = vadd.f32 1e-05, %v6650_v7  ;;  %v9808_v7 = vld [vmem:[%s12567_s18 + $0x28] sm:$0xff] }
0x2b34   :  { %v6645_v16 = vpop.xlane.xlu0 %6644 }
0x2b35   :  { %9727 = vrsqrt.f32 %v6655_v14  ;;  %v6651_v63 = vmul.f32 0.0625, %v6645_v16 }
0x2b36   :  { %v9722_v44 = vpop.eup %9721  ;;  %9729 = vrsqrt.f32 %v6656_v49  ;;  %v9809_v49 = vld [vmem:[%s12567_s18 + $0x80] sm:$0xff] }
0x2b37   :  { %v6665_v6 = vmul.f32 %v9722_v44, %v6617_v1  ;;  %v6657_v0 = vadd.f32 1e-05, %v6651_v63  ;;  %v9810_v63 = vld [vmem:[%s12567_s18 + $0x78] sm:$0xff] }
0x2b38   :  { %v9724_v41 = vpop.eup %9723 }
0x2b39   :  { %v6664_v39 = vmul.f32 %v9724_v41, %v6616_v33  ;;  %9731 = vrsqrt.f32 %v6657_v0  ;;  %v6671_v51 = vmul.f32 %v9802_v45, %v6665_v6  ;;  %v9811_v6 = vld [vmem:[%s12567_s18 + $0x10] sm:$0xff]  ;;  %v9812_v41 = vld [vmem:[%s12567_s18 + $0x68] sm:$0xff] }
0x2b3b   :  { %v6670_v56 = vmul.f32 %v9802_v45, %v6664_v39  ;;  %v6677_v9 = vadd.f32 %v9803_v61, %v6671_v51 }
0x2b3d   :  { %v6676_v19 = vadd.f32 %v9803_v61, %v6670_v56  ;;  %v9814_v56 = vld [vmem:[%s12567_s18 + $0x50] sm:$0xff] }
0x2b3e   :  { %v9726_v62 = vpop.eup %9725 }
0x2b3f   :  { %8174 = vmatmul.mubr.msk.f32.vlgmr.msra.gmra.mxu1 %vm654_vm3, %v6676_v19  ;;  %9363 = vmatprep.mubr.msk.f32.mxu0 %vm654_vm3, %v6676_v19  ;;  %v6666_v17 = vmul.f32 %v9726_v62, %v6618_v21  ;;  %v9815_v19 = vld [vmem:[%s12567_s18 + $0x48] sm:$0xff] }
0x2b40   :  { %9364 = vmatmul.mubr.msk.f32.vlgmr.msra.gmra.mxu0 %vm654_vm3, %v6677_v9  ;;  %6770 = vmatprep.mubr.f32.mxu1 %v12561_v52 }
0x2b41   :  { %v6672_v36 = vmul.f32 %v9802_v45, %v6666_v17  ;;  %v9817_v17 = vld [vmem:[%s12567_s18 + $0x38] sm:$0xff] }
0x2b42   :  { %v9728_v1 = vpop.eup %9727 }
0x2b43   :  { %v9730_v32 = vpop.eup %9729  ;;  %v6667_v33 = vmul.f32 %v9728_v1, %v6619_v11  ;;  %8175 = vmatmul.mubr.msk.f32.gmra.mxu1 %vm654_vm3, %v6677_v9  ;;  %v6678_v30 = vadd.f32 %v9803_v61, %v6672_v36  ;;  %v9816_v9 = vld [vmem:[%s12568_s16] sm:$0x3]  ;;  %v9818_v1 = vld [vmem:[#allocation2 + $0x5e8] sm:$0xff] }
0x2b44   :  { %6776 = vmatprep.mubr.f32.mxu1 %v12561_v52  ;;  %v6668_v58 = vmul.f32 %v9730_v32, %v6620_v29  ;;  %v9819_v32 = vld [vmem:[%s12567_s18 + $0x30] sm:$0xff] }
0x2b45   :  { %9366 = vmatprep.mubr.msk.f32.mxu0 %vm654_vm3, %v6678_v30  ;;  %v6673_v59 = vmul.f32 %v9802_v45, %v6667_v33 }
0x2b46   :  { %v9732_v4 = vpop.eup %9731  ;;  %v6674_v25 = vmul.f32 %v9802_v45, %v6668_v58  ;;  %v9821_v58 = vld [vmem:[%s12567_s18 + $0x20] sm:$0xff] }
0x2b47   :  { %v6669_v27 = vmul.f32 %v9732_v4, %v6621_v54  ;;  %8176 = vmatmul.mubr.msk.f32.gmra.mxu1 %vm654_vm3, %v6678_v30  ;;  %v6679_v21 = vadd.f32 %v9803_v61, %v6673_v59  ;;  %v9820_v30 = vld [vmem:[#allocation2 + $0x5e0] sm:$0xff]  ;;  %v9822_v4 = vld [vmem:[#allocation2 + $0x5c8] sm:$0xff] }
0x2b48   :  { %6782 = vmatprep.mubr.f32.mxu1 %v12561_v52  ;;  %v6680_v31 = vadd.f32 %v9803_v61, %v6674_v25  ;;  %v9823_v25 = vld [vmem:[%s12567_s18 + $0x18] sm:$0xff] }
0x2b49   :  { %9367 = vmatmul.mubr.msk.f32.gmra.mxu0 %vm654_vm3, %v6679_v21  ;;  %v6675_v26 = vmul.f32 %v9802_v45, %v6669_v27  ;;  %v9813_v45 = vld [vmem:[%s12567_s18 + $0x60] sm:$0xff] }
0x2b4a   :  { %9369 = vmatprep.mubr.msk.f32.mxu0 %vm654_vm3, %v6680_v31 }
0x2b4b   :  { %8177 = vmatmul.mubr.msk.f32.gmra.mxu1 %vm654_vm3, %v6679_v21  ;;  %v6681_v55 = vadd.f32 %v9803_v61, %v6675_v26  ;;  %v9824_v21 = vld [vmem:[#allocation2 + $0x5c0] sm:$0xff] }
0x2b4c   :  { %6788 = vmatprep.mubr.f32.mxu1 %v12561_v52 }
0x2b4d   :  { %9370 = vmatmul.mubr.msk.f32.gmra.mxu0 %vm654_vm3, %v6681_v55 }
0x2b4e   :  { %6978 = vmatprep.mubr.f32.mxu0 %v12561_v52 }
0x2b4f   :  { %8178 = vmatmul.mubr.msk.f32.gmra.mxu1 %vm654_vm3, %v6680_v31  ;;  %v9825_v31 = vld [vmem:[%s12567_s18 + $0x8] sm:$0xff] }
0x2b50   :  { %6794 = vmatprep.mubr.f32.mxu1 %v12561_v52 }
0x2b53   :  { %8179 = vmatmul.mubr.msk.f32.gmra.mxu1 %vm654_vm3, %v6681_v55  ;;  %v9826_v55 = vld [vmem:[#allocation2 + $0x5a8] sm:$0xff] }
0x2b54   :  { %9384 = vmatprep.mubr.msk.f32.mxu1 %vm10181_vm0, %v12561_v52 }
0x2bff   :  { %v12266_v38 = vpop.f32.mrf.mxu1 }
0x2c00   :  { %v9365_v11 = vpop.f32.mrf.mxu0 }
0x2c01   :  { %v12268_v46 = vpop.f32.mrf.mxu1  ;;  %v6901_v14 = vmul.f32 %v9808_v7, %v9365_v11  ;;  %v9827_v11 = vld [vmem:[%s12567_s18] sm:$0xff] }
0x2c02   :  { %v6867_v13 = vpop.f32.mrf.mxu0  ;;  %v6897_v26 = vmul.f32 %v9825_v31, %v12268_v46  ;;  %v9832_v46 = vld [vmem:[#allocation2 + $0x1e0] sm:$0xff]  ;;  %v9881_v31 = vld [vmem:[#allocation2 + $0x48] sm:$0xff] }
0x2c03   :  { %v12270_v29 = vpop.f32.mrf.mxu1  ;;  %v6898_v0 = vmul.f32 %v9811_v6, %v6867_v13  ;;  %v6896_v13 = vmul.f32 %v9827_v11, %v12266_v38  ;;  %v9835_v38 = vld [vmem:[#allocation2 + $0x560] sm:$0xff]  ;;  %v9858_v6 = vld [vmem:[#allocation2 + $0x108] sm:$0xff] }
0x2c04   :  { %v6899_v27 = vmul.f32 %v9823_v25, %v12270_v29  ;;  %v9830_v29 = vld [vmem:[#allocation2 + $0x580] sm:$0xff]  ;;  %v9878_v25 = vld [vmem:[#allocation2 + $0x68] sm:$0xff] }
0x2c05   :  { %v12272_v23 = vpop.f32.mrf.mxu1  ;;  %v9852_v7 = vld [vmem:[#allocation2 + $0x140] sm:$0xff]  ;;  %v9884_v11 = vld [vmem:[#allocation2 + $0x28] sm:$0xff] }
0x2c06   :  { %v6900_v59 = vmul.f32 %v9821_v58, %v12272_v23  ;;  %v9828_v23 = vld [vmem:[#allocation2 + $0x5a0] sm:$0xff] }
0x2c07   :  { %v6778_v22 = vpop.f32.mrf.mxu1  ;;  %v9875_v58 = vld [vmem:[#allocation2 + $0x420] sm:$0xff] }
0x2c08   :  { %v6902_v33 = vmul.f32 %v9819_v32, %v6778_v22  ;;  %v9829_v22 = vld [vmem:[#allocation2 + $0x588] sm:$0xff]  ;;  %v9872_v32 = vld [vmem:[#allocation2 + $0xa0] sm:$0xff] }
0x2c09   :  { %v6780_v12 = vpop.f32.mrf.mxu1  ;;  %v9368_v42 = vpop.f32.mrf.mxu0 }
0x2c0a   :  { %v6907_v60 = vmul.f32 %v9806_v5, %v9368_v42  ;;  %v6903_v36 = vmul.f32 %v9817_v17, %v6780_v12  ;;  %v9831_v12 = vld [vmem:[#allocation2 + $0x1e8] sm:$0xff] }
0x2c0b   :  { %v6784_v54 = vpop.f32.mrf.mxu1  ;;  %v6877_v34 = vpop.f32.mrf.mxu0  ;;  %v9833_v42 = vld [vmem:[#allocation2 + $0x568] sm:$0xff] }
0x2c0c   :  { %v6904_v2 = vmul.f32 %v9807_v43, %v6877_v34  ;;  %v6905_v62 = vmul.f32 %v9815_v19, %v6784_v54  ;;  %v9834_v54 = vld [vmem:[#allocation2 + $0x1c8] sm:$0xff]  ;;  %v9836_v34 = vld [vmem:[#allocation2 + $0x1c0] sm:$0xff] }
0x2c0d   :  { %v6786_v35 = vpop.f32.mrf.mxu1  ;;  %v9371_v20 = vpop.f32.mrf.mxu0  ;;  %v9846_v5 = vld [vmem:[#allocation2 + $0x168] sm:$0xff] }
0x2c0e   :  { %v6913_v18 = vmul.f32 %v9804_v3, %v9371_v20  ;;  %v6906_v61 = vmul.f32 %v9814_v56, %v6786_v35  ;;  %v9837_v35 = vld [vmem:[#allocation2 + $0x548] sm:$0xff]  ;;  %v9839_v3 = vld [vmem:[#allocation2 + $0x540] sm:$0xff] }
0x2c0f   :  { %v6790_v40 = vpop.f32.mrf.mxu1  ;;  %v6887_v48 = vpop.f32.mrf.mxu0  ;;  %v9838_v20 = vld [vmem:[#allocation2 + $0x1a8] sm:$0xff]  ;;  %v9864_v56 = vld [vmem:[#allocation2 + $0xe0] sm:$0xff] }
0x2c10   :  { %v6910_v8 = vmul.f32 %v9805_v57, %v6887_v48  ;;  %9373 = vmatpush3.msra.mxu1 %v6913_v18  ;;  %v6908_v51 = vmul.f32 %v9813_v45, %v6790_v40  ;;  %v9840_v18 = vld [vmem:[#allocation2 + $0x1a0] sm:$0xff]  ;;  %v9841_v40 = vld [vmem:[#allocation2 + $0x528] sm:$0xff] }
0x2c11   :  { %v6792_v47 = vpop.f32.mrf.mxu1  ;;  %9374 = vmatprep.subr.mxu1 %v12561_v52  ;;  %v9842_v48 = vld [vmem:[#allocation2 + $0x188] sm:$0xff]  ;;  %v9843_v57 = vld [vmem:[#allocation2 + $0x520] sm:$0xff] }
0x2c12   :  { %9375 = vmatpush3.msra.mxu1 %v6910_v8  ;;  %v6909_v39 = vmul.f32 %v9812_v41, %v6792_v47  ;;  %v9844_v8 = vld [vmem:[#allocation2 + $0x180] sm:$0xff]  ;;  %v9845_v47 = vld [vmem:[#allocation2 + $0x508] sm:$0xff] }
0x2c13   :  { %v6796_v15 = vpop.f32.mrf.mxu1  ;;  %9376 = vmatprep.subr.mxu1 %v12561_v52  ;;  %v9849_v43 = vld [vmem:[#allocation2 + $0x4e8] sm:$0xff]  ;;  %v9860_v41 = vld [vmem:[#allocation2 + $0x100] sm:$0xff] }
0x2c14   :  { %9377 = vmatpush3.msra.mxu1 %v6907_v60  ;;  %v6911_v44 = vmul.f32 %v9810_v63, %v6796_v15  ;;  %v9847_v60 = vld [vmem:[#allocation2 + $0x500] sm:$0xff]  ;;  %v9862_v45 = vld [vmem:[#allocation2 + $0xe8] sm:$0xff] }
0x2c15   :  { %v6798_v37 = vpop.f32.mrf.mxu1  ;;  %9378 = vmatprep.subr.mxu1 %v12561_v52  ;;  %v9848_v15 = vld [vmem:[#allocation2 + $0x160] sm:$0xff]  ;;  %v9866_v19 = vld [vmem:[#allocation2 + $0xc8] sm:$0xff] }
0x2c16   :  { %v6912_v16 = vmul.f32 %v9809_v49, %v6798_v37  ;;  %9379 = vmatpush3.msra.mxu1 %v6904_v2  ;;  %v9850_v2 = vld [vmem:[#allocation2 + $0x148] sm:$0xff]  ;;  %v9851_v37 = vld [vmem:[#allocation2 + $0x4e0] sm:$0xff] }
0x2c17   :  { %9380 = vmatprep.subr.mxu1 %v12561_v52  ;;  %v9854_v49 = vld [vmem:[#allocation2 + $0x128] sm:$0xff]  ;;  %v9856_v63 = vld [vmem:[#allocation2 + $0x120] sm:$0xff] }
0x2c18   :  { %6934 = vmatprep.subr.mxu0 %v6912_v16  ;;  %9381 = vmatpush3.msra.mxu1 %v6901_v14  ;;  %v9853_v14 = vld [vmem:[#allocation2 + $0x4c8] sm:$0xff]  ;;  %v9855_v16 = vld [vmem:[#allocation2 + $0x4c0] sm:$0xff] }
0x2c19   :  { %6935 = vmatpush1.msra.mxu0 %v6911_v44  ;;  %9382 = vmatprep.subr.mxu1 %v12561_v52  ;;  %v9857_v44 = vld [vmem:[#allocation2 + $0x4a8] sm:$0xff] }
0x2c1a   :  { %6936 = vmatprep.subr.mxu0 %v6909_v39  ;;  %9383 = vmatpush3.msra.mxu1 %v6898_v0  ;;  %v9859_v0 = vld [vmem:[#allocation2 + $0x4a0] sm:$0xff]  ;;  %v9861_v39 = vld [vmem:[#allocation2 + $0x488] sm:$0xff] }
0x2c1b   :  { %6937 = vmatpush1.msra.mxu0 %v6908_v51  ;;  %9385 = vmatmul.mubr.msk.f32.vlgmr.msra.gmra.mxu1 %vm1162_vm6, %v9816_v9  ;;  %v9863_v51 = vld [vmem:[#allocation2 + $0x480] sm:$0xff]  ;;  %v9869_v17 = vld [vmem:[#allocation2 + $0x448] sm:$0xff] }
0x2c1c   :  { %6938 = vmatprep.subr.mxu0 %v6906_v61  ;;  %7126 = vmatprep.subr.mxu1 %v9818_v1  ;;  %v9865_v61 = vld [vmem:[#allocation2 + $0x468] sm:$0xff]  ;;  %v9871_v1 = vld [vmem:[#allocation2 + $0x440] sm:$0xff] }
0x2c1d   :  { %6939 = vmatpush1.msra.mxu0 %v6905_v62  ;;  %7127 = vmatpush1.msra.mxu1 %v9820_v30  ;;  %v9867_v62 = vld [vmem:[#allocation2 + $0x460] sm:$0xff]  ;;  %v9874_v30 = vld [vmem:[#allocation2 + $0x88] sm:$0xff] }
0x2c1e   :  { %6940 = vmatprep.subr.mxu0 %v6903_v36  ;;  %7128 = vmatprep.subr.mxu1 %v9822_v4  ;;  %v9870_v36 = vld [vmem:[#allocation2 + $0xa8] sm:$0xff] }
0x2c1f   :  { %6941 = vmatpush1.msra.mxu0 %v6902_v33  ;;  %7129 = vmatpush1.msra.mxu1 %v9824_v21  ;;  %v9873_v33 = vld [vmem:[#allocation2 + $0x428] sm:$0xff]  ;;  %v9880_v21 = vld [vmem:[#allocation2 + $0x60] sm:$0xff] }
0x2c20   :  { %6942 = vmatprep.subr.mxu0 %v6900_v59  ;;  %7130 = vmatprep.subr.mxu1 %v9826_v55  ;;  %v9876_v59 = vld [vmem:[#allocation2 + $0x80] sm:$0xff]  ;;  %v9877_v4 = vld [vmem:[#allocation2 + $0x408] sm:$0xff] }
0x2c21   :  { %6943 = vmatpush1.msra.mxu0 %v6899_v27  ;;  %7131 = vmatpush1.msra.mxu1 %v9828_v23  ;;  %v9879_v27 = vld [vmem:[#allocation2 + $0x400] sm:$0xff]  ;;  %v9886_v23 = vld [vmem:[#allocation2 + $0x8] sm:$0xff] }
0x2c22   :  { %6944 = vmatprep.subr.mxu0 %v6897_v26  ;;  %7132 = vmatprep.subr.mxu1 %v9829_v22  ;;  %v9882_v26 = vld [vmem:[#allocation2 + $0x1f8] sm:$0xff]  ;;  %v9883_v55 = vld [vmem:[#allocation2 + $0x40] sm:$0xff] }
0x2c23   :  { %6945 = vmatpush1.msra.mxu0 %v6896_v13  ;;  %7133 = vmatpush1.msra.mxu1 %v9830_v29  ;;  %v9885_v13 = vld [vmem:[#allocation2 + $0x20] sm:$0xff]  ;;  %v9888_v29 = vld [vmem:[#allocation2 + $0x3e8] sm:$0xff] }
0x2c24   :  { %8186 = vmatmul.mubr.msk.f32.vlgmr.msra.gmra.mxu0 %vm1162_vm6, %v9816_v9  ;;  %7055 = vmatprep.subr.mxu0 %v9831_v12  ;;  %v9868_v9 = vld [vmem:[#allocation2 + $0xc0] sm:$0xff] }
0x2c25   :  { %7056 = vmatpush1.msra.mxu0 %v9832_v46  ;;  %7134 = vmatprep.subr.mxu1 %v9833_v42  ;;  %v9887_v22 = vld [vmem:[#allocation2] sm:$0xff]  ;;  %v9890_v46 = vld [vmem:[#allocation2 + $0x3c8] sm:$0xff] }
0x2c26   :  { %7057 = vmatprep.subr.mxu0 %v9834_v54  ;;  %7135 = vmatpush1.msra.mxu1 %v9835_v38  ;;  %v9889_v12 = vld [vmem:[#allocation2 + $0x3e0] sm:$0xff]  ;;  %v9892_v54 = vld [vmem:[#allocation2 + $0x3a8] sm:$0xff] }
0x2c27   :  { %7058 = vmatpush1.msra.mxu0 %v9836_v34  ;;  %7136 = vmatprep.subr.mxu1 %v9837_v35  ;;  %v9891_v42 = vld [vmem:[#allocation2 + $0x3c0] sm:$0xff]  ;;  %v9894_v34 = vld [vmem:[#allocation2 + $0x388] sm:$0xff] }
0x2c28   :  { %7059 = vmatprep.subr.mxu0 %v9838_v20  ;;  %7137 = vmatpush1.msra.mxu1 %v9839_v3  ;;  %v9893_v38 = vld [vmem:[#allocation2 + $0x3a0] sm:$0xff]  ;;  %v9896_v20 = vld [vmem:[#allocation2 + $0x368] sm:$0xff] }
0x2c29   :  { %7060 = vmatpush1.msra.mxu0 %v9840_v18  ;;  %7138 = vmatprep.subr.mxu1 %v9841_v40  ;;  %v9895_v35 = vld [vmem:[#allocation2 + $0x380] sm:$0xff]  ;;  %v9898_v18 = vld [vmem:[#allocation2 + $0x348] sm:$0xff] }
0x2c2a   :  { %7061 = vmatprep.subr.mxu0 %v9842_v48  ;;  %7139 = vmatpush1.msra.mxu1 %v9843_v57  ;;  %v9897_v3 = vld [vmem:[#allocation2 + $0x360] sm:$0xff]  ;;  %v9900_v48 = vld [vmem:[#allocation2 + $0x328] sm:$0xff] }
0x2c2b   :  { %7062 = vmatpush1.msra.mxu0 %v9844_v8  ;;  %7140 = vmatprep.subr.mxu1 %v9845_v47  ;;  %v9899_v40 = vld [vmem:[#allocation2 + $0x340] sm:$0xff]  ;;  %v9902_v8 = vld [vmem:[#allocation2 + $0x308] sm:$0xff] }
0x2c2c   :  { %7063 = vmatprep.subr.mxu0 %v9846_v5  ;;  %7141 = vmatpush1.msra.mxu1 %v9847_v60  ;;  %v9901_v57 = vld [vmem:[#allocation2 + $0x320] sm:$0xff]  ;;  %v9904_v5 = vld [vmem:[#allocation2 + $0x2e8] sm:$0xff] }
0x2c2d   :  { %7064 = vmatpush1.msra.mxu0 %v9848_v15  ;;  %7142 = vmatprep.subr.mxu1 %v9849_v43  ;;  %v9903_v47 = vld [vmem:[#allocation2 + $0x300] sm:$0xff]  ;;  %v9906_v15 = vld [vmem:[#allocation2 + $0x2c8] sm:$0xff] }
0x2c2e   :  { %7065 = vmatprep.subr.mxu0 %v9850_v2  ;;  %7143 = vmatpush1.msra.mxu1 %v9851_v37  ;;  %v9905_v60 = vld [vmem:[#allocation2 + $0x2e0] sm:$0xff]  ;;  %v9908_v2 = vld [vmem:[#allocation2 + $0x2a8] sm:$0xff] }
0x2c2f   :  { %7066 = vmatpush1.msra.mxu0 %v9852_v7  ;;  %7144 = vmatprep.subr.mxu1 %v9853_v14  ;;  %v9907_v43 = vld [vmem:[#allocation2 + $0x2c0] sm:$0xff]  ;;  %v9910_v7 = vld [vmem:[#allocation2 + $0x288] sm:$0xff] }
0x2c30   :  { %7067 = vmatprep.subr.mxu0 %v9854_v49  ;;  %7145 = vmatpush1.msra.mxu1 %v9855_v16  ;;  %v9909_v37 = vld [vmem:[#allocation2 + $0x2a0] sm:$0xff]  ;;  %v9912_v49 = vld [vmem:[#allocation2 + $0x268] sm:$0xff] }
0x2c31   :  { %7068 = vmatpush1.msra.mxu0 %v9856_v63  ;;  %7146 = vmatprep.subr.mxu1 %v9857_v44  ;;  %v9911_v14 = vld [vmem:[#allocation2 + $0x280] sm:$0xff]  ;;  %v9914_v63 = vld [vmem:[#allocation2 + $0x248] sm:$0xff] }
0x2c32   :  { %7069 = vmatprep.subr.mxu0 %v9858_v6  ;;  %7147 = vmatpush1.msra.mxu1 %v9859_v0  ;;  %v9913_v16 = vld [vmem:[#allocation2 + $0x260] sm:$0xff]  ;;  %v9916_v6 = vld [vmem:[#allocation2 + $0x228] sm:$0xff] }
0x2c33   :  { %7070 = vmatpush1.msra.mxu0 %v9860_v41  ;;  %7148 = vmatprep.subr.mxu1 %v9861_v39  ;;  %v9915_v44 = vld [vmem:[#allocation2 + $0x240] sm:$0xff]  ;;  %v9918_v41 = vld [vmem:[#allocation2 + $0x208] sm:$0xff] }
0x2c34   :  { %7071 = vmatprep.subr.mxu0 %v9862_v45  ;;  %7149 = vmatpush1.msra.mxu1 %v9863_v51  ;;  %v9917_v0 = vld [vmem:[#allocation2 + $0x220] sm:$0xff]  ;;  %v9920_v45 = vld [vmem:[#allocation2 + $0x5f8] sm:$0xff] }
0x2c35   :  { %7072 = vmatpush1.msra.mxu0 %v9864_v56  ;;  %7150 = vmatprep.subr.mxu1 %v9865_v61  ;;  %v9919_v39 = vld [vmem:[#allocation2 + $0x200] sm:$0xff]  ;;  %v9921_v56 = vld [vmem:[#allocation2 + $0x1f0] sm:$0xff] }
0x2c36   :  { %7073 = vmatprep.subr.mxu0 %v9866_v19  ;;  %7151 = vmatpush1.msra.mxu1 %v9867_v62  ;;  %v9922_v19 = vld [vmem:[#allocation2 + $0x1d8] sm:$0xff]  ;;  %v9923_v62 = vld [vmem:[#allocation2 + $0x1d0] sm:$0xff] }
0x2c37   :  { %7074 = vmatpush1.msra.mxu0 %v9868_v9  ;;  %7152 = vmatprep.subr.mxu1 %v9869_v17  ;;  %v9924_v9 = vld [vmem:[#allocation2 + $0x1b8] sm:$0xff]  ;;  %v9925_v17 = vld [vmem:[#allocation2 + $0x1b0] sm:$0xff] }
0x2c38   :  { %7075 = vmatprep.subr.mxu0 %v9870_v36  ;;  %7153 = vmatpush1.msra.mxu1 %v9871_v1  ;;  %v9926_v36 = vld [vmem:[#allocation2 + $0x198] sm:$0xff]  ;;  %v9927_v1 = vld [vmem:[#allocation2 + $0x190] sm:$0xff] }
0x2c39   :  { %7076 = vmatpush1.msra.mxu0 %v9872_v32  ;;  %7154 = vmatprep.subr.mxu1 %v9873_v33  ;;  %v9928_v32 = vld [vmem:[#allocation2 + $0x178] sm:$0xff] }
0x2c3a   :  { %7077 = vmatprep.subr.mxu0 %v9874_v30  ;;  %7155 = vmatpush1.msra.mxu1 %v9875_v58  ;;  %v9929_v30 = vld [vmem:[#allocation2 + $0x170] sm:$0xff]  ;;  %v9930_v58 = vld [vmem:[#allocation2 + $0x158] sm:$0xff] }
0x2c3b   :  { %7078 = vmatpush1.msra.mxu0 %v9876_v59  ;;  %7156 = vmatprep.subr.mxu1 %v9877_v4  ;;  %v9931_v4 = vld [vmem:[#allocation2 + $0x150] sm:$0xff] }
0x2c3c   :  { %7079 = vmatprep.subr.mxu0 %v9878_v25  ;;  %7157 = vmatpush1.msra.mxu1 %v9879_v27  ;;  %v9932_v25 = vld [vmem:[#allocation2 + $0x138] sm:$0xff]  ;;  %v9933_v27 = vld [vmem:[#allocation2 + $0x130] sm:$0xff] }
0x2c3d   :  { %7080 = vmatpush1.msra.mxu0 %v9880_v21  ;;  %7190 = vmatprep.mubr.f32.mxu1 %v12561_v52  ;;  %v9934_v21 = vld [vmem:[#allocation2 + $0x5f0] sm:$0xff] }
0x2c3e   :  { %7081 = vmatprep.subr.mxu0 %v9881_v31  ;;  %7197 = vmatprep.subr.mxu1 %v9882_v26  ;;  %v9935_v31 = vld [vmem:[#allocation2 + $0x118] sm:$0xff] }
0x2c3f   :  { %7082 = vmatpush1.msra.mxu0 %v9883_v55  ;;  %v9936_v26 = vld [vmem:[#allocation2 + $0x5d8] sm:$0xff]  ;;  %v9937_v55 = vld [vmem:[#allocation2 + $0x110] sm:$0xff] }
0x2c40   :  { %7083 = vmatprep.subr.mxu0 %v9884_v11  ;;  %v9938_v11 = vld [vmem:[#allocation2 + $0x5d0] sm:$0xff] }
0x2c41   :  { %7084 = vmatpush1.msra.mxu0 %v9885_v13  ;;  %v9939_v13 = vld [vmem:[#allocation2 + $0xf8] sm:$0xff] }
0x2c42   :  { %7085 = vmatprep.subr.mxu0 %v9886_v23  ;;  %v9940_v23 = vld [vmem:[#allocation2 + $0x5b8] sm:$0xff] }
0x2c43   :  { %7086 = vmatpush1.msra.mxu0 %v9887_v22  ;;  %v9941_v22 = vld [vmem:[#allocation2 + $0xf0] sm:$0xff] }
0x2c44   :  { %7087 = vmatprep.subr.mxu0 %v9888_v29  ;;  %v9942_v29 = vld [vmem:[#allocation2 + $0x5b0] sm:$0xff] }
0x2c45   :  { %7088 = vmatpush2.msra.mxu0 %v9889_v12  ;;  %v9943_v12 = vld [vmem:[#allocation2 + $0xd8] sm:$0xff] }
0x2c46   :  { %7089 = vmatprep.subr.mxu0 %v9890_v46  ;;  %v9944_v46 = vld [vmem:[#allocation2 + $0x598] sm:$0xff] }
0x2c47   :  { %7090 = vmatpush2.msra.mxu0 %v9891_v42  ;;  %v9945_v42 = vld [vmem:[#allocation2 + $0xd0] sm:$0xff] }
0x2c48   :  { %7091 = vmatprep.subr.mxu0 %v9892_v54  ;;  %v9946_v54 = vld [vmem:[#allocation2 + $0x590] sm:$0xff] }
0x2c49   :  { %7092 = vmatpush2.msra.mxu0 %v9893_v38  ;;  %v9947_v38 = vld [vmem:[#allocation2 + $0xb8] sm:$0xff] }
0x2c4a   :  { %7093 = vmatprep.subr.mxu0 %v9894_v34  ;;  %v9948_v34 = vld [vmem:[#allocation2 + $0x578] sm:$0xff] }
0x2c4b   :  { %7094 = vmatpush2.msra.mxu0 %v9895_v35  ;;  %v9949_v35 = vld [vmem:[#allocation2 + $0xb0] sm:$0xff] }
0x2c4c   :  { %7095 = vmatprep.subr.mxu0 %v9896_v20  ;;  %v9950_v20 = vld [vmem:[#allocation2 + $0x570] sm:$0xff] }
0x2c4d   :  { %7096 = vmatpush2.msra.mxu0 %v9897_v3  ;;  %v9951_v3 = vld [vmem:[#allocation2 + $0x98] sm:$0xff] }
0x2c4e   :  { %7097 = vmatprep.subr.mxu0 %v9898_v18  ;;  %v9952_v18 = vld [vmem:[#allocation2 + $0x558] sm:$0xff] }
0x2c4f   :  { %7098 = vmatpush2.msra.mxu0 %v9899_v40  ;;  %v9953_v40 = vld [vmem:[#allocation2 + $0x90] sm:$0xff] }
0x2c50   :  { %7099 = vmatprep.subr.mxu0 %v9900_v48  ;;  %v9954_v48 = vld [vmem:[#allocation2 + $0x550] sm:$0xff] }
0x2c51   :  { %7100 = vmatpush2.msra.mxu0 %v9901_v57  ;;  %v9955_v57 = vld [vmem:[#allocation2 + $0x78] sm:$0xff] }
0x2c52   :  { %7101 = vmatprep.subr.mxu0 %v9902_v8  ;;  %v9956_v8 = vld [vmem:[#allocation2 + $0x538] sm:$0xff] }
0x2c53   :  { %7102 = vmatpush2.msra.mxu0 %v9903_v47  ;;  %v9957_v47 = vld [vmem:[#allocation2 + $0x70] sm:$0xff] }
0x2c54   :  { %7103 = vmatprep.subr.mxu0 %v9904_v5  ;;  %v9958_v5 = vld [vmem:[#allocation2 + $0x530] sm:$0xff] }
0x2c55   :  { %7104 = vmatpush2.msra.mxu0 %v9905_v60  ;;  %v9959_v60 = vld [vmem:[#allocation2 + $0x58] sm:$0xff] }
0x2c56   :  { %7105 = vmatprep.subr.mxu0 %v9906_v15  ;;  %v9960_v15 = vld [vmem:[#allocation2 + $0x518] sm:$0xff] }
0x2c57   :  { %7106 = vmatpush2.msra.mxu0 %v9907_v43  ;;  %v9961_v43 = vld [vmem:[#allocation2 + $0x50] sm:$0xff] }
0x2c58   :  { %7107 = vmatprep.subr.mxu0 %v9908_v2  ;;  %v9962_v2 = vld [vmem:[#allocation2 + $0x510] sm:$0xff] }
0x2c59   :  { %7108 = vmatpush2.msra.mxu0 %v9909_v37  ;;  %v9963_v37 = vld [vmem:[#allocation2 + $0x38] sm:$0xff] }
0x2c5a   :  { %7109 = vmatprep.subr.mxu0 %v9910_v7  ;;  %v9964_v7 = vld [vmem:[#allocation2 + $0x4f8] sm:$0xff] }
0x2c5b   :  { %7110 = vmatpush2.msra.mxu0 %v9911_v14  ;;  %v9965_v14 = vld [vmem:[#allocation2 + $0x30] sm:$0xff] }
0x2c5c   :  { %7111 = vmatprep.subr.mxu0 %v9912_v49  ;;  %v9966_v49 = vld [vmem:[#allocation2 + $0x4f0] sm:$0xff] }
0x2c5d   :  { %7112 = vmatpush2.msra.mxu0 %v9913_v16  ;;  %v9967_v16 = vld [vmem:[#allocation2 + $0x18] sm:$0xff] }
0x2c5e   :  { %7113 = vmatprep.subr.mxu0 %v9914_v63  ;;  %v9968_v63 = vld [vmem:[#allocation2 + $0x4d8] sm:$0xff] }
0x2c5f   :  { %7114 = vmatpush2.msra.mxu0 %v9915_v44  ;;  %v9969_v44 = vld [vmem:[#allocation2 + $0x10] sm:$0xff] }
0x2c60   :  { %7115 = vmatprep.subr.mxu0 %v9916_v6  ;;  %v9970_v6 = vld [vmem:[#allocation2 + $0x4d0] sm:$0xff] }
0x2c61   :  { %7116 = vmatpush2.msra.mxu0 %v9917_v0  ;;  %v9971_v0 = vld [vmem:[#allocation2 + $0x3f8] sm:$0xff] }
0x2c62   :  { %7117 = vmatprep.subr.mxu0 %v9918_v41  ;;  %v9972_v41 = vld [vmem:[#allocation2 + $0x4b8] sm:$0xff] }
0x2c63   :  { %7118 = vmatpush2.msra.mxu0 %v9919_v39  ;;  %v9973_v39 = vld [vmem:[#allocation2 + $0x3f0] sm:$0xff] }
0x2c64   :  { %7268 = vmatprep.subr.mxu0 %v9920_v45  ;;  %v9974_v45 = vld [vmem:[#allocation2 + $0x4b0] sm:$0xff] }
0x2cdb   :  { %v12305_v51 = vpop.f32.mrf.mxu1 }
0x2cdc   :  { %7191 = vmatmul.mubr.f32.vlgmr.msra.gmra.mxu1 %v12305_v51 }
0x2cdd   :  { %7198 = vmatpush1.msra.mxu1 %v9921_v56  ;;  %v9386_v61 = vpop.f32.mrf.mxu1  ;;  %v9975_v56 = vld [vmem:[#allocation2 + $0x3d8] sm:$0xff] }
0x2cde   :  { %7199 = vmatprep.subr.mxu1 %v9922_v19  ;;  %v9976_v61 = vld [vmem:[#allocation2 + $0x498] sm:$0xff]  ;;  %v9977_v19 = vld [vmem:[#allocation2 + $0x3d0] sm:$0xff] }
0x2cdf   :  { %7200 = vmatpush1.msra.mxu1 %v9923_v62  ;;  %v9978_v62 = vld [vmem:[#allocation2 + $0x490] sm:$0xff] }
0x2ce0   :  { %7201 = vmatprep.subr.mxu1 %v9924_v9  ;;  %v9979_v9 = vld [vmem:[#allocation2 + $0x3b8] sm:$0xff] }
0x2ce1   :  { %7202 = vmatpush1.msra.mxu1 %v9925_v17  ;;  %v9980_v17 = vld [vmem:[#allocation2 + $0x478] sm:$0xff] }
0x2ce2   :  { %7203 = vmatprep.subr.mxu1 %v9926_v36  ;;  %v9981_v36 = vld [vmem:[#allocation2 + $0x3b0] sm:$0xff] }
0x2ce3   :  { %7204 = vmatpush1.msra.mxu1 %v9927_v1  ;;  %v9982_v1 = vld [vmem:[#allocation2 + $0x470] sm:$0xff] }
0x2ce4   :  { %7205 = vmatprep.subr.mxu1 %v9928_v32  ;;  %v12308_v33 = vpop.f32.mrf.mxu0  ;;  %v9983_v32 = vld [vmem:[#allocation2 + $0x398] sm:$0xff] }
0x2ce5   :  { %7206 = vmatpush1.msra.mxu1 %v9929_v30  ;;  %v9984_v30 = vld [vmem:[#allocation2 + $0x458] sm:$0xff] }
0x2ce6   :  { %7207 = vmatprep.subr.mxu1 %v9930_v58  ;;  %v12310_v59 = vpop.f32.mrf.mxu0  ;;  %v9985_v58 = vld [vmem:[#allocation2 + $0x390] sm:$0xff] }
0x2ce7   :  { %7208 = vmatpush1.msra.mxu1 %v9931_v4  ;;  %7119 = vmatprep.mubr.f32.mxu0 %v12310_v59  ;;  %v9986_v4 = vld [vmem:[#allocation2 + $0x450] sm:$0xff] }
0x2ce8   :  { %7209 = vmatprep.subr.mxu1 %v9932_v25  ;;  %7120 = vmatmul.mubr.f32.vlgmr.msra.gmra.mxu0 %v12308_v33  ;;  %v9987_v25 = vld [vmem:[#allocation2 + $0x378] sm:$0xff] }
0x2ce9   :  { %7210 = vmatpush1.msra.mxu1 %v9933_v27  ;;  %7269 = vmatpush1.msra.mxu0 %v9934_v21  ;;  %v9988_v27 = vld [vmem:[#allocation2 + $0x438] sm:$0xff]  ;;  %v9989_v21 = vld [vmem:[#allocation2 + $0x370] sm:$0xff] }
0x2cea   :  { %7211 = vmatprep.subr.mxu1 %v9935_v31  ;;  %7270 = vmatprep.subr.mxu0 %v9936_v26  ;;  %v9990_v31 = vld [vmem:[#allocation2 + $0x430] sm:$0xff]  ;;  %v9991_v26 = vld [vmem:[#allocation2 + $0x358] sm:$0xff] }
0x2ceb   :  { %7212 = vmatpush1.msra.mxu1 %v9937_v55  ;;  %7271 = vmatpush1.msra.mxu0 %v9938_v11  ;;  %v9992_v55 = vld [vmem:[#allocation2 + $0x418] sm:$0xff]  ;;  %v9993_v11 = vld [vmem:[#allocation2 + $0x350] sm:$0xff] }
0x2cec   :  { %7213 = vmatprep.subr.mxu1 %v9939_v13  ;;  %7272 = vmatprep.subr.mxu0 %v9940_v23  ;;  %v9994_v13 = vld [vmem:[#allocation2 + $0x410] sm:$0xff]  ;;  %v9995_v23 = vld [vmem:[#allocation2 + $0x338] sm:$0xff] }
0x2ced   :  { %7214 = vmatpush1.msra.mxu1 %v9941_v22  ;;  %7273 = vmatpush1.msra.mxu0 %v9942_v29  ;;  %v9996_v22 = vld [vmem:[#allocation2 + $0x330] sm:$0xff]  ;;  %v9997_v29 = vld [vmem:[#allocation2 + $0x318] sm:$0xff] }
0x2cee   :  { %7215 = vmatprep.subr.mxu1 %v9943_v12  ;;  %7274 = vmatprep.subr.mxu0 %v9944_v46  ;;  %v9998_v12 = vld [vmem:[#allocation2 + $0x310] sm:$0xff]  ;;  %v9999_v46 = vld [vmem:[%s12569_s1 + $0xf8] sm:$0xff] }
0x2cef   :  { %7216 = vmatpush1.msra.mxu1 %v9945_v42  ;;  %7275 = vmatpush1.msra.mxu0 %v9946_v54  ;;  %v10000_v42 = vld [vmem:[#allocation2 + $0x2f8] sm:$0xff] }
0x2cf0   :  { %7217 = vmatprep.subr.mxu1 %v9947_v38  ;;  %7276 = vmatprep.subr.mxu0 %v9948_v34  ;;  %v10001_v54 = vld [vmem:[%s12569_s1 + $0x78] sm:$0xff]  ;;  %v10002_v38 = vld [vmem:[#allocation2 + $0x2f0] sm:$0xff] }
0x2cf1   :  { %7218 = vmatpush1.msra.mxu1 %v9949_v35  ;;  %7277 = vmatpush1.msra.mxu0 %v9950_v20  ;;  %v10004_v34 = vld [vmem:[#allocation2 + $0x2d8] sm:$0xff]  ;;  %v10006_v35 = vld [vmem:[#allocation2 + $0x2d0] sm:$0xff]  ;;  %v10007_v20 = vld [vmem:[%s12569_s1 + $0xe8] sm:$0xff] }
0x2cf2   :  { %7219 = vmatprep.subr.mxu1 %v9951_v3  ;;  %7278 = vmatprep.subr.mxu0 %v9952_v18  ;;  %v10008_v3 = vld [vmem:[#allocation2 + $0x2b8] sm:$0xff]  ;;  %v10009_v18 = vld [vmem:[%s12569_s1 + $0x68] sm:$0xff] }
0x2cf3   :  { %7220 = vmatpush1.msra.mxu1 %v9953_v40  ;;  %7279 = vmatpush1.msra.mxu0 %v9954_v48  ;;  %v10010_v40 = vld [vmem:[#allocation2 + $0x2b0] sm:$0xff]  ;;  %v10011_v48 = vld [vmem:[%s12569_s1 + $0xe0] sm:$0xff] }
0x2cf4   :  { %7221 = vmatprep.subr.mxu1 %v9955_v57  ;;  %7280 = vmatprep.subr.mxu0 %v9956_v8  ;;  %v10012_v57 = vld [vmem:[#allocation2 + $0x298] sm:$0xff]  ;;  %v10013_v8 = vld [vmem:[%s12569_s1 + $0x60] sm:$0xff] }
0x2cf5   :  { %7222 = vmatpush1.msra.mxu1 %v9957_v47  ;;  %7281 = vmatpush1.msra.mxu0 %v9958_v5  ;;  %v10014_v47 = vld [vmem:[#allocation2 + $0x290] sm:$0xff]  ;;  %v10015_v5 = vld [vmem:[%s12569_s1 + $0xd8] sm:$0xff] }
0x2cf6   :  { %7223 = vmatprep.subr.mxu1 %v9959_v60  ;;  %7282 = vmatprep.subr.mxu0 %v9960_v15  ;;  %v10016_v60 = vld [vmem:[#allocation2 + $0x278] sm:$0xff] }
0x2cf7   :  { %7224 = vmatpush1.msra.mxu1 %v9961_v43  ;;  %7283 = vmatpush1.msra.mxu0 %v9962_v2  ;;  %v10017_v15 = vld [vmem:[%s12569_s1 + $0x58] sm:$0xff]  ;;  %v10018_v43 = vld [vmem:[#allocation2 + $0x270] sm:$0xff] }
0x2cf8   :  { %7225 = vmatprep.subr.mxu1 %v9963_v37  ;;  %7284 = vmatprep.subr.mxu0 %v9964_v7  ;;  %v10019_v2 = vld [vmem:[%s12569_s1 + $0xd0] sm:$0xff]  ;;  %v10020_v37 = vld [vmem:[#allocation2 + $0x258] sm:$0xff] }
0x2cf9   :  { %7226 = vmatpush1.msra.mxu1 %v9965_v14  ;;  %7285 = vmatpush1.msra.mxu0 %v9966_v49  ;;  %v10021_v7 = vld [vmem:[%s12569_s1 + $0x50] sm:$0xff]  ;;  %v10023_v49 = vld [vmem:[%s12569_s1 + $0xc8] sm:$0xff] }
0x2cfa   :  { %7227 = vmatprep.subr.mxu1 %v9967_v16  ;;  %7286 = vmatprep.subr.mxu0 %v9968_v63  ;;  %v10022_v14 = vld [vmem:[#allocation2 + $0x250] sm:$0xff]  ;;  %v10024_v16 = vld [vmem:[#allocation2 + $0x238] sm:$0xff]  ;;  %v10025_v63 = vld [vmem:[%s12569_s1 + $0x48] sm:$0xff] }
0x2cfb   :  { %7228 = vmatpush1.msra.mxu1 %v9969_v44  ;;  %7287 = vmatpush1.msra.mxu0 %v9970_v6  ;;  %v10026_v44 = vld [vmem:[#allocation2 + $0x230] sm:$0xff]  ;;  %v10027_v6 = vld [vmem:[%s12569_s1 + $0xc0] sm:$0xff] }
0x2cfc   :  { %7229 = vmatprep.subr.mxu1 %v9971_v0  ;;  %7288 = vmatprep.subr.mxu0 %v9972_v41  ;;  %v10028_v0 = vld [vmem:[#allocation2 + $0x218] sm:$0xff]  ;;  %v10029_v41 = vld [vmem:[%s12569_s1 + $0x40] sm:$0xff] }
0x2cfd   :  { %7230 = vmatpush2.msra.mxu1 %v9973_v39  ;;  %7289 = vmatpush1.msra.mxu0 %v9974_v45  ;;  %v10030_v39 = vld [vmem:[#allocation2 + $0x210] sm:$0xff]  ;;  %v10031_v45 = vld [vmem:[%s12569_s1 + $0xb8] sm:$0xff] }
0x2cfe   :  { %7231 = vmatprep.subr.mxu1 %v9975_v56  ;;  %7290 = vmatprep.subr.mxu0 %v9976_v61  ;;  %v10032_v56 = vld [vmem:[%s12569_s1 + $0x38] sm:$0xff]  ;;  %v10033_v61 = vld [vmem:[%s12569_s1 + $0xb0] sm:$0xff] }
0x2cff   :  { %7232 = vmatpush2.msra.mxu1 %v9977_v19  ;;  %7291 = vmatpush1.msra.mxu0 %v9978_v62  ;;  %v10034_v19 = vld [vmem:[%s12569_s1 + $0x1f8] sm:$0xff]  ;;  %v10035_v62 = vld [vmem:[%s12569_s1 + $0x30] sm:$0xff] }
0x2d00   :  { %7233 = vmatprep.subr.mxu1 %v9979_v9  ;;  %7292 = vmatprep.subr.mxu0 %v9980_v17  ;;  %v10036_v9 = vld [vmem:[%s12569_s1 + $0x178] sm:$0xff]  ;;  %v10037_v17 = vld [vmem:[%s12569_s1 + $0xa8] sm:$0xff] }
0x2d01   :  { %7234 = vmatpush2.msra.mxu1 %v9981_v36  ;;  %7293 = vmatpush1.msra.mxu0 %v9982_v1  ;;  %v10038_v36 = vld [vmem:[%s12569_s1 + $0x1f0] sm:$0xff] }
0x2d02   :  { %7235 = vmatprep.subr.mxu1 %v9983_v32  ;;  %7294 = vmatprep.subr.mxu0 %v9984_v30  ;;  %v10040_v1 = vld [vmem:[%s12569_s1 + $0x170] sm:$0xff]  ;;  %v10041_v32 = vld [vmem:[%s12569_s1 + $0xa0] sm:$0xff]  ;;  %v10042_v30 = vld [vmem:[%s12569_s1 + $0x1e8] sm:$0xff] }
0x2d03   :  { %7236 = vmatpush2.msra.mxu1 %v9985_v58  ;;  %7295 = vmatpush1.msra.mxu0 %v9986_v4  ;;  %v10043_v58 = vld [vmem:[%s12569_s1 + $0x20] sm:$0xff]  ;;  %v10044_v4 = vld [vmem:[%s12569_s1 + $0x168] sm:$0xff] }
0x2d04   :  { %7237 = vmatprep.subr.mxu1 %v9987_v25  ;;  %7296 = vmatprep.subr.mxu0 %v9988_v27  ;;  %v10045_v25 = vld [vmem:[%s12569_s1 + $0x98] sm:$0xff]  ;;  %v10046_v27 = vld [vmem:[%s12569_s1 + $0x1e0] sm:$0xff] }
0x2d05   :  { %7238 = vmatpush2.msra.mxu1 %v9989_v21  ;;  %7297 = vmatpush1.msra.mxu0 %v9990_v31  ;;  %v10047_v21 = vld [vmem:[%s12569_s1 + $0x18] sm:$0xff]  ;;  %v10048_v31 = vld [vmem:[%s12569_s1 + $0x160] sm:$0xff] }
0x2d06   :  { %7239 = vmatprep.subr.mxu1 %v9991_v26  ;;  %7298 = vmatprep.subr.mxu0 %v9992_v55  ;;  %v10049_v26 = vld [vmem:[%s12569_s1 + $0x90] sm:$0xff]  ;;  %v10050_v55 = vld [vmem:[%s12569_s1 + $0x1d8] sm:$0xff] }
0x2d07   :  { %7240 = vmatpush2.msra.mxu1 %v9993_v11  ;;  %7299 = vmatpush1.msra.mxu0 %v9994_v13  ;;  %v10051_v11 = vld [vmem:[%s12569_s1 + $0x10] sm:$0xff]  ;;  %v10052_v13 = vld [vmem:[%s12569_s1 + $0x158] sm:$0xff] }
0x2d08   :  { %7332 = vmatprep.mubr.f32.mxu0 %v12561_v52  ;;  %7241 = vmatprep.subr.mxu1 %v9995_v23  ;;  %v10053_v23 = vld [vmem:[%s12569_s1 + $0x88] sm:$0xff] }
0x2d09   :  { %7333 = vmatmul.mubr.f32.vlgmr.msra.gmra.mxu0 %v12305_v51  ;;  %7242 = vmatpush2.msra.mxu1 %v9996_v22  ;;  %v10003_v51 = vld [vmem:[%s12569_s1 + $0xf0] sm:$0xff] }
0x2d0a   :  { %7261 = vmatprep.mubr.f32.mxu1 %v12310_v59  ;;  %7243 = vmatprep.subr.mxu1 %v9997_v29  ;;  %v10005_v59 = vld [vmem:[%s12569_s1 + $0x70] sm:$0xff]  ;;  %v10055_v29 = vld [vmem:[%s12569_s1 + $0x8] sm:$0xff] }
0x2d0b   :  { %7244 = vmatpush2.msra.mxu1 %v9998_v12  ;;  %8620 = vmatprep.subr.mxu0 %v9999_v46  ;;  %v10054_v22 = vld [vmem:[%s12569_s1 + $0x1d0] sm:$0xff]  ;;  %v10057_v46 = vld [vmem:[%s12569_s1 + $0x80] sm:$0xff] }
0x2d0c   :  { %7245 = vmatprep.subr.mxu1 %v10000_v42  ;;  %8621 = vmatpush3.msra.mxu0 %v10001_v54  ;;  %v10056_v12 = vld [vmem:[%s12569_s1 + $0x150] sm:$0xff]  ;;  %v10058_v42 = vld [vmem:[%s12569_s1 + $0x1c8] sm:$0xff]  ;;  %v10059_v54 = vld [vmem:[%s12569_s1] sm:$0xff] }
0x2d0d   :  { %7246 = vmatpush2.msra.mxu1 %v10002_v38  ;;  %8622 = vmatprep.subr.mxu0 %v10003_v51  ;;  %v10060_v38 = vld [vmem:[%s12569_s1 + $0x148] sm:$0xff]  ;;  %v10061_v51 = vld [vmem:[%s12569_s1 + $0x1c0] sm:$0xff] }
0x2d0e   :  { %7247 = vmatprep.subr.mxu1 %v10004_v34  ;;  %8623 = vmatpush3.msra.mxu0 %v10005_v59  ;;  %v10062_v34 = vld [vmem:[%s12569_s1 + $0x140] sm:$0xff]  ;;  %v10063_v59 = vld [vmem:[%s12569_s1 + $0x1b8] sm:$0xff] }
0x2d0f   :  { %7248 = vmatpush2.msra.mxu1 %v10006_v35  ;;  %8624 = vmatprep.subr.mxu0 %v10007_v20  ;;  %v10064_v35 = vld [vmem:[%s12569_s1 + $0x138] sm:$0xff]  ;;  %v10065_v20 = vld [vmem:[%s12569_s1 + $0x1b0] sm:$0xff] }
0x2d10   :  { %7249 = vmatprep.subr.mxu1 %v10008_v3  ;;  %8625 = vmatpush3.msra.mxu0 %v10009_v18  ;;  %v10066_v3 = vld [vmem:[%s12569_s1 + $0x130] sm:$0xff]  ;;  %v10067_v18 = vld [vmem:[%s12569_s1 + $0x1a8] sm:$0xff] }
0x2d11   :  { %7250 = vmatpush2.msra.mxu1 %v10010_v40  ;;  %8626 = vmatprep.subr.mxu0 %v10011_v48  ;;  %v10068_v40 = vld [vmem:[%s12569_s1 + $0x128] sm:$0xff]  ;;  %v10069_v48 = vld [vmem:[%s12569_s1 + $0x1a0] sm:$0xff] }
0x2d12   :  { %7251 = vmatprep.subr.mxu1 %v10012_v57  ;;  %8627 = vmatpush3.msra.mxu0 %v10013_v8  ;;  %v10070_v57 = vld [vmem:[%s12569_s1 + $0x120] sm:$0xff]  ;;  %v10071_v8 = vld [vmem:[%s12569_s1 + $0x198] sm:$0xff] }
0x2d13   :  { %7252 = vmatpush2.msra.mxu1 %v10014_v47  ;;  %8628 = vmatprep.subr.mxu0 %v10015_v5  ;;  %v10072_v47 = vld [vmem:[%s12569_s1 + $0x118] sm:$0xff]  ;;  %v10073_v5 = vld [vmem:[%s12569_s1 + $0x190] sm:$0xff] }
0x2d14   :  { %7253 = vmatprep.subr.mxu1 %v10016_v60  ;;  %8629 = vmatpush3.msra.mxu0 %v10017_v15  ;;  %v10074_v60 = vld [vmem:[%s12569_s1 + $0x110] sm:$0xff]  ;;  %v10075_v15 = vld [vmem:[%s12569_s1 + $0x188] sm:$0xff] }
0x2d15   :  { %7254 = vmatpush2.msra.mxu1 %v10018_v43  ;;  %8630 = vmatprep.subr.mxu0 %v10019_v2  ;;  %v10076_v43 = vld [vmem:[%s12569_s1 + $0x108] sm:$0xff]  ;;  %v10077_v2 = vld [vmem:[%s12569_s1 + $0x180] sm:$0xff] }
0x2d16   :  { %7255 = vmatprep.subr.mxu1 %v10020_v37  ;;  %8631 = vmatpush3.msra.mxu0 %v10021_v7  ;;  %v10078_v37 = vld [vmem:[%s12569_s1 + $0x100] sm:$0xff] }
0x2d17   :  { %7256 = vmatpush2.msra.mxu1 %v10022_v14  ;;  %8632 = vmatprep.subr.mxu0 %v10023_v49 }
0x2d18   :  { %7257 = vmatprep.subr.mxu1 %v10024_v16  ;;  %8633 = vmatpush3.msra.mxu0 %v10025_v63 }
0x2d19   :  { %7258 = vmatpush2.msra.mxu1 %v10026_v44  ;;  %8634 = vmatprep.subr.mxu0 %v10027_v6 }
0x2d1a   :  { %7259 = vmatprep.subr.mxu1 %v10028_v0  ;;  %8635 = vmatpush3.msra.mxu0 %v10029_v41 }
0x2d1b   :  { %7260 = vmatpush2.msra.mxu1 %v10030_v39  ;;  %8636 = vmatprep.subr.mxu0 %v10031_v45 }
0x2d1c   :  { %7262 = vmatmul.mubr.f32.vlgmr.msra.gmra.mxu1 %v12308_v33  ;;  %8637 = vmatpush3.msra.mxu0 %v10032_v56  ;;  %v10039_v33 = vld [vmem:[%s12569_s1 + $0x28] sm:$0xff]  ;;  %s10189_s1 = smov 120  }
0x2d1d   :  { %8638 = vmatprep.subr.mxu0 %v10033_v61  ;;  %8655 = vmatprep.subr.mxu1 %v10034_v19  ;;  %v10079_v61 = vld [vmem:[%s12592_s8 + $0x10] sm:$0xff] }
0x2d1e   :  { %8639 = vmatpush3.msra.mxu0 %v10035_v62  ;;  %8656 = vmatpush3.msra.mxu1 %v10036_v9 }
0x2d1f   :  { %8640 = vmatprep.subr.mxu0 %v10037_v17  ;;  %8657 = vmatprep.subr.mxu1 %v10038_v36 }
0x2d20   :  { %8641 = vmatpush3.msra.mxu0 %v10039_v33  ;;  %8658 = vmatpush3.msra.mxu1 %v10040_v1 }
0x2d21   :  { %8642 = vmatprep.subr.mxu0 %v10041_v32  ;;  %8659 = vmatprep.subr.mxu1 %v10042_v30 }
0x2d22   :  { %8643 = vmatpush3.msra.mxu0 %v10043_v58  ;;  %8660 = vmatpush3.msra.mxu1 %v10044_v4 }
0x2d23   :  { %8644 = vmatprep.subr.mxu0 %v10045_v25  ;;  %8661 = vmatprep.subr.mxu1 %v10046_v27  ;;  %v10082_v27 = vld [vmem:[%s12593_s14 + $0x60] sm:$0x7f] }
0x2d24   :  { %8645 = vmatpush3.msra.mxu0 %v10047_v21  ;;  %8662 = vmatpush3.msra.mxu1 %v10048_v31  ;;  %v10085_v21 = vld [vmem:[%s12593_s14 + $0x48] sm:$0xff]  ;;  %v10086_v31 = vld [vmem:[%s12593_s14 + $0x40] sm:$0xff] }
0x2d25   :  { %8646 = vmatprep.subr.mxu0 %v10049_v26  ;;  %8663 = vmatprep.subr.mxu1 %v10050_v55  ;;  %v10087_v26 = vld [vmem:[%s12593_s14 + $0x38] sm:$0xff]  ;;  %v10088_v55 = vld [vmem:[%s12593_s14 + $0x30] sm:$0xff] }
0x2d26   :  { %8647 = vmatpush3.msra.mxu0 %v10051_v11  ;;  %8664 = vmatpush3.msra.mxu1 %v10052_v13  ;;  %v10089_v11 = vld [vmem:[%s12593_s14 + $0x28] sm:$0xff]  ;;  %v10090_v13 = vld [vmem:[%s12593_s14 + $0x20] sm:$0xff] }
0x2d27   :  { %8648 = vmatprep.subr.mxu0 %v10053_v23  ;;  %8665 = vmatprep.subr.mxu1 %v10054_v22  ;;  %v10091_v23 = vld [vmem:[%s12593_s14 + $0x18] sm:$0xff]  ;;  %v10092_v22 = vld [vmem:[%s12593_s14 + $0x10] sm:$0xff] }
0x2d28   :  { %8649 = vmatpush3.msra.mxu0 %v10055_v29  ;;  %8666 = vmatpush3.msra.mxu1 %v10056_v12  ;;  %v10093_v29 = vld [vmem:[%s12593_s14 + $0x8] sm:$0xff]  ;;  %v10094_v12 = vld [vmem:[%s12593_s14] sm:$0xff] }
0x2d29   :  { %8650 = vmatprep.subr.mxu0 %v10057_v46  ;;  %8667 = vmatprep.subr.mxu1 %v10058_v42 }
0x2d2a   :  { %8651 = vmatpush3.msra.mxu0 %v10059_v54  ;;  %8668 = vmatpush3.msra.mxu1 %v10060_v38 }
0x2d2b   :  { %8669 = vmatprep.subr.mxu1 %v10061_v51  ;;  %9387 = vmatprep.subr.mxu0 %v12561_v52 }
0x2d2c   :  { %8670 = vmatpush3.msra.mxu1 %v10062_v34  ;;  %v10095_v34 = vld [vmem:[%s12594_s19] ss:$0 sm:$0xff] }
0x2d2d   :  { %8671 = vmatprep.subr.mxu1 %v10063_v59 }
0x2d2e   :  { %8672 = vmatpush3.msra.mxu1 %v10064_v35 }
0x2d2f   :  { %8673 = vmatprep.subr.mxu1 %v10065_v20 }
0x2d30   :  { %8674 = vmatpush3.msra.mxu1 %v10066_v3 }
0x2d31   :  { %8675 = vmatprep.subr.mxu1 %v10067_v18  ;;  %v10096_v18 = vld [vmem:[%s12595_s24 + $0x40] sm:$0x7f] }
0x2d32   :  { %8676 = vmatpush3.msra.mxu1 %v10068_v40  ;;  %v10097_v40 = vld [vmem:[%s12595_s24 + $0x38] sm:$0xff] }
0x2d33   :  { %8677 = vmatprep.subr.mxu1 %v10069_v48  ;;  %v10098_v48 = vld [vmem:[%s12595_s24 + $0x30] sm:$0xff] }
0x2d34   :  { %8678 = vmatpush3.msra.mxu1 %v10070_v57  ;;  %v10100_v57 = vld [vmem:[%s12595_s24 + $0x20] sm:$0xff] }
0x2d35   :  { %8679 = vmatprep.subr.mxu1 %v10071_v8  ;;  %v10101_v8 = vld [vmem:[%s12595_s24 + $0x18] sm:$0xff] }
0x2d36   :  { %8680 = vmatpush3.msra.mxu1 %v10072_v47  ;;  %v10102_v47 = vld [vmem:[%s12595_s24 + $0x10] sm:$0xff] }
0x2d37   :  { %8681 = vmatprep.subr.mxu1 %v10073_v5  ;;  %v10103_v5 = vld [vmem:[%s12595_s24 + $0x8] sm:$0xff] }
0x2d38   :  { %8682 = vmatpush3.msra.mxu1 %v10074_v60  ;;  %v10104_v60 = vld [vmem:[%s12595_s24] sm:$0xff] }
0x2d39   :  { %8683 = vmatprep.subr.mxu1 %v10075_v15 }
0x2d3a   :  { %8684 = vmatpush3.msra.mxu1 %v10076_v43  ;;  %v10105_v43 = vld [vmem:[%s12596_s6] ss:$0 sm:$0xff] }
0x2d3b   :  { %8685 = vmatprep.subr.mxu1 %v10077_v2 }
0x2d3c   :  { %8686 = vmatpush3.msra.mxu1 %v10078_v37 }
0x2d3d   :  { %9417 = vmatprep.subr.mxu1 %v12561_v52 }
0x2d9c   :  { %v7192_v7 = vpop.f32.mrf.mxu1 }
0x2d9e   :  { %v7194_v6 = vpop.f32.mrf.mxu1 }
0x2da8   :  { %v7121_v14 = vpop.f32.mrf.mxu0 }
0x2da9   :  { %v7122_v49 = vadd.f32 %v7121_v14, %v11369_v28  ;;  %v10080_v28 = vld [vmem:[%s12592_s8 + $0x8] sm:$0xff] }
0x2daa   :  { %v7123_v16 = vpop.f32.mrf.mxu0 }
0x2dab   :  { %v7193_v63 = vadd.f32 %v7192_v7, %v7122_v49  ;;  %v7124_v44 = vadd.f32 %v7123_v16, %v11373_v24  ;;  %v10081_v24 = vld [vmem:[%s12592_s8] sm:$0xff]  ;;  %v10106_v16 = vld [vmem:[%s12581_s7 + $0x8] sm:$0x1] }
0x2dad   :  { %v7195_v0 = vadd.f32 %v7194_v6, %v7124_v44  ;;  %v7343_v41 = vmul.f32 0.01, %v7193_v63  ;;  %vm7339_vm4 = vcmp.ge.f32.partialorder %v7193_v63, 0.0  ;;  %v10108_v6 = vld [vmem:[%s12579_s11] ss:$0 sm:$0xff] }
0x2daf   :  { %vm7340_vm5 = vcmp.ge.f32.partialorder %v7195_v0, 0.0  ;;  %v7344_v39 = vmul.f32 0.01, %v7195_v0  ;;  %v7347_v56 = vsel %vm7339_vm4, %v7193_v63, %v7343_v41  ;;  %v10107_v63 = vld [vmem:[%s12581_s7] sm:$0xff] }
0x2db1   :  { %v7348_v45 = vsel %vm7340_vm5, %v7195_v0, %v7344_v39 }
0x2db2   :  { %7415 = vmatprep.mubr.f32.mxu0 %v7348_v45  ;;  %v12597_v45 = vld [vmem:[#allocation29_spill] sm:$0xff] }
0x2db3   :  { %7416 = vmatmul.mubr.f32.vlgmr.msra.gmra.mxu0 %v7347_v56 }
0x2db4   :  { %9388 = vmatpush3.msra.mxu0 %v10079_v61  ;;  %9393 = vmatprep.mubr.msk.f32.mxu0 %vm10181_vm0, %v12561_v52 }
0x2db5   :  { %9389 = vmatprep.subr.mxu0 %v12561_v52 }
0x2db6   :  { %9390 = vmatpush3.msra.mxu0 %v10080_v28 }
0x2db7   :  { %9391 = vmatprep.subr.mxu0 %v12561_v52 }
0x2db8   :  { %9392 = vmatpush3.msra.mxu0 %v10081_v24 }
0x2db9   :  { %9396 = vmatprep.subr.mxu0 %v12561_v52 }
0x2dc9   :  { %v7334_v19 = vpop.f32.mrf.mxu0 }
0x2dcb   :  { %v7336_v1 = vpop.f32.mrf.mxu0 }
0x2ddc   :  { %v7263_v62 = vpop.f32.mrf.mxu1 }
0x2ddd   :  { %v7264_v9 = vadd.f32 %v7263_v62, %v11381_v53  ;;  %v10083_v53 = vld [vmem:[%s12593_s14 + $0x58] sm:$0xff] }
0x2dde   :  { %v7265_v17 = vpop.f32.mrf.mxu1 }
0x2ddf   :  { %v7335_v36 = vadd.f32 %v7334_v19, %v7264_v9  ;;  %v7266_v33 = vadd.f32 %v7265_v17, %v11383_v10  ;;  %v10084_v10 = vld [vmem:[%s12593_s14 + $0x50] sm:$0xff]  ;;  %v10109_v19 = vld [vmem:[%s12582_s10] ss:$0 sm:$0xff] }
0x2de1   :  { %v7337_v32 = vadd.f32 %v7336_v1, %v7266_v33  ;;  %v7345_v30 = vmul.f32 0.01, %v7335_v36  ;;  %vm7341_vm6 = vcmp.ge.f32.partialorder %v7335_v36, 0.0  ;;  %v10110_v1 = vld [vmem:[%s10384_s27 + $0x18] sm:$0xff] }
0x2de3   :  { %vm7342_vm7 = vcmp.ge.f32.partialorder %v7337_v32, 0.0  ;;  %v7346_v58 = vmul.f32 0.01, %v7337_v32  ;;  %v7349_v25 = vsel %vm7341_vm6, %v7335_v36, %v7345_v30  ;;  %v10112_v30 = vld [vmem:[%s10384_s27 + $0x8] sm:$0xff] }
0x2de5   :  { %v7350_v4 = vsel %vm7342_vm7, %v7337_v32, %v7346_v58  ;;  %v10111_v32 = vld [vmem:[%s10384_s27 + $0x10] sm:$0xff]  ;;  %v10113_v58 = vld [vmem:[%s10384_s27] sm:$0xff] }
0x2de6   :  { %7485 = vmatprep.mubr.f32.mxu1 %v7350_v4 }
0x2de7   :  { %7486 = vmatmul.mubr.f32.vlgmr.msra.gmra.mxu1 %v7349_v25  ;;  %v10114_v25 = vld [vmem:[%s10379_s12] ss:$0 sm:$0xff]  ;;  %s10190_s12 = smov 104  }
0x2de8   :  { %9418 = vmatpush3.msk.msra.mxu1 %vm3942_vm12, %v10082_v27  ;;  %9443 = vmatprep.mubr.msk.f32.mxu1 %vm10181_vm0, %v12561_v52 }
0x2de9   :  { %9419 = vmatprep.subr.mxu1 %v12561_v52 }
0x2dea   :  { %9420 = vmatpush3.msra.mxu1 %v10083_v53 }
0x2deb   :  { %9421 = vmatprep.subr.mxu1 %v12561_v52 }
0x2dec   :  { %9422 = vmatpush3.msra.mxu1 %v10084_v10 }
0x2ded   :  { %9423 = vmatprep.subr.mxu1 %v12561_v52 }
0x2dee   :  { %9424 = vmatpush3.msra.mxu1 %v10085_v21 }
0x2def   :  { %9425 = vmatprep.subr.mxu1 %v12561_v52 }
0x2df0   :  { %9426 = vmatpush3.msra.mxu1 %v10086_v31 }
0x2df1   :  { %9427 = vmatprep.subr.mxu1 %v12561_v52 }
0x2df2   :  { %9428 = vmatpush3.msra.mxu1 %v10087_v26  ;;  %v12598_v26 = vld [vmem:[#allocation28_spill] sm:$0xff] }
0x2df3   :  { %9429 = vmatprep.subr.mxu1 %v12561_v52 }
0x2df4   :  { %9430 = vmatpush3.msra.mxu1 %v10088_v55  ;;  %v12599_v55 = vld [vmem:[#allocation31_spill] sm:$0xff] }
0x2df5   :  { %9431 = vmatprep.subr.mxu1 %v12561_v52 }
0x2df6   :  { %9432 = vmatpush3.msra.mxu1 %v10089_v11  ;;  %v4745_v11 = vadd.f32 %v12599_v55, %v12598_v26 }
0x2df7   :  { %9433 = vmatprep.subr.mxu1 %v12561_v52 }
0x2df8   :  { %9434 = vmatpush3.msra.mxu1 %v10090_v13  ;;  %v10115_v13 = vld [vmem:[%s10389_s30] ss:$0 sm:$0xff] }
0x2df9   :  { %9435 = vmatprep.subr.mxu1 %v12561_v52 }
0x2dfa   :  { %9436 = vmatpush3.msra.mxu1 %v10091_v23 }
0x2dfb   :  { %9437 = vmatprep.subr.mxu1 %v12561_v52 }
0x2dfc   :  { %9438 = vmatpush3.msra.mxu1 %v10092_v22 }
0x2dfd   :  { %9439 = vmatprep.subr.mxu1 %v12561_v52 }
0x2dfe   :  { %9440 = vmatpush3.msra.mxu1 %v10093_v29 }
0x2dff   :  { %9441 = vmatprep.subr.mxu1 %v12561_v52 }
0x2e00   :  { %9442 = vmatpush3.msra.mxu1 %v10094_v12 }
0x2e73   :  { %v8652_v46 = vpop.f32.mrf.mxu0 }
0x2e75   :  { %v8653_v42 = vpop.f32.mrf.mxu0 }
0x2e76   :  { %v8654_v54 = vadd.f32 %v8653_v42, %v8652_v46 }
0x2e78   :  { %v7418_v59 = vadd.f32 %v10095_v34, %v8654_v54 }
0x2ea7   :  { %v8687_v38 = vpop.f32.mrf.mxu1 }
0x2ea9   :  { %v8688_v51 = vpop.f32.mrf.mxu1 }
0x2eaa   :  { %v8689_v35 = vadd.f32 %v8688_v51, %v8687_v38 }
0x2eac   :  { %v7488_v20 = vadd.f32 %v8689_v35, %v7418_v59 }
0x2eae   :  { %v7491_v3 = vsub.f32 %v11562_v50, %v7488_v20  ;;  %v10099_v50 = vld [vmem:[%s12595_s24 + $0x28] sm:$0xff]  ;;  %v7492_v56 = vadd.f32 %v7488_v20, %v12597_v45 }
0x2eb0   :  { %9394 = vmatmul.mubr.msk.f32.vlgmr.msra.gmra.mxu0 %vm236_vm1, %v7491_v3  ;;  %v7880_v12 = vadd.f32 %v7492_v56, %v4745_v11 }
0x2eb1   :  { %9397 = vmatpush3.msk.msra.mxu0 %vm3942_vm12, %v10096_v18  ;;  %9414 = vmatprep.mubr.msk.f32.mxu0 %vm10181_vm0, %v12561_v52 }
0x2eb2   :  { %9398 = vmatprep.subr.mxu0 %v12561_v52 }
0x2eb3   :  { %9399 = vmatpush3.msra.mxu0 %v10097_v40 }
0x2eb4   :  { %9400 = vmatprep.subr.mxu0 %v12561_v52 }
0x2eb5   :  { %9401 = vmatpush3.msra.mxu0 %v10098_v48 }
0x2eb6   :  { %9402 = vmatprep.subr.mxu0 %v12561_v52 }
0x2eb7   :  { %9403 = vmatpush3.msra.mxu0 %v10099_v50 }
0x2eb8   :  { %9404 = vmatprep.subr.mxu0 %v12561_v52 }
0x2eb9   :  { %9405 = vmatpush3.msra.mxu0 %v10100_v57 }
0x2eba   :  { %9406 = vmatprep.subr.mxu0 %v12561_v52 }
0x2ebb   :  { %9407 = vmatpush3.msra.mxu0 %v10101_v8 }
0x2ebc   :  { %9408 = vmatprep.subr.mxu0 %v12561_v52 }
0x2ebd   :  { %9409 = vmatpush3.msra.mxu0 %v10102_v47 }
0x2ebe   :  { %9410 = vmatprep.subr.mxu0 %v12561_v52 }
0x2ebf   :  { %9411 = vmatpush3.msra.mxu0 %v10103_v5 }
0x2ec0   :  { %9412 = vmatprep.subr.mxu0 %v12561_v52 }
0x2ec1   :  { %9413 = vmatpush3.msra.mxu0 %v10104_v60 }
0x2ec2   :  { %9446 = vmatprep.subr.mxu0 %v12561_v52 }
0x2f70   :  { %v7562_v15 = vpop.f32.mrf.mxu0 }
0x2f71   :  { %v7563_v2 = vadd.f32 %v10105_v43, %v7562_v15 }
0x2f72   :  { %v9395_v37 = vpop.f32.mrf.mxu0 }
0x2f73   :  { %v7566_v7 = vmax.f32 %v7563_v2, 0.0 }
0x2f75   :  { %7568 = vrot.lane.b32.xlu1 %v7566_v7, %s12580_s20 }
0x2fe7   :  { %v7569_v14 = vpop.permute.xlu1 %7568 }
0x2fe8   :  { %v7571_v49 = vmax.f32 %v7566_v7, %v7569_v14 }
0x2fea   :  { %9415 = vmatmul.mubr.msk.f32.vlgmr.msra.gmra.mxu0 %vm3938_vm13, %v7571_v49 }
0x2feb   :  { %9447 = vmatpush3.msk.msra.mxu0 %vm4138_vm15, %v10106_v16  ;;  %9450 = vmatprep.mubr.msk.f32.mxu0 %vm10181_vm0, %v12561_v52 }
0x2fec   :  { %9448 = vmatprep.subr.mxu0 %v12561_v52 }
0x2fed   :  { %9449 = vmatpush3.msra.mxu0 %v10107_v63 }
0x2fee   :  { %9453 = vmatprep.subr.mxu0 %v12561_v52 }
0x30aa   :  { %v7641_v44 = vpop.f32.mrf.mxu0 }
0x30ab   :  { %v7642_v0 = vadd.f32 %v10108_v6, %v7641_v44 }
0x30ac   :  { %v9416_v41 = vpop.f32.mrf.mxu0 }
0x30ad   :  { %v7645_v39 = vmax.f32 %v7642_v0, 0.0 }
0x30af   :  { %7647 = vrot.lane.b32.xlu0 %v7645_v39, %s12580_s20 }
0x30b3   :  { %7891 = vrot.lane.b32.xlu0 %v7492_v56, %s10189_s1 }
0x3121   :  { %v7648_v61 = vpop.permute.xlu0 %7647 }
0x3122   :  { %v7650_v28 = vmax.f32 %v7645_v39, %v7648_v61 }
0x3124   :  { %9444 = vmatmul.mubr.msk.f32.vlgmr.msra.gmra.mxu1 %vm4042_vm14, %v7650_v28 }
0x3125   :  { %v7892_v38 = vpop.permute.xlu0 %7891 }
0x31e4   :  { %v7720_v24 = vpop.f32.mrf.mxu1 }
0x31e5   :  { %v7721_v62 = vadd.f32 %v10109_v19, %v7720_v24 }
0x31e6   :  { %v9445_v9 = vpop.f32.mrf.mxu1 }
0x31e7   :  { %v7724_v17 = vmax.f32 %v7721_v62, 0.0 }
0x31e9   :  { %7726 = vrot.lane.b32.xlu1 %v7724_v17, %s12580_s20  ;;  %s12600_s20 = sld [smem:[#allocation27_spill]] }
0x325b   :  { %v7727_v36 = vpop.permute.xlu1 %7726 }
0x325c   :  { %v7729_v33 = vmax.f32 %v7724_v17, %v7727_v36 }
0x325e   :  { %9451 = vmatmul.mubr.msk.f32.vlgmr.msra.gmra.mxu0 %vm4134_vm8, %v7729_v33 }
0x325f   :  { %9454 = vmatpush3.msra.mxu0 %v10110_v1  ;;  %9461 = vmatprep.mubr.msk.f32.mxu0 %vm10181_vm0, %v12561_v52  ;;  %vm7894_vm0 = vcmask 64512  }
0x3260   :  { %9455 = vmatprep.subr.mxu0 %v12561_v52 }
0x3261   :  { %9456 = vmatpush3.msra.mxu0 %v10111_v32 }
0x3262   :  { %9457 = vmatprep.subr.mxu0 %v12561_v52 }
0x3263   :  { %9458 = vmatpush3.msra.mxu0 %v10112_v30 }
0x3264   :  { %9459 = vmatprep.subr.mxu0 %v12561_v52  ;;  %v12601_v52 = vld [vmem:[#allocation30_spill] sm:$0xff] }
0x3265   :  { %9460 = vmatpush3.msra.mxu0 %v10113_v58 }
0x331e   :  { %v7799_v4 = vpop.f32.mrf.mxu0 }
0x331f   :  { %v7800_v27 = vadd.f32 %v10114_v25, %v7799_v4 }
0x3320   :  { %v9452_v53 = vpop.f32.mrf.mxu0 }
0x3321   :  { %vm7803_vm10 = vcmp.ge.f32.partialorder %v7800_v27, 0.0  ;;  %v7804_v10 = vmul.f32 0.01, %v7800_v27 }
0x3323   :  { %v7805_v21 = vsel %vm7803_vm10, %v7800_v27, %v7804_v10 }
0x3324   :  { %9462 = vmatmul.mubr.msk.f32.vlgmr.msra.gmra.mxu0 %vm322_vm2, %v7805_v21  ;;  %vm7898_vm2 = vcmask 254976  }
0x33e4   :  { %v7875_v31 = vpop.f32.mrf.mxu0 }
0x33e5   :  { %v7876_v23 = vadd.f32 %v10115_v13, %v7875_v31 }
0x33e6   :  { %v9463_v22 = vpop.f32.mrf.mxu0 }
0x33e7   :  { %v7879_v29 = vadd.f32 %v7876_v23, %v12601_v52 }
0x33e9   :  { %v7881_v46 = vadd.f32 %v7880_v12, %v7879_v29 }
0x33eb   :  { %7883 = vrot.lane.b32.xlu1 %v7881_v46, %s10190_s12 }
0x33ef   :  { %7887 = vrot.lane.b32.xlu1 %v4745_v11, %s12587_s17 }
0x345d   :  { %v7884_v42 = vpop.permute.xlu1 %7883 }
0x3461   :  { %v7888_v54 = vpop.permute.xlu1 %7887 }
0x3462   :  { %v7895_v51 = vsel %vm7894_vm0, %v7884_v42, %v7888_v54 }
0x3463   :  { %v7896_v34 = vsel %vm654_vm3, %v7895_v51, %v7892_v38 }
0x3464   :  { %v7897_v59 = vsel %vm236_vm1, %v7896_v34, %v7879_v29 }
0x3465   :  { %7899 = vst.msk [vmem:[%s12600_s20] sm:$0x3] %vm7898_vm2, %v7897_v59 }
0x3466   :  { %7904 = vsyncpa [#allocation3], 1 }

</bundles_post_ra>
